<compile_context>
chip_gen: v7x
topology: tpu7x:2x2x1
jax: 0.10.0
libtpu: 0.0.40
codegen_flags: <defaults>
</compile_context>

<pallas_src>
import math

import jax
import jax.numpy as jnp
from jax import lax
from jax.experimental import pallas as pl
from jax.experimental.pallas import tpu as pltpu

# --------------------------------------------------------------------------
# Config (tiny T5)
# --------------------------------------------------------------------------
VOCAB = 64
D_MODEL = 32
D_KV = 8
N_HEADS = 4
INNER = N_HEADS * D_KV          # 32
D_FF = 64
N_LAYERS = 2                    # encoder layers == decoder layers
NUM_BUCKETS = 32
MAX_DISTANCE = 128
EPS = 1e-6
NEG = jnp.finfo(jnp.float32).min
PAD_ID = 0                      # decoder_start_token_id == pad_token_id == 0


# --------------------------------------------------------------------------
# In-kernel helpers (traced inside the fused Pallas kernel)
# --------------------------------------------------------------------------
def _rms(x, w):
    # T5 LayerNorm: RMS only (no mean subtraction, no bias). f32 VPU math.
    var = jnp.mean(x * x, axis=-1, keepdims=True)
    return x * lax.rsqrt(var + EPS) * w


def _mha(q_b, k_b, v_b, bias_fn, wo_b):
    """Multi-head attention for one batch element.

    q_b/k_b/v_b: bf16 (Sq|Sk, INNER); wo_b: bf16 (INNER, D); bias_fn(h) -> f32
    additive bias broadcastable to (Sq, Sk).  Matmuls feed the MXU in bf16 with
    f32 accumulation; softmax stays f32 on the VPU.  Returns f32 (Sq, D).
    """
    acc = None
    for hh in range(N_HEADS):
        sl = slice(hh * D_KV, (hh + 1) * D_KV)
        # contract last dims of both operands -> no explicit transpose, MXU-direct
        s = lax.dot_general(q_b[:, sl], k_b[:, sl],
                            dimension_numbers=(((1,), (1,)), ((), ())),
                            preferred_element_type=jnp.float32)        # (Sq, Sk) f32
        s = s + bias_fn(hh)
        s = s - jnp.max(s, axis=-1, keepdims=True)
        p = jnp.exp(s)
        p = p / jnp.sum(p, axis=-1, keepdims=True)
        ctx = jnp.dot(p.astype(jnp.bfloat16), v_b[:, sl],
                      preferred_element_type=jnp.float32)               # (Sq, dh)
        # TODO(synk): at real sizes lay heads out row-stacked so this collapses
        # into a single (Sq, INNER) @ (INNER, D) O-projection (one MXU op).
        out = jnp.dot(ctx.astype(jnp.bfloat16), wo_b[sl, :],
                      preferred_element_type=jnp.float32)               # (Sq, D)
        acc = out if acc is None else acc + out
    return acc


# --------------------------------------------------------------------------
# The fused kernel: encoder stack + decoder stack + lm_head + CE loss
# --------------------------------------------------------------------------
def _t5_kernel(enc_h_ref, dec_h_ref, enc_bias_ref, dec_bias_ref, cmask_ref, labels_ref,
               e_ln1_ref, e_wqkv_ref, e_wo_ref, e_ln2_ref, e_wi_ref, e_wff_ref, e_fln_ref,
               d_ln1_ref, d_wqkv_ref, d_wo1_ref, d_ln2_ref, d_wq_ref, d_wkv_ref, d_wo2_ref,
               d_ln3_ref, d_wi_ref, d_wff_ref, d_fln_ref, emb_ref,
               loss_ref):
    B, H, S, _ = enc_bias_ref.shape
    Sd = dec_bias_ref.shape[1]
    L = e_wqkv_ref.shape[0]

    def dense(x_f32, w_b):
        # bf16 operands into the MXU, f32 accumulation out.
        return jnp.dot(x_f32.astype(jnp.bfloat16), w_b,
                       preferred_element_type=jnp.float32)

    # ---------------- encoder stack (static layer unroll, batch folded) ----------------
    h = enc_h_ref[...].astype(jnp.float32)                       # (B*S, D) residual in f32
    for l in range(L):
        x = _rms(h, e_ln1_ref[l])
        qkv = dense(x, e_wqkv_ref[l]).astype(jnp.bfloat16)       # (B*S, 3*INNER)
        wo = e_wo_ref[l]
        parts = []
        for b in range(B):
            r = slice(b * S, (b + 1) * S)                        # free sublane row slice
            bias_b = enc_bias_ref[b]                             # (H, S, S) f32, mask pre-folded
            parts.append(_mha(qkv[r, :INNER], qkv[r, INNER:2 * INNER],
                              qkv[r, 2 * INNER:],
                              lambda hh, _bb=bias_b: _bb[hh], wo))
        h = h + jnp.concatenate(parts, axis=0)
        x = _rms(h, e_ln2_ref[l])
        ff = jnp.maximum(dense(x, e_wi_ref[l]), 0.0)             # relu FFN
        h = h + dense(ff, e_wff_ref[l])
    # encoder final LN fused here — encoder output never leaves VMEM
    enc_b = _rms(h, e_fln_ref[...]).astype(jnp.bfloat16)         # (B*S, D) bf16

    # ---------------- decoder stack ----------------
    hd = dec_h_ref[...].astype(jnp.float32)                      # (B*Sd, D)
    dbias = dec_bias_ref[...]                                    # (H, Sd, Sd) f32 (rel bias + causal)
    for l in range(L):
        # causal self-attention
        x = _rms(hd, d_ln1_ref[l])
        qkv = dense(x, d_wqkv_ref[l]).astype(jnp.bfloat16)
        wo1 = d_wo1_ref[l]
        parts = []
        for b in range(B):
            r = slice(b * Sd, (b + 1) * Sd)
            parts.append(_mha(qkv[r, :INNER], qkv[r, INNER:2 * INNER],
                              qkv[r, 2 * INNER:],
                              lambda hh: dbias[hh], wo1))
        hd = hd + jnp.concatenate(parts, axis=0)

        # cross-attention (K/V from encoder output; padding mask only, no rel bias)
        x = _rms(hd, d_ln2_ref[l])
        q = dense(x, d_wq_ref[l]).astype(jnp.bfloat16)           # (B*Sd, INNER)
        kv = jnp.dot(enc_b, d_wkv_ref[l],
                     preferred_element_type=jnp.float32).astype(jnp.bfloat16)  # (B*S, 2*INNER)
        wo2 = d_wo2_ref[l]
        parts = []
        for b in range(B):
            rd = slice(b * Sd, (b + 1) * Sd)
            re_ = slice(b * S, (b + 1) * S)
            cm = cmask_ref[b]                                    # (1, S) f32 additive mask
            parts.append(_mha(q[rd, :], kv[re_, :INNER], kv[re_, INNER:],
                              lambda hh, _cm=cm: _cm, wo2))
        hd = hd + jnp.concatenate(parts, axis=0)

        # relu FFN
        x = _rms(hd, d_ln3_ref[l])
        ff = jnp.maximum(dense(x, d_wi_ref[l]), 0.0)
        hd = hd + dense(ff, d_wff_ref[l])

    # ---------------- final LN + tied lm_head (d_model^-0.5) + cross-entropy ----------------
    hf = _rms(hd, d_fln_ref[...]) * (D_MODEL ** -0.5)
    # contract feature dims of both -> embedding consumed transposed, no HBM transpose;
    # logits (N, V) exist only in VMEM.
    logits = lax.dot_general(hf.astype(jnp.bfloat16), emb_ref[...],
                             dimension_numbers=(((1,), (1,)), ((), ())),
                             preferred_element_type=jnp.float32)
    labels = labels_ref[...]                                     # (N, 1) int32
    N, V = logits.shape
    m = jnp.max(logits, axis=-1, keepdims=True)
    lse = jnp.log(jnp.sum(jnp.exp(logits - m), axis=-1, keepdims=True)) + m
    col = lax.broadcasted_iota(jnp.int32, (N, V), 1)
    label_logit = jnp.sum(jnp.where(col == labels, logits, 0.0), axis=-1, keepdims=True)
    valid = (labels != -100).astype(jnp.float32)                 # ignore_index = -100
    loss_i = (lse - label_logit) * valid
    total = jnp.sum(loss_i, axis=0, keepdims=True)               # (1, 1)
    count = jnp.sum(valid, axis=0, keepdims=True)                # (1, 1)
    # NOTE: matches torch.nn.CrossEntropyLoss — NaN if every label is ignored.
    loss_ref[...] = total / count


# --------------------------------------------------------------------------
# T5 glue (plain JAX): relative position bias, masks, parameter init
# --------------------------------------------------------------------------
def _relative_position_bucket(relative_position, bidirectional,
                              num_buckets=NUM_BUCKETS, max_distance=MAX_DISTANCE):
    relative_buckets = jnp.zeros_like(relative_position)
    if bidirectional:
        num_buckets //= 2
        relative_buckets = relative_buckets + (relative_position > 0).astype(jnp.int32) * num_buckets
        relative_position = jnp.abs(relative_position)
    else:
        relative_position = -jnp.minimum(relative_position, 0)
    max_exact = num_buckets // 2
    is_small = relative_position < max_exact
    rp_f = jnp.maximum(relative_position, 1).astype(jnp.float32)
    rp_large = max_exact + (
        jnp.log(rp_f / max_exact) / math.log(max_distance / max_exact) * (num_buckets - max_exact)
    ).astype(jnp.int32)
    rp_large = jnp.minimum(rp_large, num_buckets - 1)
    return relative_buckets + jnp.where(is_small, relative_position, rp_large)


def compute_position_bias(table, q_len, k_len, bidirectional):
    # table: (NUM_BUCKETS, H) -> (H, q_len, k_len)
    ctx = jnp.arange(q_len)[:, None]
    mem = jnp.arange(k_len)[None, :]
    buckets = _relative_position_bucket(mem - ctx, bidirectional)
    values = table[buckets]                       # (q, k, H)
    return jnp.transpose(values, (2, 0, 1))


def init_params(key):
    def nrm(k, shape, scale=0.02):
        return scale * jax.random.normal(k, shape, dtype=jnp.float32)

    keys = iter(jax.random.split(key, 64))
    L = N_LAYERS
    ones_l = jnp.ones((L, 1, D_MODEL), jnp.float32)
    return {
        "embed": nrm(next(keys), (VOCAB, D_MODEL), 1.0),
        "enc_rel_bias": nrm(next(keys), (NUM_BUCKETS, N_HEADS)),
        "dec_rel_bias": nrm(next(keys), (NUM_BUCKETS, N_HEADS)),
        "enc_final_ln": jnp.ones((1, D_MODEL), jnp.float32),
        "dec_final_ln": jnp.ones((1, D_MODEL), jnp.float32),
        # per-layer weights stacked along a leading L axis
        "enc": {
            "ln1": ones_l,
            "wqkv": nrm(next(keys), (L, D_MODEL, 3 * INNER)),
            "wo": nrm(next(keys), (L, INNER, D_MODEL)),
            "ln2": ones_l,
            "wi": nrm(next(keys), (L, D_MODEL, D_FF)),
            "wff": nrm(next(keys), (L, D_FF, D_MODEL)),
        },
        "dec": {
            "ln1": ones_l,
            "wqkv": nrm(next(keys), (L, D_MODEL, 3 * INNER)),
            "wo1": nrm(next(keys), (L, INNER, D_MODEL)),
            "ln2": ones_l,
            "wq": nrm(next(keys), (L, D_MODEL, INNER)),
            "wkv": nrm(next(keys), (L, D_MODEL, 2 * INNER)),
            "wo2": nrm(next(keys), (L, INNER, D_MODEL)),
            "ln3": ones_l,
            "wi": nrm(next(keys), (L, D_MODEL, D_FF)),
            "wff": nrm(next(keys), (L, D_FF, D_MODEL)),
        },
    }


# --------------------------------------------------------------------------
# T5 forward (loss): ONE fused pallas_call
# --------------------------------------------------------------------------
def t5_forward_loss(params, input_ids, attention_mask, labels):
    B, S = input_ids.shape
    Sd = labels.shape[1]
    embed = params["embed"]

    # ---- embeddings (gather stays in XLA) ----
    enc_h = embed[input_ids].reshape(B * S, D_MODEL).astype(jnp.bfloat16)

    # shift labels right to build decoder inputs (decoder_start_token_id = pad)
    safe_labels = jnp.where(labels == -100, PAD_ID, labels)
    dec_ids = jnp.concatenate(
        [jnp.full((B, 1), PAD_ID, dtype=labels.dtype), safe_labels[:, :-1]], axis=1)
    dec_h = embed[dec_ids].reshape(B * Sd, D_MODEL).astype(jnp.bfloat16)

    # ---- masks / position biases pre-folded at trace time (kept f32!) ----
    enc_mask = (1.0 - attention_mask.astype(jnp.float32)) * NEG          # (B, S)
    enc_bias = compute_position_bias(params["enc_rel_bias"], S, S, True)  # (H, S, S)
    enc_bias_m = enc_bias[None, :, :, :] + enc_mask[:, None, None, :]     # (B, H, S, S)
    cross_mask = enc_mask[:, None, :]                                     # (B, 1, S)
    causal = (1.0 - jnp.tril(jnp.ones((Sd, Sd), jnp.float32))) * NEG
    dec_bias = (compute_position_bias(params["dec_rel_bias"], Sd, Sd, False)
                + causal[None])                                           # (H, Sd, Sd)

    labels2 = labels.reshape(B * Sd, 1).astype(jnp.int32)

    bf = lambda a: a.astype(jnp.bfloat16)
    e, d = params["enc"], params["dec"]

    loss = pl.pallas_call(
        _t5_kernel,
        out_shape=jax.ShapeDtypeStruct((1, 1), jnp.float32),
        # no grid: single invocation, every operand whole-block resident in VMEM
    )(enc_h, dec_h, enc_bias_m, dec_bias, cross_mask, labels2,
      e["ln1"], bf(e["wqkv"]), bf(e["wo"]), e["ln2"], bf(e["wi"]), bf(e["wff"]),
      params["enc_final_ln"],
      d["ln1"], bf(d["wqkv"]), bf(d["wo1"]), d["ln2"], bf(d["wq"]), bf(d["wkv"]),
      bf(d["wo2"]), d["ln3"], bf(d["wi"]), bf(d["wff"]),
      params["dec_final_ln"],
      bf(embed))
    return loss[0, 0]


# --------------------------------------------------------------------------
if __name__ == "__main__":
    B, S = 2, 8
    key = jax.random.PRNGKey(0)
    k_p, k_in, k_lab = jax.random.split(key, 3)

    params = init_params(k_p)
    input_ids = jax.random.randint(k_in, (B, S), 1, VOCAB, dtype=jnp.int32)
    labels = jax.random.randint(k_lab, (B, S), 1, VOCAB, dtype=jnp.int32)
    # ignore last label of batch 1 (exercise ignore_index=-100)
    labels = labels.at[1, -1].set(-100)
    attention_mask = jnp.ones((B, S), jnp.int32).at[1, -1].set(0)

    loss = jax.jit(t5_forward_loss)(params, input_ids, attention_mask, labels)
    jax.block_until_ready(loss)
    assert loss.shape == () and bool(jnp.isfinite(loss))
    print("KERNEL_OK")
</pallas_src>

<mosaic_0001>
module attributes {stable_mosaic.version = 11 : i64} {
  func.func @_t5_kernel(%arg0: memref<16x32xbf16, #tpu.memory_space<vmem>>, %arg1: memref<16x32xbf16, #tpu.memory_space<vmem>>, %arg2: memref<2x4x8x8xf32, #tpu.memory_space<vmem>>, %arg3: memref<4x8x8xf32, #tpu.memory_space<vmem>>, %arg4: memref<2x1x8xf32, #tpu.memory_space<vmem>>, %arg5: memref<16x1xi32, #tpu.memory_space<vmem>>, %arg6: memref<2x1x32xf32, #tpu.memory_space<vmem>>, %arg7: memref<2x32x96xbf16, #tpu.memory_space<vmem>>, %arg8: memref<2x32x32xbf16, #tpu.memory_space<vmem>>, %arg9: memref<2x1x32xf32, #tpu.memory_space<vmem>>, %arg10: memref<2x32x64xbf16, #tpu.memory_space<vmem>>, %arg11: memref<2x64x32xbf16, #tpu.memory_space<vmem>>, %arg12: memref<1x32xf32, #tpu.memory_space<vmem>>, %arg13: memref<2x1x32xf32, #tpu.memory_space<vmem>>, %arg14: memref<2x32x96xbf16, #tpu.memory_space<vmem>>, %arg15: memref<2x32x32xbf16, #tpu.memory_space<vmem>>, %arg16: memref<2x1x32xf32, #tpu.memory_space<vmem>>, %arg17: memref<2x32x32xbf16, #tpu.memory_space<vmem>>, %arg18: memref<2x32x64xbf16, #tpu.memory_space<vmem>>, %arg19: memref<2x32x32xbf16, #tpu.memory_space<vmem>>, %arg20: memref<2x1x32xf32, #tpu.memory_space<vmem>>, %arg21: memref<2x32x64xbf16, #tpu.memory_space<vmem>>, %arg22: memref<2x64x32xbf16, #tpu.memory_space<vmem>>, %arg23: memref<1x32xf32, #tpu.memory_space<vmem>>, %arg24: memref<64x32xbf16, #tpu.memory_space<vmem>>, %arg25: memref<1x1xf32, #tpu.memory_space<vmem>>) attributes {dimension_semantics = [], scalar_prefetch = 0 : i64, scratch_operands = 0 : i64, tpu.core_type = #tpu.core_type<tc>} {
    %c0 = arith.constant 0 : index
    %c0_0 = arith.constant 0 : index
    %0 = vector.load %arg0[%c0, %c0_0] : memref<16x32xbf16, #tpu.memory_space<vmem>>, vector<16x32xbf16>
    %1 = arith.extf %0 : vector<16x32xbf16> to vector<16x32xf32>
    %c0_1 = arith.constant 0 : index
    %c0_2 = arith.constant 0 : index
    %c0_3 = arith.constant 0 : index
    %2 = vector.load %arg6[%c0_1, %c0_2, %c0_3] : memref<2x1x32xf32, #tpu.memory_space<vmem>>, vector<1x1x32xf32>
    %3 = vector.shape_cast %2 : vector<1x1x32xf32> to vector<1x32xf32>
    %4 = arith.mulf %1, %1 : vector<16x32xf32>
    %cst = arith.constant dense<0.000000e+00> : vector<16xf32>
    %5 = vector.multi_reduction <add>, %4, %cst [1] : vector<16x32xf32> to vector<16xf32>
    %6 = vector.shape_cast %5 : vector<16xf32> to vector<16x1xf32>
    %cst_4 = arith.constant 3.200000e+01 : f32
    %7 = vector.broadcast %cst_4 : f32 to vector<16x1xf32>
    %8 = arith.divf %6, %7 : vector<16x1xf32>
    %cst_5 = arith.constant 9.99999997E-7 : f32
    %9 = vector.broadcast %cst_5 : f32 to vector<16x1xf32>
    %10 = arith.addf %8, %9 : vector<16x1xf32>
    %11 = math.rsqrt %10 : vector<16x1xf32>
    %12 = vector.broadcast %11 : vector<16x1xf32> to vector<16x32xf32>
    %13 = arith.mulf %1, %12 : vector<16x32xf32>
    %14 = vector.broadcast %3 : vector<1x32xf32> to vector<16x32xf32>
    %15 = arith.mulf %13, %14 : vector<16x32xf32>
    %c0_6 = arith.constant 0 : index
    %c0_7 = arith.constant 0 : index
    %c0_8 = arith.constant 0 : index
    %16 = vector.load %arg7[%c0_6, %c0_7, %c0_8] : memref<2x32x96xbf16, #tpu.memory_space<vmem>>, vector<1x32x96xbf16>
    %17 = vector.shape_cast %16 : vector<1x32x96xbf16> to vector<32x96xbf16>
    %18 = arith.truncf %15 : vector<16x32xf32> to vector<16x32xbf16>
    %cst_9 = arith.constant dense<0.000000e+00> : vector<16x96xf32>
    %19 = tpu.matmul %18, %17, %cst_9 {dimension_numbers = #tpu.dot_dimension_numbers<[1], [0], [0], [1], [0, 0, 1, 1], [], []>} : vector<16x32xbf16>, vector<32x96xbf16>, vector<16x96xf32> -> vector<16x96xf32>
    %20 = arith.truncf %19 : vector<16x96xf32> to vector<16x96xbf16>
    %c0_10 = arith.constant 0 : index
    %c0_11 = arith.constant 0 : index
    %c0_12 = arith.constant 0 : index
    %21 = vector.load %arg8[%c0_10, %c0_11, %c0_12] : memref<2x32x32xbf16, #tpu.memory_space<vmem>>, vector<1x32x32xbf16>
    %22 = vector.shape_cast %21 : vector<1x32x32xbf16> to vector<32x32xbf16>
    %c0_13 = arith.constant 0 : index
    %c0_14 = arith.constant 0 : index
    %c0_15 = arith.constant 0 : index
    %c0_16 = arith.constant 0 : index
    %23 = vector.load %arg2[%c0_13, %c0_14, %c0_15, %c0_16] : memref<2x4x8x8xf32, #tpu.memory_space<vmem>>, vector<1x4x8x8xf32>
    %24 = vector.shape_cast %23 : vector<1x4x8x8xf32> to vector<4x8x8xf32>
    %25 = vector.extract_strided_slice %20 {offsets = [0, 0], sizes = [8, 32], strides = [1, 1]} : vector<16x96xbf16> to vector<8x32xbf16>
    %26 = vector.extract_strided_slice %20 {offsets = [0, 32], sizes = [8, 32], strides = [1, 1]} : vector<16x96xbf16> to vector<8x32xbf16>
    %27 = vector.extract_strided_slice %20 {offsets = [0, 64], sizes = [8, 32], strides = [1, 1]} : vector<16x96xbf16> to vector<8x32xbf16>
    %28 = vector.extract_strided_slice %25 {offsets = [0, 0], sizes = [8, 8], strides = [1, 1]} : vector<8x32xbf16> to vector<8x8xbf16>
    %29 = vector.extract_strided_slice %26 {offsets = [0, 0], sizes = [8, 8], strides = [1, 1]} : vector<8x32xbf16> to vector<8x8xbf16>
    %cst_17 = arith.constant dense<0.000000e+00> : vector<8x8xf32>
    %30 = tpu.matmul %28, %29, %cst_17 {dimension_numbers = #tpu.dot_dimension_numbers<[1], [1], [0], [0], [0, 0, 1, 0], [], []>} : vector<8x8xbf16>, vector<8x8xbf16>, vector<8x8xf32> -> vector<8x8xf32>
    %31 = vector.extract_strided_slice %24 {offsets = [0, 0, 0], sizes = [1, 8, 8], strides = [1, 1, 1]} : vector<4x8x8xf32> to vector<1x8x8xf32>
    %32 = vector.shape_cast %31 : vector<1x8x8xf32> to vector<8x8xf32>
    %33 = arith.addf %30, %32 : vector<8x8xf32>
    %cst_18 = arith.constant dense<0xFF800000> : vector<8xf32>
    %34 = vector.multi_reduction <maximumf>, %33, %cst_18 [1] : vector<8x8xf32> to vector<8xf32>
    %35 = vector.shape_cast %34 : vector<8xf32> to vector<8x1xf32>
    %36 = vector.broadcast %35 : vector<8x1xf32> to vector<8x8xf32>
    %37 = arith.subf %33, %36 : vector<8x8xf32>
    %38 = math.exp %37 : vector<8x8xf32>
    %cst_19 = arith.constant dense<0.000000e+00> : vector<8xf32>
    %39 = vector.multi_reduction <add>, %38, %cst_19 [1] : vector<8x8xf32> to vector<8xf32>
    %40 = vector.shape_cast %39 : vector<8xf32> to vector<8x1xf32>
    %41 = vector.broadcast %40 : vector<8x1xf32> to vector<8x8xf32>
    %42 = arith.divf %38, %41 : vector<8x8xf32>
    %43 = arith.truncf %42 : vector<8x8xf32> to vector<8x8xbf16>
    %44 = vector.extract_strided_slice %27 {offsets = [0, 0], sizes = [8, 8], strides = [1, 1]} : vector<8x32xbf16> to vector<8x8xbf16>
    %cst_20 = arith.constant dense<0.000000e+00> : vector<8x8xf32>
    %45 = tpu.matmul %43, %44, %cst_20 {dimension_numbers = #tpu.dot_dimension_numbers<[1], [0], [0], [1], [0, 0, 1, 1], [], []>} : vector<8x8xbf16>, vector<8x8xbf16>, vector<8x8xf32> -> vector<8x8xf32>
    %46 = arith.truncf %45 : vector<8x8xf32> to vector<8x8xbf16>
    %47 = vector.extract_strided_slice %22 {offsets = [0, 0], sizes = [8, 32], strides = [1, 1]} : vector<32x32xbf16> to vector<8x32xbf16>
    %cst_21 = arith.constant dense<0.000000e+00> : vector<8x32xf32>
    %48 = tpu.matmul %46, %47, %cst_21 {dimension_numbers = #tpu.dot_dimension_numbers<[1], [0], [0], [1], [0, 0, 1, 1], [], []>} : vector<8x8xbf16>, vector<8x32xbf16>, vector<8x32xf32> -> vector<8x32xf32>
    %49 = vector.extract_strided_slice %25 {offsets = [0, 8], sizes = [8, 8], strides = [1, 1]} : vector<8x32xbf16> to vector<8x8xbf16>
    %50 = vector.extract_strided_slice %26 {offsets = [0, 8], sizes = [8, 8], strides = [1, 1]} : vector<8x32xbf16> to vector<8x8xbf16>
    %cst_22 = arith.constant dense<0.000000e+00> : vector<8x8xf32>
    %51 = tpu.matmul %49, %50, %cst_22 {dimension_numbers = #tpu.dot_dimension_numbers<[1], [1], [0], [0], [0, 0, 1, 0], [], []>} : vector<8x8xbf16>, vector<8x8xbf16>, vector<8x8xf32> -> vector<8x8xf32>
    %52 = vector.extract_strided_slice %24 {offsets = [1, 0, 0], sizes = [1, 8, 8], strides = [1, 1, 1]} : vector<4x8x8xf32> to vector<1x8x8xf32>
    %53 = vector.shape_cast %52 : vector<1x8x8xf32> to vector<8x8xf32>
    %54 = arith.addf %51, %53 : vector<8x8xf32>
    %cst_23 = arith.constant dense<0xFF800000> : vector<8xf32>
    %55 = vector.multi_reduction <maximumf>, %54, %cst_23 [1] : vector<8x8xf32> to vector<8xf32>
    %56 = vector.shape_cast %55 : vector<8xf32> to vector<8x1xf32>
    %57 = vector.broadcast %56 : vector<8x1xf32> to vector<8x8xf32>
    %58 = arith.subf %54, %57 : vector<8x8xf32>
    %59 = math.exp %58 : vector<8x8xf32>
    %cst_24 = arith.constant dense<0.000000e+00> : vector<8xf32>
    %60 = vector.multi_reduction <add>, %59, %cst_24 [1] : vector<8x8xf32> to vector<8xf32>
    %61 = vector.shape_cast %60 : vector<8xf32> to vector<8x1xf32>
    %62 = vector.broadcast %61 : vector<8x1xf32> to vector<8x8xf32>
    %63 = arith.divf %59, %62 : vector<8x8xf32>
    %64 = arith.truncf %63 : vector<8x8xf32> to vector<8x8xbf16>
    %65 = vector.extract_strided_slice %27 {offsets = [0, 8], sizes = [8, 8], strides = [1, 1]} : vector<8x32xbf16> to vector<8x8xbf16>
    %cst_25 = arith.constant dense<0.000000e+00> : vector<8x8xf32>
    %66 = tpu.matmul %64, %65, %cst_25 {dimension_numbers = #tpu.dot_dimension_numbers<[1], [0], [0], [1], [0, 0, 1, 1], [], []>} : vector<8x8xbf16>, vector<8x8xbf16>, vector<8x8xf32> -> vector<8x8xf32>
    %67 = arith.truncf %66 : vector<8x8xf32> to vector<8x8xbf16>
    %68 = vector.extract_strided_slice %22 {offsets = [8, 0], sizes = [8, 32], strides = [1, 1]} : vector<32x32xbf16> to vector<8x32xbf16>
    %cst_26 = arith.constant dense<0.000000e+00> : vector<8x32xf32>
    %69 = tpu.matmul %67, %68, %cst_26 {dimension_numbers = #tpu.dot_dimension_numbers<[1], [0], [0], [1], [0, 0, 1, 1], [], []>} : vector<8x8xbf16>, vector<8x32xbf16>, vector<8x32xf32> -> vector<8x32xf32>
    %70 = arith.addf %48, %69 : vector<8x32xf32>
    %71 = vector.extract_strided_slice %25 {offsets = [0, 16], sizes = [8, 8], strides = [1, 1]} : vector<8x32xbf16> to vector<8x8xbf16>
    %72 = vector.extract_strided_slice %26 {offsets = [0, 16], sizes = [8, 8], strides = [1, 1]} : vector<8x32xbf16> to vector<8x8xbf16>
    %cst_27 = arith.constant dense<0.000000e+00> : vector<8x8xf32>
    %73 = tpu.matmul %71, %72, %cst_27 {dimension_numbers = #tpu.dot_dimension_numbers<[1], [1], [0], [0], [0, 0, 1, 0], [], []>} : vector<8x8xbf16>, vector<8x8xbf16>, vector<8x8xf32> -> vector<8x8xf32>
    %74 = vector.extract_strided_slice %24 {offsets = [2, 0, 0], sizes = [1, 8, 8], strides = [1, 1, 1]} : vector<4x8x8xf32> to vector<1x8x8xf32>
    %75 = vector.shape_cast %74 : vector<1x8x8xf32> to vector<8x8xf32>
    %76 = arith.addf %73, %75 : vector<8x8xf32>
    %cst_28 = arith.constant dense<0xFF800000> : vector<8xf32>
    %77 = vector.multi_reduction <maximumf>, %76, %cst_28 [1] : vector<8x8xf32> to vector<8xf32>
    %78 = vector.shape_cast %77 : vector<8xf32> to vector<8x1xf32>
    %79 = vector.broadcast %78 : vector<8x1xf32> to vector<8x8xf32>
    %80 = arith.subf %76, %79 : vector<8x8xf32>
    %81 = math.exp %80 : vector<8x8xf32>
    %cst_29 = arith.constant dense<0.000000e+00> : vector<8xf32>
    %82 = vector.multi_reduction <add>, %81, %cst_29 [1] : vector<8x8xf32> to vector<8xf32>
    %83 = vector.shape_cast %82 : vector<8xf32> to vector<8x1xf32>
    %84 = vector.broadcast %83 : vector<8x1xf32> to vector<8x8xf32>
    %85 = arith.divf %81, %84 : vector<8x8xf32>
    %86 = arith.truncf %85 : vector<8x8xf32> to vector<8x8xbf16>
    %87 = vector.extract_strided_slice %27 {offsets = [0, 16], sizes = [8, 8], strides = [1, 1]} : vector<8x32xbf16> to vector<8x8xbf16>
    %cst_30 = arith.constant dense<0.000000e+00> : vector<8x8xf32>
    %88 = tpu.matmul %86, %87, %cst_30 {dimension_numbers = #tpu.dot_dimension_numbers<[1], [0], [0], [1], [0, 0, 1, 1], [], []>} : vector<8x8xbf16>, vector<8x8xbf16>, vector<8x8xf32> -> vector<8x8xf32>
    %89 = arith.truncf %88 : vector<8x8xf32> to vector<8x8xbf16>
    %90 = vector.extract_strided_slice %22 {offsets = [16, 0], sizes = [8, 32], strides = [1, 1]} : vector<32x32xbf16> to vector<8x32xbf16>
    %cst_31 = arith.constant dense<0.000000e+00> : vector<8x32xf32>
    %91 = tpu.matmul %89, %90, %cst_31 {dimension_numbers = #tpu.dot_dimension_numbers<[1], [0], [0], [1], [0, 0, 1, 1], [], []>} : vector<8x8xbf16>, vector<8x32xbf16>, vector<8x32xf32> -> vector<8x32xf32>
    %92 = arith.addf %70, %91 : vector<8x32xf32>
    %93 = vector.extract_strided_slice %25 {offsets = [0, 24], sizes = [8, 8], strides = [1, 1]} : vector<8x32xbf16> to vector<8x8xbf16>
    %94 = vector.extract_strided_slice %26 {offsets = [0, 24], sizes = [8, 8], strides = [1, 1]} : vector<8x32xbf16> to vector<8x8xbf16>
    %cst_32 = arith.constant dense<0.000000e+00> : vector<8x8xf32>
    %95 = tpu.matmul %93, %94, %cst_32 {dimension_numbers = #tpu.dot_dimension_numbers<[1], [1], [0], [0], [0, 0, 1, 0], [], []>} : vector<8x8xbf16>, vector<8x8xbf16>, vector<8x8xf32> -> vector<8x8xf32>
    %96 = vector.extract_strided_slice %24 {offsets = [3, 0, 0], sizes = [1, 8, 8], strides = [1, 1, 1]} : vector<4x8x8xf32> to vector<1x8x8xf32>
    %97 = vector.shape_cast %96 : vector<1x8x8xf32> to vector<8x8xf32>
    %98 = arith.addf %95, %97 : vector<8x8xf32>
    %cst_33 = arith.constant dense<0xFF800000> : vector<8xf32>
    %99 = vector.multi_reduction <maximumf>, %98, %cst_33 [1] : vector<8x8xf32> to vector<8xf32>
    %100 = vector.shape_cast %99 : vector<8xf32> to vector<8x1xf32>
    %101 = vector.broadcast %100 : vector<8x1xf32> to vector<8x8xf32>
    %102 = arith.subf %98, %101 : vector<8x8xf32>
    %103 = math.exp %102 : vector<8x8xf32>
    %cst_34 = arith.constant dense<0.000000e+00> : vector<8xf32>
    %104 = vector.multi_reduction <add>, %103, %cst_34 [1] : vector<8x8xf32> to vector<8xf32>
    %105 = vector.shape_cast %104 : vector<8xf32> to vector<8x1xf32>
    %106 = vector.broadcast %105 : vector<8x1xf32> to vector<8x8xf32>
    %107 = arith.divf %103, %106 : vector<8x8xf32>
    %108 = arith.truncf %107 : vector<8x8xf32> to vector<8x8xbf16>
    %109 = vector.extract_strided_slice %27 {offsets = [0, 24], sizes = [8, 8], strides = [1, 1]} : vector<8x32xbf16> to vector<8x8xbf16>
    %cst_35 = arith.constant dense<0.000000e+00> : vector<8x8xf32>
    %110 = tpu.matmul %108, %109, %cst_35 {dimension_numbers = #tpu.dot_dimension_numbers<[1], [0], [0], [1], [0, 0, 1, 1], [], []>} : vector<8x8xbf16>, vector<8x8xbf16>, vector<8x8xf32> -> vector<8x8xf32>
    %111 = arith.truncf %110 : vector<8x8xf32> to vector<8x8xbf16>
    %112 = vector.extract_strided_slice %22 {offsets = [24, 0], sizes = [8, 32], strides = [1, 1]} : vector<32x32xbf16> to vector<8x32xbf16>
    %cst_36 = arith.constant dense<0.000000e+00> : vector<8x32xf32>
    %113 = tpu.matmul %111, %112, %cst_36 {dimension_numbers = #tpu.dot_dimension_numbers<[1], [0], [0], [1], [0, 0, 1, 1], [], []>} : vector<8x8xbf16>, vector<8x32xbf16>, vector<8x32xf32> -> vector<8x32xf32>
    %114 = arith.addf %92, %113 : vector<8x32xf32>
    %c1 = arith.constant 1 : index
    %c0_37 = arith.constant 0 : index
    %c0_38 = arith.constant 0 : index
    %c0_39 = arith.constant 0 : index
    %115 = vector.load %arg2[%c1, %c0_37, %c0_38, %c0_39] : memref<2x4x8x8xf32, #tpu.memory_space<vmem>>, vector<1x4x8x8xf32>
    %116 = vector.shape_cast %115 : vector<1x4x8x8xf32> to vector<4x8x8xf32>
    %117 = vector.extract_strided_slice %20 {offsets = [8, 0], sizes = [8, 32], strides = [1, 1]} : vector<16x96xbf16> to vector<8x32xbf16>
    %118 = vector.extract_strided_slice %20 {offsets = [8, 32], sizes = [8, 32], strides = [1, 1]} : vector<16x96xbf16> to vector<8x32xbf16>
    %119 = vector.extract_strided_slice %20 {offsets = [8, 64], sizes = [8, 32], strides = [1, 1]} : vector<16x96xbf16> to vector<8x32xbf16>
    %120 = vector.extract_strided_slice %117 {offsets = [0, 0], sizes = [8, 8], strides = [1, 1]} : vector<8x32xbf16> to vector<8x8xbf16>
    %121 = vector.extract_strided_slice %118 {offsets = [0, 0], sizes = [8, 8], strides = [1, 1]} : vector<8x32xbf16> to vector<8x8xbf16>
    %cst_40 = arith.constant dense<0.000000e+00> : vector<8x8xf32>
    %122 = tpu.matmul %120, %121, %cst_40 {dimension_numbers = #tpu.dot_dimension_numbers<[1], [1], [0], [0], [0, 0, 1, 0], [], []>} : vector<8x8xbf16>, vector<8x8xbf16>, vector<8x8xf32> -> vector<8x8xf32>
    %123 = vector.extract_strided_slice %116 {offsets = [0, 0, 0], sizes = [1, 8, 8], strides = [1, 1, 1]} : vector<4x8x8xf32> to vector<1x8x8xf32>
    %124 = vector.shape_cast %123 : vector<1x8x8xf32> to vector<8x8xf32>
    %125 = arith.addf %122, %124 : vector<8x8xf32>
    %cst_41 = arith.constant dense<0xFF800000> : vector<8xf32>
    %126 = vector.multi_reduction <maximumf>, %125, %cst_41 [1] : vector<8x8xf32> to vector<8xf32>
    %127 = vector.shape_cast %126 : vector<8xf32> to vector<8x1xf32>
    %128 = vector.broadcast %127 : vector<8x1xf32> to vector<8x8xf32>
    %129 = arith.subf %125, %128 : vector<8x8xf32>
    %130 = math.exp %129 : vector<8x8xf32>
    %cst_42 = arith.constant dense<0.000000e+00> : vector<8xf32>
    %131 = vector.multi_reduction <add>, %130, %cst_42 [1] : vector<8x8xf32> to vector<8xf32>
    %132 = vector.shape_cast %131 : vector<8xf32> to vector<8x1xf32>
    %133 = vector.broadcast %132 : vector<8x1xf32> to vector<8x8xf32>
    %134 = arith.divf %130, %133 : vector<8x8xf32>
    %135 = arith.truncf %134 : vector<8x8xf32> to vector<8x8xbf16>
    %136 = vector.extract_strided_slice %119 {offsets = [0, 0], sizes = [8, 8], strides = [1, 1]} : vector<8x32xbf16> to vector<8x8xbf16>
    %cst_43 = arith.constant dense<0.000000e+00> : vector<8x8xf32>
    %137 = tpu.matmul %135, %136, %cst_43 {dimension_numbers = #tpu.dot_dimension_numbers<[1], [0], [0], [1], [0, 0, 1, 1], [], []>} : vector<8x8xbf16>, vector<8x8xbf16>, vector<8x8xf32> -> vector<8x8xf32>
    %138 = arith.truncf %137 : vector<8x8xf32> to vector<8x8xbf16>
    %139 = vector.extract_strided_slice %22 {offsets = [0, 0], sizes = [8, 32], strides = [1, 1]} : vector<32x32xbf16> to vector<8x32xbf16>
    %cst_44 = arith.constant dense<0.000000e+00> : vector<8x32xf32>
    %140 = tpu.matmul %138, %139, %cst_44 {dimension_numbers = #tpu.dot_dimension_numbers<[1], [0], [0], [1], [0, 0, 1, 1], [], []>} : vector<8x8xbf16>, vector<8x32xbf16>, vector<8x32xf32> -> vector<8x32xf32>
    %141 = vector.extract_strided_slice %117 {offsets = [0, 8], sizes = [8, 8], strides = [1, 1]} : vector<8x32xbf16> to vector<8x8xbf16>
    %142 = vector.extract_strided_slice %118 {offsets = [0, 8], sizes = [8, 8], strides = [1, 1]} : vector<8x32xbf16> to vector<8x8xbf16>
    %cst_45 = arith.constant dense<0.000000e+00> : vector<8x8xf32>
    %143 = tpu.matmul %141, %142, %cst_45 {dimension_numbers = #tpu.dot_dimension_numbers<[1], [1], [0], [0], [0, 0, 1, 0], [], []>} : vector<8x8xbf16>, vector<8x8xbf16>, vector<8x8xf32> -> vector<8x8xf32>
    %144 = vector.extract_strided_slice %116 {offsets = [1, 0, 0], sizes = [1, 8, 8], strides = [1, 1, 1]} : vector<4x8x8xf32> to vector<1x8x8xf32>
    %145 = vector.shape_cast %144 : vector<1x8x8xf32> to vector<8x8xf32>
    %146 = arith.addf %143, %145 : vector<8x8xf32>
    %cst_46 = arith.constant dense<0xFF800000> : vector<8xf32>
    %147 = vector.multi_reduction <maximumf>, %146, %cst_46 [1] : vector<8x8xf32> to vector<8xf32>
    %148 = vector.shape_cast %147 : vector<8xf32> to vector<8x1xf32>
    %149 = vector.broadcast %148 : vector<8x1xf32> to vector<8x8xf32>
    %150 = arith.subf %146, %149 : vector<8x8xf32>
    %151 = math.exp %150 : vector<8x8xf32>
    %cst_47 = arith.constant dense<0.000000e+00> : vector<8xf32>
    %152 = vector.multi_reduction <add>, %151, %cst_47 [1] : vector<8x8xf32> to vector<8xf32>
    %153 = vector.shape_cast %152 : vector<8xf32> to vector<8x1xf32>
    %154 = vector.broadcast %153 : vector<8x1xf32> to vector<8x8xf32>
    %155 = arith.divf %151, %154 : vector<8x8xf32>
    %156 = arith.truncf %155 : vector<8x8xf32> to vector<8x8xbf16>
    %157 = vector.extract_strided_slice %119 {offsets = [0, 8], sizes = [8, 8], strides = [1, 1]} : vector<8x32xbf16> to vector<8x8xbf16>
    %cst_48 = arith.constant dense<0.000000e+00> : vector<8x8xf32>
    %158 = tpu.matmul %156, %157, %cst_48 {dimension_numbers = #tpu.dot_dimension_numbers<[1], [0], [0], [1], [0, 0, 1, 1], [], []>} : vector<8x8xbf16>, vector<8x8xbf16>, vector<8x8xf32> -> vector<8x8xf32>
    %159 = arith.truncf %158 : vector<8x8xf32> to vector<8x8xbf16>
    %160 = vector.extract_strided_slice %22 {offsets = [8, 0], sizes = [8, 32], strides = [1, 1]} : vector<32x32xbf16> to vector<8x32xbf16>
    %cst_49 = arith.constant dense<0.000000e+00> : vector<8x32xf32>
    %161 = tpu.matmul %159, %160, %cst_49 {dimension_numbers = #tpu.dot_dimension_numbers<[1], [0], [0], [1], [0, 0, 1, 1], [], []>} : vector<8x8xbf16>, vector<8x32xbf16>, vector<8x32xf32> -> vector<8x32xf32>
    %162 = arith.addf %140, %161 : vector<8x32xf32>
    %163 = vector.extract_strided_slice %117 {offsets = [0, 16], sizes = [8, 8], strides = [1, 1]} : vector<8x32xbf16> to vector<8x8xbf16>
    %164 = vector.extract_strided_slice %118 {offsets = [0, 16], sizes = [8, 8], strides = [1, 1]} : vector<8x32xbf16> to vector<8x8xbf16>
    %cst_50 = arith.constant dense<0.000000e+00> : vector<8x8xf32>
    %165 = tpu.matmul %163, %164, %cst_50 {dimension_numbers = #tpu.dot_dimension_numbers<[1], [1], [0], [0], [0, 0, 1, 0], [], []>} : vector<8x8xbf16>, vector<8x8xbf16>, vector<8x8xf32> -> vector<8x8xf32>
    %166 = vector.extract_strided_slice %116 {offsets = [2, 0, 0], sizes = [1, 8, 8], strides = [1, 1, 1]} : vector<4x8x8xf32> to vector<1x8x8xf32>
    %167 = vector.shape_cast %166 : vector<1x8x8xf32> to vector<8x8xf32>
    %168 = arith.addf %165, %167 : vector<8x8xf32>
    %cst_51 = arith.constant dense<0xFF800000> : vector<8xf32>
    %169 = vector.multi_reduction <maximumf>, %168, %cst_51 [1] : vector<8x8xf32> to vector<8xf32>
    %170 = vector.shape_cast %169 : vector<8xf32> to vector<8x1xf32>
    %171 = vector.broadcast %170 : vector<8x1xf32> to vector<8x8xf32>
    %172 = arith.subf %168, %171 : vector<8x8xf32>
    %173 = math.exp %172 : vector<8x8xf32>
    %cst_52 = arith.constant dense<0.000000e+00> : vector<8xf32>
    %174 = vector.multi_reduction <add>, %173, %cst_52 [1] : vector<8x8xf32> to vector<8xf32>
    %175 = vector.shape_cast %174 : vector<8xf32> to vector<8x1xf32>
    %176 = vector.broadcast %175 : vector<8x1xf32> to vector<8x8xf32>
    %177 = arith.divf %173, %176 : vector<8x8xf32>
    %178 = arith.truncf %177 : vector<8x8xf32> to vector<8x8xbf16>
    %179 = vector.extract_strided_slice %119 {offsets = [0, 16], sizes = [8, 8], strides = [1, 1]} : vector<8x32xbf16> to vector<8x8xbf16>
    %cst_53 = arith.constant dense<0.000000e+00> : vector<8x8xf32>
    %180 = tpu.matmul %178, %179, %cst_53 {dimension_numbers = #tpu.dot_dimension_numbers<[1], [0], [0], [1], [0, 0, 1, 1], [], []>} : vector<8x8xbf16>, vector<8x8xbf16>, vector<8x8xf32> -> vector<8x8xf32>
    %181 = arith.truncf %180 : vector<8x8xf32> to vector<8x8xbf16>
    %182 = vector.extract_strided_slice %22 {offsets = [16, 0], sizes = [8, 32], strides = [1, 1]} : vector<32x32xbf16> to vector<8x32xbf16>
    %cst_54 = arith.constant dense<0.000000e+00> : vector<8x32xf32>
    %183 = tpu.matmul %181, %182, %cst_54 {dimension_numbers = #tpu.dot_dimension_numbers<[1], [0], [0], [1], [0, 0, 1, 1], [], []>} : vector<8x8xbf16>, vector<8x32xbf16>, vector<8x32xf32> -> vector<8x32xf32>
    %184 = arith.addf %162, %183 : vector<8x32xf32>
    %185 = vector.extract_strided_slice %117 {offsets = [0, 24], sizes = [8, 8], strides = [1, 1]} : vector<8x32xbf16> to vector<8x8xbf16>
    %186 = vector.extract_strided_slice %118 {offsets = [0, 24], sizes = [8, 8], strides = [1, 1]} : vector<8x32xbf16> to vector<8x8xbf16>
    %cst_55 = arith.constant dense<0.000000e+00> : vector<8x8xf32>
    %187 = tpu.matmul %185, %186, %cst_55 {dimension_numbers = #tpu.dot_dimension_numbers<[1], [1], [0], [0], [0, 0, 1, 0], [], []>} : vector<8x8xbf16>, vector<8x8xbf16>, vector<8x8xf32> -> vector<8x8xf32>
    %188 = vector.extract_strided_slice %116 {offsets = [3, 0, 0], sizes = [1, 8, 8], strides = [1, 1, 1]} : vector<4x8x8xf32> to vector<1x8x8xf32>
    %189 = vector.shape_cast %188 : vector<1x8x8xf32> to vector<8x8xf32>
    %190 = arith.addf %187, %189 : vector<8x8xf32>
    %cst_56 = arith.constant dense<0xFF800000> : vector<8xf32>
    %191 = vector.multi_reduction <maximumf>, %190, %cst_56 [1] : vector<8x8xf32> to vector<8xf32>
    %192 = vector.shape_cast %191 : vector<8xf32> to vector<8x1xf32>
    %193 = vector.broadcast %192 : vector<8x1xf32> to vector<8x8xf32>
    %194 = arith.subf %190, %193 : vector<8x8xf32>
    %195 = math.exp %194 : vector<8x8xf32>
    %cst_57 = arith.constant dense<0.000000e+00> : vector<8xf32>
    %196 = vector.multi_reduction <add>, %195, %cst_57 [1] : vector<8x8xf32> to vector<8xf32>
    %197 = vector.shape_cast %196 : vector<8xf32> to vector<8x1xf32>
    %198 = vector.broadcast %197 : vector<8x1xf32> to vector<8x8xf32>
    %199 = arith.divf %195, %198 : vector<8x8xf32>
    %200 = arith.truncf %199 : vector<8x8xf32> to vector<8x8xbf16>
    %201 = vector.extract_strided_slice %119 {offsets = [0, 24], sizes = [8, 8], strides = [1, 1]} : vector<8x32xbf16> to vector<8x8xbf16>
    %cst_58 = arith.constant dense<0.000000e+00> : vector<8x8xf32>
    %202 = tpu.matmul %200, %201, %cst_58 {dimension_numbers = #tpu.dot_dimension_numbers<[1], [0], [0], [1], [0, 0, 1, 1], [], []>} : vector<8x8xbf16>, vector<8x8xbf16>, vector<8x8xf32> -> vector<8x8xf32>
    %203 = arith.truncf %202 : vector<8x8xf32> to vector<8x8xbf16>
    %204 = vector.extract_strided_slice %22 {offsets = [24, 0], sizes = [8, 32], strides = [1, 1]} : vector<32x32xbf16> to vector<8x32xbf16>
    %cst_59 = arith.constant dense<0.000000e+00> : vector<8x32xf32>
    %205 = tpu.matmul %203, %204, %cst_59 {dimension_numbers = #tpu.dot_dimension_numbers<[1], [0], [0], [1], [0, 0, 1, 1], [], []>} : vector<8x8xbf16>, vector<8x32xbf16>, vector<8x32xf32> -> vector<8x32xf32>
    %206 = arith.addf %184, %205 : vector<8x32xf32>
    %207 = tpu.concatenate %114, %206 in 0 : vector<8x32xf32>, vector<8x32xf32> -> vector<16x32xf32>
    %208 = arith.addf %1, %207 : vector<16x32xf32>
    %c0_60 = arith.constant 0 : index
    %c0_61 = arith.constant 0 : index
    %c0_62 = arith.constant 0 : index
    %209 = vector.load %arg9[%c0_60, %c0_61, %c0_62] : memref<2x1x32xf32, #tpu.memory_space<vmem>>, vector<1x1x32xf32>
    %210 = vector.shape_cast %209 : vector<1x1x32xf32> to vector<1x32xf32>
    %211 = arith.mulf %208, %208 : vector<16x32xf32>
    %cst_63 = arith.constant dense<0.000000e+00> : vector<16xf32>
    %212 = vector.multi_reduction <add>, %211, %cst_63 [1] : vector<16x32xf32> to vector<16xf32>
    %213 = vector.shape_cast %212 : vector<16xf32> to vector<16x1xf32>
    %cst_64 = arith.constant 3.200000e+01 : f32
    %214 = vector.broadcast %cst_64 : f32 to vector<16x1xf32>
    %215 = arith.divf %213, %214 : vector<16x1xf32>
    %cst_65 = arith.constant 9.99999997E-7 : f32
    %216 = vector.broadcast %cst_65 : f32 to vector<16x1xf32>
    %217 = arith.addf %215, %216 : vector<16x1xf32>
    %218 = math.rsqrt %217 : vector<16x1xf32>
    %219 = vector.broadcast %218 : vector<16x1xf32> to vector<16x32xf32>
    %220 = arith.mulf %208, %219 : vector<16x32xf32>
    %221 = vector.broadcast %210 : vector<1x32xf32> to vector<16x32xf32>
    %222 = arith.mulf %220, %221 : vector<16x32xf32>
    %c0_66 = arith.constant 0 : index
    %c0_67 = arith.constant 0 : index
    %c0_68 = arith.constant 0 : index
    %223 = vector.load %arg10[%c0_66, %c0_67, %c0_68] : memref<2x32x64xbf16, #tpu.memory_space<vmem>>, vector<1x32x64xbf16>
    %224 = vector.shape_cast %223 : vector<1x32x64xbf16> to vector<32x64xbf16>
    %225 = arith.truncf %222 : vector<16x32xf32> to vector<16x32xbf16>
    %cst_69 = arith.constant dense<0.000000e+00> : vector<16x64xf32>
    %226 = tpu.matmul %225, %224, %cst_69 {dimension_numbers = #tpu.dot_dimension_numbers<[1], [0], [0], [1], [0, 0, 1, 1], [], []>} : vector<16x32xbf16>, vector<32x64xbf16>, vector<16x64xf32> -> vector<16x64xf32>
    %cst_70 = arith.constant 0.000000e+00 : f32
    %227 = vector.broadcast %cst_70 : f32 to vector<16x64xf32>
    %228 = arith.maximumf %226, %227 : vector<16x64xf32>
    %c0_71 = arith.constant 0 : index
    %c0_72 = arith.constant 0 : index
    %c0_73 = arith.constant 0 : index
    %229 = vector.load %arg11[%c0_71, %c0_72, %c0_73] : memref<2x64x32xbf16, #tpu.memory_space<vmem>>, vector<1x64x32xbf16>
    %230 = vector.shape_cast %229 : vector<1x64x32xbf16> to vector<64x32xbf16>
    %231 = arith.truncf %228 : vector<16x64xf32> to vector<16x64xbf16>
    %cst_74 = arith.constant dense<0.000000e+00> : vector<16x32xf32>
    %232 = tpu.matmul %231, %230, %cst_74 {dimension_numbers = #tpu.dot_dimension_numbers<[1], [0], [0], [1], [0, 0, 1, 1], [], []>} : vector<16x64xbf16>, vector<64x32xbf16>, vector<16x32xf32> -> vector<16x32xf32>
    %233 = arith.addf %208, %232 : vector<16x32xf32>
    %c1_75 = arith.constant 1 : index
    %c0_76 = arith.constant 0 : index
    %c0_77 = arith.constant 0 : index
    %234 = vector.load %arg6[%c1_75, %c0_76, %c0_77] : memref<2x1x32xf32, #tpu.memory_space<vmem>>, vector<1x1x32xf32>
    %235 = vector.shape_cast %234 : vector<1x1x32xf32> to vector<1x32xf32>
    %236 = arith.mulf %233, %233 : vector<16x32xf32>
    %cst_78 = arith.constant dense<0.000000e+00> : vector<16xf32>
    %237 = vector.multi_reduction <add>, %236, %cst_78 [1] : vector<16x32xf32> to vector<16xf32>
    %238 = vector.shape_cast %237 : vector<16xf32> to vector<16x1xf32>
    %cst_79 = arith.constant 3.200000e+01 : f32
    %239 = vector.broadcast %cst_79 : f32 to vector<16x1xf32>
    %240 = arith.divf %238, %239 : vector<16x1xf32>
    %cst_80 = arith.constant 9.99999997E-7 : f32
    %241 = vector.broadcast %cst_80 : f32 to vector<16x1xf32>
    %242 = arith.addf %240, %241 : vector<16x1xf32>
    %243 = math.rsqrt %242 : vector<16x1xf32>
    %244 = vector.broadcast %243 : vector<16x1xf32> to vector<16x32xf32>
    %245 = arith.mulf %233, %244 : vector<16x32xf32>
    %246 = vector.broadcast %235 : vector<1x32xf32> to vector<16x32xf32>
    %247 = arith.mulf %245, %246 : vector<16x32xf32>
    %c1_81 = arith.constant 1 : index
    %c0_82 = arith.constant 0 : index
    %c0_83 = arith.constant 0 : index
    %248 = vector.load %arg7[%c1_81, %c0_82, %c0_83] : memref<2x32x96xbf16, #tpu.memory_space<vmem>>, vector<1x32x96xbf16>
    %249 = vector.shape_cast %248 : vector<1x32x96xbf16> to vector<32x96xbf16>
    %250 = arith.truncf %247 : vector<16x32xf32> to vector<16x32xbf16>
    %cst_84 = arith.constant dense<0.000000e+00> : vector<16x96xf32>
    %251 = tpu.matmul %250, %249, %cst_84 {dimension_numbers = #tpu.dot_dimension_numbers<[1], [0], [0], [1], [0, 0, 1, 1], [], []>} : vector<16x32xbf16>, vector<32x96xbf16>, vector<16x96xf32> -> vector<16x96xf32>
    %252 = arith.truncf %251 : vector<16x96xf32> to vector<16x96xbf16>
    %c1_85 = arith.constant 1 : index
    %c0_86 = arith.constant 0 : index
    %c0_87 = arith.constant 0 : index
    %253 = vector.load %arg8[%c1_85, %c0_86, %c0_87] : memref<2x32x32xbf16, #tpu.memory_space<vmem>>, vector<1x32x32xbf16>
    %254 = vector.shape_cast %253 : vector<1x32x32xbf16> to vector<32x32xbf16>
    %c0_88 = arith.constant 0 : index
    %c0_89 = arith.constant 0 : index
    %c0_90 = arith.constant 0 : index
    %c0_91 = arith.constant 0 : index
    %255 = vector.load %arg2[%c0_88, %c0_89, %c0_90, %c0_91] : memref<2x4x8x8xf32, #tpu.memory_space<vmem>>, vector<1x4x8x8xf32>
    %256 = vector.shape_cast %255 : vector<1x4x8x8xf32> to vector<4x8x8xf32>
    %257 = vector.extract_strided_slice %252 {offsets = [0, 0], sizes = [8, 32], strides = [1, 1]} : vector<16x96xbf16> to vector<8x32xbf16>
    %258 = vector.extract_strided_slice %252 {offsets = [0, 32], sizes = [8, 32], strides = [1, 1]} : vector<16x96xbf16> to vector<8x32xbf16>
    %259 = vector.extract_strided_slice %252 {offsets = [0, 64], sizes = [8, 32], strides = [1, 1]} : vector<16x96xbf16> to vector<8x32xbf16>
    %260 = vector.extract_strided_slice %257 {offsets = [0, 0], sizes = [8, 8], strides = [1, 1]} : vector<8x32xbf16> to vector<8x8xbf16>
    %261 = vector.extract_strided_slice %258 {offsets = [0, 0], sizes = [8, 8], strides = [1, 1]} : vector<8x32xbf16> to vector<8x8xbf16>
    %cst_92 = arith.constant dense<0.000000e+00> : vector<8x8xf32>
    %262 = tpu.matmul %260, %261, %cst_92 {dimension_numbers = #tpu.dot_dimension_numbers<[1], [1], [0], [0], [0, 0, 1, 0], [], []>} : vector<8x8xbf16>, vector<8x8xbf16>, vector<8x8xf32> -> vector<8x8xf32>
    %263 = vector.extract_strided_slice %256 {offsets = [0, 0, 0], sizes = [1, 8, 8], strides = [1, 1, 1]} : vector<4x8x8xf32> to vector<1x8x8xf32>
    %264 = vector.shape_cast %263 : vector<1x8x8xf32> to vector<8x8xf32>
    %265 = arith.addf %262, %264 : vector<8x8xf32>
    %cst_93 = arith.constant dense<0xFF800000> : vector<8xf32>
    %266 = vector.multi_reduction <maximumf>, %265, %cst_93 [1] : vector<8x8xf32> to vector<8xf32>
    %267 = vector.shape_cast %266 : vector<8xf32> to vector<8x1xf32>
    %268 = vector.broadcast %267 : vector<8x1xf32> to vector<8x8xf32>
    %269 = arith.subf %265, %268 : vector<8x8xf32>
    %270 = math.exp %269 : vector<8x8xf32>
    %cst_94 = arith.constant dense<0.000000e+00> : vector<8xf32>
    %271 = vector.multi_reduction <add>, %270, %cst_94 [1] : vector<8x8xf32> to vector<8xf32>
    %272 = vector.shape_cast %271 : vector<8xf32> to vector<8x1xf32>
    %273 = vector.broadcast %272 : vector<8x1xf32> to vector<8x8xf32>
    %274 = arith.divf %270, %273 : vector<8x8xf32>
    %275 = arith.truncf %274 : vector<8x8xf32> to vector<8x8xbf16>
    %276 = vector.extract_strided_slice %259 {offsets = [0, 0], sizes = [8, 8], strides = [1, 1]} : vector<8x32xbf16> to vector<8x8xbf16>
    %cst_95 = arith.constant dense<0.000000e+00> : vector<8x8xf32>
    %277 = tpu.matmul %275, %276, %cst_95 {dimension_numbers = #tpu.dot_dimension_numbers<[1], [0], [0], [1], [0, 0, 1, 1], [], []>} : vector<8x8xbf16>, vector<8x8xbf16>, vector<8x8xf32> -> vector<8x8xf32>
    %278 = arith.truncf %277 : vector<8x8xf32> to vector<8x8xbf16>
    %279 = vector.extract_strided_slice %254 {offsets = [0, 0], sizes = [8, 32], strides = [1, 1]} : vector<32x32xbf16> to vector<8x32xbf16>
    %cst_96 = arith.constant dense<0.000000e+00> : vector<8x32xf32>
    %280 = tpu.matmul %278, %279, %cst_96 {dimension_numbers = #tpu.dot_dimension_numbers<[1], [0], [0], [1], [0, 0, 1, 1], [], []>} : vector<8x8xbf16>, vector<8x32xbf16>, vector<8x32xf32> -> vector<8x32xf32>
    %281 = vector.extract_strided_slice %257 {offsets = [0, 8], sizes = [8, 8], strides = [1, 1]} : vector<8x32xbf16> to vector<8x8xbf16>
    %282 = vector.extract_strided_slice %258 {offsets = [0, 8], sizes = [8, 8], strides = [1, 1]} : vector<8x32xbf16> to vector<8x8xbf16>
    %cst_97 = arith.constant dense<0.000000e+00> : vector<8x8xf32>
    %283 = tpu.matmul %281, %282, %cst_97 {dimension_numbers = #tpu.dot_dimension_numbers<[1], [1], [0], [0], [0, 0, 1, 0], [], []>} : vector<8x8xbf16>, vector<8x8xbf16>, vector<8x8xf32> -> vector<8x8xf32>
    %284 = vector.extract_strided_slice %256 {offsets = [1, 0, 0], sizes = [1, 8, 8], strides = [1, 1, 1]} : vector<4x8x8xf32> to vector<1x8x8xf32>
    %285 = vector.shape_cast %284 : vector<1x8x8xf32> to vector<8x8xf32>
    %286 = arith.addf %283, %285 : vector<8x8xf32>
    %cst_98 = arith.constant dense<0xFF800000> : vector<8xf32>
    %287 = vector.multi_reduction <maximumf>, %286, %cst_98 [1] : vector<8x8xf32> to vector<8xf32>
    %288 = vector.shape_cast %287 : vector<8xf32> to vector<8x1xf32>
    %289 = vector.broadcast %288 : vector<8x1xf32> to vector<8x8xf32>
    %290 = arith.subf %286, %289 : vector<8x8xf32>
    %291 = math.exp %290 : vector<8x8xf32>
    %cst_99 = arith.constant dense<0.000000e+00> : vector<8xf32>
    %292 = vector.multi_reduction <add>, %291, %cst_99 [1] : vector<8x8xf32> to vector<8xf32>
    %293 = vector.shape_cast %292 : vector<8xf32> to vector<8x1xf32>
    %294 = vector.broadcast %293 : vector<8x1xf32> to vector<8x8xf32>
    %295 = arith.divf %291, %294 : vector<8x8xf32>
    %296 = arith.truncf %295 : vector<8x8xf32> to vector<8x8xbf16>
    %297 = vector.extract_strided_slice %259 {offsets = [0, 8], sizes = [8, 8], strides = [1, 1]} : vector<8x32xbf16> to vector<8x8xbf16>
    %cst_100 = arith.constant dense<0.000000e+00> : vector<8x8xf32>
    %298 = tpu.matmul %296, %297, %cst_100 {dimension_numbers = #tpu.dot_dimension_numbers<[1], [0], [0], [1], [0, 0, 1, 1], [], []>} : vector<8x8xbf16>, vector<8x8xbf16>, vector<8x8xf32> -> vector<8x8xf32>
    %299 = arith.truncf %298 : vector<8x8xf32> to vector<8x8xbf16>
    %300 = vector.extract_strided_slice %254 {offsets = [8, 0], sizes = [8, 32], strides = [1, 1]} : vector<32x32xbf16> to vector<8x32xbf16>
    %cst_101 = arith.constant dense<0.000000e+00> : vector<8x32xf32>
    %301 = tpu.matmul %299, %300, %cst_101 {dimension_numbers = #tpu.dot_dimension_numbers<[1], [0], [0], [1], [0, 0, 1, 1], [], []>} : vector<8x8xbf16>, vector<8x32xbf16>, vector<8x32xf32> -> vector<8x32xf32>
    %302 = arith.addf %280, %301 : vector<8x32xf32>
    %303 = vector.extract_strided_slice %257 {offsets = [0, 16], sizes = [8, 8], strides = [1, 1]} : vector<8x32xbf16> to vector<8x8xbf16>
    %304 = vector.extract_strided_slice %258 {offsets = [0, 16], sizes = [8, 8], strides = [1, 1]} : vector<8x32xbf16> to vector<8x8xbf16>
    %cst_102 = arith.constant dense<0.000000e+00> : vector<8x8xf32>
    %305 = tpu.matmul %303, %304, %cst_102 {dimension_numbers = #tpu.dot_dimension_numbers<[1], [1], [0], [0], [0, 0, 1, 0], [], []>} : vector<8x8xbf16>, vector<8x8xbf16>, vector<8x8xf32> -> vector<8x8xf32>
    %306 = vector.extract_strided_slice %256 {offsets = [2, 0, 0], sizes = [1, 8, 8], strides = [1, 1, 1]} : vector<4x8x8xf32> to vector<1x8x8xf32>
    %307 = vector.shape_cast %306 : vector<1x8x8xf32> to vector<8x8xf32>
    %308 = arith.addf %305, %307 : vector<8x8xf32>
    %cst_103 = arith.constant dense<0xFF800000> : vector<8xf32>
    %309 = vector.multi_reduction <maximumf>, %308, %cst_103 [1] : vector<8x8xf32> to vector<8xf32>
    %310 = vector.shape_cast %309 : vector<8xf32> to vector<8x1xf32>
    %311 = vector.broadcast %310 : vector<8x1xf32> to vector<8x8xf32>
    %312 = arith.subf %308, %311 : vector<8x8xf32>
    %313 = math.exp %312 : vector<8x8xf32>
    %cst_104 = arith.constant dense<0.000000e+00> : vector<8xf32>
    %314 = vector.multi_reduction <add>, %313, %cst_104 [1] : vector<8x8xf32> to vector<8xf32>
    %315 = vector.shape_cast %314 : vector<8xf32> to vector<8x1xf32>
    %316 = vector.broadcast %315 : vector<8x1xf32> to vector<8x8xf32>
    %317 = arith.divf %313, %316 : vector<8x8xf32>
    %318 = arith.truncf %317 : vector<8x8xf32> to vector<8x8xbf16>
    %319 = vector.extract_strided_slice %259 {offsets = [0, 16], sizes = [8, 8], strides = [1, 1]} : vector<8x32xbf16> to vector<8x8xbf16>
    %cst_105 = arith.constant dense<0.000000e+00> : vector<8x8xf32>
    %320 = tpu.matmul %318, %319, %cst_105 {dimension_numbers = #tpu.dot_dimension_numbers<[1], [0], [0], [1], [0, 0, 1, 1], [], []>} : vector<8x8xbf16>, vector<8x8xbf16>, vector<8x8xf32> -> vector<8x8xf32>
    %321 = arith.truncf %320 : vector<8x8xf32> to vector<8x8xbf16>
    %322 = vector.extract_strided_slice %254 {offsets = [16, 0], sizes = [8, 32], strides = [1, 1]} : vector<32x32xbf16> to vector<8x32xbf16>
    %cst_106 = arith.constant dense<0.000000e+00> : vector<8x32xf32>
    %323 = tpu.matmul %321, %322, %cst_106 {dimension_numbers = #tpu.dot_dimension_numbers<[1], [0], [0], [1], [0, 0, 1, 1], [], []>} : vector<8x8xbf16>, vector<8x32xbf16>, vector<8x32xf32> -> vector<8x32xf32>
    %324 = arith.addf %302, %323 : vector<8x32xf32>
    %325 = vector.extract_strided_slice %257 {offsets = [0, 24], sizes = [8, 8], strides = [1, 1]} : vector<8x32xbf16> to vector<8x8xbf16>
    %326 = vector.extract_strided_slice %258 {offsets = [0, 24], sizes = [8, 8], strides = [1, 1]} : vector<8x32xbf16> to vector<8x8xbf16>
    %cst_107 = arith.constant dense<0.000000e+00> : vector<8x8xf32>
    %327 = tpu.matmul %325, %326, %cst_107 {dimension_numbers = #tpu.dot_dimension_numbers<[1], [1], [0], [0], [0, 0, 1, 0], [], []>} : vector<8x8xbf16>, vector<8x8xbf16>, vector<8x8xf32> -> vector<8x8xf32>
    %328 = vector.extract_strided_slice %256 {offsets = [3, 0, 0], sizes = [1, 8, 8], strides = [1, 1, 1]} : vector<4x8x8xf32> to vector<1x8x8xf32>
    %329 = vector.shape_cast %328 : vector<1x8x8xf32> to vector<8x8xf32>
    %330 = arith.addf %327, %329 : vector<8x8xf32>
    %cst_108 = arith.constant dense<0xFF800000> : vector<8xf32>
    %331 = vector.multi_reduction <maximumf>, %330, %cst_108 [1] : vector<8x8xf32> to vector<8xf32>
    %332 = vector.shape_cast %331 : vector<8xf32> to vector<8x1xf32>
    %333 = vector.broadcast %332 : vector<8x1xf32> to vector<8x8xf32>
    %334 = arith.subf %330, %333 : vector<8x8xf32>
    %335 = math.exp %334 : vector<8x8xf32>
    %cst_109 = arith.constant dense<0.000000e+00> : vector<8xf32>
    %336 = vector.multi_reduction <add>, %335, %cst_109 [1] : vector<8x8xf32> to vector<8xf32>
    %337 = vector.shape_cast %336 : vector<8xf32> to vector<8x1xf32>
    %338 = vector.broadcast %337 : vector<8x1xf32> to vector<8x8xf32>
    %339 = arith.divf %335, %338 : vector<8x8xf32>
    %340 = arith.truncf %339 : vector<8x8xf32> to vector<8x8xbf16>
    %341 = vector.extract_strided_slice %259 {offsets = [0, 24], sizes = [8, 8], strides = [1, 1]} : vector<8x32xbf16> to vector<8x8xbf16>
    %cst_110 = arith.constant dense<0.000000e+00> : vector<8x8xf32>
    %342 = tpu.matmul %340, %341, %cst_110 {dimension_numbers = #tpu.dot_dimension_numbers<[1], [0], [0], [1], [0, 0, 1, 1], [], []>} : vector<8x8xbf16>, vector<8x8xbf16>, vector<8x8xf32> -> vector<8x8xf32>
    %343 = arith.truncf %342 : vector<8x8xf32> to vector<8x8xbf16>
    %344 = vector.extract_strided_slice %254 {offsets = [24, 0], sizes = [8, 32], strides = [1, 1]} : vector<32x32xbf16> to vector<8x32xbf16>
    %cst_111 = arith.constant dense<0.000000e+00> : vector<8x32xf32>
    %345 = tpu.matmul %343, %344, %cst_111 {dimension_numbers = #tpu.dot_dimension_numbers<[1], [0], [0], [1], [0, 0, 1, 1], [], []>} : vector<8x8xbf16>, vector<8x32xbf16>, vector<8x32xf32> -> vector<8x32xf32>
    %346 = arith.addf %324, %345 : vector<8x32xf32>
    %c1_112 = arith.constant 1 : index
    %c0_113 = arith.constant 0 : index
    %c0_114 = arith.constant 0 : index
    %c0_115 = arith.constant 0 : index
    %347 = vector.load %arg2[%c1_112, %c0_113, %c0_114, %c0_115] : memref<2x4x8x8xf32, #tpu.memory_space<vmem>>, vector<1x4x8x8xf32>
    %348 = vector.shape_cast %347 : vector<1x4x8x8xf32> to vector<4x8x8xf32>
    %349 = vector.extract_strided_slice %252 {offsets = [8, 0], sizes = [8, 32], strides = [1, 1]} : vector<16x96xbf16> to vector<8x32xbf16>
    %350 = vector.extract_strided_slice %252 {offsets = [8, 32], sizes = [8, 32], strides = [1, 1]} : vector<16x96xbf16> to vector<8x32xbf16>
    %351 = vector.extract_strided_slice %252 {offsets = [8, 64], sizes = [8, 32], strides = [1, 1]} : vector<16x96xbf16> to vector<8x32xbf16>
    %352 = vector.extract_strided_slice %349 {offsets = [0, 0], sizes = [8, 8], strides = [1, 1]} : vector<8x32xbf16> to vector<8x8xbf16>
    %353 = vector.extract_strided_slice %350 {offsets = [0, 0], sizes = [8, 8], strides = [1, 1]} : vector<8x32xbf16> to vector<8x8xbf16>
    %cst_116 = arith.constant dense<0.000000e+00> : vector<8x8xf32>
    %354 = tpu.matmul %352, %353, %cst_116 {dimension_numbers = #tpu.dot_dimension_numbers<[1], [1], [0], [0], [0, 0, 1, 0], [], []>} : vector<8x8xbf16>, vector<8x8xbf16>, vector<8x8xf32> -> vector<8x8xf32>
    %355 = vector.extract_strided_slice %348 {offsets = [0, 0, 0], sizes = [1, 8, 8], strides = [1, 1, 1]} : vector<4x8x8xf32> to vector<1x8x8xf32>
    %356 = vector.shape_cast %355 : vector<1x8x8xf32> to vector<8x8xf32>
    %357 = arith.addf %354, %356 : vector<8x8xf32>
    %cst_117 = arith.constant dense<0xFF800000> : vector<8xf32>
    %358 = vector.multi_reduction <maximumf>, %357, %cst_117 [1] : vector<8x8xf32> to vector<8xf32>
    %359 = vector.shape_cast %358 : vector<8xf32> to vector<8x1xf32>
    %360 = vector.broadcast %359 : vector<8x1xf32> to vector<8x8xf32>
    %361 = arith.subf %357, %360 : vector<8x8xf32>
    %362 = math.exp %361 : vector<8x8xf32>
    %cst_118 = arith.constant dense<0.000000e+00> : vector<8xf32>
    %363 = vector.multi_reduction <add>, %362, %cst_118 [1] : vector<8x8xf32> to vector<8xf32>
    %364 = vector.shape_cast %363 : vector<8xf32> to vector<8x1xf32>
    %365 = vector.broadcast %364 : vector<8x1xf32> to vector<8x8xf32>
    %366 = arith.divf %362, %365 : vector<8x8xf32>
    %367 = arith.truncf %366 : vector<8x8xf32> to vector<8x8xbf16>
    %368 = vector.extract_strided_slice %351 {offsets = [0, 0], sizes = [8, 8], strides = [1, 1]} : vector<8x32xbf16> to vector<8x8xbf16>
    %cst_119 = arith.constant dense<0.000000e+00> : vector<8x8xf32>
    %369 = tpu.matmul %367, %368, %cst_119 {dimension_numbers = #tpu.dot_dimension_numbers<[1], [0], [0], [1], [0, 0, 1, 1], [], []>} : vector<8x8xbf16>, vector<8x8xbf16>, vector<8x8xf32> -> vector<8x8xf32>
    %370 = arith.truncf %369 : vector<8x8xf32> to vector<8x8xbf16>
    %371 = vector.extract_strided_slice %254 {offsets = [0, 0], sizes = [8, 32], strides = [1, 1]} : vector<32x32xbf16> to vector<8x32xbf16>
    %cst_120 = arith.constant dense<0.000000e+00> : vector<8x32xf32>
    %372 = tpu.matmul %370, %371, %cst_120 {dimension_numbers = #tpu.dot_dimension_numbers<[1], [0], [0], [1], [0, 0, 1, 1], [], []>} : vector<8x8xbf16>, vector<8x32xbf16>, vector<8x32xf32> -> vector<8x32xf32>
    %373 = vector.extract_strided_slice %349 {offsets = [0, 8], sizes = [8, 8], strides = [1, 1]} : vector<8x32xbf16> to vector<8x8xbf16>
    %374 = vector.extract_strided_slice %350 {offsets = [0, 8], sizes = [8, 8], strides = [1, 1]} : vector<8x32xbf16> to vector<8x8xbf16>
    %cst_121 = arith.constant dense<0.000000e+00> : vector<8x8xf32>
    %375 = tpu.matmul %373, %374, %cst_121 {dimension_numbers = #tpu.dot_dimension_numbers<[1], [1], [0], [0], [0, 0, 1, 0], [], []>} : vector<8x8xbf16>, vector<8x8xbf16>, vector<8x8xf32> -> vector<8x8xf32>
    %376 = vector.extract_strided_slice %348 {offsets = [1, 0, 0], sizes = [1, 8, 8], strides = [1, 1, 1]} : vector<4x8x8xf32> to vector<1x8x8xf32>
    %377 = vector.shape_cast %376 : vector<1x8x8xf32> to vector<8x8xf32>
    %378 = arith.addf %375, %377 : vector<8x8xf32>
    %cst_122 = arith.constant dense<0xFF800000> : vector<8xf32>
    %379 = vector.multi_reduction <maximumf>, %378, %cst_122 [1] : vector<8x8xf32> to vector<8xf32>
    %380 = vector.shape_cast %379 : vector<8xf32> to vector<8x1xf32>
    %381 = vector.broadcast %380 : vector<8x1xf32> to vector<8x8xf32>
    %382 = arith.subf %378, %381 : vector<8x8xf32>
    %383 = math.exp %382 : vector<8x8xf32>
    %cst_123 = arith.constant dense<0.000000e+00> : vector<8xf32>
    %384 = vector.multi_reduction <add>, %383, %cst_123 [1] : vector<8x8xf32> to vector<8xf32>
    %385 = vector.shape_cast %384 : vector<8xf32> to vector<8x1xf32>
    %386 = vector.broadcast %385 : vector<8x1xf32> to vector<8x8xf32>
    %387 = arith.divf %383, %386 : vector<8x8xf32>
    %388 = arith.truncf %387 : vector<8x8xf32> to vector<8x8xbf16>
    %389 = vector.extract_strided_slice %351 {offsets = [0, 8], sizes = [8, 8], strides = [1, 1]} : vector<8x32xbf16> to vector<8x8xbf16>
    %cst_124 = arith.constant dense<0.000000e+00> : vector<8x8xf32>
    %390 = tpu.matmul %388, %389, %cst_124 {dimension_numbers = #tpu.dot_dimension_numbers<[1], [0], [0], [1], [0, 0, 1, 1], [], []>} : vector<8x8xbf16>, vector<8x8xbf16>, vector<8x8xf32> -> vector<8x8xf32>
    %391 = arith.truncf %390 : vector<8x8xf32> to vector<8x8xbf16>
    %392 = vector.extract_strided_slice %254 {offsets = [8, 0], sizes = [8, 32], strides = [1, 1]} : vector<32x32xbf16> to vector<8x32xbf16>
    %cst_125 = arith.constant dense<0.000000e+00> : vector<8x32xf32>
    %393 = tpu.matmul %391, %392, %cst_125 {dimension_numbers = #tpu.dot_dimension_numbers<[1], [0], [0], [1], [0, 0, 1, 1], [], []>} : vector<8x8xbf16>, vector<8x32xbf16>, vector<8x32xf32> -> vector<8x32xf32>
    %394 = arith.addf %372, %393 : vector<8x32xf32>
    %395 = vector.extract_strided_slice %349 {offsets = [0, 16], sizes = [8, 8], strides = [1, 1]} : vector<8x32xbf16> to vector<8x8xbf16>
    %396 = vector.extract_strided_slice %350 {offsets = [0, 16], sizes = [8, 8], strides = [1, 1]} : vector<8x32xbf16> to vector<8x8xbf16>
    %cst_126 = arith.constant dense<0.000000e+00> : vector<8x8xf32>
    %397 = tpu.matmul %395, %396, %cst_126 {dimension_numbers = #tpu.dot_dimension_numbers<[1], [1], [0], [0], [0, 0, 1, 0], [], []>} : vector<8x8xbf16>, vector<8x8xbf16>, vector<8x8xf32> -> vector<8x8xf32>
    %398 = vector.extract_strided_slice %348 {offsets = [2, 0, 0], sizes = [1, 8, 8], strides = [1, 1, 1]} : vector<4x8x8xf32> to vector<1x8x8xf32>
    %399 = vector.shape_cast %398 : vector<1x8x8xf32> to vector<8x8xf32>
    %400 = arith.addf %397, %399 : vector<8x8xf32>
    %cst_127 = arith.constant dense<0xFF800000> : vector<8xf32>
    %401 = vector.multi_reduction <maximumf>, %400, %cst_127 [1] : vector<8x8xf32> to vector<8xf32>
    %402 = vector.shape_cast %401 : vector<8xf32> to vector<8x1xf32>
    %403 = vector.broadcast %402 : vector<8x1xf32> to vector<8x8xf32>
    %404 = arith.subf %400, %403 : vector<8x8xf32>
    %405 = math.exp %404 : vector<8x8xf32>
    %cst_128 = arith.constant dense<0.000000e+00> : vector<8xf32>
    %406 = vector.multi_reduction <add>, %405, %cst_128 [1] : vector<8x8xf32> to vector<8xf32>
    %407 = vector.shape_cast %406 : vector<8xf32> to vector<8x1xf32>
    %408 = vector.broadcast %407 : vector<8x1xf32> to vector<8x8xf32>
    %409 = arith.divf %405, %408 : vector<8x8xf32>
    %410 = arith.truncf %409 : vector<8x8xf32> to vector<8x8xbf16>
    %411 = vector.extract_strided_slice %351 {offsets = [0, 16], sizes = [8, 8], strides = [1, 1]} : vector<8x32xbf16> to vector<8x8xbf16>
    %cst_129 = arith.constant dense<0.000000e+00> : vector<8x8xf32>
    %412 = tpu.matmul %410, %411, %cst_129 {dimension_numbers = #tpu.dot_dimension_numbers<[1], [0], [0], [1], [0, 0, 1, 1], [], []>} : vector<8x8xbf16>, vector<8x8xbf16>, vector<8x8xf32> -> vector<8x8xf32>
    %413 = arith.truncf %412 : vector<8x8xf32> to vector<8x8xbf16>
    %414 = vector.extract_strided_slice %254 {offsets = [16, 0], sizes = [8, 32], strides = [1, 1]} : vector<32x32xbf16> to vector<8x32xbf16>
    %cst_130 = arith.constant dense<0.000000e+00> : vector<8x32xf32>
    %415 = tpu.matmul %413, %414, %cst_130 {dimension_numbers = #tpu.dot_dimension_numbers<[1], [0], [0], [1], [0, 0, 1, 1], [], []>} : vector<8x8xbf16>, vector<8x32xbf16>, vector<8x32xf32> -> vector<8x32xf32>
    %416 = arith.addf %394, %415 : vector<8x32xf32>
    %417 = vector.extract_strided_slice %349 {offsets = [0, 24], sizes = [8, 8], strides = [1, 1]} : vector<8x32xbf16> to vector<8x8xbf16>
    %418 = vector.extract_strided_slice %350 {offsets = [0, 24], sizes = [8, 8], strides = [1, 1]} : vector<8x32xbf16> to vector<8x8xbf16>
    %cst_131 = arith.constant dense<0.000000e+00> : vector<8x8xf32>
    %419 = tpu.matmul %417, %418, %cst_131 {dimension_numbers = #tpu.dot_dimension_numbers<[1], [1], [0], [0], [0, 0, 1, 0], [], []>} : vector<8x8xbf16>, vector<8x8xbf16>, vector<8x8xf32> -> vector<8x8xf32>
    %420 = vector.extract_strided_slice %348 {offsets = [3, 0, 0], sizes = [1, 8, 8], strides = [1, 1, 1]} : vector<4x8x8xf32> to vector<1x8x8xf32>
    %421 = vector.shape_cast %420 : vector<1x8x8xf32> to vector<8x8xf32>
    %422 = arith.addf %419, %421 : vector<8x8xf32>
    %cst_132 = arith.constant dense<0xFF800000> : vector<8xf32>
    %423 = vector.multi_reduction <maximumf>, %422, %cst_132 [1] : vector<8x8xf32> to vector<8xf32>
    %424 = vector.shape_cast %423 : vector<8xf32> to vector<8x1xf32>
    %425 = vector.broadcast %424 : vector<8x1xf32> to vector<8x8xf32>
    %426 = arith.subf %422, %425 : vector<8x8xf32>
    %427 = math.exp %426 : vector<8x8xf32>
    %cst_133 = arith.constant dense<0.000000e+00> : vector<8xf32>
    %428 = vector.multi_reduction <add>, %427, %cst_133 [1] : vector<8x8xf32> to vector<8xf32>
    %429 = vector.shape_cast %428 : vector<8xf32> to vector<8x1xf32>
    %430 = vector.broadcast %429 : vector<8x1xf32> to vector<8x8xf32>
    %431 = arith.divf %427, %430 : vector<8x8xf32>
    %432 = arith.truncf %431 : vector<8x8xf32> to vector<8x8xbf16>
    %433 = vector.extract_strided_slice %351 {offsets = [0, 24], sizes = [8, 8], strides = [1, 1]} : vector<8x32xbf16> to vector<8x8xbf16>
    %cst_134 = arith.constant dense<0.000000e+00> : vector<8x8xf32>
    %434 = tpu.matmul %432, %433, %cst_134 {dimension_numbers = #tpu.dot_dimension_numbers<[1], [0], [0], [1], [0, 0, 1, 1], [], []>} : vector<8x8xbf16>, vector<8x8xbf16>, vector<8x8xf32> -> vector<8x8xf32>
    %435 = arith.truncf %434 : vector<8x8xf32> to vector<8x8xbf16>
    %436 = vector.extract_strided_slice %254 {offsets = [24, 0], sizes = [8, 32], strides = [1, 1]} : vector<32x32xbf16> to vector<8x32xbf16>
    %cst_135 = arith.constant dense<0.000000e+00> : vector<8x32xf32>
    %437 = tpu.matmul %435, %436, %cst_135 {dimension_numbers = #tpu.dot_dimension_numbers<[1], [0], [0], [1], [0, 0, 1, 1], [], []>} : vector<8x8xbf16>, vector<8x32xbf16>, vector<8x32xf32> -> vector<8x32xf32>
    %438 = arith.addf %416, %437 : vector<8x32xf32>
    %439 = tpu.concatenate %346, %438 in 0 : vector<8x32xf32>, vector<8x32xf32> -> vector<16x32xf32>
    %440 = arith.addf %233, %439 : vector<16x32xf32>
    %c1_136 = arith.constant 1 : index
    %c0_137 = arith.constant 0 : index
    %c0_138 = arith.constant 0 : index
    %441 = vector.load %arg9[%c1_136, %c0_137, %c0_138] : memref<2x1x32xf32, #tpu.memory_space<vmem>>, vector<1x1x32xf32>
    %442 = vector.shape_cast %441 : vector<1x1x32xf32> to vector<1x32xf32>
    %443 = arith.mulf %440, %440 : vector<16x32xf32>
    %cst_139 = arith.constant dense<0.000000e+00> : vector<16xf32>
    %444 = vector.multi_reduction <add>, %443, %cst_139 [1] : vector<16x32xf32> to vector<16xf32>
    %445 = vector.shape_cast %444 : vector<16xf32> to vector<16x1xf32>
    %cst_140 = arith.constant 3.200000e+01 : f32
    %446 = vector.broadcast %cst_140 : f32 to vector<16x1xf32>
    %447 = arith.divf %445, %446 : vector<16x1xf32>
    %cst_141 = arith.constant 9.99999997E-7 : f32
    %448 = vector.broadcast %cst_141 : f32 to vector<16x1xf32>
    %449 = arith.addf %447, %448 : vector<16x1xf32>
    %450 = math.rsqrt %449 : vector<16x1xf32>
    %451 = vector.broadcast %450 : vector<16x1xf32> to vector<16x32xf32>
    %452 = arith.mulf %440, %451 : vector<16x32xf32>
    %453 = vector.broadcast %442 : vector<1x32xf32> to vector<16x32xf32>
    %454 = arith.mulf %452, %453 : vector<16x32xf32>
    %c1_142 = arith.constant 1 : index
    %c0_143 = arith.constant 0 : index
    %c0_144 = arith.constant 0 : index
    %455 = vector.load %arg10[%c1_142, %c0_143, %c0_144] : memref<2x32x64xbf16, #tpu.memory_space<vmem>>, vector<1x32x64xbf16>
    %456 = vector.shape_cast %455 : vector<1x32x64xbf16> to vector<32x64xbf16>
    %457 = arith.truncf %454 : vector<16x32xf32> to vector<16x32xbf16>
    %cst_145 = arith.constant dense<0.000000e+00> : vector<16x64xf32>
    %458 = tpu.matmul %457, %456, %cst_145 {dimension_numbers = #tpu.dot_dimension_numbers<[1], [0], [0], [1], [0, 0, 1, 1], [], []>} : vector<16x32xbf16>, vector<32x64xbf16>, vector<16x64xf32> -> vector<16x64xf32>
    %cst_146 = arith.constant 0.000000e+00 : f32
    %459 = vector.broadcast %cst_146 : f32 to vector<16x64xf32>
    %460 = arith.maximumf %458, %459 : vector<16x64xf32>
    %c1_147 = arith.constant 1 : index
    %c0_148 = arith.constant 0 : index
    %c0_149 = arith.constant 0 : index
    %461 = vector.load %arg11[%c1_147, %c0_148, %c0_149] : memref<2x64x32xbf16, #tpu.memory_space<vmem>>, vector<1x64x32xbf16>
    %462 = vector.shape_cast %461 : vector<1x64x32xbf16> to vector<64x32xbf16>
    %463 = arith.truncf %460 : vector<16x64xf32> to vector<16x64xbf16>
    %cst_150 = arith.constant dense<0.000000e+00> : vector<16x32xf32>
    %464 = tpu.matmul %463, %462, %cst_150 {dimension_numbers = #tpu.dot_dimension_numbers<[1], [0], [0], [1], [0, 0, 1, 1], [], []>} : vector<16x64xbf16>, vector<64x32xbf16>, vector<16x32xf32> -> vector<16x32xf32>
    %465 = arith.addf %440, %464 : vector<16x32xf32>
    %c0_151 = arith.constant 0 : index
    %c0_152 = arith.constant 0 : index
    %466 = vector.load %arg12[%c0_151, %c0_152] : memref<1x32xf32, #tpu.memory_space<vmem>>, vector<1x32xf32>
    %467 = arith.mulf %465, %465 : vector<16x32xf32>
    %cst_153 = arith.constant dense<0.000000e+00> : vector<16xf32>
    %468 = vector.multi_reduction <add>, %467, %cst_153 [1] : vector<16x32xf32> to vector<16xf32>
    %469 = vector.shape_cast %468 : vector<16xf32> to vector<16x1xf32>
    %cst_154 = arith.constant 3.200000e+01 : f32
    %470 = vector.broadcast %cst_154 : f32 to vector<16x1xf32>
    %471 = arith.divf %469, %470 : vector<16x1xf32>
    %cst_155 = arith.constant 9.99999997E-7 : f32
    %472 = vector.broadcast %cst_155 : f32 to vector<16x1xf32>
    %473 = arith.addf %471, %472 : vector<16x1xf32>
    %474 = math.rsqrt %473 : vector<16x1xf32>
    %475 = vector.broadcast %474 : vector<16x1xf32> to vector<16x32xf32>
    %476 = arith.mulf %465, %475 : vector<16x32xf32>
    %477 = vector.broadcast %466 : vector<1x32xf32> to vector<16x32xf32>
    %478 = arith.mulf %476, %477 : vector<16x32xf32>
    %479 = arith.truncf %478 : vector<16x32xf32> to vector<16x32xbf16>
    %c0_156 = arith.constant 0 : index
    %c0_157 = arith.constant 0 : index
    %480 = vector.load %arg1[%c0_156, %c0_157] : memref<16x32xbf16, #tpu.memory_space<vmem>>, vector<16x32xbf16>
    %481 = arith.extf %480 : vector<16x32xbf16> to vector<16x32xf32>
    %c0_158 = arith.constant 0 : index
    %c0_159 = arith.constant 0 : index
    %c0_160 = arith.constant 0 : index
    %482 = vector.load %arg3[%c0_158, %c0_159, %c0_160] : memref<4x8x8xf32, #tpu.memory_space<vmem>>, vector<4x8x8xf32>
    %c0_161 = arith.constant 0 : index
    %c0_162 = arith.constant 0 : index
    %c0_163 = arith.constant 0 : index
    %483 = vector.load %arg13[%c0_161, %c0_162, %c0_163] : memref<2x1x32xf32, #tpu.memory_space<vmem>>, vector<1x1x32xf32>
    %484 = vector.shape_cast %483 : vector<1x1x32xf32> to vector<1x32xf32>
    %485 = arith.mulf %481, %481 : vector<16x32xf32>
    %cst_164 = arith.constant dense<0.000000e+00> : vector<16xf32>
    %486 = vector.multi_reduction <add>, %485, %cst_164 [1] : vector<16x32xf32> to vector<16xf32>
    %487 = vector.shape_cast %486 : vector<16xf32> to vector<16x1xf32>
    %cst_165 = arith.constant 3.200000e+01 : f32
    %488 = vector.broadcast %cst_165 : f32 to vector<16x1xf32>
    %489 = arith.divf %487, %488 : vector<16x1xf32>
    %cst_166 = arith.constant 9.99999997E-7 : f32
    %490 = vector.broadcast %cst_166 : f32 to vector<16x1xf32>
    %491 = arith.addf %489, %490 : vector<16x1xf32>
    %492 = math.rsqrt %491 : vector<16x1xf32>
    %493 = vector.broadcast %492 : vector<16x1xf32> to vector<16x32xf32>
    %494 = arith.mulf %481, %493 : vector<16x32xf32>
    %495 = vector.broadcast %484 : vector<1x32xf32> to vector<16x32xf32>
    %496 = arith.mulf %494, %495 : vector<16x32xf32>
    %c0_167 = arith.constant 0 : index
    %c0_168 = arith.constant 0 : index
    %c0_169 = arith.constant 0 : index
    %497 = vector.load %arg14[%c0_167, %c0_168, %c0_169] : memref<2x32x96xbf16, #tpu.memory_space<vmem>>, vector<1x32x96xbf16>
    %498 = vector.shape_cast %497 : vector<1x32x96xbf16> to vector<32x96xbf16>
    %499 = arith.truncf %496 : vector<16x32xf32> to vector<16x32xbf16>
    %cst_170 = arith.constant dense<0.000000e+00> : vector<16x96xf32>
    %500 = tpu.matmul %499, %498, %cst_170 {dimension_numbers = #tpu.dot_dimension_numbers<[1], [0], [0], [1], [0, 0, 1, 1], [], []>} : vector<16x32xbf16>, vector<32x96xbf16>, vector<16x96xf32> -> vector<16x96xf32>
    %501 = arith.truncf %500 : vector<16x96xf32> to vector<16x96xbf16>
    %c0_171 = arith.constant 0 : index
    %c0_172 = arith.constant 0 : index
    %c0_173 = arith.constant 0 : index
    %502 = vector.load %arg15[%c0_171, %c0_172, %c0_173] : memref<2x32x32xbf16, #tpu.memory_space<vmem>>, vector<1x32x32xbf16>
    %503 = vector.shape_cast %502 : vector<1x32x32xbf16> to vector<32x32xbf16>
    %504 = vector.extract_strided_slice %501 {offsets = [0, 0], sizes = [8, 32], strides = [1, 1]} : vector<16x96xbf16> to vector<8x32xbf16>
    %505 = vector.extract_strided_slice %501 {offsets = [0, 32], sizes = [8, 32], strides = [1, 1]} : vector<16x96xbf16> to vector<8x32xbf16>
    %506 = vector.extract_strided_slice %501 {offsets = [0, 64], sizes = [8, 32], strides = [1, 1]} : vector<16x96xbf16> to vector<8x32xbf16>
    %507 = vector.extract_strided_slice %504 {offsets = [0, 0], sizes = [8, 8], strides = [1, 1]} : vector<8x32xbf16> to vector<8x8xbf16>
    %508 = vector.extract_strided_slice %505 {offsets = [0, 0], sizes = [8, 8], strides = [1, 1]} : vector<8x32xbf16> to vector<8x8xbf16>
    %cst_174 = arith.constant dense<0.000000e+00> : vector<8x8xf32>
    %509 = tpu.matmul %507, %508, %cst_174 {dimension_numbers = #tpu.dot_dimension_numbers<[1], [1], [0], [0], [0, 0, 1, 0], [], []>} : vector<8x8xbf16>, vector<8x8xbf16>, vector<8x8xf32> -> vector<8x8xf32>
    %510 = vector.extract_strided_slice %482 {offsets = [0, 0, 0], sizes = [1, 8, 8], strides = [1, 1, 1]} : vector<4x8x8xf32> to vector<1x8x8xf32>
    %511 = vector.shape_cast %510 : vector<1x8x8xf32> to vector<8x8xf32>
    %512 = arith.addf %509, %511 : vector<8x8xf32>
    %cst_175 = arith.constant dense<0xFF800000> : vector<8xf32>
    %513 = vector.multi_reduction <maximumf>, %512, %cst_175 [1] : vector<8x8xf32> to vector<8xf32>
    %514 = vector.shape_cast %513 : vector<8xf32> to vector<8x1xf32>
    %515 = vector.broadcast %514 : vector<8x1xf32> to vector<8x8xf32>
    %516 = arith.subf %512, %515 : vector<8x8xf32>
    %517 = math.exp %516 : vector<8x8xf32>
    %cst_176 = arith.constant dense<0.000000e+00> : vector<8xf32>
    %518 = vector.multi_reduction <add>, %517, %cst_176 [1] : vector<8x8xf32> to vector<8xf32>
    %519 = vector.shape_cast %518 : vector<8xf32> to vector<8x1xf32>
    %520 = vector.broadcast %519 : vector<8x1xf32> to vector<8x8xf32>
    %521 = arith.divf %517, %520 : vector<8x8xf32>
    %522 = arith.truncf %521 : vector<8x8xf32> to vector<8x8xbf16>
    %523 = vector.extract_strided_slice %506 {offsets = [0, 0], sizes = [8, 8], strides = [1, 1]} : vector<8x32xbf16> to vector<8x8xbf16>
    %cst_177 = arith.constant dense<0.000000e+00> : vector<8x8xf32>
    %524 = tpu.matmul %522, %523, %cst_177 {dimension_numbers = #tpu.dot_dimension_numbers<[1], [0], [0], [1], [0, 0, 1, 1], [], []>} : vector<8x8xbf16>, vector<8x8xbf16>, vector<8x8xf32> -> vector<8x8xf32>
    %525 = arith.truncf %524 : vector<8x8xf32> to vector<8x8xbf16>
    %526 = vector.extract_strided_slice %503 {offsets = [0, 0], sizes = [8, 32], strides = [1, 1]} : vector<32x32xbf16> to vector<8x32xbf16>
    %cst_178 = arith.constant dense<0.000000e+00> : vector<8x32xf32>
    %527 = tpu.matmul %525, %526, %cst_178 {dimension_numbers = #tpu.dot_dimension_numbers<[1], [0], [0], [1], [0, 0, 1, 1], [], []>} : vector<8x8xbf16>, vector<8x32xbf16>, vector<8x32xf32> -> vector<8x32xf32>
    %528 = vector.extract_strided_slice %504 {offsets = [0, 8], sizes = [8, 8], strides = [1, 1]} : vector<8x32xbf16> to vector<8x8xbf16>
    %529 = vector.extract_strided_slice %505 {offsets = [0, 8], sizes = [8, 8], strides = [1, 1]} : vector<8x32xbf16> to vector<8x8xbf16>
    %cst_179 = arith.constant dense<0.000000e+00> : vector<8x8xf32>
    %530 = tpu.matmul %528, %529, %cst_179 {dimension_numbers = #tpu.dot_dimension_numbers<[1], [1], [0], [0], [0, 0, 1, 0], [], []>} : vector<8x8xbf16>, vector<8x8xbf16>, vector<8x8xf32> -> vector<8x8xf32>
    %531 = vector.extract_strided_slice %482 {offsets = [1, 0, 0], sizes = [1, 8, 8], strides = [1, 1, 1]} : vector<4x8x8xf32> to vector<1x8x8xf32>
    %532 = vector.shape_cast %531 : vector<1x8x8xf32> to vector<8x8xf32>
    %533 = arith.addf %530, %532 : vector<8x8xf32>
    %cst_180 = arith.constant dense<0xFF800000> : vector<8xf32>
    %534 = vector.multi_reduction <maximumf>, %533, %cst_180 [1] : vector<8x8xf32> to vector<8xf32>
    %535 = vector.shape_cast %534 : vector<8xf32> to vector<8x1xf32>
    %536 = vector.broadcast %535 : vector<8x1xf32> to vector<8x8xf32>
    %537 = arith.subf %533, %536 : vector<8x8xf32>
    %538 = math.exp %537 : vector<8x8xf32>
    %cst_181 = arith.constant dense<0.000000e+00> : vector<8xf32>
    %539 = vector.multi_reduction <add>, %538, %cst_181 [1] : vector<8x8xf32> to vector<8xf32>
    %540 = vector.shape_cast %539 : vector<8xf32> to vector<8x1xf32>
    %541 = vector.broadcast %540 : vector<8x1xf32> to vector<8x8xf32>
    %542 = arith.divf %538, %541 : vector<8x8xf32>
    %543 = arith.truncf %542 : vector<8x8xf32> to vector<8x8xbf16>
    %544 = vector.extract_strided_slice %506 {offsets = [0, 8], sizes = [8, 8], strides = [1, 1]} : vector<8x32xbf16> to vector<8x8xbf16>
    %cst_182 = arith.constant dense<0.000000e+00> : vector<8x8xf32>
    %545 = tpu.matmul %543, %544, %cst_182 {dimension_numbers = #tpu.dot_dimension_numbers<[1], [0], [0], [1], [0, 0, 1, 1], [], []>} : vector<8x8xbf16>, vector<8x8xbf16>, vector<8x8xf32> -> vector<8x8xf32>
    %546 = arith.truncf %545 : vector<8x8xf32> to vector<8x8xbf16>
    %547 = vector.extract_strided_slice %503 {offsets = [8, 0], sizes = [8, 32], strides = [1, 1]} : vector<32x32xbf16> to vector<8x32xbf16>
    %cst_183 = arith.constant dense<0.000000e+00> : vector<8x32xf32>
    %548 = tpu.matmul %546, %547, %cst_183 {dimension_numbers = #tpu.dot_dimension_numbers<[1], [0], [0], [1], [0, 0, 1, 1], [], []>} : vector<8x8xbf16>, vector<8x32xbf16>, vector<8x32xf32> -> vector<8x32xf32>
    %549 = arith.addf %527, %548 : vector<8x32xf32>
    %550 = vector.extract_strided_slice %504 {offsets = [0, 16], sizes = [8, 8], strides = [1, 1]} : vector<8x32xbf16> to vector<8x8xbf16>
    %551 = vector.extract_strided_slice %505 {offsets = [0, 16], sizes = [8, 8], strides = [1, 1]} : vector<8x32xbf16> to vector<8x8xbf16>
    %cst_184 = arith.constant dense<0.000000e+00> : vector<8x8xf32>
    %552 = tpu.matmul %550, %551, %cst_184 {dimension_numbers = #tpu.dot_dimension_numbers<[1], [1], [0], [0], [0, 0, 1, 0], [], []>} : vector<8x8xbf16>, vector<8x8xbf16>, vector<8x8xf32> -> vector<8x8xf32>
    %553 = vector.extract_strided_slice %482 {offsets = [2, 0, 0], sizes = [1, 8, 8], strides = [1, 1, 1]} : vector<4x8x8xf32> to vector<1x8x8xf32>
    %554 = vector.shape_cast %553 : vector<1x8x8xf32> to vector<8x8xf32>
    %555 = arith.addf %552, %554 : vector<8x8xf32>
    %cst_185 = arith.constant dense<0xFF800000> : vector<8xf32>
    %556 = vector.multi_reduction <maximumf>, %555, %cst_185 [1] : vector<8x8xf32> to vector<8xf32>
    %557 = vector.shape_cast %556 : vector<8xf32> to vector<8x1xf32>
    %558 = vector.broadcast %557 : vector<8x1xf32> to vector<8x8xf32>
    %559 = arith.subf %555, %558 : vector<8x8xf32>
    %560 = math.exp %559 : vector<8x8xf32>
    %cst_186 = arith.constant dense<0.000000e+00> : vector<8xf32>
    %561 = vector.multi_reduction <add>, %560, %cst_186 [1] : vector<8x8xf32> to vector<8xf32>
    %562 = vector.shape_cast %561 : vector<8xf32> to vector<8x1xf32>
    %563 = vector.broadcast %562 : vector<8x1xf32> to vector<8x8xf32>
    %564 = arith.divf %560, %563 : vector<8x8xf32>
    %565 = arith.truncf %564 : vector<8x8xf32> to vector<8x8xbf16>
    %566 = vector.extract_strided_slice %506 {offsets = [0, 16], sizes = [8, 8], strides = [1, 1]} : vector<8x32xbf16> to vector<8x8xbf16>
    %cst_187 = arith.constant dense<0.000000e+00> : vector<8x8xf32>
    %567 = tpu.matmul %565, %566, %cst_187 {dimension_numbers = #tpu.dot_dimension_numbers<[1], [0], [0], [1], [0, 0, 1, 1], [], []>} : vector<8x8xbf16>, vector<8x8xbf16>, vector<8x8xf32> -> vector<8x8xf32>
    %568 = arith.truncf %567 : vector<8x8xf32> to vector<8x8xbf16>
    %569 = vector.extract_strided_slice %503 {offsets = [16, 0], sizes = [8, 32], strides = [1, 1]} : vector<32x32xbf16> to vector<8x32xbf16>
    %cst_188 = arith.constant dense<0.000000e+00> : vector<8x32xf32>
    %570 = tpu.matmul %568, %569, %cst_188 {dimension_numbers = #tpu.dot_dimension_numbers<[1], [0], [0], [1], [0, 0, 1, 1], [], []>} : vector<8x8xbf16>, vector<8x32xbf16>, vector<8x32xf32> -> vector<8x32xf32>
    %571 = arith.addf %549, %570 : vector<8x32xf32>
    %572 = vector.extract_strided_slice %504 {offsets = [0, 24], sizes = [8, 8], strides = [1, 1]} : vector<8x32xbf16> to vector<8x8xbf16>
    %573 = vector.extract_strided_slice %505 {offsets = [0, 24], sizes = [8, 8], strides = [1, 1]} : vector<8x32xbf16> to vector<8x8xbf16>
    %cst_189 = arith.constant dense<0.000000e+00> : vector<8x8xf32>
    %574 = tpu.matmul %572, %573, %cst_189 {dimension_numbers = #tpu.dot_dimension_numbers<[1], [1], [0], [0], [0, 0, 1, 0], [], []>} : vector<8x8xbf16>, vector<8x8xbf16>, vector<8x8xf32> -> vector<8x8xf32>
    %575 = vector.extract_strided_slice %482 {offsets = [3, 0, 0], sizes = [1, 8, 8], strides = [1, 1, 1]} : vector<4x8x8xf32> to vector<1x8x8xf32>
    %576 = vector.shape_cast %575 : vector<1x8x8xf32> to vector<8x8xf32>
    %577 = arith.addf %574, %576 : vector<8x8xf32>
    %cst_190 = arith.constant dense<0xFF800000> : vector<8xf32>
    %578 = vector.multi_reduction <maximumf>, %577, %cst_190 [1] : vector<8x8xf32> to vector<8xf32>
    %579 = vector.shape_cast %578 : vector<8xf32> to vector<8x1xf32>
    %580 = vector.broadcast %579 : vector<8x1xf32> to vector<8x8xf32>
    %581 = arith.subf %577, %580 : vector<8x8xf32>
    %582 = math.exp %581 : vector<8x8xf32>
    %cst_191 = arith.constant dense<0.000000e+00> : vector<8xf32>
    %583 = vector.multi_reduction <add>, %582, %cst_191 [1] : vector<8x8xf32> to vector<8xf32>
    %584 = vector.shape_cast %583 : vector<8xf32> to vector<8x1xf32>
    %585 = vector.broadcast %584 : vector<8x1xf32> to vector<8x8xf32>
    %586 = arith.divf %582, %585 : vector<8x8xf32>
    %587 = arith.truncf %586 : vector<8x8xf32> to vector<8x8xbf16>
    %588 = vector.extract_strided_slice %506 {offsets = [0, 24], sizes = [8, 8], strides = [1, 1]} : vector<8x32xbf16> to vector<8x8xbf16>
    %cst_192 = arith.constant dense<0.000000e+00> : vector<8x8xf32>
    %589 = tpu.matmul %587, %588, %cst_192 {dimension_numbers = #tpu.dot_dimension_numbers<[1], [0], [0], [1], [0, 0, 1, 1], [], []>} : vector<8x8xbf16>, vector<8x8xbf16>, vector<8x8xf32> -> vector<8x8xf32>
    %590 = arith.truncf %589 : vector<8x8xf32> to vector<8x8xbf16>
    %591 = vector.extract_strided_slice %503 {offsets = [24, 0], sizes = [8, 32], strides = [1, 1]} : vector<32x32xbf16> to vector<8x32xbf16>
    %cst_193 = arith.constant dense<0.000000e+00> : vector<8x32xf32>
    %592 = tpu.matmul %590, %591, %cst_193 {dimension_numbers = #tpu.dot_dimension_numbers<[1], [0], [0], [1], [0, 0, 1, 1], [], []>} : vector<8x8xbf16>, vector<8x32xbf16>, vector<8x32xf32> -> vector<8x32xf32>
    %593 = arith.addf %571, %592 : vector<8x32xf32>
    %594 = vector.extract_strided_slice %501 {offsets = [8, 0], sizes = [8, 32], strides = [1, 1]} : vector<16x96xbf16> to vector<8x32xbf16>
    %595 = vector.extract_strided_slice %501 {offsets = [8, 32], sizes = [8, 32], strides = [1, 1]} : vector<16x96xbf16> to vector<8x32xbf16>
    %596 = vector.extract_strided_slice %501 {offsets = [8, 64], sizes = [8, 32], strides = [1, 1]} : vector<16x96xbf16> to vector<8x32xbf16>
    %597 = vector.extract_strided_slice %594 {offsets = [0, 0], sizes = [8, 8], strides = [1, 1]} : vector<8x32xbf16> to vector<8x8xbf16>
    %598 = vector.extract_strided_slice %595 {offsets = [0, 0], sizes = [8, 8], strides = [1, 1]} : vector<8x32xbf16> to vector<8x8xbf16>
    %cst_194 = arith.constant dense<0.000000e+00> : vector<8x8xf32>
    %599 = tpu.matmul %597, %598, %cst_194 {dimension_numbers = #tpu.dot_dimension_numbers<[1], [1], [0], [0], [0, 0, 1, 0], [], []>} : vector<8x8xbf16>, vector<8x8xbf16>, vector<8x8xf32> -> vector<8x8xf32>
    %600 = vector.extract_strided_slice %482 {offsets = [0, 0, 0], sizes = [1, 8, 8], strides = [1, 1, 1]} : vector<4x8x8xf32> to vector<1x8x8xf32>
    %601 = vector.shape_cast %600 : vector<1x8x8xf32> to vector<8x8xf32>
    %602 = arith.addf %599, %601 : vector<8x8xf32>
    %cst_195 = arith.constant dense<0xFF800000> : vector<8xf32>
    %603 = vector.multi_reduction <maximumf>, %602, %cst_195 [1] : vector<8x8xf32> to vector<8xf32>
    %604 = vector.shape_cast %603 : vector<8xf32> to vector<8x1xf32>
    %605 = vector.broadcast %604 : vector<8x1xf32> to vector<8x8xf32>
    %606 = arith.subf %602, %605 : vector<8x8xf32>
    %607 = math.exp %606 : vector<8x8xf32>
    %cst_196 = arith.constant dense<0.000000e+00> : vector<8xf32>
    %608 = vector.multi_reduction <add>, %607, %cst_196 [1] : vector<8x8xf32> to vector<8xf32>
    %609 = vector.shape_cast %608 : vector<8xf32> to vector<8x1xf32>
    %610 = vector.broadcast %609 : vector<8x1xf32> to vector<8x8xf32>
    %611 = arith.divf %607, %610 : vector<8x8xf32>
    %612 = arith.truncf %611 : vector<8x8xf32> to vector<8x8xbf16>
    %613 = vector.extract_strided_slice %596 {offsets = [0, 0], sizes = [8, 8], strides = [1, 1]} : vector<8x32xbf16> to vector<8x8xbf16>
    %cst_197 = arith.constant dense<0.000000e+00> : vector<8x8xf32>
    %614 = tpu.matmul %612, %613, %cst_197 {dimension_numbers = #tpu.dot_dimension_numbers<[1], [0], [0], [1], [0, 0, 1, 1], [], []>} : vector<8x8xbf16>, vector<8x8xbf16>, vector<8x8xf32> -> vector<8x8xf32>
    %615 = arith.truncf %614 : vector<8x8xf32> to vector<8x8xbf16>
    %616 = vector.extract_strided_slice %503 {offsets = [0, 0], sizes = [8, 32], strides = [1, 1]} : vector<32x32xbf16> to vector<8x32xbf16>
    %cst_198 = arith.constant dense<0.000000e+00> : vector<8x32xf32>
    %617 = tpu.matmul %615, %616, %cst_198 {dimension_numbers = #tpu.dot_dimension_numbers<[1], [0], [0], [1], [0, 0, 1, 1], [], []>} : vector<8x8xbf16>, vector<8x32xbf16>, vector<8x32xf32> -> vector<8x32xf32>
    %618 = vector.extract_strided_slice %594 {offsets = [0, 8], sizes = [8, 8], strides = [1, 1]} : vector<8x32xbf16> to vector<8x8xbf16>
    %619 = vector.extract_strided_slice %595 {offsets = [0, 8], sizes = [8, 8], strides = [1, 1]} : vector<8x32xbf16> to vector<8x8xbf16>
    %cst_199 = arith.constant dense<0.000000e+00> : vector<8x8xf32>
    %620 = tpu.matmul %618, %619, %cst_199 {dimension_numbers = #tpu.dot_dimension_numbers<[1], [1], [0], [0], [0, 0, 1, 0], [], []>} : vector<8x8xbf16>, vector<8x8xbf16>, vector<8x8xf32> -> vector<8x8xf32>
    %621 = vector.extract_strided_slice %482 {offsets = [1, 0, 0], sizes = [1, 8, 8], strides = [1, 1, 1]} : vector<4x8x8xf32> to vector<1x8x8xf32>
    %622 = vector.shape_cast %621 : vector<1x8x8xf32> to vector<8x8xf32>
    %623 = arith.addf %620, %622 : vector<8x8xf32>
    %cst_200 = arith.constant dense<0xFF800000> : vector<8xf32>
    %624 = vector.multi_reduction <maximumf>, %623, %cst_200 [1] : vector<8x8xf32> to vector<8xf32>
    %625 = vector.shape_cast %624 : vector<8xf32> to vector<8x1xf32>
    %626 = vector.broadcast %625 : vector<8x1xf32> to vector<8x8xf32>
    %627 = arith.subf %623, %626 : vector<8x8xf32>
    %628 = math.exp %627 : vector<8x8xf32>
    %cst_201 = arith.constant dense<0.000000e+00> : vector<8xf32>
    %629 = vector.multi_reduction <add>, %628, %cst_201 [1] : vector<8x8xf32> to vector<8xf32>
    %630 = vector.shape_cast %629 : vector<8xf32> to vector<8x1xf32>
    %631 = vector.broadcast %630 : vector<8x1xf32> to vector<8x8xf32>
    %632 = arith.divf %628, %631 : vector<8x8xf32>
    %633 = arith.truncf %632 : vector<8x8xf32> to vector<8x8xbf16>
    %634 = vector.extract_strided_slice %596 {offsets = [0, 8], sizes = [8, 8], strides = [1, 1]} : vector<8x32xbf16> to vector<8x8xbf16>
    %cst_202 = arith.constant dense<0.000000e+00> : vector<8x8xf32>
    %635 = tpu.matmul %633, %634, %cst_202 {dimension_numbers = #tpu.dot_dimension_numbers<[1], [0], [0], [1], [0, 0, 1, 1], [], []>} : vector<8x8xbf16>, vector<8x8xbf16>, vector<8x8xf32> -> vector<8x8xf32>
    %636 = arith.truncf %635 : vector<8x8xf32> to vector<8x8xbf16>
    %637 = vector.extract_strided_slice %503 {offsets = [8, 0], sizes = [8, 32], strides = [1, 1]} : vector<32x32xbf16> to vector<8x32xbf16>
    %cst_203 = arith.constant dense<0.000000e+00> : vector<8x32xf32>
    %638 = tpu.matmul %636, %637, %cst_203 {dimension_numbers = #tpu.dot_dimension_numbers<[1], [0], [0], [1], [0, 0, 1, 1], [], []>} : vector<8x8xbf16>, vector<8x32xbf16>, vector<8x32xf32> -> vector<8x32xf32>
    %639 = arith.addf %617, %638 : vector<8x32xf32>
    %640 = vector.extract_strided_slice %594 {offsets = [0, 16], sizes = [8, 8], strides = [1, 1]} : vector<8x32xbf16> to vector<8x8xbf16>
    %641 = vector.extract_strided_slice %595 {offsets = [0, 16], sizes = [8, 8], strides = [1, 1]} : vector<8x32xbf16> to vector<8x8xbf16>
    %cst_204 = arith.constant dense<0.000000e+00> : vector<8x8xf32>
    %642 = tpu.matmul %640, %641, %cst_204 {dimension_numbers = #tpu.dot_dimension_numbers<[1], [1], [0], [0], [0, 0, 1, 0], [], []>} : vector<8x8xbf16>, vector<8x8xbf16>, vector<8x8xf32> -> vector<8x8xf32>
    %643 = vector.extract_strided_slice %482 {offsets = [2, 0, 0], sizes = [1, 8, 8], strides = [1, 1, 1]} : vector<4x8x8xf32> to vector<1x8x8xf32>
    %644 = vector.shape_cast %643 : vector<1x8x8xf32> to vector<8x8xf32>
    %645 = arith.addf %642, %644 : vector<8x8xf32>
    %cst_205 = arith.constant dense<0xFF800000> : vector<8xf32>
    %646 = vector.multi_reduction <maximumf>, %645, %cst_205 [1] : vector<8x8xf32> to vector<8xf32>
    %647 = vector.shape_cast %646 : vector<8xf32> to vector<8x1xf32>
    %648 = vector.broadcast %647 : vector<8x1xf32> to vector<8x8xf32>
    %649 = arith.subf %645, %648 : vector<8x8xf32>
    %650 = math.exp %649 : vector<8x8xf32>
    %cst_206 = arith.constant dense<0.000000e+00> : vector<8xf32>
    %651 = vector.multi_reduction <add>, %650, %cst_206 [1] : vector<8x8xf32> to vector<8xf32>
    %652 = vector.shape_cast %651 : vector<8xf32> to vector<8x1xf32>
    %653 = vector.broadcast %652 : vector<8x1xf32> to vector<8x8xf32>
    %654 = arith.divf %650, %653 : vector<8x8xf32>
    %655 = arith.truncf %654 : vector<8x8xf32> to vector<8x8xbf16>
    %656 = vector.extract_strided_slice %596 {offsets = [0, 16], sizes = [8, 8], strides = [1, 1]} : vector<8x32xbf16> to vector<8x8xbf16>
    %cst_207 = arith.constant dense<0.000000e+00> : vector<8x8xf32>
    %657 = tpu.matmul %655, %656, %cst_207 {dimension_numbers = #tpu.dot_dimension_numbers<[1], [0], [0], [1], [0, 0, 1, 1], [], []>} : vector<8x8xbf16>, vector<8x8xbf16>, vector<8x8xf32> -> vector<8x8xf32>
    %658 = arith.truncf %657 : vector<8x8xf32> to vector<8x8xbf16>
    %659 = vector.extract_strided_slice %503 {offsets = [16, 0], sizes = [8, 32], strides = [1, 1]} : vector<32x32xbf16> to vector<8x32xbf16>
    %cst_208 = arith.constant dense<0.000000e+00> : vector<8x32xf32>
    %660 = tpu.matmul %658, %659, %cst_208 {dimension_numbers = #tpu.dot_dimension_numbers<[1], [0], [0], [1], [0, 0, 1, 1], [], []>} : vector<8x8xbf16>, vector<8x32xbf16>, vector<8x32xf32> -> vector<8x32xf32>
    %661 = arith.addf %639, %660 : vector<8x32xf32>
    %662 = vector.extract_strided_slice %594 {offsets = [0, 24], sizes = [8, 8], strides = [1, 1]} : vector<8x32xbf16> to vector<8x8xbf16>
    %663 = vector.extract_strided_slice %595 {offsets = [0, 24], sizes = [8, 8], strides = [1, 1]} : vector<8x32xbf16> to vector<8x8xbf16>
    %cst_209 = arith.constant dense<0.000000e+00> : vector<8x8xf32>
    %664 = tpu.matmul %662, %663, %cst_209 {dimension_numbers = #tpu.dot_dimension_numbers<[1], [1], [0], [0], [0, 0, 1, 0], [], []>} : vector<8x8xbf16>, vector<8x8xbf16>, vector<8x8xf32> -> vector<8x8xf32>
    %665 = vector.extract_strided_slice %482 {offsets = [3, 0, 0], sizes = [1, 8, 8], strides = [1, 1, 1]} : vector<4x8x8xf32> to vector<1x8x8xf32>
    %666 = vector.shape_cast %665 : vector<1x8x8xf32> to vector<8x8xf32>
    %667 = arith.addf %664, %666 : vector<8x8xf32>
    %cst_210 = arith.constant dense<0xFF800000> : vector<8xf32>
    %668 = vector.multi_reduction <maximumf>, %667, %cst_210 [1] : vector<8x8xf32> to vector<8xf32>
    %669 = vector.shape_cast %668 : vector<8xf32> to vector<8x1xf32>
    %670 = vector.broadcast %669 : vector<8x1xf32> to vector<8x8xf32>
    %671 = arith.subf %667, %670 : vector<8x8xf32>
    %672 = math.exp %671 : vector<8x8xf32>
    %cst_211 = arith.constant dense<0.000000e+00> : vector<8xf32>
    %673 = vector.multi_reduction <add>, %672, %cst_211 [1] : vector<8x8xf32> to vector<8xf32>
    %674 = vector.shape_cast %673 : vector<8xf32> to vector<8x1xf32>
    %675 = vector.broadcast %674 : vector<8x1xf32> to vector<8x8xf32>
    %676 = arith.divf %672, %675 : vector<8x8xf32>
    %677 = arith.truncf %676 : vector<8x8xf32> to vector<8x8xbf16>
    %678 = vector.extract_strided_slice %596 {offsets = [0, 24], sizes = [8, 8], strides = [1, 1]} : vector<8x32xbf16> to vector<8x8xbf16>
    %cst_212 = arith.constant dense<0.000000e+00> : vector<8x8xf32>
    %679 = tpu.matmul %677, %678, %cst_212 {dimension_numbers = #tpu.dot_dimension_numbers<[1], [0], [0], [1], [0, 0, 1, 1], [], []>} : vector<8x8xbf16>, vector<8x8xbf16>, vector<8x8xf32> -> vector<8x8xf32>
    %680 = arith.truncf %679 : vector<8x8xf32> to vector<8x8xbf16>
    %681 = vector.extract_strided_slice %503 {offsets = [24, 0], sizes = [8, 32], strides = [1, 1]} : vector<32x32xbf16> to vector<8x32xbf16>
    %cst_213 = arith.constant dense<0.000000e+00> : vector<8x32xf32>
    %682 = tpu.matmul %680, %681, %cst_213 {dimension_numbers = #tpu.dot_dimension_numbers<[1], [0], [0], [1], [0, 0, 1, 1], [], []>} : vector<8x8xbf16>, vector<8x32xbf16>, vector<8x32xf32> -> vector<8x32xf32>
    %683 = arith.addf %661, %682 : vector<8x32xf32>
    %684 = tpu.concatenate %593, %683 in 0 : vector<8x32xf32>, vector<8x32xf32> -> vector<16x32xf32>
    %685 = arith.addf %481, %684 : vector<16x32xf32>
    %c0_214 = arith.constant 0 : index
    %c0_215 = arith.constant 0 : index
    %c0_216 = arith.constant 0 : index
    %686 = vector.load %arg16[%c0_214, %c0_215, %c0_216] : memref<2x1x32xf32, #tpu.memory_space<vmem>>, vector<1x1x32xf32>
    %687 = vector.shape_cast %686 : vector<1x1x32xf32> to vector<1x32xf32>
    %688 = arith.mulf %685, %685 : vector<16x32xf32>
    %cst_217 = arith.constant dense<0.000000e+00> : vector<16xf32>
    %689 = vector.multi_reduction <add>, %688, %cst_217 [1] : vector<16x32xf32> to vector<16xf32>
    %690 = vector.shape_cast %689 : vector<16xf32> to vector<16x1xf32>
    %cst_218 = arith.constant 3.200000e+01 : f32
    %691 = vector.broadcast %cst_218 : f32 to vector<16x1xf32>
    %692 = arith.divf %690, %691 : vector<16x1xf32>
    %cst_219 = arith.constant 9.99999997E-7 : f32
    %693 = vector.broadcast %cst_219 : f32 to vector<16x1xf32>
    %694 = arith.addf %692, %693 : vector<16x1xf32>
    %695 = math.rsqrt %694 : vector<16x1xf32>
    %696 = vector.broadcast %695 : vector<16x1xf32> to vector<16x32xf32>
    %697 = arith.mulf %685, %696 : vector<16x32xf32>
    %698 = vector.broadcast %687 : vector<1x32xf32> to vector<16x32xf32>
    %699 = arith.mulf %697, %698 : vector<16x32xf32>
    %c0_220 = arith.constant 0 : index
    %c0_221 = arith.constant 0 : index
    %c0_222 = arith.constant 0 : index
    %700 = vector.load %arg17[%c0_220, %c0_221, %c0_222] : memref<2x32x32xbf16, #tpu.memory_space<vmem>>, vector<1x32x32xbf16>
    %701 = vector.shape_cast %700 : vector<1x32x32xbf16> to vector<32x32xbf16>
    %702 = arith.truncf %699 : vector<16x32xf32> to vector<16x32xbf16>
    %cst_223 = arith.constant dense<0.000000e+00> : vector<16x32xf32>
    %703 = tpu.matmul %702, %701, %cst_223 {dimension_numbers = #tpu.dot_dimension_numbers<[1], [0], [0], [1], [0, 0, 1, 1], [], []>} : vector<16x32xbf16>, vector<32x32xbf16>, vector<16x32xf32> -> vector<16x32xf32>
    %704 = arith.truncf %703 : vector<16x32xf32> to vector<16x32xbf16>
    %c0_224 = arith.constant 0 : index
    %c0_225 = arith.constant 0 : index
    %c0_226 = arith.constant 0 : index
    %705 = vector.load %arg18[%c0_224, %c0_225, %c0_226] : memref<2x32x64xbf16, #tpu.memory_space<vmem>>, vector<1x32x64xbf16>
    %706 = vector.shape_cast %705 : vector<1x32x64xbf16> to vector<32x64xbf16>
    %cst_227 = arith.constant dense<0.000000e+00> : vector<16x64xf32>
    %707 = tpu.matmul %479, %706, %cst_227 {dimension_numbers = #tpu.dot_dimension_numbers<[1], [0], [0], [1], [0, 0, 1, 1], [], []>} : vector<16x32xbf16>, vector<32x64xbf16>, vector<16x64xf32> -> vector<16x64xf32>
    %708 = arith.truncf %707 : vector<16x64xf32> to vector<16x64xbf16>
    %c0_228 = arith.constant 0 : index
    %c0_229 = arith.constant 0 : index
    %c0_230 = arith.constant 0 : index
    %709 = vector.load %arg19[%c0_228, %c0_229, %c0_230] : memref<2x32x32xbf16, #tpu.memory_space<vmem>>, vector<1x32x32xbf16>
    %710 = vector.shape_cast %709 : vector<1x32x32xbf16> to vector<32x32xbf16>
    %c0_231 = arith.constant 0 : index
    %c0_232 = arith.constant 0 : index
    %c0_233 = arith.constant 0 : index
    %711 = vector.load %arg4[%c0_231, %c0_232, %c0_233] : memref<2x1x8xf32, #tpu.memory_space<vmem>>, vector<1x1x8xf32>
    %712 = vector.shape_cast %711 : vector<1x1x8xf32> to vector<1x8xf32>
    %713 = vector.extract_strided_slice %704 {offsets = [0, 0], sizes = [8, 32], strides = [1, 1]} : vector<16x32xbf16> to vector<8x32xbf16>
    %714 = vector.extract_strided_slice %708 {offsets = [0, 0], sizes = [8, 32], strides = [1, 1]} : vector<16x64xbf16> to vector<8x32xbf16>
    %715 = vector.extract_strided_slice %708 {offsets = [0, 32], sizes = [8, 32], strides = [1, 1]} : vector<16x64xbf16> to vector<8x32xbf16>
    %716 = vector.extract_strided_slice %713 {offsets = [0, 0], sizes = [8, 8], strides = [1, 1]} : vector<8x32xbf16> to vector<8x8xbf16>
    %717 = vector.extract_strided_slice %714 {offsets = [0, 0], sizes = [8, 8], strides = [1, 1]} : vector<8x32xbf16> to vector<8x8xbf16>
    %cst_234 = arith.constant dense<0.000000e+00> : vector<8x8xf32>
    %718 = tpu.matmul %716, %717, %cst_234 {dimension_numbers = #tpu.dot_dimension_numbers<[1], [1], [0], [0], [0, 0, 1, 0], [], []>} : vector<8x8xbf16>, vector<8x8xbf16>, vector<8x8xf32> -> vector<8x8xf32>
    %719 = vector.broadcast %712 : vector<1x8xf32> to vector<8x8xf32>
    %720 = arith.addf %718, %719 : vector<8x8xf32>
    %cst_235 = arith.constant dense<0xFF800000> : vector<8xf32>
    %721 = vector.multi_reduction <maximumf>, %720, %cst_235 [1] : vector<8x8xf32> to vector<8xf32>
    %722 = vector.shape_cast %721 : vector<8xf32> to vector<8x1xf32>
    %723 = vector.broadcast %722 : vector<8x1xf32> to vector<8x8xf32>
    %724 = arith.subf %720, %723 : vector<8x8xf32>
    %725 = math.exp %724 : vector<8x8xf32>
    %cst_236 = arith.constant dense<0.000000e+00> : vector<8xf32>
    %726 = vector.multi_reduction <add>, %725, %cst_236 [1] : vector<8x8xf32> to vector<8xf32>
    %727 = vector.shape_cast %726 : vector<8xf32> to vector<8x1xf32>
    %728 = vector.broadcast %727 : vector<8x1xf32> to vector<8x8xf32>
    %729 = arith.divf %725, %728 : vector<8x8xf32>
    %730 = arith.truncf %729 : vector<8x8xf32> to vector<8x8xbf16>
    %731 = vector.extract_strided_slice %715 {offsets = [0, 0], sizes = [8, 8], strides = [1, 1]} : vector<8x32xbf16> to vector<8x8xbf16>
    %cst_237 = arith.constant dense<0.000000e+00> : vector<8x8xf32>
    %732 = tpu.matmul %730, %731, %cst_237 {dimension_numbers = #tpu.dot_dimension_numbers<[1], [0], [0], [1], [0, 0, 1, 1], [], []>} : vector<8x8xbf16>, vector<8x8xbf16>, vector<8x8xf32> -> vector<8x8xf32>
    %733 = arith.truncf %732 : vector<8x8xf32> to vector<8x8xbf16>
    %734 = vector.extract_strided_slice %710 {offsets = [0, 0], sizes = [8, 32], strides = [1, 1]} : vector<32x32xbf16> to vector<8x32xbf16>
    %cst_238 = arith.constant dense<0.000000e+00> : vector<8x32xf32>
    %735 = tpu.matmul %733, %734, %cst_238 {dimension_numbers = #tpu.dot_dimension_numbers<[1], [0], [0], [1], [0, 0, 1, 1], [], []>} : vector<8x8xbf16>, vector<8x32xbf16>, vector<8x32xf32> -> vector<8x32xf32>
    %736 = vector.extract_strided_slice %713 {offsets = [0, 8], sizes = [8, 8], strides = [1, 1]} : vector<8x32xbf16> to vector<8x8xbf16>
    %737 = vector.extract_strided_slice %714 {offsets = [0, 8], sizes = [8, 8], strides = [1, 1]} : vector<8x32xbf16> to vector<8x8xbf16>
    %cst_239 = arith.constant dense<0.000000e+00> : vector<8x8xf32>
    %738 = tpu.matmul %736, %737, %cst_239 {dimension_numbers = #tpu.dot_dimension_numbers<[1], [1], [0], [0], [0, 0, 1, 0], [], []>} : vector<8x8xbf16>, vector<8x8xbf16>, vector<8x8xf32> -> vector<8x8xf32>
    %739 = vector.broadcast %712 : vector<1x8xf32> to vector<8x8xf32>
    %740 = arith.addf %738, %739 : vector<8x8xf32>
    %cst_240 = arith.constant dense<0xFF800000> : vector<8xf32>
    %741 = vector.multi_reduction <maximumf>, %740, %cst_240 [1] : vector<8x8xf32> to vector<8xf32>
    %742 = vector.shape_cast %741 : vector<8xf32> to vector<8x1xf32>
    %743 = vector.broadcast %742 : vector<8x1xf32> to vector<8x8xf32>
    %744 = arith.subf %740, %743 : vector<8x8xf32>
    %745 = math.exp %744 : vector<8x8xf32>
    %cst_241 = arith.constant dense<0.000000e+00> : vector<8xf32>
    %746 = vector.multi_reduction <add>, %745, %cst_241 [1] : vector<8x8xf32> to vector<8xf32>
    %747 = vector.shape_cast %746 : vector<8xf32> to vector<8x1xf32>
    %748 = vector.broadcast %747 : vector<8x1xf32> to vector<8x8xf32>
    %749 = arith.divf %745, %748 : vector<8x8xf32>
    %750 = arith.truncf %749 : vector<8x8xf32> to vector<8x8xbf16>
    %751 = vector.extract_strided_slice %715 {offsets = [0, 8], sizes = [8, 8], strides = [1, 1]} : vector<8x32xbf16> to vector<8x8xbf16>
    %cst_242 = arith.constant dense<0.000000e+00> : vector<8x8xf32>
    %752 = tpu.matmul %750, %751, %cst_242 {dimension_numbers = #tpu.dot_dimension_numbers<[1], [0], [0], [1], [0, 0, 1, 1], [], []>} : vector<8x8xbf16>, vector<8x8xbf16>, vector<8x8xf32> -> vector<8x8xf32>
    %753 = arith.truncf %752 : vector<8x8xf32> to vector<8x8xbf16>
    %754 = vector.extract_strided_slice %710 {offsets = [8, 0], sizes = [8, 32], strides = [1, 1]} : vector<32x32xbf16> to vector<8x32xbf16>
    %cst_243 = arith.constant dense<0.000000e+00> : vector<8x32xf32>
    %755 = tpu.matmul %753, %754, %cst_243 {dimension_numbers = #tpu.dot_dimension_numbers<[1], [0], [0], [1], [0, 0, 1, 1], [], []>} : vector<8x8xbf16>, vector<8x32xbf16>, vector<8x32xf32> -> vector<8x32xf32>
    %756 = arith.addf %735, %755 : vector<8x32xf32>
    %757 = vector.extract_strided_slice %713 {offsets = [0, 16], sizes = [8, 8], strides = [1, 1]} : vector<8x32xbf16> to vector<8x8xbf16>
    %758 = vector.extract_strided_slice %714 {offsets = [0, 16], sizes = [8, 8], strides = [1, 1]} : vector<8x32xbf16> to vector<8x8xbf16>
    %cst_244 = arith.constant dense<0.000000e+00> : vector<8x8xf32>
    %759 = tpu.matmul %757, %758, %cst_244 {dimension_numbers = #tpu.dot_dimension_numbers<[1], [1], [0], [0], [0, 0, 1, 0], [], []>} : vector<8x8xbf16>, vector<8x8xbf16>, vector<8x8xf32> -> vector<8x8xf32>
    %760 = vector.broadcast %712 : vector<1x8xf32> to vector<8x8xf32>
    %761 = arith.addf %759, %760 : vector<8x8xf32>
    %cst_245 = arith.constant dense<0xFF800000> : vector<8xf32>
    %762 = vector.multi_reduction <maximumf>, %761, %cst_245 [1] : vector<8x8xf32> to vector<8xf32>
    %763 = vector.shape_cast %762 : vector<8xf32> to vector<8x1xf32>
    %764 = vector.broadcast %763 : vector<8x1xf32> to vector<8x8xf32>
    %765 = arith.subf %761, %764 : vector<8x8xf32>
    %766 = math.exp %765 : vector<8x8xf32>
    %cst_246 = arith.constant dense<0.000000e+00> : vector<8xf32>
    %767 = vector.multi_reduction <add>, %766, %cst_246 [1] : vector<8x8xf32> to vector<8xf32>
    %768 = vector.shape_cast %767 : vector<8xf32> to vector<8x1xf32>
    %769 = vector.broadcast %768 : vector<8x1xf32> to vector<8x8xf32>
    %770 = arith.divf %766, %769 : vector<8x8xf32>
    %771 = arith.truncf %770 : vector<8x8xf32> to vector<8x8xbf16>
    %772 = vector.extract_strided_slice %715 {offsets = [0, 16], sizes = [8, 8], strides = [1, 1]} : vector<8x32xbf16> to vector<8x8xbf16>
    %cst_247 = arith.constant dense<0.000000e+00> : vector<8x8xf32>
    %773 = tpu.matmul %771, %772, %cst_247 {dimension_numbers = #tpu.dot_dimension_numbers<[1], [0], [0], [1], [0, 0, 1, 1], [], []>} : vector<8x8xbf16>, vector<8x8xbf16>, vector<8x8xf32> -> vector<8x8xf32>
    %774 = arith.truncf %773 : vector<8x8xf32> to vector<8x8xbf16>
    %775 = vector.extract_strided_slice %710 {offsets = [16, 0], sizes = [8, 32], strides = [1, 1]} : vector<32x32xbf16> to vector<8x32xbf16>
    %cst_248 = arith.constant dense<0.000000e+00> : vector<8x32xf32>
    %776 = tpu.matmul %774, %775, %cst_248 {dimension_numbers = #tpu.dot_dimension_numbers<[1], [0], [0], [1], [0, 0, 1, 1], [], []>} : vector<8x8xbf16>, vector<8x32xbf16>, vector<8x32xf32> -> vector<8x32xf32>
    %777 = arith.addf %756, %776 : vector<8x32xf32>
    %778 = vector.extract_strided_slice %713 {offsets = [0, 24], sizes = [8, 8], strides = [1, 1]} : vector<8x32xbf16> to vector<8x8xbf16>
    %779 = vector.extract_strided_slice %714 {offsets = [0, 24], sizes = [8, 8], strides = [1, 1]} : vector<8x32xbf16> to vector<8x8xbf16>
    %cst_249 = arith.constant dense<0.000000e+00> : vector<8x8xf32>
    %780 = tpu.matmul %778, %779, %cst_249 {dimension_numbers = #tpu.dot_dimension_numbers<[1], [1], [0], [0], [0, 0, 1, 0], [], []>} : vector<8x8xbf16>, vector<8x8xbf16>, vector<8x8xf32> -> vector<8x8xf32>
    %781 = vector.broadcast %712 : vector<1x8xf32> to vector<8x8xf32>
    %782 = arith.addf %780, %781 : vector<8x8xf32>
    %cst_250 = arith.constant dense<0xFF800000> : vector<8xf32>
    %783 = vector.multi_reduction <maximumf>, %782, %cst_250 [1] : vector<8x8xf32> to vector<8xf32>
    %784 = vector.shape_cast %783 : vector<8xf32> to vector<8x1xf32>
    %785 = vector.broadcast %784 : vector<8x1xf32> to vector<8x8xf32>
    %786 = arith.subf %782, %785 : vector<8x8xf32>
    %787 = math.exp %786 : vector<8x8xf32>
    %cst_251 = arith.constant dense<0.000000e+00> : vector<8xf32>
    %788 = vector.multi_reduction <add>, %787, %cst_251 [1] : vector<8x8xf32> to vector<8xf32>
    %789 = vector.shape_cast %788 : vector<8xf32> to vector<8x1xf32>
    %790 = vector.broadcast %789 : vector<8x1xf32> to vector<8x8xf32>
    %791 = arith.divf %787, %790 : vector<8x8xf32>
    %792 = arith.truncf %791 : vector<8x8xf32> to vector<8x8xbf16>
    %793 = vector.extract_strided_slice %715 {offsets = [0, 24], sizes = [8, 8], strides = [1, 1]} : vector<8x32xbf16> to vector<8x8xbf16>
    %cst_252 = arith.constant dense<0.000000e+00> : vector<8x8xf32>
    %794 = tpu.matmul %792, %793, %cst_252 {dimension_numbers = #tpu.dot_dimension_numbers<[1], [0], [0], [1], [0, 0, 1, 1], [], []>} : vector<8x8xbf16>, vector<8x8xbf16>, vector<8x8xf32> -> vector<8x8xf32>
    %795 = arith.truncf %794 : vector<8x8xf32> to vector<8x8xbf16>
    %796 = vector.extract_strided_slice %710 {offsets = [24, 0], sizes = [8, 32], strides = [1, 1]} : vector<32x32xbf16> to vector<8x32xbf16>
    %cst_253 = arith.constant dense<0.000000e+00> : vector<8x32xf32>
    %797 = tpu.matmul %795, %796, %cst_253 {dimension_numbers = #tpu.dot_dimension_numbers<[1], [0], [0], [1], [0, 0, 1, 1], [], []>} : vector<8x8xbf16>, vector<8x32xbf16>, vector<8x32xf32> -> vector<8x32xf32>
    %798 = arith.addf %777, %797 : vector<8x32xf32>
    %c1_254 = arith.constant 1 : index
    %c0_255 = arith.constant 0 : index
    %c0_256 = arith.constant 0 : index
    %799 = vector.load %arg4[%c1_254, %c0_255, %c0_256] : memref<2x1x8xf32, #tpu.memory_space<vmem>>, vector<1x1x8xf32>
    %800 = vector.shape_cast %799 : vector<1x1x8xf32> to vector<1x8xf32>
    %801 = vector.extract_strided_slice %704 {offsets = [8, 0], sizes = [8, 32], strides = [1, 1]} : vector<16x32xbf16> to vector<8x32xbf16>
    %802 = vector.extract_strided_slice %708 {offsets = [8, 0], sizes = [8, 32], strides = [1, 1]} : vector<16x64xbf16> to vector<8x32xbf16>
    %803 = vector.extract_strided_slice %708 {offsets = [8, 32], sizes = [8, 32], strides = [1, 1]} : vector<16x64xbf16> to vector<8x32xbf16>
    %804 = vector.extract_strided_slice %801 {offsets = [0, 0], sizes = [8, 8], strides = [1, 1]} : vector<8x32xbf16> to vector<8x8xbf16>
    %805 = vector.extract_strided_slice %802 {offsets = [0, 0], sizes = [8, 8], strides = [1, 1]} : vector<8x32xbf16> to vector<8x8xbf16>
    %cst_257 = arith.constant dense<0.000000e+00> : vector<8x8xf32>
    %806 = tpu.matmul %804, %805, %cst_257 {dimension_numbers = #tpu.dot_dimension_numbers<[1], [1], [0], [0], [0, 0, 1, 0], [], []>} : vector<8x8xbf16>, vector<8x8xbf16>, vector<8x8xf32> -> vector<8x8xf32>
    %807 = vector.broadcast %800 : vector<1x8xf32> to vector<8x8xf32>
    %808 = arith.addf %806, %807 : vector<8x8xf32>
    %cst_258 = arith.constant dense<0xFF800000> : vector<8xf32>
    %809 = vector.multi_reduction <maximumf>, %808, %cst_258 [1] : vector<8x8xf32> to vector<8xf32>
    %810 = vector.shape_cast %809 : vector<8xf32> to vector<8x1xf32>
    %811 = vector.broadcast %810 : vector<8x1xf32> to vector<8x8xf32>
    %812 = arith.subf %808, %811 : vector<8x8xf32>
    %813 = math.exp %812 : vector<8x8xf32>
    %cst_259 = arith.constant dense<0.000000e+00> : vector<8xf32>
    %814 = vector.multi_reduction <add>, %813, %cst_259 [1] : vector<8x8xf32> to vector<8xf32>
    %815 = vector.shape_cast %814 : vector<8xf32> to vector<8x1xf32>
    %816 = vector.broadcast %815 : vector<8x1xf32> to vector<8x8xf32>
    %817 = arith.divf %813, %816 : vector<8x8xf32>
    %818 = arith.truncf %817 : vector<8x8xf32> to vector<8x8xbf16>
    %819 = vector.extract_strided_slice %803 {offsets = [0, 0], sizes = [8, 8], strides = [1, 1]} : vector<8x32xbf16> to vector<8x8xbf16>
    %cst_260 = arith.constant dense<0.000000e+00> : vector<8x8xf32>
    %820 = tpu.matmul %818, %819, %cst_260 {dimension_numbers = #tpu.dot_dimension_numbers<[1], [0], [0], [1], [0, 0, 1, 1], [], []>} : vector<8x8xbf16>, vector<8x8xbf16>, vector<8x8xf32> -> vector<8x8xf32>
    %821 = arith.truncf %820 : vector<8x8xf32> to vector<8x8xbf16>
    %822 = vector.extract_strided_slice %710 {offsets = [0, 0], sizes = [8, 32], strides = [1, 1]} : vector<32x32xbf16> to vector<8x32xbf16>
    %cst_261 = arith.constant dense<0.000000e+00> : vector<8x32xf32>
    %823 = tpu.matmul %821, %822, %cst_261 {dimension_numbers = #tpu.dot_dimension_numbers<[1], [0], [0], [1], [0, 0, 1, 1], [], []>} : vector<8x8xbf16>, vector<8x32xbf16>, vector<8x32xf32> -> vector<8x32xf32>
    %824 = vector.extract_strided_slice %801 {offsets = [0, 8], sizes = [8, 8], strides = [1, 1]} : vector<8x32xbf16> to vector<8x8xbf16>
    %825 = vector.extract_strided_slice %802 {offsets = [0, 8], sizes = [8, 8], strides = [1, 1]} : vector<8x32xbf16> to vector<8x8xbf16>
    %cst_262 = arith.constant dense<0.000000e+00> : vector<8x8xf32>
    %826 = tpu.matmul %824, %825, %cst_262 {dimension_numbers = #tpu.dot_dimension_numbers<[1], [1], [0], [0], [0, 0, 1, 0], [], []>} : vector<8x8xbf16>, vector<8x8xbf16>, vector<8x8xf32> -> vector<8x8xf32>
    %827 = vector.broadcast %800 : vector<1x8xf32> to vector<8x8xf32>
    %828 = arith.addf %826, %827 : vector<8x8xf32>
    %cst_263 = arith.constant dense<0xFF800000> : vector<8xf32>
    %829 = vector.multi_reduction <maximumf>, %828, %cst_263 [1] : vector<8x8xf32> to vector<8xf32>
    %830 = vector.shape_cast %829 : vector<8xf32> to vector<8x1xf32>
    %831 = vector.broadcast %830 : vector<8x1xf32> to vector<8x8xf32>
    %832 = arith.subf %828, %831 : vector<8x8xf32>
    %833 = math.exp %832 : vector<8x8xf32>
    %cst_264 = arith.constant dense<0.000000e+00> : vector<8xf32>
    %834 = vector.multi_reduction <add>, %833, %cst_264 [1] : vector<8x8xf32> to vector<8xf32>
    %835 = vector.shape_cast %834 : vector<8xf32> to vector<8x1xf32>
    %836 = vector.broadcast %835 : vector<8x1xf32> to vector<8x8xf32>
    %837 = arith.divf %833, %836 : vector<8x8xf32>
    %838 = arith.truncf %837 : vector<8x8xf32> to vector<8x8xbf16>
    %839 = vector.extract_strided_slice %803 {offsets = [0, 8], sizes = [8, 8], strides = [1, 1]} : vector<8x32xbf16> to vector<8x8xbf16>
    %cst_265 = arith.constant dense<0.000000e+00> : vector<8x8xf32>
    %840 = tpu.matmul %838, %839, %cst_265 {dimension_numbers = #tpu.dot_dimension_numbers<[1], [0], [0], [1], [0, 0, 1, 1], [], []>} : vector<8x8xbf16>, vector<8x8xbf16>, vector<8x8xf32> -> vector<8x8xf32>
    %841 = arith.truncf %840 : vector<8x8xf32> to vector<8x8xbf16>
    %842 = vector.extract_strided_slice %710 {offsets = [8, 0], sizes = [8, 32], strides = [1, 1]} : vector<32x32xbf16> to vector<8x32xbf16>
    %cst_266 = arith.constant dense<0.000000e+00> : vector<8x32xf32>
    %843 = tpu.matmul %841, %842, %cst_266 {dimension_numbers = #tpu.dot_dimension_numbers<[1], [0], [0], [1], [0, 0, 1, 1], [], []>} : vector<8x8xbf16>, vector<8x32xbf16>, vector<8x32xf32> -> vector<8x32xf32>
    %844 = arith.addf %823, %843 : vector<8x32xf32>
    %845 = vector.extract_strided_slice %801 {offsets = [0, 16], sizes = [8, 8], strides = [1, 1]} : vector<8x32xbf16> to vector<8x8xbf16>
    %846 = vector.extract_strided_slice %802 {offsets = [0, 16], sizes = [8, 8], strides = [1, 1]} : vector<8x32xbf16> to vector<8x8xbf16>
    %cst_267 = arith.constant dense<0.000000e+00> : vector<8x8xf32>
    %847 = tpu.matmul %845, %846, %cst_267 {dimension_numbers = #tpu.dot_dimension_numbers<[1], [1], [0], [0], [0, 0, 1, 0], [], []>} : vector<8x8xbf16>, vector<8x8xbf16>, vector<8x8xf32> -> vector<8x8xf32>
    %848 = vector.broadcast %800 : vector<1x8xf32> to vector<8x8xf32>
    %849 = arith.addf %847, %848 : vector<8x8xf32>
    %cst_268 = arith.constant dense<0xFF800000> : vector<8xf32>
    %850 = vector.multi_reduction <maximumf>, %849, %cst_268 [1] : vector<8x8xf32> to vector<8xf32>
    %851 = vector.shape_cast %850 : vector<8xf32> to vector<8x1xf32>
    %852 = vector.broadcast %851 : vector<8x1xf32> to vector<8x8xf32>
    %853 = arith.subf %849, %852 : vector<8x8xf32>
    %854 = math.exp %853 : vector<8x8xf32>
    %cst_269 = arith.constant dense<0.000000e+00> : vector<8xf32>
    %855 = vector.multi_reduction <add>, %854, %cst_269 [1] : vector<8x8xf32> to vector<8xf32>
    %856 = vector.shape_cast %855 : vector<8xf32> to vector<8x1xf32>
    %857 = vector.broadcast %856 : vector<8x1xf32> to vector<8x8xf32>
    %858 = arith.divf %854, %857 : vector<8x8xf32>
    %859 = arith.truncf %858 : vector<8x8xf32> to vector<8x8xbf16>
    %860 = vector.extract_strided_slice %803 {offsets = [0, 16], sizes = [8, 8], strides = [1, 1]} : vector<8x32xbf16> to vector<8x8xbf16>
    %cst_270 = arith.constant dense<0.000000e+00> : vector<8x8xf32>
    %861 = tpu.matmul %859, %860, %cst_270 {dimension_numbers = #tpu.dot_dimension_numbers<[1], [0], [0], [1], [0, 0, 1, 1], [], []>} : vector<8x8xbf16>, vector<8x8xbf16>, vector<8x8xf32> -> vector<8x8xf32>
    %862 = arith.truncf %861 : vector<8x8xf32> to vector<8x8xbf16>
    %863 = vector.extract_strided_slice %710 {offsets = [16, 0], sizes = [8, 32], strides = [1, 1]} : vector<32x32xbf16> to vector<8x32xbf16>
    %cst_271 = arith.constant dense<0.000000e+00> : vector<8x32xf32>
    %864 = tpu.matmul %862, %863, %cst_271 {dimension_numbers = #tpu.dot_dimension_numbers<[1], [0], [0], [1], [0, 0, 1, 1], [], []>} : vector<8x8xbf16>, vector<8x32xbf16>, vector<8x32xf32> -> vector<8x32xf32>
    %865 = arith.addf %844, %864 : vector<8x32xf32>
    %866 = vector.extract_strided_slice %801 {offsets = [0, 24], sizes = [8, 8], strides = [1, 1]} : vector<8x32xbf16> to vector<8x8xbf16>
    %867 = vector.extract_strided_slice %802 {offsets = [0, 24], sizes = [8, 8], strides = [1, 1]} : vector<8x32xbf16> to vector<8x8xbf16>
    %cst_272 = arith.constant dense<0.000000e+00> : vector<8x8xf32>
    %868 = tpu.matmul %866, %867, %cst_272 {dimension_numbers = #tpu.dot_dimension_numbers<[1], [1], [0], [0], [0, 0, 1, 0], [], []>} : vector<8x8xbf16>, vector<8x8xbf16>, vector<8x8xf32> -> vector<8x8xf32>
    %869 = vector.broadcast %800 : vector<1x8xf32> to vector<8x8xf32>
    %870 = arith.addf %868, %869 : vector<8x8xf32>
    %cst_273 = arith.constant dense<0xFF800000> : vector<8xf32>
    %871 = vector.multi_reduction <maximumf>, %870, %cst_273 [1] : vector<8x8xf32> to vector<8xf32>
    %872 = vector.shape_cast %871 : vector<8xf32> to vector<8x1xf32>
    %873 = vector.broadcast %872 : vector<8x1xf32> to vector<8x8xf32>
    %874 = arith.subf %870, %873 : vector<8x8xf32>
    %875 = math.exp %874 : vector<8x8xf32>
    %cst_274 = arith.constant dense<0.000000e+00> : vector<8xf32>
    %876 = vector.multi_reduction <add>, %875, %cst_274 [1] : vector<8x8xf32> to vector<8xf32>
    %877 = vector.shape_cast %876 : vector<8xf32> to vector<8x1xf32>
    %878 = vector.broadcast %877 : vector<8x1xf32> to vector<8x8xf32>
    %879 = arith.divf %875, %878 : vector<8x8xf32>
    %880 = arith.truncf %879 : vector<8x8xf32> to vector<8x8xbf16>
    %881 = vector.extract_strided_slice %803 {offsets = [0, 24], sizes = [8, 8], strides = [1, 1]} : vector<8x32xbf16> to vector<8x8xbf16>
    %cst_275 = arith.constant dense<0.000000e+00> : vector<8x8xf32>
    %882 = tpu.matmul %880, %881, %cst_275 {dimension_numbers = #tpu.dot_dimension_numbers<[1], [0], [0], [1], [0, 0, 1, 1], [], []>} : vector<8x8xbf16>, vector<8x8xbf16>, vector<8x8xf32> -> vector<8x8xf32>
    %883 = arith.truncf %882 : vector<8x8xf32> to vector<8x8xbf16>
    %884 = vector.extract_strided_slice %710 {offsets = [24, 0], sizes = [8, 32], strides = [1, 1]} : vector<32x32xbf16> to vector<8x32xbf16>
    %cst_276 = arith.constant dense<0.000000e+00> : vector<8x32xf32>
    %885 = tpu.matmul %883, %884, %cst_276 {dimension_numbers = #tpu.dot_dimension_numbers<[1], [0], [0], [1], [0, 0, 1, 1], [], []>} : vector<8x8xbf16>, vector<8x32xbf16>, vector<8x32xf32> -> vector<8x32xf32>
    %886 = arith.addf %865, %885 : vector<8x32xf32>
    %887 = tpu.concatenate %798, %886 in 0 : vector<8x32xf32>, vector<8x32xf32> -> vector<16x32xf32>
    %888 = arith.addf %685, %887 : vector<16x32xf32>
    %c0_277 = arith.constant 0 : index
    %c0_278 = arith.constant 0 : index
    %c0_279 = arith.constant 0 : index
    %889 = vector.load %arg20[%c0_277, %c0_278, %c0_279] : memref<2x1x32xf32, #tpu.memory_space<vmem>>, vector<1x1x32xf32>
    %890 = vector.shape_cast %889 : vector<1x1x32xf32> to vector<1x32xf32>
    %891 = arith.mulf %888, %888 : vector<16x32xf32>
    %cst_280 = arith.constant dense<0.000000e+00> : vector<16xf32>
    %892 = vector.multi_reduction <add>, %891, %cst_280 [1] : vector<16x32xf32> to vector<16xf32>
    %893 = vector.shape_cast %892 : vector<16xf32> to vector<16x1xf32>
    %cst_281 = arith.constant 3.200000e+01 : f32
    %894 = vector.broadcast %cst_281 : f32 to vector<16x1xf32>
    %895 = arith.divf %893, %894 : vector<16x1xf32>
    %cst_282 = arith.constant 9.99999997E-7 : f32
    %896 = vector.broadcast %cst_282 : f32 to vector<16x1xf32>
    %897 = arith.addf %895, %896 : vector<16x1xf32>
    %898 = math.rsqrt %897 : vector<16x1xf32>
    %899 = vector.broadcast %898 : vector<16x1xf32> to vector<16x32xf32>
    %900 = arith.mulf %888, %899 : vector<16x32xf32>
    %901 = vector.broadcast %890 : vector<1x32xf32> to vector<16x32xf32>
    %902 = arith.mulf %900, %901 : vector<16x32xf32>
    %c0_283 = arith.constant 0 : index
    %c0_284 = arith.constant 0 : index
    %c0_285 = arith.constant 0 : index
    %903 = vector.load %arg21[%c0_283, %c0_284, %c0_285] : memref<2x32x64xbf16, #tpu.memory_space<vmem>>, vector<1x32x64xbf16>
    %904 = vector.shape_cast %903 : vector<1x32x64xbf16> to vector<32x64xbf16>
    %905 = arith.truncf %902 : vector<16x32xf32> to vector<16x32xbf16>
    %cst_286 = arith.constant dense<0.000000e+00> : vector<16x64xf32>
    %906 = tpu.matmul %905, %904, %cst_286 {dimension_numbers = #tpu.dot_dimension_numbers<[1], [0], [0], [1], [0, 0, 1, 1], [], []>} : vector<16x32xbf16>, vector<32x64xbf16>, vector<16x64xf32> -> vector<16x64xf32>
    %cst_287 = arith.constant 0.000000e+00 : f32
    %907 = vector.broadcast %cst_287 : f32 to vector<16x64xf32>
    %908 = arith.maximumf %906, %907 : vector<16x64xf32>
    %c0_288 = arith.constant 0 : index
    %c0_289 = arith.constant 0 : index
    %c0_290 = arith.constant 0 : index
    %909 = vector.load %arg22[%c0_288, %c0_289, %c0_290] : memref<2x64x32xbf16, #tpu.memory_space<vmem>>, vector<1x64x32xbf16>
    %910 = vector.shape_cast %909 : vector<1x64x32xbf16> to vector<64x32xbf16>
    %911 = arith.truncf %908 : vector<16x64xf32> to vector<16x64xbf16>
    %cst_291 = arith.constant dense<0.000000e+00> : vector<16x32xf32>
    %912 = tpu.matmul %911, %910, %cst_291 {dimension_numbers = #tpu.dot_dimension_numbers<[1], [0], [0], [1], [0, 0, 1, 1], [], []>} : vector<16x64xbf16>, vector<64x32xbf16>, vector<16x32xf32> -> vector<16x32xf32>
    %913 = arith.addf %888, %912 : vector<16x32xf32>
    %c1_292 = arith.constant 1 : index
    %c0_293 = arith.constant 0 : index
    %c0_294 = arith.constant 0 : index
    %914 = vector.load %arg13[%c1_292, %c0_293, %c0_294] : memref<2x1x32xf32, #tpu.memory_space<vmem>>, vector<1x1x32xf32>
    %915 = vector.shape_cast %914 : vector<1x1x32xf32> to vector<1x32xf32>
    %916 = arith.mulf %913, %913 : vector<16x32xf32>
    %cst_295 = arith.constant dense<0.000000e+00> : vector<16xf32>
    %917 = vector.multi_reduction <add>, %916, %cst_295 [1] : vector<16x32xf32> to vector<16xf32>
    %918 = vector.shape_cast %917 : vector<16xf32> to vector<16x1xf32>
    %cst_296 = arith.constant 3.200000e+01 : f32
    %919 = vector.broadcast %cst_296 : f32 to vector<16x1xf32>
    %920 = arith.divf %918, %919 : vector<16x1xf32>
    %cst_297 = arith.constant 9.99999997E-7 : f32
    %921 = vector.broadcast %cst_297 : f32 to vector<16x1xf32>
    %922 = arith.addf %920, %921 : vector<16x1xf32>
    %923 = math.rsqrt %922 : vector<16x1xf32>
    %924 = vector.broadcast %923 : vector<16x1xf32> to vector<16x32xf32>
    %925 = arith.mulf %913, %924 : vector<16x32xf32>
    %926 = vector.broadcast %915 : vector<1x32xf32> to vector<16x32xf32>
    %927 = arith.mulf %925, %926 : vector<16x32xf32>
    %c1_298 = arith.constant 1 : index
    %c0_299 = arith.constant 0 : index
    %c0_300 = arith.constant 0 : index
    %928 = vector.load %arg14[%c1_298, %c0_299, %c0_300] : memref<2x32x96xbf16, #tpu.memory_space<vmem>>, vector<1x32x96xbf16>
    %929 = vector.shape_cast %928 : vector<1x32x96xbf16> to vector<32x96xbf16>
    %930 = arith.truncf %927 : vector<16x32xf32> to vector<16x32xbf16>
    %cst_301 = arith.constant dense<0.000000e+00> : vector<16x96xf32>
    %931 = tpu.matmul %930, %929, %cst_301 {dimension_numbers = #tpu.dot_dimension_numbers<[1], [0], [0], [1], [0, 0, 1, 1], [], []>} : vector<16x32xbf16>, vector<32x96xbf16>, vector<16x96xf32> -> vector<16x96xf32>
    %932 = arith.truncf %931 : vector<16x96xf32> to vector<16x96xbf16>
    %c1_302 = arith.constant 1 : index
    %c0_303 = arith.constant 0 : index
    %c0_304 = arith.constant 0 : index
    %933 = vector.load %arg15[%c1_302, %c0_303, %c0_304] : memref<2x32x32xbf16, #tpu.memory_space<vmem>>, vector<1x32x32xbf16>
    %934 = vector.shape_cast %933 : vector<1x32x32xbf16> to vector<32x32xbf16>
    %935 = vector.extract_strided_slice %932 {offsets = [0, 0], sizes = [8, 32], strides = [1, 1]} : vector<16x96xbf16> to vector<8x32xbf16>
    %936 = vector.extract_strided_slice %932 {offsets = [0, 32], sizes = [8, 32], strides = [1, 1]} : vector<16x96xbf16> to vector<8x32xbf16>
    %937 = vector.extract_strided_slice %932 {offsets = [0, 64], sizes = [8, 32], strides = [1, 1]} : vector<16x96xbf16> to vector<8x32xbf16>
    %938 = vector.extract_strided_slice %935 {offsets = [0, 0], sizes = [8, 8], strides = [1, 1]} : vector<8x32xbf16> to vector<8x8xbf16>
    %939 = vector.extract_strided_slice %936 {offsets = [0, 0], sizes = [8, 8], strides = [1, 1]} : vector<8x32xbf16> to vector<8x8xbf16>
    %cst_305 = arith.constant dense<0.000000e+00> : vector<8x8xf32>
    %940 = tpu.matmul %938, %939, %cst_305 {dimension_numbers = #tpu.dot_dimension_numbers<[1], [1], [0], [0], [0, 0, 1, 0], [], []>} : vector<8x8xbf16>, vector<8x8xbf16>, vector<8x8xf32> -> vector<8x8xf32>
    %941 = vector.extract_strided_slice %482 {offsets = [0, 0, 0], sizes = [1, 8, 8], strides = [1, 1, 1]} : vector<4x8x8xf32> to vector<1x8x8xf32>
    %942 = vector.shape_cast %941 : vector<1x8x8xf32> to vector<8x8xf32>
    %943 = arith.addf %940, %942 : vector<8x8xf32>
    %cst_306 = arith.constant dense<0xFF800000> : vector<8xf32>
    %944 = vector.multi_reduction <maximumf>, %943, %cst_306 [1] : vector<8x8xf32> to vector<8xf32>
    %945 = vector.shape_cast %944 : vector<8xf32> to vector<8x1xf32>
    %946 = vector.broadcast %945 : vector<8x1xf32> to vector<8x8xf32>
    %947 = arith.subf %943, %946 : vector<8x8xf32>
    %948 = math.exp %947 : vector<8x8xf32>
    %cst_307 = arith.constant dense<0.000000e+00> : vector<8xf32>
    %949 = vector.multi_reduction <add>, %948, %cst_307 [1] : vector<8x8xf32> to vector<8xf32>
    %950 = vector.shape_cast %949 : vector<8xf32> to vector<8x1xf32>
    %951 = vector.broadcast %950 : vector<8x1xf32> to vector<8x8xf32>
    %952 = arith.divf %948, %951 : vector<8x8xf32>
    %953 = arith.truncf %952 : vector<8x8xf32> to vector<8x8xbf16>
    %954 = vector.extract_strided_slice %937 {offsets = [0, 0], sizes = [8, 8], strides = [1, 1]} : vector<8x32xbf16> to vector<8x8xbf16>
    %cst_308 = arith.constant dense<0.000000e+00> : vector<8x8xf32>
    %955 = tpu.matmul %953, %954, %cst_308 {dimension_numbers = #tpu.dot_dimension_numbers<[1], [0], [0], [1], [0, 0, 1, 1], [], []>} : vector<8x8xbf16>, vector<8x8xbf16>, vector<8x8xf32> -> vector<8x8xf32>
    %956 = arith.truncf %955 : vector<8x8xf32> to vector<8x8xbf16>
    %957 = vector.extract_strided_slice %934 {offsets = [0, 0], sizes = [8, 32], strides = [1, 1]} : vector<32x32xbf16> to vector<8x32xbf16>
    %cst_309 = arith.constant dense<0.000000e+00> : vector<8x32xf32>
    %958 = tpu.matmul %956, %957, %cst_309 {dimension_numbers = #tpu.dot_dimension_numbers<[1], [0], [0], [1], [0, 0, 1, 1], [], []>} : vector<8x8xbf16>, vector<8x32xbf16>, vector<8x32xf32> -> vector<8x32xf32>
    %959 = vector.extract_strided_slice %935 {offsets = [0, 8], sizes = [8, 8], strides = [1, 1]} : vector<8x32xbf16> to vector<8x8xbf16>
    %960 = vector.extract_strided_slice %936 {offsets = [0, 8], sizes = [8, 8], strides = [1, 1]} : vector<8x32xbf16> to vector<8x8xbf16>
    %cst_310 = arith.constant dense<0.000000e+00> : vector<8x8xf32>
    %961 = tpu.matmul %959, %960, %cst_310 {dimension_numbers = #tpu.dot_dimension_numbers<[1], [1], [0], [0], [0, 0, 1, 0], [], []>} : vector<8x8xbf16>, vector<8x8xbf16>, vector<8x8xf32> -> vector<8x8xf32>
    %962 = vector.extract_strided_slice %482 {offsets = [1, 0, 0], sizes = [1, 8, 8], strides = [1, 1, 1]} : vector<4x8x8xf32> to vector<1x8x8xf32>
    %963 = vector.shape_cast %962 : vector<1x8x8xf32> to vector<8x8xf32>
    %964 = arith.addf %961, %963 : vector<8x8xf32>
    %cst_311 = arith.constant dense<0xFF800000> : vector<8xf32>
    %965 = vector.multi_reduction <maximumf>, %964, %cst_311 [1] : vector<8x8xf32> to vector<8xf32>
    %966 = vector.shape_cast %965 : vector<8xf32> to vector<8x1xf32>
    %967 = vector.broadcast %966 : vector<8x1xf32> to vector<8x8xf32>
    %968 = arith.subf %964, %967 : vector<8x8xf32>
    %969 = math.exp %968 : vector<8x8xf32>
    %cst_312 = arith.constant dense<0.000000e+00> : vector<8xf32>
    %970 = vector.multi_reduction <add>, %969, %cst_312 [1] : vector<8x8xf32> to vector<8xf32>
    %971 = vector.shape_cast %970 : vector<8xf32> to vector<8x1xf32>
    %972 = vector.broadcast %971 : vector<8x1xf32> to vector<8x8xf32>
    %973 = arith.divf %969, %972 : vector<8x8xf32>
    %974 = arith.truncf %973 : vector<8x8xf32> to vector<8x8xbf16>
    %975 = vector.extract_strided_slice %937 {offsets = [0, 8], sizes = [8, 8], strides = [1, 1]} : vector<8x32xbf16> to vector<8x8xbf16>
    %cst_313 = arith.constant dense<0.000000e+00> : vector<8x8xf32>
    %976 = tpu.matmul %974, %975, %cst_313 {dimension_numbers = #tpu.dot_dimension_numbers<[1], [0], [0], [1], [0, 0, 1, 1], [], []>} : vector<8x8xbf16>, vector<8x8xbf16>, vector<8x8xf32> -> vector<8x8xf32>
    %977 = arith.truncf %976 : vector<8x8xf32> to vector<8x8xbf16>
    %978 = vector.extract_strided_slice %934 {offsets = [8, 0], sizes = [8, 32], strides = [1, 1]} : vector<32x32xbf16> to vector<8x32xbf16>
    %cst_314 = arith.constant dense<0.000000e+00> : vector<8x32xf32>
    %979 = tpu.matmul %977, %978, %cst_314 {dimension_numbers = #tpu.dot_dimension_numbers<[1], [0], [0], [1], [0, 0, 1, 1], [], []>} : vector<8x8xbf16>, vector<8x32xbf16>, vector<8x32xf32> -> vector<8x32xf32>
    %980 = arith.addf %958, %979 : vector<8x32xf32>
    %981 = vector.extract_strided_slice %935 {offsets = [0, 16], sizes = [8, 8], strides = [1, 1]} : vector<8x32xbf16> to vector<8x8xbf16>
    %982 = vector.extract_strided_slice %936 {offsets = [0, 16], sizes = [8, 8], strides = [1, 1]} : vector<8x32xbf16> to vector<8x8xbf16>
    %cst_315 = arith.constant dense<0.000000e+00> : vector<8x8xf32>
    %983 = tpu.matmul %981, %982, %cst_315 {dimension_numbers = #tpu.dot_dimension_numbers<[1], [1], [0], [0], [0, 0, 1, 0], [], []>} : vector<8x8xbf16>, vector<8x8xbf16>, vector<8x8xf32> -> vector<8x8xf32>
    %984 = vector.extract_strided_slice %482 {offsets = [2, 0, 0], sizes = [1, 8, 8], strides = [1, 1, 1]} : vector<4x8x8xf32> to vector<1x8x8xf32>
    %985 = vector.shape_cast %984 : vector<1x8x8xf32> to vector<8x8xf32>
    %986 = arith.addf %983, %985 : vector<8x8xf32>
    %cst_316 = arith.constant dense<0xFF800000> : vector<8xf32>
    %987 = vector.multi_reduction <maximumf>, %986, %cst_316 [1] : vector<8x8xf32> to vector<8xf32>
    %988 = vector.shape_cast %987 : vector<8xf32> to vector<8x1xf32>
    %989 = vector.broadcast %988 : vector<8x1xf32> to vector<8x8xf32>
    %990 = arith.subf %986, %989 : vector<8x8xf32>
    %991 = math.exp %990 : vector<8x8xf32>
    %cst_317 = arith.constant dense<0.000000e+00> : vector<8xf32>
    %992 = vector.multi_reduction <add>, %991, %cst_317 [1] : vector<8x8xf32> to vector<8xf32>
    %993 = vector.shape_cast %992 : vector<8xf32> to vector<8x1xf32>
    %994 = vector.broadcast %993 : vector<8x1xf32> to vector<8x8xf32>
    %995 = arith.divf %991, %994 : vector<8x8xf32>
    %996 = arith.truncf %995 : vector<8x8xf32> to vector<8x8xbf16>
    %997 = vector.extract_strided_slice %937 {offsets = [0, 16], sizes = [8, 8], strides = [1, 1]} : vector<8x32xbf16> to vector<8x8xbf16>
    %cst_318 = arith.constant dense<0.000000e+00> : vector<8x8xf32>
    %998 = tpu.matmul %996, %997, %cst_318 {dimension_numbers = #tpu.dot_dimension_numbers<[1], [0], [0], [1], [0, 0, 1, 1], [], []>} : vector<8x8xbf16>, vector<8x8xbf16>, vector<8x8xf32> -> vector<8x8xf32>
    %999 = arith.truncf %998 : vector<8x8xf32> to vector<8x8xbf16>
    %1000 = vector.extract_strided_slice %934 {offsets = [16, 0], sizes = [8, 32], strides = [1, 1]} : vector<32x32xbf16> to vector<8x32xbf16>
    %cst_319 = arith.constant dense<0.000000e+00> : vector<8x32xf32>
    %1001 = tpu.matmul %999, %1000, %cst_319 {dimension_numbers = #tpu.dot_dimension_numbers<[1], [0], [0], [1], [0, 0, 1, 1], [], []>} : vector<8x8xbf16>, vector<8x32xbf16>, vector<8x32xf32> -> vector<8x32xf32>
    %1002 = arith.addf %980, %1001 : vector<8x32xf32>
    %1003 = vector.extract_strided_slice %935 {offsets = [0, 24], sizes = [8, 8], strides = [1, 1]} : vector<8x32xbf16> to vector<8x8xbf16>
    %1004 = vector.extract_strided_slice %936 {offsets = [0, 24], sizes = [8, 8], strides = [1, 1]} : vector<8x32xbf16> to vector<8x8xbf16>
    %cst_320 = arith.constant dense<0.000000e+00> : vector<8x8xf32>
    %1005 = tpu.matmul %1003, %1004, %cst_320 {dimension_numbers = #tpu.dot_dimension_numbers<[1], [1], [0], [0], [0, 0, 1, 0], [], []>} : vector<8x8xbf16>, vector<8x8xbf16>, vector<8x8xf32> -> vector<8x8xf32>
    %1006 = vector.extract_strided_slice %482 {offsets = [3, 0, 0], sizes = [1, 8, 8], strides = [1, 1, 1]} : vector<4x8x8xf32> to vector<1x8x8xf32>
    %1007 = vector.shape_cast %1006 : vector<1x8x8xf32> to vector<8x8xf32>
    %1008 = arith.addf %1005, %1007 : vector<8x8xf32>
    %cst_321 = arith.constant dense<0xFF800000> : vector<8xf32>
    %1009 = vector.multi_reduction <maximumf>, %1008, %cst_321 [1] : vector<8x8xf32> to vector<8xf32>
    %1010 = vector.shape_cast %1009 : vector<8xf32> to vector<8x1xf32>
    %1011 = vector.broadcast %1010 : vector<8x1xf32> to vector<8x8xf32>
    %1012 = arith.subf %1008, %1011 : vector<8x8xf32>
    %1013 = math.exp %1012 : vector<8x8xf32>
    %cst_322 = arith.constant dense<0.000000e+00> : vector<8xf32>
    %1014 = vector.multi_reduction <add>, %1013, %cst_322 [1] : vector<8x8xf32> to vector<8xf32>
    %1015 = vector.shape_cast %1014 : vector<8xf32> to vector<8x1xf32>
    %1016 = vector.broadcast %1015 : vector<8x1xf32> to vector<8x8xf32>
    %1017 = arith.divf %1013, %1016 : vector<8x8xf32>
    %1018 = arith.truncf %1017 : vector<8x8xf32> to vector<8x8xbf16>
    %1019 = vector.extract_strided_slice %937 {offsets = [0, 24], sizes = [8, 8], strides = [1, 1]} : vector<8x32xbf16> to vector<8x8xbf16>
    %cst_323 = arith.constant dense<0.000000e+00> : vector<8x8xf32>
    %1020 = tpu.matmul %1018, %1019, %cst_323 {dimension_numbers = #tpu.dot_dimension_numbers<[1], [0], [0], [1], [0, 0, 1, 1], [], []>} : vector<8x8xbf16>, vector<8x8xbf16>, vector<8x8xf32> -> vector<8x8xf32>
    %1021 = arith.truncf %1020 : vector<8x8xf32> to vector<8x8xbf16>
    %1022 = vector.extract_strided_slice %934 {offsets = [24, 0], sizes = [8, 32], strides = [1, 1]} : vector<32x32xbf16> to vector<8x32xbf16>
    %cst_324 = arith.constant dense<0.000000e+00> : vector<8x32xf32>
    %1023 = tpu.matmul %1021, %1022, %cst_324 {dimension_numbers = #tpu.dot_dimension_numbers<[1], [0], [0], [1], [0, 0, 1, 1], [], []>} : vector<8x8xbf16>, vector<8x32xbf16>, vector<8x32xf32> -> vector<8x32xf32>
    %1024 = arith.addf %1002, %1023 : vector<8x32xf32>
    %1025 = vector.extract_strided_slice %932 {offsets = [8, 0], sizes = [8, 32], strides = [1, 1]} : vector<16x96xbf16> to vector<8x32xbf16>
    %1026 = vector.extract_strided_slice %932 {offsets = [8, 32], sizes = [8, 32], strides = [1, 1]} : vector<16x96xbf16> to vector<8x32xbf16>
    %1027 = vector.extract_strided_slice %932 {offsets = [8, 64], sizes = [8, 32], strides = [1, 1]} : vector<16x96xbf16> to vector<8x32xbf16>
    %1028 = vector.extract_strided_slice %1025 {offsets = [0, 0], sizes = [8, 8], strides = [1, 1]} : vector<8x32xbf16> to vector<8x8xbf16>
    %1029 = vector.extract_strided_slice %1026 {offsets = [0, 0], sizes = [8, 8], strides = [1, 1]} : vector<8x32xbf16> to vector<8x8xbf16>
    %cst_325 = arith.constant dense<0.000000e+00> : vector<8x8xf32>
    %1030 = tpu.matmul %1028, %1029, %cst_325 {dimension_numbers = #tpu.dot_dimension_numbers<[1], [1], [0], [0], [0, 0, 1, 0], [], []>} : vector<8x8xbf16>, vector<8x8xbf16>, vector<8x8xf32> -> vector<8x8xf32>
    %1031 = vector.extract_strided_slice %482 {offsets = [0, 0, 0], sizes = [1, 8, 8], strides = [1, 1, 1]} : vector<4x8x8xf32> to vector<1x8x8xf32>
    %1032 = vector.shape_cast %1031 : vector<1x8x8xf32> to vector<8x8xf32>
    %1033 = arith.addf %1030, %1032 : vector<8x8xf32>
    %cst_326 = arith.constant dense<0xFF800000> : vector<8xf32>
    %1034 = vector.multi_reduction <maximumf>, %1033, %cst_326 [1] : vector<8x8xf32> to vector<8xf32>
    %1035 = vector.shape_cast %1034 : vector<8xf32> to vector<8x1xf32>
    %1036 = vector.broadcast %1035 : vector<8x1xf32> to vector<8x8xf32>
    %1037 = arith.subf %1033, %1036 : vector<8x8xf32>
    %1038 = math.exp %1037 : vector<8x8xf32>
    %cst_327 = arith.constant dense<0.000000e+00> : vector<8xf32>
    %1039 = vector.multi_reduction <add>, %1038, %cst_327 [1] : vector<8x8xf32> to vector<8xf32>
    %1040 = vector.shape_cast %1039 : vector<8xf32> to vector<8x1xf32>
    %1041 = vector.broadcast %1040 : vector<8x1xf32> to vector<8x8xf32>
    %1042 = arith.divf %1038, %1041 : vector<8x8xf32>
    %1043 = arith.truncf %1042 : vector<8x8xf32> to vector<8x8xbf16>
    %1044 = vector.extract_strided_slice %1027 {offsets = [0, 0], sizes = [8, 8], strides = [1, 1]} : vector<8x32xbf16> to vector<8x8xbf16>
    %cst_328 = arith.constant dense<0.000000e+00> : vector<8x8xf32>
    %1045 = tpu.matmul %1043, %1044, %cst_328 {dimension_numbers = #tpu.dot_dimension_numbers<[1], [0], [0], [1], [0, 0, 1, 1], [], []>} : vector<8x8xbf16>, vector<8x8xbf16>, vector<8x8xf32> -> vector<8x8xf32>
    %1046 = arith.truncf %1045 : vector<8x8xf32> to vector<8x8xbf16>
    %1047 = vector.extract_strided_slice %934 {offsets = [0, 0], sizes = [8, 32], strides = [1, 1]} : vector<32x32xbf16> to vector<8x32xbf16>
    %cst_329 = arith.constant dense<0.000000e+00> : vector<8x32xf32>
    %1048 = tpu.matmul %1046, %1047, %cst_329 {dimension_numbers = #tpu.dot_dimension_numbers<[1], [0], [0], [1], [0, 0, 1, 1], [], []>} : vector<8x8xbf16>, vector<8x32xbf16>, vector<8x32xf32> -> vector<8x32xf32>
    %1049 = vector.extract_strided_slice %1025 {offsets = [0, 8], sizes = [8, 8], strides = [1, 1]} : vector<8x32xbf16> to vector<8x8xbf16>
    %1050 = vector.extract_strided_slice %1026 {offsets = [0, 8], sizes = [8, 8], strides = [1, 1]} : vector<8x32xbf16> to vector<8x8xbf16>
    %cst_330 = arith.constant dense<0.000000e+00> : vector<8x8xf32>
    %1051 = tpu.matmul %1049, %1050, %cst_330 {dimension_numbers = #tpu.dot_dimension_numbers<[1], [1], [0], [0], [0, 0, 1, 0], [], []>} : vector<8x8xbf16>, vector<8x8xbf16>, vector<8x8xf32> -> vector<8x8xf32>
    %1052 = vector.extract_strided_slice %482 {offsets = [1, 0, 0], sizes = [1, 8, 8], strides = [1, 1, 1]} : vector<4x8x8xf32> to vector<1x8x8xf32>
    %1053 = vector.shape_cast %1052 : vector<1x8x8xf32> to vector<8x8xf32>
    %1054 = arith.addf %1051, %1053 : vector<8x8xf32>
    %cst_331 = arith.constant dense<0xFF800000> : vector<8xf32>
    %1055 = vector.multi_reduction <maximumf>, %1054, %cst_331 [1] : vector<8x8xf32> to vector<8xf32>
    %1056 = vector.shape_cast %1055 : vector<8xf32> to vector<8x1xf32>
    %1057 = vector.broadcast %1056 : vector<8x1xf32> to vector<8x8xf32>
    %1058 = arith.subf %1054, %1057 : vector<8x8xf32>
    %1059 = math.exp %1058 : vector<8x8xf32>
    %cst_332 = arith.constant dense<0.000000e+00> : vector<8xf32>
    %1060 = vector.multi_reduction <add>, %1059, %cst_332 [1] : vector<8x8xf32> to vector<8xf32>
    %1061 = vector.shape_cast %1060 : vector<8xf32> to vector<8x1xf32>
    %1062 = vector.broadcast %1061 : vector<8x1xf32> to vector<8x8xf32>
    %1063 = arith.divf %1059, %1062 : vector<8x8xf32>
    %1064 = arith.truncf %1063 : vector<8x8xf32> to vector<8x8xbf16>
    %1065 = vector.extract_strided_slice %1027 {offsets = [0, 8], sizes = [8, 8], strides = [1, 1]} : vector<8x32xbf16> to vector<8x8xbf16>
    %cst_333 = arith.constant dense<0.000000e+00> : vector<8x8xf32>
    %1066 = tpu.matmul %1064, %1065, %cst_333 {dimension_numbers = #tpu.dot_dimension_numbers<[1], [0], [0], [1], [0, 0, 1, 1], [], []>} : vector<8x8xbf16>, vector<8x8xbf16>, vector<8x8xf32> -> vector<8x8xf32>
    %1067 = arith.truncf %1066 : vector<8x8xf32> to vector<8x8xbf16>
    %1068 = vector.extract_strided_slice %934 {offsets = [8, 0], sizes = [8, 32], strides = [1, 1]} : vector<32x32xbf16> to vector<8x32xbf16>
    %cst_334 = arith.constant dense<0.000000e+00> : vector<8x32xf32>
    %1069 = tpu.matmul %1067, %1068, %cst_334 {dimension_numbers = #tpu.dot_dimension_numbers<[1], [0], [0], [1], [0, 0, 1, 1], [], []>} : vector<8x8xbf16>, vector<8x32xbf16>, vector<8x32xf32> -> vector<8x32xf32>
    %1070 = arith.addf %1048, %1069 : vector<8x32xf32>
    %1071 = vector.extract_strided_slice %1025 {offsets = [0, 16], sizes = [8, 8], strides = [1, 1]} : vector<8x32xbf16> to vector<8x8xbf16>
    %1072 = vector.extract_strided_slice %1026 {offsets = [0, 16], sizes = [8, 8], strides = [1, 1]} : vector<8x32xbf16> to vector<8x8xbf16>
    %cst_335 = arith.constant dense<0.000000e+00> : vector<8x8xf32>
    %1073 = tpu.matmul %1071, %1072, %cst_335 {dimension_numbers = #tpu.dot_dimension_numbers<[1], [1], [0], [0], [0, 0, 1, 0], [], []>} : vector<8x8xbf16>, vector<8x8xbf16>, vector<8x8xf32> -> vector<8x8xf32>
    %1074 = vector.extract_strided_slice %482 {offsets = [2, 0, 0], sizes = [1, 8, 8], strides = [1, 1, 1]} : vector<4x8x8xf32> to vector<1x8x8xf32>
    %1075 = vector.shape_cast %1074 : vector<1x8x8xf32> to vector<8x8xf32>
    %1076 = arith.addf %1073, %1075 : vector<8x8xf32>
    %cst_336 = arith.constant dense<0xFF800000> : vector<8xf32>
    %1077 = vector.multi_reduction <maximumf>, %1076, %cst_336 [1] : vector<8x8xf32> to vector<8xf32>
    %1078 = vector.shape_cast %1077 : vector<8xf32> to vector<8x1xf32>
    %1079 = vector.broadcast %1078 : vector<8x1xf32> to vector<8x8xf32>
    %1080 = arith.subf %1076, %1079 : vector<8x8xf32>
    %1081 = math.exp %1080 : vector<8x8xf32>
    %cst_337 = arith.constant dense<0.000000e+00> : vector<8xf32>
    %1082 = vector.multi_reduction <add>, %1081, %cst_337 [1] : vector<8x8xf32> to vector<8xf32>
    %1083 = vector.shape_cast %1082 : vector<8xf32> to vector<8x1xf32>
    %1084 = vector.broadcast %1083 : vector<8x1xf32> to vector<8x8xf32>
    %1085 = arith.divf %1081, %1084 : vector<8x8xf32>
    %1086 = arith.truncf %1085 : vector<8x8xf32> to vector<8x8xbf16>
    %1087 = vector.extract_strided_slice %1027 {offsets = [0, 16], sizes = [8, 8], strides = [1, 1]} : vector<8x32xbf16> to vector<8x8xbf16>
    %cst_338 = arith.constant dense<0.000000e+00> : vector<8x8xf32>
    %1088 = tpu.matmul %1086, %1087, %cst_338 {dimension_numbers = #tpu.dot_dimension_numbers<[1], [0], [0], [1], [0, 0, 1, 1], [], []>} : vector<8x8xbf16>, vector<8x8xbf16>, vector<8x8xf32> -> vector<8x8xf32>
    %1089 = arith.truncf %1088 : vector<8x8xf32> to vector<8x8xbf16>
    %1090 = vector.extract_strided_slice %934 {offsets = [16, 0], sizes = [8, 32], strides = [1, 1]} : vector<32x32xbf16> to vector<8x32xbf16>
    %cst_339 = arith.constant dense<0.000000e+00> : vector<8x32xf32>
    %1091 = tpu.matmul %1089, %1090, %cst_339 {dimension_numbers = #tpu.dot_dimension_numbers<[1], [0], [0], [1], [0, 0, 1, 1], [], []>} : vector<8x8xbf16>, vector<8x32xbf16>, vector<8x32xf32> -> vector<8x32xf32>
    %1092 = arith.addf %1070, %1091 : vector<8x32xf32>
    %1093 = vector.extract_strided_slice %1025 {offsets = [0, 24], sizes = [8, 8], strides = [1, 1]} : vector<8x32xbf16> to vector<8x8xbf16>
    %1094 = vector.extract_strided_slice %1026 {offsets = [0, 24], sizes = [8, 8], strides = [1, 1]} : vector<8x32xbf16> to vector<8x8xbf16>
    %cst_340 = arith.constant dense<0.000000e+00> : vector<8x8xf32>
    %1095 = tpu.matmul %1093, %1094, %cst_340 {dimension_numbers = #tpu.dot_dimension_numbers<[1], [1], [0], [0], [0, 0, 1, 0], [], []>} : vector<8x8xbf16>, vector<8x8xbf16>, vector<8x8xf32> -> vector<8x8xf32>
    %1096 = vector.extract_strided_slice %482 {offsets = [3, 0, 0], sizes = [1, 8, 8], strides = [1, 1, 1]} : vector<4x8x8xf32> to vector<1x8x8xf32>
    %1097 = vector.shape_cast %1096 : vector<1x8x8xf32> to vector<8x8xf32>
    %1098 = arith.addf %1095, %1097 : vector<8x8xf32>
    %cst_341 = arith.constant dense<0xFF800000> : vector<8xf32>
    %1099 = vector.multi_reduction <maximumf>, %1098, %cst_341 [1] : vector<8x8xf32> to vector<8xf32>
    %1100 = vector.shape_cast %1099 : vector<8xf32> to vector<8x1xf32>
    %1101 = vector.broadcast %1100 : vector<8x1xf32> to vector<8x8xf32>
    %1102 = arith.subf %1098, %1101 : vector<8x8xf32>
    %1103 = math.exp %1102 : vector<8x8xf32>
    %cst_342 = arith.constant dense<0.000000e+00> : vector<8xf32>
    %1104 = vector.multi_reduction <add>, %1103, %cst_342 [1] : vector<8x8xf32> to vector<8xf32>
    %1105 = vector.shape_cast %1104 : vector<8xf32> to vector<8x1xf32>
    %1106 = vector.broadcast %1105 : vector<8x1xf32> to vector<8x8xf32>
    %1107 = arith.divf %1103, %1106 : vector<8x8xf32>
    %1108 = arith.truncf %1107 : vector<8x8xf32> to vector<8x8xbf16>
    %1109 = vector.extract_strided_slice %1027 {offsets = [0, 24], sizes = [8, 8], strides = [1, 1]} : vector<8x32xbf16> to vector<8x8xbf16>
    %cst_343 = arith.constant dense<0.000000e+00> : vector<8x8xf32>
    %1110 = tpu.matmul %1108, %1109, %cst_343 {dimension_numbers = #tpu.dot_dimension_numbers<[1], [0], [0], [1], [0, 0, 1, 1], [], []>} : vector<8x8xbf16>, vector<8x8xbf16>, vector<8x8xf32> -> vector<8x8xf32>
    %1111 = arith.truncf %1110 : vector<8x8xf32> to vector<8x8xbf16>
    %1112 = vector.extract_strided_slice %934 {offsets = [24, 0], sizes = [8, 32], strides = [1, 1]} : vector<32x32xbf16> to vector<8x32xbf16>
    %cst_344 = arith.constant dense<0.000000e+00> : vector<8x32xf32>
    %1113 = tpu.matmul %1111, %1112, %cst_344 {dimension_numbers = #tpu.dot_dimension_numbers<[1], [0], [0], [1], [0, 0, 1, 1], [], []>} : vector<8x8xbf16>, vector<8x32xbf16>, vector<8x32xf32> -> vector<8x32xf32>
    %1114 = arith.addf %1092, %1113 : vector<8x32xf32>
    %1115 = tpu.concatenate %1024, %1114 in 0 : vector<8x32xf32>, vector<8x32xf32> -> vector<16x32xf32>
    %1116 = arith.addf %913, %1115 : vector<16x32xf32>
    %c1_345 = arith.constant 1 : index
    %c0_346 = arith.constant 0 : index
    %c0_347 = arith.constant 0 : index
    %1117 = vector.load %arg16[%c1_345, %c0_346, %c0_347] : memref<2x1x32xf32, #tpu.memory_space<vmem>>, vector<1x1x32xf32>
    %1118 = vector.shape_cast %1117 : vector<1x1x32xf32> to vector<1x32xf32>
    %1119 = arith.mulf %1116, %1116 : vector<16x32xf32>
    %cst_348 = arith.constant dense<0.000000e+00> : vector<16xf32>
    %1120 = vector.multi_reduction <add>, %1119, %cst_348 [1] : vector<16x32xf32> to vector<16xf32>
    %1121 = vector.shape_cast %1120 : vector<16xf32> to vector<16x1xf32>
    %cst_349 = arith.constant 3.200000e+01 : f32
    %1122 = vector.broadcast %cst_349 : f32 to vector<16x1xf32>
    %1123 = arith.divf %1121, %1122 : vector<16x1xf32>
    %cst_350 = arith.constant 9.99999997E-7 : f32
    %1124 = vector.broadcast %cst_350 : f32 to vector<16x1xf32>
    %1125 = arith.addf %1123, %1124 : vector<16x1xf32>
    %1126 = math.rsqrt %1125 : vector<16x1xf32>
    %1127 = vector.broadcast %1126 : vector<16x1xf32> to vector<16x32xf32>
    %1128 = arith.mulf %1116, %1127 : vector<16x32xf32>
    %1129 = vector.broadcast %1118 : vector<1x32xf32> to vector<16x32xf32>
    %1130 = arith.mulf %1128, %1129 : vector<16x32xf32>
    %c1_351 = arith.constant 1 : index
    %c0_352 = arith.constant 0 : index
    %c0_353 = arith.constant 0 : index
    %1131 = vector.load %arg17[%c1_351, %c0_352, %c0_353] : memref<2x32x32xbf16, #tpu.memory_space<vmem>>, vector<1x32x32xbf16>
    %1132 = vector.shape_cast %1131 : vector<1x32x32xbf16> to vector<32x32xbf16>
    %1133 = arith.truncf %1130 : vector<16x32xf32> to vector<16x32xbf16>
    %cst_354 = arith.constant dense<0.000000e+00> : vector<16x32xf32>
    %1134 = tpu.matmul %1133, %1132, %cst_354 {dimension_numbers = #tpu.dot_dimension_numbers<[1], [0], [0], [1], [0, 0, 1, 1], [], []>} : vector<16x32xbf16>, vector<32x32xbf16>, vector<16x32xf32> -> vector<16x32xf32>
    %1135 = arith.truncf %1134 : vector<16x32xf32> to vector<16x32xbf16>
    %c1_355 = arith.constant 1 : index
    %c0_356 = arith.constant 0 : index
    %c0_357 = arith.constant 0 : index
    %1136 = vector.load %arg18[%c1_355, %c0_356, %c0_357] : memref<2x32x64xbf16, #tpu.memory_space<vmem>>, vector<1x32x64xbf16>
    %1137 = vector.shape_cast %1136 : vector<1x32x64xbf16> to vector<32x64xbf16>
    %cst_358 = arith.constant dense<0.000000e+00> : vector<16x64xf32>
    %1138 = tpu.matmul %479, %1137, %cst_358 {dimension_numbers = #tpu.dot_dimension_numbers<[1], [0], [0], [1], [0, 0, 1, 1], [], []>} : vector<16x32xbf16>, vector<32x64xbf16>, vector<16x64xf32> -> vector<16x64xf32>
    %1139 = arith.truncf %1138 : vector<16x64xf32> to vector<16x64xbf16>
    %c1_359 = arith.constant 1 : index
    %c0_360 = arith.constant 0 : index
    %c0_361 = arith.constant 0 : index
    %1140 = vector.load %arg19[%c1_359, %c0_360, %c0_361] : memref<2x32x32xbf16, #tpu.memory_space<vmem>>, vector<1x32x32xbf16>
    %1141 = vector.shape_cast %1140 : vector<1x32x32xbf16> to vector<32x32xbf16>
    %c0_362 = arith.constant 0 : index
    %c0_363 = arith.constant 0 : index
    %c0_364 = arith.constant 0 : index
    %1142 = vector.load %arg4[%c0_362, %c0_363, %c0_364] : memref<2x1x8xf32, #tpu.memory_space<vmem>>, vector<1x1x8xf32>
    %1143 = vector.shape_cast %1142 : vector<1x1x8xf32> to vector<1x8xf32>
    %1144 = vector.extract_strided_slice %1135 {offsets = [0, 0], sizes = [8, 32], strides = [1, 1]} : vector<16x32xbf16> to vector<8x32xbf16>
    %1145 = vector.extract_strided_slice %1139 {offsets = [0, 0], sizes = [8, 32], strides = [1, 1]} : vector<16x64xbf16> to vector<8x32xbf16>
    %1146 = vector.extract_strided_slice %1139 {offsets = [0, 32], sizes = [8, 32], strides = [1, 1]} : vector<16x64xbf16> to vector<8x32xbf16>
    %1147 = vector.extract_strided_slice %1144 {offsets = [0, 0], sizes = [8, 8], strides = [1, 1]} : vector<8x32xbf16> to vector<8x8xbf16>
    %1148 = vector.extract_strided_slice %1145 {offsets = [0, 0], sizes = [8, 8], strides = [1, 1]} : vector<8x32xbf16> to vector<8x8xbf16>
    %cst_365 = arith.constant dense<0.000000e+00> : vector<8x8xf32>
    %1149 = tpu.matmul %1147, %1148, %cst_365 {dimension_numbers = #tpu.dot_dimension_numbers<[1], [1], [0], [0], [0, 0, 1, 0], [], []>} : vector<8x8xbf16>, vector<8x8xbf16>, vector<8x8xf32> -> vector<8x8xf32>
    %1150 = vector.broadcast %1143 : vector<1x8xf32> to vector<8x8xf32>
    %1151 = arith.addf %1149, %1150 : vector<8x8xf32>
    %cst_366 = arith.constant dense<0xFF800000> : vector<8xf32>
    %1152 = vector.multi_reduction <maximumf>, %1151, %cst_366 [1] : vector<8x8xf32> to vector<8xf32>
    %1153 = vector.shape_cast %1152 : vector<8xf32> to vector<8x1xf32>
    %1154 = vector.broadcast %1153 : vector<8x1xf32> to vector<8x8xf32>
    %1155 = arith.subf %1151, %1154 : vector<8x8xf32>
    %1156 = math.exp %1155 : vector<8x8xf32>
    %cst_367 = arith.constant dense<0.000000e+00> : vector<8xf32>
    %1157 = vector.multi_reduction <add>, %1156, %cst_367 [1] : vector<8x8xf32> to vector<8xf32>
    %1158 = vector.shape_cast %1157 : vector<8xf32> to vector<8x1xf32>
    %1159 = vector.broadcast %1158 : vector<8x1xf32> to vector<8x8xf32>
    %1160 = arith.divf %1156, %1159 : vector<8x8xf32>
    %1161 = arith.truncf %1160 : vector<8x8xf32> to vector<8x8xbf16>
    %1162 = vector.extract_strided_slice %1146 {offsets = [0, 0], sizes = [8, 8], strides = [1, 1]} : vector<8x32xbf16> to vector<8x8xbf16>
    %cst_368 = arith.constant dense<0.000000e+00> : vector<8x8xf32>
    %1163 = tpu.matmul %1161, %1162, %cst_368 {dimension_numbers = #tpu.dot_dimension_numbers<[1], [0], [0], [1], [0, 0, 1, 1], [], []>} : vector<8x8xbf16>, vector<8x8xbf16>, vector<8x8xf32> -> vector<8x8xf32>
    %1164 = arith.truncf %1163 : vector<8x8xf32> to vector<8x8xbf16>
    %1165 = vector.extract_strided_slice %1141 {offsets = [0, 0], sizes = [8, 32], strides = [1, 1]} : vector<32x32xbf16> to vector<8x32xbf16>
    %cst_369 = arith.constant dense<0.000000e+00> : vector<8x32xf32>
    %1166 = tpu.matmul %1164, %1165, %cst_369 {dimension_numbers = #tpu.dot_dimension_numbers<[1], [0], [0], [1], [0, 0, 1, 1], [], []>} : vector<8x8xbf16>, vector<8x32xbf16>, vector<8x32xf32> -> vector<8x32xf32>
    %1167 = vector.extract_strided_slice %1144 {offsets = [0, 8], sizes = [8, 8], strides = [1, 1]} : vector<8x32xbf16> to vector<8x8xbf16>
    %1168 = vector.extract_strided_slice %1145 {offsets = [0, 8], sizes = [8, 8], strides = [1, 1]} : vector<8x32xbf16> to vector<8x8xbf16>
    %cst_370 = arith.constant dense<0.000000e+00> : vector<8x8xf32>
    %1169 = tpu.matmul %1167, %1168, %cst_370 {dimension_numbers = #tpu.dot_dimension_numbers<[1], [1], [0], [0], [0, 0, 1, 0], [], []>} : vector<8x8xbf16>, vector<8x8xbf16>, vector<8x8xf32> -> vector<8x8xf32>
    %1170 = vector.broadcast %1143 : vector<1x8xf32> to vector<8x8xf32>
    %1171 = arith.addf %1169, %1170 : vector<8x8xf32>
    %cst_371 = arith.constant dense<0xFF800000> : vector<8xf32>
    %1172 = vector.multi_reduction <maximumf>, %1171, %cst_371 [1] : vector<8x8xf32> to vector<8xf32>
    %1173 = vector.shape_cast %1172 : vector<8xf32> to vector<8x1xf32>
    %1174 = vector.broadcast %1173 : vector<8x1xf32> to vector<8x8xf32>
    %1175 = arith.subf %1171, %1174 : vector<8x8xf32>
    %1176 = math.exp %1175 : vector<8x8xf32>
    %cst_372 = arith.constant dense<0.000000e+00> : vector<8xf32>
    %1177 = vector.multi_reduction <add>, %1176, %cst_372 [1] : vector<8x8xf32> to vector<8xf32>
    %1178 = vector.shape_cast %1177 : vector<8xf32> to vector<8x1xf32>
    %1179 = vector.broadcast %1178 : vector<8x1xf32> to vector<8x8xf32>
    %1180 = arith.divf %1176, %1179 : vector<8x8xf32>
    %1181 = arith.truncf %1180 : vector<8x8xf32> to vector<8x8xbf16>
    %1182 = vector.extract_strided_slice %1146 {offsets = [0, 8], sizes = [8, 8], strides = [1, 1]} : vector<8x32xbf16> to vector<8x8xbf16>
    %cst_373 = arith.constant dense<0.000000e+00> : vector<8x8xf32>
    %1183 = tpu.matmul %1181, %1182, %cst_373 {dimension_numbers = #tpu.dot_dimension_numbers<[1], [0], [0], [1], [0, 0, 1, 1], [], []>} : vector<8x8xbf16>, vector<8x8xbf16>, vector<8x8xf32> -> vector<8x8xf32>
    %1184 = arith.truncf %1183 : vector<8x8xf32> to vector<8x8xbf16>
    %1185 = vector.extract_strided_slice %1141 {offsets = [8, 0], sizes = [8, 32], strides = [1, 1]} : vector<32x32xbf16> to vector<8x32xbf16>
    %cst_374 = arith.constant dense<0.000000e+00> : vector<8x32xf32>
    %1186 = tpu.matmul %1184, %1185, %cst_374 {dimension_numbers = #tpu.dot_dimension_numbers<[1], [0], [0], [1], [0, 0, 1, 1], [], []>} : vector<8x8xbf16>, vector<8x32xbf16>, vector<8x32xf32> -> vector<8x32xf32>
    %1187 = arith.addf %1166, %1186 : vector<8x32xf32>
    %1188 = vector.extract_strided_slice %1144 {offsets = [0, 16], sizes = [8, 8], strides = [1, 1]} : vector<8x32xbf16> to vector<8x8xbf16>
    %1189 = vector.extract_strided_slice %1145 {offsets = [0, 16], sizes = [8, 8], strides = [1, 1]} : vector<8x32xbf16> to vector<8x8xbf16>
    %cst_375 = arith.constant dense<0.000000e+00> : vector<8x8xf32>
    %1190 = tpu.matmul %1188, %1189, %cst_375 {dimension_numbers = #tpu.dot_dimension_numbers<[1], [1], [0], [0], [0, 0, 1, 0], [], []>} : vector<8x8xbf16>, vector<8x8xbf16>, vector<8x8xf32> -> vector<8x8xf32>
    %1191 = vector.broadcast %1143 : vector<1x8xf32> to vector<8x8xf32>
    %1192 = arith.addf %1190, %1191 : vector<8x8xf32>
    %cst_376 = arith.constant dense<0xFF800000> : vector<8xf32>
    %1193 = vector.multi_reduction <maximumf>, %1192, %cst_376 [1] : vector<8x8xf32> to vector<8xf32>
    %1194 = vector.shape_cast %1193 : vector<8xf32> to vector<8x1xf32>
    %1195 = vector.broadcast %1194 : vector<8x1xf32> to vector<8x8xf32>
    %1196 = arith.subf %1192, %1195 : vector<8x8xf32>
    %1197 = math.exp %1196 : vector<8x8xf32>
    %cst_377 = arith.constant dense<0.000000e+00> : vector<8xf32>
    %1198 = vector.multi_reduction <add>, %1197, %cst_377 [1] : vector<8x8xf32> to vector<8xf32>
    %1199 = vector.shape_cast %1198 : vector<8xf32> to vector<8x1xf32>
    %1200 = vector.broadcast %1199 : vector<8x1xf32> to vector<8x8xf32>
    %1201 = arith.divf %1197, %1200 : vector<8x8xf32>
    %1202 = arith.truncf %1201 : vector<8x8xf32> to vector<8x8xbf16>
    %1203 = vector.extract_strided_slice %1146 {offsets = [0, 16], sizes = [8, 8], strides = [1, 1]} : vector<8x32xbf16> to vector<8x8xbf16>
    %cst_378 = arith.constant dense<0.000000e+00> : vector<8x8xf32>
    %1204 = tpu.matmul %1202, %1203, %cst_378 {dimension_numbers = #tpu.dot_dimension_numbers<[1], [0], [0], [1], [0, 0, 1, 1], [], []>} : vector<8x8xbf16>, vector<8x8xbf16>, vector<8x8xf32> -> vector<8x8xf32>
    %1205 = arith.truncf %1204 : vector<8x8xf32> to vector<8x8xbf16>
    %1206 = vector.extract_strided_slice %1141 {offsets = [16, 0], sizes = [8, 32], strides = [1, 1]} : vector<32x32xbf16> to vector<8x32xbf16>
    %cst_379 = arith.constant dense<0.000000e+00> : vector<8x32xf32>
    %1207 = tpu.matmul %1205, %1206, %cst_379 {dimension_numbers = #tpu.dot_dimension_numbers<[1], [0], [0], [1], [0, 0, 1, 1], [], []>} : vector<8x8xbf16>, vector<8x32xbf16>, vector<8x32xf32> -> vector<8x32xf32>
    %1208 = arith.addf %1187, %1207 : vector<8x32xf32>
    %1209 = vector.extract_strided_slice %1144 {offsets = [0, 24], sizes = [8, 8], strides = [1, 1]} : vector<8x32xbf16> to vector<8x8xbf16>
    %1210 = vector.extract_strided_slice %1145 {offsets = [0, 24], sizes = [8, 8], strides = [1, 1]} : vector<8x32xbf16> to vector<8x8xbf16>
    %cst_380 = arith.constant dense<0.000000e+00> : vector<8x8xf32>
    %1211 = tpu.matmul %1209, %1210, %cst_380 {dimension_numbers = #tpu.dot_dimension_numbers<[1], [1], [0], [0], [0, 0, 1, 0], [], []>} : vector<8x8xbf16>, vector<8x8xbf16>, vector<8x8xf32> -> vector<8x8xf32>
    %1212 = vector.broadcast %1143 : vector<1x8xf32> to vector<8x8xf32>
    %1213 = arith.addf %1211, %1212 : vector<8x8xf32>
    %cst_381 = arith.constant dense<0xFF800000> : vector<8xf32>
    %1214 = vector.multi_reduction <maximumf>, %1213, %cst_381 [1] : vector<8x8xf32> to vector<8xf32>
    %1215 = vector.shape_cast %1214 : vector<8xf32> to vector<8x1xf32>
    %1216 = vector.broadcast %1215 : vector<8x1xf32> to vector<8x8xf32>
    %1217 = arith.subf %1213, %1216 : vector<8x8xf32>
    %1218 = math.exp %1217 : vector<8x8xf32>
    %cst_382 = arith.constant dense<0.000000e+00> : vector<8xf32>
    %1219 = vector.multi_reduction <add>, %1218, %cst_382 [1] : vector<8x8xf32> to vector<8xf32>
    %1220 = vector.shape_cast %1219 : vector<8xf32> to vector<8x1xf32>
    %1221 = vector.broadcast %1220 : vector<8x1xf32> to vector<8x8xf32>
    %1222 = arith.divf %1218, %1221 : vector<8x8xf32>
    %1223 = arith.truncf %1222 : vector<8x8xf32> to vector<8x8xbf16>
    %1224 = vector.extract_strided_slice %1146 {offsets = [0, 24], sizes = [8, 8], strides = [1, 1]} : vector<8x32xbf16> to vector<8x8xbf16>
    %cst_383 = arith.constant dense<0.000000e+00> : vector<8x8xf32>
    %1225 = tpu.matmul %1223, %1224, %cst_383 {dimension_numbers = #tpu.dot_dimension_numbers<[1], [0], [0], [1], [0, 0, 1, 1], [], []>} : vector<8x8xbf16>, vector<8x8xbf16>, vector<8x8xf32> -> vector<8x8xf32>
    %1226 = arith.truncf %1225 : vector<8x8xf32> to vector<8x8xbf16>
    %1227 = vector.extract_strided_slice %1141 {offsets = [24, 0], sizes = [8, 32], strides = [1, 1]} : vector<32x32xbf16> to vector<8x32xbf16>
    %cst_384 = arith.constant dense<0.000000e+00> : vector<8x32xf32>
    %1228 = tpu.matmul %1226, %1227, %cst_384 {dimension_numbers = #tpu.dot_dimension_numbers<[1], [0], [0], [1], [0, 0, 1, 1], [], []>} : vector<8x8xbf16>, vector<8x32xbf16>, vector<8x32xf32> -> vector<8x32xf32>
    %1229 = arith.addf %1208, %1228 : vector<8x32xf32>
    %c1_385 = arith.constant 1 : index
    %c0_386 = arith.constant 0 : index
    %c0_387 = arith.constant 0 : index
    %1230 = vector.load %arg4[%c1_385, %c0_386, %c0_387] : memref<2x1x8xf32, #tpu.memory_space<vmem>>, vector<1x1x8xf32>
    %1231 = vector.shape_cast %1230 : vector<1x1x8xf32> to vector<1x8xf32>
    %1232 = vector.extract_strided_slice %1135 {offsets = [8, 0], sizes = [8, 32], strides = [1, 1]} : vector<16x32xbf16> to vector<8x32xbf16>
    %1233 = vector.extract_strided_slice %1139 {offsets = [8, 0], sizes = [8, 32], strides = [1, 1]} : vector<16x64xbf16> to vector<8x32xbf16>
    %1234 = vector.extract_strided_slice %1139 {offsets = [8, 32], sizes = [8, 32], strides = [1, 1]} : vector<16x64xbf16> to vector<8x32xbf16>
    %1235 = vector.extract_strided_slice %1232 {offsets = [0, 0], sizes = [8, 8], strides = [1, 1]} : vector<8x32xbf16> to vector<8x8xbf16>
    %1236 = vector.extract_strided_slice %1233 {offsets = [0, 0], sizes = [8, 8], strides = [1, 1]} : vector<8x32xbf16> to vector<8x8xbf16>
    %cst_388 = arith.constant dense<0.000000e+00> : vector<8x8xf32>
    %1237 = tpu.matmul %1235, %1236, %cst_388 {dimension_numbers = #tpu.dot_dimension_numbers<[1], [1], [0], [0], [0, 0, 1, 0], [], []>} : vector<8x8xbf16>, vector<8x8xbf16>, vector<8x8xf32> -> vector<8x8xf32>
    %1238 = vector.broadcast %1231 : vector<1x8xf32> to vector<8x8xf32>
    %1239 = arith.addf %1237, %1238 : vector<8x8xf32>
    %cst_389 = arith.constant dense<0xFF800000> : vector<8xf32>
    %1240 = vector.multi_reduction <maximumf>, %1239, %cst_389 [1] : vector<8x8xf32> to vector<8xf32>
    %1241 = vector.shape_cast %1240 : vector<8xf32> to vector<8x1xf32>
    %1242 = vector.broadcast %1241 : vector<8x1xf32> to vector<8x8xf32>
    %1243 = arith.subf %1239, %1242 : vector<8x8xf32>
    %1244 = math.exp %1243 : vector<8x8xf32>
    %cst_390 = arith.constant dense<0.000000e+00> : vector<8xf32>
    %1245 = vector.multi_reduction <add>, %1244, %cst_390 [1] : vector<8x8xf32> to vector<8xf32>
    %1246 = vector.shape_cast %1245 : vector<8xf32> to vector<8x1xf32>
    %1247 = vector.broadcast %1246 : vector<8x1xf32> to vector<8x8xf32>
    %1248 = arith.divf %1244, %1247 : vector<8x8xf32>
    %1249 = arith.truncf %1248 : vector<8x8xf32> to vector<8x8xbf16>
    %1250 = vector.extract_strided_slice %1234 {offsets = [0, 0], sizes = [8, 8], strides = [1, 1]} : vector<8x32xbf16> to vector<8x8xbf16>
    %cst_391 = arith.constant dense<0.000000e+00> : vector<8x8xf32>
    %1251 = tpu.matmul %1249, %1250, %cst_391 {dimension_numbers = #tpu.dot_dimension_numbers<[1], [0], [0], [1], [0, 0, 1, 1], [], []>} : vector<8x8xbf16>, vector<8x8xbf16>, vector<8x8xf32> -> vector<8x8xf32>
    %1252 = arith.truncf %1251 : vector<8x8xf32> to vector<8x8xbf16>
    %1253 = vector.extract_strided_slice %1141 {offsets = [0, 0], sizes = [8, 32], strides = [1, 1]} : vector<32x32xbf16> to vector<8x32xbf16>
    %cst_392 = arith.constant dense<0.000000e+00> : vector<8x32xf32>
    %1254 = tpu.matmul %1252, %1253, %cst_392 {dimension_numbers = #tpu.dot_dimension_numbers<[1], [0], [0], [1], [0, 0, 1, 1], [], []>} : vector<8x8xbf16>, vector<8x32xbf16>, vector<8x32xf32> -> vector<8x32xf32>
    %1255 = vector.extract_strided_slice %1232 {offsets = [0, 8], sizes = [8, 8], strides = [1, 1]} : vector<8x32xbf16> to vector<8x8xbf16>
    %1256 = vector.extract_strided_slice %1233 {offsets = [0, 8], sizes = [8, 8], strides = [1, 1]} : vector<8x32xbf16> to vector<8x8xbf16>
    %cst_393 = arith.constant dense<0.000000e+00> : vector<8x8xf32>
    %1257 = tpu.matmul %1255, %1256, %cst_393 {dimension_numbers = #tpu.dot_dimension_numbers<[1], [1], [0], [0], [0, 0, 1, 0], [], []>} : vector<8x8xbf16>, vector<8x8xbf16>, vector<8x8xf32> -> vector<8x8xf32>
    %1258 = vector.broadcast %1231 : vector<1x8xf32> to vector<8x8xf32>
    %1259 = arith.addf %1257, %1258 : vector<8x8xf32>
    %cst_394 = arith.constant dense<0xFF800000> : vector<8xf32>
    %1260 = vector.multi_reduction <maximumf>, %1259, %cst_394 [1] : vector<8x8xf32> to vector<8xf32>
    %1261 = vector.shape_cast %1260 : vector<8xf32> to vector<8x1xf32>
    %1262 = vector.broadcast %1261 : vector<8x1xf32> to vector<8x8xf32>
    %1263 = arith.subf %1259, %1262 : vector<8x8xf32>
    %1264 = math.exp %1263 : vector<8x8xf32>
    %cst_395 = arith.constant dense<0.000000e+00> : vector<8xf32>
    %1265 = vector.multi_reduction <add>, %1264, %cst_395 [1] : vector<8x8xf32> to vector<8xf32>
    %1266 = vector.shape_cast %1265 : vector<8xf32> to vector<8x1xf32>
    %1267 = vector.broadcast %1266 : vector<8x1xf32> to vector<8x8xf32>
    %1268 = arith.divf %1264, %1267 : vector<8x8xf32>
    %1269 = arith.truncf %1268 : vector<8x8xf32> to vector<8x8xbf16>
    %1270 = vector.extract_strided_slice %1234 {offsets = [0, 8], sizes = [8, 8], strides = [1, 1]} : vector<8x32xbf16> to vector<8x8xbf16>
    %cst_396 = arith.constant dense<0.000000e+00> : vector<8x8xf32>
    %1271 = tpu.matmul %1269, %1270, %cst_396 {dimension_numbers = #tpu.dot_dimension_numbers<[1], [0], [0], [1], [0, 0, 1, 1], [], []>} : vector<8x8xbf16>, vector<8x8xbf16>, vector<8x8xf32> -> vector<8x8xf32>
    %1272 = arith.truncf %1271 : vector<8x8xf32> to vector<8x8xbf16>
    %1273 = vector.extract_strided_slice %1141 {offsets = [8, 0], sizes = [8, 32], strides = [1, 1]} : vector<32x32xbf16> to vector<8x32xbf16>
    %cst_397 = arith.constant dense<0.000000e+00> : vector<8x32xf32>
    %1274 = tpu.matmul %1272, %1273, %cst_397 {dimension_numbers = #tpu.dot_dimension_numbers<[1], [0], [0], [1], [0, 0, 1, 1], [], []>} : vector<8x8xbf16>, vector<8x32xbf16>, vector<8x32xf32> -> vector<8x32xf32>
    %1275 = arith.addf %1254, %1274 : vector<8x32xf32>
    %1276 = vector.extract_strided_slice %1232 {offsets = [0, 16], sizes = [8, 8], strides = [1, 1]} : vector<8x32xbf16> to vector<8x8xbf16>
    %1277 = vector.extract_strided_slice %1233 {offsets = [0, 16], sizes = [8, 8], strides = [1, 1]} : vector<8x32xbf16> to vector<8x8xbf16>
    %cst_398 = arith.constant dense<0.000000e+00> : vector<8x8xf32>
    %1278 = tpu.matmul %1276, %1277, %cst_398 {dimension_numbers = #tpu.dot_dimension_numbers<[1], [1], [0], [0], [0, 0, 1, 0], [], []>} : vector<8x8xbf16>, vector<8x8xbf16>, vector<8x8xf32> -> vector<8x8xf32>
    %1279 = vector.broadcast %1231 : vector<1x8xf32> to vector<8x8xf32>
    %1280 = arith.addf %1278, %1279 : vector<8x8xf32>
    %cst_399 = arith.constant dense<0xFF800000> : vector<8xf32>
    %1281 = vector.multi_reduction <maximumf>, %1280, %cst_399 [1] : vector<8x8xf32> to vector<8xf32>
    %1282 = vector.shape_cast %1281 : vector<8xf32> to vector<8x1xf32>
    %1283 = vector.broadcast %1282 : vector<8x1xf32> to vector<8x8xf32>
    %1284 = arith.subf %1280, %1283 : vector<8x8xf32>
    %1285 = math.exp %1284 : vector<8x8xf32>
    %cst_400 = arith.constant dense<0.000000e+00> : vector<8xf32>
    %1286 = vector.multi_reduction <add>, %1285, %cst_400 [1] : vector<8x8xf32> to vector<8xf32>
    %1287 = vector.shape_cast %1286 : vector<8xf32> to vector<8x1xf32>
    %1288 = vector.broadcast %1287 : vector<8x1xf32> to vector<8x8xf32>
    %1289 = arith.divf %1285, %1288 : vector<8x8xf32>
    %1290 = arith.truncf %1289 : vector<8x8xf32> to vector<8x8xbf16>
    %1291 = vector.extract_strided_slice %1234 {offsets = [0, 16], sizes = [8, 8], strides = [1, 1]} : vector<8x32xbf16> to vector<8x8xbf16>
    %cst_401 = arith.constant dense<0.000000e+00> : vector<8x8xf32>
    %1292 = tpu.matmul %1290, %1291, %cst_401 {dimension_numbers = #tpu.dot_dimension_numbers<[1], [0], [0], [1], [0, 0, 1, 1], [], []>} : vector<8x8xbf16>, vector<8x8xbf16>, vector<8x8xf32> -> vector<8x8xf32>
    %1293 = arith.truncf %1292 : vector<8x8xf32> to vector<8x8xbf16>
    %1294 = vector.extract_strided_slice %1141 {offsets = [16, 0], sizes = [8, 32], strides = [1, 1]} : vector<32x32xbf16> to vector<8x32xbf16>
    %cst_402 = arith.constant dense<0.000000e+00> : vector<8x32xf32>
    %1295 = tpu.matmul %1293, %1294, %cst_402 {dimension_numbers = #tpu.dot_dimension_numbers<[1], [0], [0], [1], [0, 0, 1, 1], [], []>} : vector<8x8xbf16>, vector<8x32xbf16>, vector<8x32xf32> -> vector<8x32xf32>
    %1296 = arith.addf %1275, %1295 : vector<8x32xf32>
    %1297 = vector.extract_strided_slice %1232 {offsets = [0, 24], sizes = [8, 8], strides = [1, 1]} : vector<8x32xbf16> to vector<8x8xbf16>
    %1298 = vector.extract_strided_slice %1233 {offsets = [0, 24], sizes = [8, 8], strides = [1, 1]} : vector<8x32xbf16> to vector<8x8xbf16>
    %cst_403 = arith.constant dense<0.000000e+00> : vector<8x8xf32>
    %1299 = tpu.matmul %1297, %1298, %cst_403 {dimension_numbers = #tpu.dot_dimension_numbers<[1], [1], [0], [0], [0, 0, 1, 0], [], []>} : vector<8x8xbf16>, vector<8x8xbf16>, vector<8x8xf32> -> vector<8x8xf32>
    %1300 = vector.broadcast %1231 : vector<1x8xf32> to vector<8x8xf32>
    %1301 = arith.addf %1299, %1300 : vector<8x8xf32>
    %cst_404 = arith.constant dense<0xFF800000> : vector<8xf32>
    %1302 = vector.multi_reduction <maximumf>, %1301, %cst_404 [1] : vector<8x8xf32> to vector<8xf32>
    %1303 = vector.shape_cast %1302 : vector<8xf32> to vector<8x1xf32>
    %1304 = vector.broadcast %1303 : vector<8x1xf32> to vector<8x8xf32>
    %1305 = arith.subf %1301, %1304 : vector<8x8xf32>
    %1306 = math.exp %1305 : vector<8x8xf32>
    %cst_405 = arith.constant dense<0.000000e+00> : vector<8xf32>
    %1307 = vector.multi_reduction <add>, %1306, %cst_405 [1] : vector<8x8xf32> to vector<8xf32>
    %1308 = vector.shape_cast %1307 : vector<8xf32> to vector<8x1xf32>
    %1309 = vector.broadcast %1308 : vector<8x1xf32> to vector<8x8xf32>
    %1310 = arith.divf %1306, %1309 : vector<8x8xf32>
    %1311 = arith.truncf %1310 : vector<8x8xf32> to vector<8x8xbf16>
    %1312 = vector.extract_strided_slice %1234 {offsets = [0, 24], sizes = [8, 8], strides = [1, 1]} : vector<8x32xbf16> to vector<8x8xbf16>
    %cst_406 = arith.constant dense<0.000000e+00> : vector<8x8xf32>
    %1313 = tpu.matmul %1311, %1312, %cst_406 {dimension_numbers = #tpu.dot_dimension_numbers<[1], [0], [0], [1], [0, 0, 1, 1], [], []>} : vector<8x8xbf16>, vector<8x8xbf16>, vector<8x8xf32> -> vector<8x8xf32>
    %1314 = arith.truncf %1313 : vector<8x8xf32> to vector<8x8xbf16>
    %1315 = vector.extract_strided_slice %1141 {offsets = [24, 0], sizes = [8, 32], strides = [1, 1]} : vector<32x32xbf16> to vector<8x32xbf16>
    %cst_407 = arith.constant dense<0.000000e+00> : vector<8x32xf32>
    %1316 = tpu.matmul %1314, %1315, %cst_407 {dimension_numbers = #tpu.dot_dimension_numbers<[1], [0], [0], [1], [0, 0, 1, 1], [], []>} : vector<8x8xbf16>, vector<8x32xbf16>, vector<8x32xf32> -> vector<8x32xf32>
    %1317 = arith.addf %1296, %1316 : vector<8x32xf32>
    %1318 = tpu.concatenate %1229, %1317 in 0 : vector<8x32xf32>, vector<8x32xf32> -> vector<16x32xf32>
    %1319 = arith.addf %1116, %1318 : vector<16x32xf32>
    %c1_408 = arith.constant 1 : index
    %c0_409 = arith.constant 0 : index
    %c0_410 = arith.constant 0 : index
    %1320 = vector.load %arg20[%c1_408, %c0_409, %c0_410] : memref<2x1x32xf32, #tpu.memory_space<vmem>>, vector<1x1x32xf32>
    %1321 = vector.shape_cast %1320 : vector<1x1x32xf32> to vector<1x32xf32>
    %1322 = arith.mulf %1319, %1319 : vector<16x32xf32>
    %cst_411 = arith.constant dense<0.000000e+00> : vector<16xf32>
    %1323 = vector.multi_reduction <add>, %1322, %cst_411 [1] : vector<16x32xf32> to vector<16xf32>
    %1324 = vector.shape_cast %1323 : vector<16xf32> to vector<16x1xf32>
    %cst_412 = arith.constant 3.200000e+01 : f32
    %1325 = vector.broadcast %cst_412 : f32 to vector<16x1xf32>
    %1326 = arith.divf %1324, %1325 : vector<16x1xf32>
    %cst_413 = arith.constant 9.99999997E-7 : f32
    %1327 = vector.broadcast %cst_413 : f32 to vector<16x1xf32>
    %1328 = arith.addf %1326, %1327 : vector<16x1xf32>
    %1329 = math.rsqrt %1328 : vector<16x1xf32>
    %1330 = vector.broadcast %1329 : vector<16x1xf32> to vector<16x32xf32>
    %1331 = arith.mulf %1319, %1330 : vector<16x32xf32>
    %1332 = vector.broadcast %1321 : vector<1x32xf32> to vector<16x32xf32>
    %1333 = arith.mulf %1331, %1332 : vector<16x32xf32>
    %c1_414 = arith.constant 1 : index
    %c0_415 = arith.constant 0 : index
    %c0_416 = arith.constant 0 : index
    %1334 = vector.load %arg21[%c1_414, %c0_415, %c0_416] : memref<2x32x64xbf16, #tpu.memory_space<vmem>>, vector<1x32x64xbf16>
    %1335 = vector.shape_cast %1334 : vector<1x32x64xbf16> to vector<32x64xbf16>
    %1336 = arith.truncf %1333 : vector<16x32xf32> to vector<16x32xbf16>
    %cst_417 = arith.constant dense<0.000000e+00> : vector<16x64xf32>
    %1337 = tpu.matmul %1336, %1335, %cst_417 {dimension_numbers = #tpu.dot_dimension_numbers<[1], [0], [0], [1], [0, 0, 1, 1], [], []>} : vector<16x32xbf16>, vector<32x64xbf16>, vector<16x64xf32> -> vector<16x64xf32>
    %cst_418 = arith.constant 0.000000e+00 : f32
    %1338 = vector.broadcast %cst_418 : f32 to vector<16x64xf32>
    %1339 = arith.maximumf %1337, %1338 : vector<16x64xf32>
    %c1_419 = arith.constant 1 : index
    %c0_420 = arith.constant 0 : index
    %c0_421 = arith.constant 0 : index
    %1340 = vector.load %arg22[%c1_419, %c0_420, %c0_421] : memref<2x64x32xbf16, #tpu.memory_space<vmem>>, vector<1x64x32xbf16>
    %1341 = vector.shape_cast %1340 : vector<1x64x32xbf16> to vector<64x32xbf16>
    %1342 = arith.truncf %1339 : vector<16x64xf32> to vector<16x64xbf16>
    %cst_422 = arith.constant dense<0.000000e+00> : vector<16x32xf32>
    %1343 = tpu.matmul %1342, %1341, %cst_422 {dimension_numbers = #tpu.dot_dimension_numbers<[1], [0], [0], [1], [0, 0, 1, 1], [], []>} : vector<16x64xbf16>, vector<64x32xbf16>, vector<16x32xf32> -> vector<16x32xf32>
    %1344 = arith.addf %1319, %1343 : vector<16x32xf32>
    %c0_423 = arith.constant 0 : index
    %c0_424 = arith.constant 0 : index
    %1345 = vector.load %arg23[%c0_423, %c0_424] : memref<1x32xf32, #tpu.memory_space<vmem>>, vector<1x32xf32>
    %1346 = arith.mulf %1344, %1344 : vector<16x32xf32>
    %cst_425 = arith.constant dense<0.000000e+00> : vector<16xf32>
    %1347 = vector.multi_reduction <add>, %1346, %cst_425 [1] : vector<16x32xf32> to vector<16xf32>
    %1348 = vector.shape_cast %1347 : vector<16xf32> to vector<16x1xf32>
    %cst_426 = arith.constant 3.200000e+01 : f32
    %1349 = vector.broadcast %cst_426 : f32 to vector<16x1xf32>
    %1350 = arith.divf %1348, %1349 : vector<16x1xf32>
    %cst_427 = arith.constant 9.99999997E-7 : f32
    %1351 = vector.broadcast %cst_427 : f32 to vector<16x1xf32>
    %1352 = arith.addf %1350, %1351 : vector<16x1xf32>
    %1353 = math.rsqrt %1352 : vector<16x1xf32>
    %1354 = vector.broadcast %1353 : vector<16x1xf32> to vector<16x32xf32>
    %1355 = arith.mulf %1344, %1354 : vector<16x32xf32>
    %1356 = vector.broadcast %1345 : vector<1x32xf32> to vector<16x32xf32>
    %1357 = arith.mulf %1355, %1356 : vector<16x32xf32>
    %cst_428 = arith.constant 0.176776692 : f32
    %1358 = vector.broadcast %cst_428 : f32 to vector<16x32xf32>
    %1359 = arith.mulf %1357, %1358 : vector<16x32xf32>
    %1360 = arith.truncf %1359 : vector<16x32xf32> to vector<16x32xbf16>
    %c0_429 = arith.constant 0 : index
    %c0_430 = arith.constant 0 : index
    %1361 = vector.load %arg24[%c0_429, %c0_430] : memref<64x32xbf16, #tpu.memory_space<vmem>>, vector<64x32xbf16>
    %cst_431 = arith.constant dense<0.000000e+00> : vector<16x64xf32>
    %1362 = tpu.matmul %1360, %1361, %cst_431 {dimension_numbers = #tpu.dot_dimension_numbers<[1], [1], [0], [0], [0, 0, 1, 0], [], []>} : vector<16x32xbf16>, vector<64x32xbf16>, vector<16x64xf32> -> vector<16x64xf32>
    %c0_432 = arith.constant 0 : index
    %c0_433 = arith.constant 0 : index
    %1363 = vector.load %arg5[%c0_432, %c0_433] : memref<16x1xi32, #tpu.memory_space<vmem>>, vector<16x1xi32>
    %cst_434 = arith.constant dense<0xFF800000> : vector<16xf32>
    %1364 = vector.multi_reduction <maximumf>, %1362, %cst_434 [1] : vector<16x64xf32> to vector<16xf32>
    %1365 = vector.shape_cast %1364 : vector<16xf32> to vector<16x1xf32>
    %1366 = vector.broadcast %1365 : vector<16x1xf32> to vector<16x64xf32>
    %1367 = arith.subf %1362, %1366 : vector<16x64xf32>
    %1368 = math.exp %1367 : vector<16x64xf32>
    %cst_435 = arith.constant dense<0.000000e+00> : vector<16xf32>
    %1369 = vector.multi_reduction <add>, %1368, %cst_435 [1] : vector<16x64xf32> to vector<16xf32>
    %1370 = vector.shape_cast %1369 : vector<16xf32> to vector<16x1xf32>
    %1371 = math.log %1370 : vector<16x1xf32>
    %1372 = arith.addf %1371, %1365 : vector<16x1xf32>
    %1373 = tpu.iota {dimensions = array<i32: 1>} : vector<16x64xi32>
    %1374 = vector.broadcast %1363 : vector<16x1xi32> to vector<16x64xi32>
    %1375 = arith.cmpi eq, %1373, %1374 : vector<16x64xi32>
    %cst_436 = arith.constant 0.000000e+00 : f32
    %1376 = vector.broadcast %cst_436 : f32 to vector<16x64xf32>
    %1377 = arith.select %1375, %1362, %1376 : vector<16x64xi1>, vector<16x64xf32>
    %cst_437 = arith.constant dense<0.000000e+00> : vector<16xf32>
    %1378 = vector.multi_reduction <add>, %1377, %cst_437 [1] : vector<16x64xf32> to vector<16xf32>
    %1379 = vector.shape_cast %1378 : vector<16xf32> to vector<16x1xf32>
    %c-100_i32 = arith.constant -100 : i32
    %1380 = vector.broadcast %c-100_i32 : i32 to vector<16x1xi32>
    %1381 = arith.cmpi ne, %1363, %1380 : vector<16x1xi32>
    %1382 = arith.extui %1381 : vector<16x1xi1> to vector<16x1xi32>
    %1383 = arith.sitofp %1382 : vector<16x1xi32> to vector<16x1xf32>
    %1384 = arith.subf %1372, %1379 : vector<16x1xf32>
    %1385 = arith.mulf %1384, %1383 : vector<16x1xf32>
    %cst_438 = arith.constant dense<0.000000e+00> : vector<1xf32>
    %1386 = vector.multi_reduction <add>, %1385, %cst_438 [0] : vector<16x1xf32> to vector<1xf32>
    %1387 = vector.shape_cast %1386 : vector<1xf32> to vector<1x1xf32>
    %cst_439 = arith.constant dense<0.000000e+00> : vector<1xf32>
    %1388 = vector.multi_reduction <add>, %1383, %cst_439 [0] : vector<16x1xf32> to vector<1xf32>
    %1389 = vector.shape_cast %1388 : vector<1xf32> to vector<1x1xf32>
    %1390 = arith.divf %1387, %1389 : vector<1x1xf32>
    %c0_440 = arith.constant 0 : index
    %c0_441 = arith.constant 0 : index
    %1391 = vector.load %arg25[%c0_440, %c0_441] : memref<1x1xf32, #tpu.memory_space<vmem>>, vector<1x1xf32>
    tpu.vector_store %arg25[%c0_440, %c0_441], %1390 {strides = array<i32>} : memref<1x1xf32, #tpu.memory_space<vmem>>, vector<1x1xf32>,
    return
  }
}

</mosaic_0001>

<bundles_post_ra>
// kernel: t5_forward_loss.1
= control target key start
LH: loop header
LB: loop body
LE: loop exit
PB: predicated region body
PF: predicated region fallthrough
CT: control target
= control target key end

     0   :  { %s13262_s0 = inlined_call_operand.vmem [shape: bf16[16,32], index: 0, kind: input, shape index: {}]   ;;  %s13263_s1 = inlined_call_operand.vmem [shape: bf16[16,32], index: 1, kind: input, shape index: {}]   ;;  %s13264_s2 = inlined_call_operand.vmem [shape: f32[2,4,8,8], index: 2, kind: input, shape index: {}]   ;;  %s13265_s3 = inlined_call_operand.vmem [shape: f32[4,8,8], index: 3, kind: input, shape index: {}]   ;;  %s13266_s4 = inlined_call_operand.vmem [shape: f32[2,1,8], index: 4, kind: input, shape index: {}]   ;;  %s13267_s5 = inlined_call_operand.vmem [shape: s32[16,1], index: 5, kind: input, shape index: {}]   ;;  %s13268_s6 = inlined_call_operand.vmem [shape: f32[2,1,32], index: 6, kind: input, shape index: {}]   ;;  %s13269_s7 = inlined_call_operand.vmem [shape: bf16[2,32,96], index: 7, kind: input, shape index: {}]   ;;  %s13270_s8 = inlined_call_operand.vmem [shape: bf16[2,32,32], index: 8, kind: input, shape index: {}]   ;;  %s13271_s9 = inlined_call_operand.vmem [shape: f32[2,1,32], index: 9, kind: input, shape index: {}]   ;;  %s13272_s10 = inlined_call_operand.vmem [shape: bf16[2,32,64], index: 10, kind: input, shape index: {}]   ;;  %s13273_s11 = inlined_call_operand.vmem [shape: bf16[2,64,32], index: 11, kind: input, shape index: {}]   ;;  %s13274_s12 = inlined_call_operand.vmem [shape: f32[1,32], index: 12, kind: input, shape index: {}]   ;;  %s13275_s13 = inlined_call_operand.vmem [shape: f32[2,1,32], index: 13, kind: input, shape index: {}]   ;;  %s13276_s14 = inlined_call_operand.vmem [shape: bf16[2,32,96], index: 14, kind: input, shape index: {}]   ;;  %s13277_s15 = inlined_call_operand.vmem [shape: bf16[2,32,32], index: 15, kind: input, shape index: {}]   ;;  %s13278_s16 = inlined_call_operand.vmem [shape: f32[2,1,32], index: 16, kind: input, shape index: {}]   ;;  %s13279_s17 = inlined_call_operand.vmem [shape: bf16[2,32,32], index: 17, kind: input, shape index: {}]   ;;  %s13280_s18 = inlined_call_operand.vmem [shape: bf16[2,32,64], index: 18, kind: input, shape index: {}]   ;;  %s13281_s19 = inlined_call_operand.vmem [shape: bf16[2,32,32], index: 19, kind: input, shape index: {}]   ;;  %s13282_s20 = inlined_call_operand.vmem [shape: f32[2,1,32], index: 20, kind: input, shape index: {}]   ;;  %s13283_s21 = inlined_call_operand.vmem [shape: bf16[2,32,64], index: 21, kind: input, shape index: {}]   ;;  %s13284_s22 = inlined_call_operand.vmem [shape: bf16[2,64,32], index: 22, kind: input, shape index: {}]   ;;  %s13285_s23 = inlined_call_operand.vmem [shape: f32[1,32], index: 23, kind: input, shape index: {}]   ;;  %s13286_s24 = inlined_call_operand.vmem [shape: bf16[64,32], index: 24, kind: input, shape index: {}]   ;;  %s13287_s25 = inlined_call_operand.hbm [shape: f32[1,1], index: 25, kind: output, shape index: {}]  }
   0x1   :  { %13320 = sst [smem:[#allocation5_spill]] %s13262_s0 }
   0x2   :  { %13321 = sst [smem:[#allocation6_spill]] %s13263_s1 }
   0x3   :  { %13322 = sst [smem:[#allocation7_spill]] %s13264_s2 }
   0x4   :  { %13323 = sst [smem:[#allocation8_spill]] %s13265_s3 }
   0x5   :  { %13324 = sst [smem:[#allocation9_spill]] %s13266_s4 }
   0x6   :  { %13325 = sst [smem:[#allocation10_spill]] %s13267_s5 }
   0x7   :  { %13326 = sst [smem:[#allocation11_spill]] %s13268_s6 }
   0x8   :  { %13327 = sst [smem:[#allocation12_spill]] %s13269_s7 }
   0x9   :  { %13328 = sst [smem:[#allocation13_spill]] %s13270_s8 }
   0xa   :  { %13329 = sst [smem:[#allocation14_spill]] %s13271_s9 }
   0xb   :  { %13330 = sst [smem:[#allocation15_spill]] %s13285_s23 }
   0xc   :  { %13331 = sst [smem:[#allocation16_spill]] %s13286_s24 }
   0xd   :  { %13332 = sst [smem:[#allocation17_spill]] %s13287_s25 }
   0xe   :  { %s13333_s6 = sld [smem:[#allocation5_spill]]  ;;  %vm89_vm0 = vcmask 261120   ;;  %s13334_s3 = sld [smem:[#allocation12_spill]]  ;;  %v11186_v9 = vmov 0.0   ;;  %vm11187_vm1 = vmmov 0  }
   0xf   :  { %9825 = vmatprep.subr.bf16.mxu0 %v11186_v9  ;;  %9829 = vmatprep.mubr.msk.bf16.mxu0 %vm11187_vm1, %v11186_v9 }
  0x10   :  { %9845 = vmatprep.subr.bf16.mxu1 %v11186_v9  ;;  %9847 = vmatprep.mubr.msk.bf16.mxu1 %vm11187_vm1, %v11186_v9 }
  0x14   :  { %v9469_v0 = vld [vmem:[%s13333_s6] sm:$0xff]   ;;  %v10863_v8 = vld [vmem:[%s13334_s3 + $0x8] sm:$0xff]  }
  0x15   :  { %v11334_v1 = vunpack.c.l.bf16 %v9469_v0  ;;  %v11336_v2 = vunpack.c.h.bf16 %v9469_v0  ;;  %v10862_v7 = vld [vmem:[%s13334_s3] sm:$0xff]  }
  0x16   :  { %9826 = vmatpush3.bf16.msra.mxu0 %v10862_v7 }
  0x17   :  { %v87_v3 = vmul.f32 %v11334_v1, %v11334_v1  ;;  %v88_v4 = vmul.f32 %v11336_v2, %v11336_v2  ;;  %9827 = vmatprep.subr.bf16.mxu0 %v11186_v9 }
  0x19   :  { %v90_v5 = vsel %vm89_vm0, %v87_v3, 0.0  ;;  %v93_v6 = vsel %vm89_vm0, %v88_v4, 0.0 }
  0x1a   :  { %91 = vadd.xlane.f32.xlu0 %v90_v5 }
  0x1e   :  { %94 = vadd.xlane.f32.xlu0 %v93_v6 }
  0x1f   :  { %30 = vsyncpa [#allocation3], 0  ;;  %9828 = vmatpush3.bf16.msra.mxu0 %v10863_v8  ;;  %s13335_s4 = sld [smem:[#allocation11_spill]]  ;;  %s13300_s28 = smov 120   ;;  %vm186_vm2 = vcmask 64512   ;;  %vm250_vm3 = vcmask 1043456  }
  0x20   :  { %9833 = vmatprep.subr.bf16.mxu0 %v11186_v9  ;;  %s13302_s9 = smov 96   ;;  %s13316_s5 = smov 88   ;;  %vm1559_vm4 = vcmask 523264   ;;  %vm9148_vm8 = vcmask 7168   ;;  %vm9169_vm10 = vcmask 0  }
  0x21   :  { %s13336_s2 = sld [smem:[#allocation7_spill]]  ;;  %s13314_s7 = smov 56  }
  0x22   :  { %s13310_s26 = smov 64   ;;  %s13308_s1 = smov 80  }
  0x23   :  { %s13312_s8 = smov 112   ;;  %s13337_s29 = sld [smem:[#allocation13_spill]] }
  0x24   :  { %s13296_s6 = smov 48   ;;  %s13298_s30 = smov 104  }
  0x25   :  { %v9185_v19 = vld [vmem:[%s13335_s4] ss:$0 sm:$0xff]  ;;  %s13306_s27 = smov 72   ;;  %s13338_s0 = smov 104  }
  0x26   :  { %s13353_s24 = sld [smem:[#allocation16_spill]] }
  0x27   :  { %v11388_v34 = vld [vmem:[%s13336_s2] sm:$0xff]  ;;  %v11394_v39 = vld [vmem:[%s13336_s2 + $0x8] sm:$0xff] }
  0x29   :  { %v175_v8 = vld [vmem:[%s13337_s29] sm:$0xf] }
  0xa7   :  { %v92_v10 = vpop.xlane.xlu0 %91 }
  0xa8   :  { %v97_v11 = vmul.f32 0.03125, %v92_v10  ;;  %v11423_v10 = vsel %vm250_vm3, %v175_v8, 0 }
  0xaa   :  { %v99_v12 = vadd.f32 1e-06, %v97_v11  ;;  %v176_v11 = vld [vmem:[%s13337_s29 + $0x4] sm:$0xf] }
  0xab   :  { %v95_v13 = vpop.xlane.xlu0 %94 }
  0xac   :  { %10906 = vrsqrt.f32 %v99_v12  ;;  %v98_v14 = vmul.f32 0.03125, %v95_v13  ;;  %v11430_v12 = vsel %vm250_vm3, %v176_v11, 0 }
  0xae   :  { %v100_v15 = vadd.f32 1e-06, %v98_v14 }
  0xb0   :  { %10908 = vrsqrt.f32 %v100_v15 }
  0xb6   :  { %v10907_v16 = vpop.eup %10906 }
  0xb7   :  { %v103_v17 = vmul.f32 %v10907_v16, %v11334_v1 }
  0xb9   :  { %v111_v21 = vmul.f32 %v9185_v19, %v103_v17 }
  0xba   :  { %v10909_v18 = vpop.eup %10908 }
  0xbb   :  { %v104_v20 = vmul.f32 %v10909_v18, %v11336_v2 }
  0xbd   :  { %v112_v22 = vmul.f32 %v9185_v19, %v104_v20 }
  0xbf   :  { %v117_v23 = vpack.c.bf16 %v112_v22, %v111_v21 }
  0xc1   :  { %9830 = vmatmul.mubr.msk.bf16.vlgmr.msra.gmra.mrb[0].mxu0 %vm89_vm0, %v117_v23 }
  0xc2   :  { %9835 = vmatprep.mubr.msk.bf16.mxu0 %vm11187_vm1, %v11186_v9 }
 0x194   :  { %v167_v24 = vpop.f32.mrb[0].mxu0 }
 0x195   :  { %v9831_v25 = vpop.f32.mrb[1].mxu0 }
 0x196   :  { %v170_v26 = vpop.f32.mrb[2].mxu0 }
 0x197   :  { %v11366_v27 = vpack.c.bf16 %v170_v26, %v167_v24  ;;  %v9832_v28 = vpop.f32.mrb[3].mxu0 }
 0x199   :  { %295 = vrot.lane.b32.xlu0 %v11366_v27, %s13300_s28  ;;  %184 = vrot.lane.b32.xlu1 %v11366_v27, %s13302_s9 }
 0x19d   :  { %297 = vrot.lane.b32.xlu1 %v11366_v27, %s13316_s5 }
 0x20b   :  { %v185_v29 = vpop.permute.xlu1 %184  ;;  %v296_v33 = vpop.permute.xlu0 %295 }
 0x20c   :  { %v191_v30 = vsel %vm186_vm2, %v185_v29, 0 }
 0x20d   :  { %9834 = vmatpush3.bf16.xpose.msra.mxu0 %v191_v30 }
 0x20e   :  { %9839 = vmatprep.subr.bf16.mxu0 %v11186_v9 }
 0x20f   :  { %v298_v31 = vpop.permute.xlu1 %297 }
 0x210   :  { %v303_v32 = vsel %vm186_vm2, %v298_v31, 0 }
 0x211   :  { %9846 = vmatpush3.bf16.xpose.msra.mxu1 %v303_v32 }
 0x212   :  { %9857 = vmatprep.subr.bf16.mxu1 %v11186_v9 }
 0x214   :  { %9836 = vmatmul.mubr.msk.bf16.vlgmr.msra.gmra.mrb[4].mxu0 %vm186_vm2, %v11366_v27 }
 0x215   :  { %9841 = vmatprep.mubr.msk.bf16.mxu0 %vm11187_vm1, %v11186_v9 }
 0x218   :  { %9848 = vmatmul.mubr.msk.bf16.vlgmr.msra.gmra.mrb[0].mxu1 %vm186_vm2, %v296_v33 }
 0x219   :  { %9859 = vmatprep.mubr.msk.bf16.mxu1 %vm11187_vm1, %v11186_v9  ;;  %9858 = vmatpush3.bf16.msra.mxu1 %v11430_v12 }
 0x21a   :  { %9869 = vmatprep.subr.bf16.mxu1 %v11186_v9 }
 0x2e7   :  { %v227_v35 = vpop.f32.mrb[4].mxu0 }
 0x2e8   :  { %v9837_v36 = vpop.f32.mrb[5].mxu0  ;;  %v228_v37 = vadd.f32 %v227_v35, %v11388_v34 }
 0x2e9   :  { %v230_v38 = vpop.f32.mrb[6].mxu0 }
 0x2ea   :  { %v9838_v40 = vpop.f32.mrb[7].mxu0  ;;  %v233_v41 = vsel %vm186_vm2, %v228_v37, -inf }
 0x2eb   :  { %v339_v42 = vpop.f32.mrb[0].mxu1  ;;  %234 = vmax.xlane.f32.xlu1 %v233_v41 }
 0x2ec   :  { %v9849_v43 = vpop.f32.mrb[1].mxu1  ;;  %v340_v44 = vadd.f32 %v339_v42, %v11394_v39 }
 0x2ed   :  { %v342_v45 = vpop.f32.mrb[2].mxu1 }
 0x2ee   :  { %v9850_v46 = vpop.f32.mrb[3].mxu1  ;;  %v345_v47 = vsel %vm186_vm2, %v340_v44, -inf }
 0x2ef   :  { %346 = vmax.xlane.f32.xlu0 %v345_v47 }
 0x305   :  { %357 = vrot.lane.b32.xlu0 %v11366_v27, %s13314_s7 }
 0x378   :  { %v235_v48 = vpop.xlane.xlu1 %234 }
 0x379   :  { %v236_v49 = vsub.f32 %v228_v37, %v235_v48  ;;  %v11451_v37 = vld [vmem:[%s13336_s2 + $0x10] sm:$0xff] }
 0x37b   :  { %v237_v50 = vmul.f32 1.442695, %v236_v49 }
 0x37c   :  { %v347_v51 = vpop.xlane.xlu0 %346 }
 0x37d   :  { %10910 = vpow2.f32 %v237_v50  ;;  %v348_v52 = vsub.f32 %v340_v44, %v347_v51 }
 0x37f   :  { %v349_v53 = vmul.f32 1.442695, %v348_v52 }
 0x380   :  { %v358_v0 = vpop.permute.xlu0 %357 }
 0x381   :  { %10912 = vpow2.f32 %v349_v53  ;;  %v363_v5 = vsel %vm250_vm3, %v358_v0, 0 }
 0x387   :  { %v10911_v54 = vpop.eup %10910 }
 0x388   :  { %v239_v55 = vsel %vm186_vm2, %v10911_v54, 0.0 }
 0x389   :  { %240 = vadd.xlane.f32.xlu1 %v239_v55 }
 0x38b   :  { %v10913_v56 = vpop.eup %10912 }
 0x38c   :  { %v351_v57 = vsel %vm186_vm2, %v10913_v56, 0.0 }
 0x38d   :  { %352 = vadd.xlane.f32.xlu1 %v351_v57 }
 0x39e   :  { %245 = vrot.lane.b32.xlu1 %v11366_v27, %s13310_s26 }
 0x3a2   :  { %500 = vrot.lane.b32.xlu1 %v11366_v27, %s13308_s1 }
 0x3a6   :  { %498 = vrot.lane.b32.xlu1 %v11366_v27, %s13312_s8 }
 0x416   :  { %v241_v58 = vpop.xlane.xlu1 %240 }
 0x417   :  { %10914 = vrcp.f32 %v241_v58 }
 0x41a   :  { %v353_v59 = vpop.xlane.xlu1 %352 }
 0x41b   :  { %10916 = vrcp.f32 %v353_v59  ;;  %v177_v59 = vld [vmem:[%s13337_s29 + $0x8] sm:$0xf] }
 0x41e   :  { %v246_v60 = vpop.permute.xlu1 %245 }
 0x41f   :  { %v252_v61 = vsel %vm250_vm3, %v246_v60, 0  ;;  %v11476_v60 = vsel %vm250_vm3, %v177_v59, 0 }
 0x420   :  { %9840 = vmatpush3.bf16.msra.mxu0 %v252_v61 }
 0x421   :  { %v10915_v62 = vpop.eup %10914  ;;  %9851 = vmatprep.subr.bf16.mxu0 %v11186_v9 }
 0x422   :  { %v243_v63 = vmul.f32 %v10915_v62, %v10911_v54  ;;  %v501_v18 = vpop.permute.xlu1 %500 }
 0x423   :  { %v506_v23 = vsel %vm186_vm2, %v501_v18, 0 }
 0x424   :  { %v244_v3 = vpack.c.bf16 %v243_v63, %v243_v63 }
 0x425   :  { %v10917_v4 = vpop.eup %10916 }
 0x426   :  { %9842 = vmatmul.mubr.msk.bf16.vlgmr.msra.gmra.mrb[8].mxu0 %vm186_vm2, %v244_v3  ;;  %v355_v6 = vmul.f32 %v10917_v4, %v10913_v56  ;;  %v499_v25 = vpop.permute.xlu1 %498  ;;  %v11486_v4 = vld [vmem:[%s13336_s2 + $0x18] sm:$0xff] }
 0x427   :  { %9852 = vmatpush3.bf16.msra.mxu0 %v363_v5  ;;  %9853 = vmatprep.mubr.msk.bf16.mxu0 %vm11187_vm1, %v11186_v9 }
 0x428   :  { %9863 = vmatprep.subr.bf16.mxu0 %v11186_v9  ;;  %v356_v7 = vpack.c.bf16 %v355_v6, %v355_v6 }
 0x42e   :  { %9854 = vmatmul.mubr.msk.bf16.vlgmr.msra.gmra.mrb[12].mxu0 %vm186_vm2, %v356_v7 }
 0x42f   :  { %9865 = vmatprep.mubr.msk.bf16.mxu0 %vm11187_vm1, %v11186_v9  ;;  %9864 = vmatpush3.bf16.msra.mxu0 %v11423_v10 }
 0x430   :  { %9875 = vmatprep.subr.bf16.mxu0 %v11186_v9 }
 0x4f9   :  { %v288_v13 = vpop.f32.mrb[8].mxu0 }
 0x4fa   :  { %v294_v14 = vpack.c.bf16 %v288_v13, %v288_v13  ;;  %v9843_v15 = vpop.f32.mrb[9].mxu0 }
 0x4fb   :  { %v291_v16 = vpop.f32.mrb[10].mxu0 }
 0x4fc   :  { %v9844_v17 = vpop.f32.mrb[11].mxu0  ;;  %9866 = vmatmul.mubr.msk.bf16.vlgmr.msra.gmra.mrb[16].mxu0 %vm186_vm2, %v294_v14  ;;  %v11491_v14 = vrot.slane %v11366_v27, 4 }
 0x4fd   :  { %9877 = vmatprep.mubr.msk.bf16.mxu0 %vm11187_vm1, %v11186_v9 }
 0x501   :  { %v399_v19 = vpop.f32.mrb[12].mxu0 }
 0x502   :  { %v405_v20 = vpack.c.bf16 %v399_v19, %v399_v19  ;;  %v9855_v21 = vpop.f32.mrb[13].mxu0 }
 0x503   :  { %v402_v22 = vpop.f32.mrb[14].mxu0 }
 0x504   :  { %v9856_v24 = vpop.f32.mrb[15].mxu0  ;;  %9860 = vmatmul.mubr.msk.bf16.vlgmr.msra.gmra.mrb[4].mxu1 %vm186_vm2, %v405_v20 }
 0x505   :  { %9870 = vmatpush3.bf16.xpose.msra.mxu1 %v506_v23  ;;  %9871 = vmatprep.mubr.msk.bf16.mxu1 %vm11187_vm1, %v11186_v9 }
 0x506   :  { %9881 = vmatprep.subr.bf16.mxu1 %v11186_v9 }
 0x50c   :  { %9872 = vmatmul.mubr.msk.bf16.vlgmr.msra.gmra.mrb[8].mxu1 %vm186_vm2, %v499_v25 }
 0x50d   :  { %9883 = vmatprep.mubr.msk.bf16.mxu1 %vm11187_vm1, %v11186_v9  ;;  %9882 = vmatpush3.bf16.msra.mxu1 %v11476_v60 }
 0x50e   :  { %9893 = vmatprep.subr.bf16.mxu1 %v11186_v9 }
 0x5cf   :  { %v492_v26 = vpop.f32.mrb[16].mxu0 }
 0x5d0   :  { %v9867_v28 = vpop.f32.mrb[17].mxu0 }
 0x5d1   :  { %v495_v29 = vpop.f32.mrb[18].mxu0 }
 0x5d2   :  { %v9868_v30 = vpop.f32.mrb[19].mxu0 }
 0x5d7   :  { %v446_v31 = vpop.f32.mrb[4].mxu1 }
 0x5d8   :  { %v11446_v32 = vadd.f32 %v492_v26, %v446_v31  ;;  %v9861_v33 = vpop.f32.mrb[5].mxu1 }
 0x5d9   :  { %v449_v35 = vpop.f32.mrb[6].mxu1 }
 0x5da   :  { %v9862_v36 = vpop.f32.mrb[7].mxu1 }
 0x5df   :  { %v542_v38 = vpop.f32.mrb[8].mxu1 }
 0x5e0   :  { %v9873_v40 = vpop.f32.mrb[9].mxu1  ;;  %v543_v41 = vadd.f32 %v542_v38, %v11451_v37  ;;  %v178_v38 = vld [vmem:[%s13337_s29 + $0xc] sm:$0xf] }
 0x5e1   :  { %v545_v42 = vpop.f32.mrb[10].mxu1  ;;  %v11527_v40 = vsel %vm250_vm3, %v178_v38, 0 }
 0x5e2   :  { %v9874_v43 = vpop.f32.mrb[11].mxu1  ;;  %v548_v44 = vsel %vm186_vm2, %v543_v41, -inf }
 0x5e3   :  { %549 = vmax.xlane.f32.xlu1 %v548_v44 }
 0x5f4   :  { %560 = vrot.lane.b32.xlu1 %v11366_v27, %s13296_s6  ;;  %s13339_s6 = smov 48  }
 0x5f8   :  { %656 = vrot.lane.b32.xlu1 %v11366_v27, %s13298_s30  ;;  %s13304_s30 = smov 40  }
 0x670   :  { %v550_v45 = vpop.xlane.xlu1 %549 }
 0x671   :  { %v551_v46 = vsub.f32 %v543_v41, %v550_v45  ;;  %v11537_v45 = vld [vmem:[%s13336_s2 + $0x20] sm:$0xff] }
 0x673   :  { %v552_v47 = vmul.f32 1.442695, %v551_v46 }
 0x674   :  { %v561_v48 = vpop.permute.xlu1 %560 }
 0x675   :  { %10918 = vpow2.f32 %v552_v47  ;;  %v566_v49 = vsel %vm250_vm3, %v561_v48, 0 }
 0x676   :  { %9876 = vmatpush3.bf16.msra.mxu0 %v566_v49 }
 0x677   :  { %9887 = vmatprep.subr.bf16.mxu0 %v11186_v9 }
 0x678   :  { %v657_v58 = vpop.permute.xlu1 %656 }
 0x67f   :  { %v10919_v50 = vpop.eup %10918 }
 0x680   :  { %v554_v51 = vsel %vm186_vm2, %v10919_v50, 0.0 }
 0x681   :  { %555 = vadd.xlane.f32.xlu0 %v554_v51 }
 0x697   :  { %658 = vrot.lane.b32.xlu0 %v11366_v27, %s13306_s27 }
 0x70e   :  { %v556_v52 = vpop.xlane.xlu0 %555 }
 0x70f   :  { %10920 = vrcp.f32 %v556_v52  ;;  %v11544_v52 = vld [vmem:[%s13336_s2 + $0x28] sm:$0xff] }
 0x712   :  { %v659_v55 = vpop.permute.xlu0 %658 }
 0x713   :  { %v664_v57 = vsel %vm186_vm2, %v659_v55, 0 }
 0x719   :  { %v10921_v53 = vpop.eup %10920 }
 0x71a   :  { %v558_v54 = vmul.f32 %v10921_v53, %v10919_v50 }
 0x71c   :  { %v559_v56 = vpack.c.bf16 %v558_v54, %v558_v54 }
 0x71e   :  { %9878 = vmatmul.mubr.msk.bf16.vlgmr.msra.gmra.mrb[20].mxu0 %vm186_vm2, %v559_v56 }
 0x71f   :  { %9888 = vmatpush3.bf16.xpose.msra.mxu0 %v664_v57  ;;  %9889 = vmatprep.mubr.msk.bf16.mxu0 %vm11187_vm1, %v11186_v9 }
 0x720   :  { %9899 = vmatprep.subr.bf16.mxu0 %v11186_v9 }
 0x726   :  { %9890 = vmatmul.mubr.msk.bf16.vlgmr.msra.gmra.mrb[24].mxu0 %vm186_vm2, %v657_v58 }
 0x727   :  { %9901 = vmatprep.mubr.msk.bf16.mxu0 %vm11187_vm1, %v11186_v9  ;;  %9900 = vmatpush3.bf16.msra.mxu0 %v11527_v40 }
 0x728   :  { %9911 = vmatprep.subr.bf16.mxu0 %v11186_v9 }
 0x7f1   :  { %v602_v61 = vpop.f32.mrb[20].mxu0 }
 0x7f2   :  { %v608_v62 = vpack.c.bf16 %v602_v61, %v602_v61  ;;  %v9879_v63 = vpop.f32.mrb[21].mxu0 }
 0x7f3   :  { %v605_v0 = vpop.f32.mrb[22].mxu0 }
 0x7f4   :  { %v9880_v3 = vpop.f32.mrb[23].mxu0  ;;  %9884 = vmatmul.mubr.msk.bf16.vlgmr.msra.gmra.mrb[12].mxu1 %vm186_vm2, %v608_v62 }
 0x7f5   :  { %9895 = vmatprep.mubr.msk.bf16.mxu1 %vm11187_vm1, %v11186_v9 }
 0x7f9   :  { %v700_v5 = vpop.f32.mrb[24].mxu0 }
 0x7fa   :  { %v9891_v6 = vpop.f32.mrb[25].mxu0  ;;  %v701_v7 = vadd.f32 %v700_v5, %v11486_v4 }
 0x7fb   :  { %v703_v8 = vpop.f32.mrb[26].mxu0 }
 0x7fc   :  { %v9892_v11 = vpop.f32.mrb[27].mxu0  ;;  %v706_v13 = vsel %vm186_vm2, %v701_v7, -inf }
 0x7fd   :  { %707 = vmax.xlane.f32.xlu1 %v706_v13 }
 0x80e   :  { %820 = vrot.lane.b32.xlu1 %v11491_v14, %s13302_s9  ;;  %s13344_s9 = smov 64  }
 0x812   :  { %931 = vrot.lane.b32.xlu1 %v11491_v14, %s13316_s5 }
 0x88a   :  { %v708_v15 = vpop.xlane.xlu1 %707 }
 0x88b   :  { %v709_v16 = vsub.f32 %v701_v7, %v708_v15 }
 0x88d   :  { %v710_v17 = vmul.f32 1.442695, %v709_v16 }
 0x88e   :  { %v821_v30 = vpop.permute.xlu1 %820 }
 0x88f   :  { %10922 = vpow2.f32 %v710_v17  ;;  %v826_v33 = vsel %vm186_vm2, %v821_v30, 0 }
 0x899   :  { %v10923_v18 = vpop.eup %10922 }
 0x89a   :  { %v712_v19 = vsel %vm186_vm2, %v10923_v18, 0.0 }
 0x89b   :  { %713 = vadd.xlane.f32.xlu0 %v712_v19 }
 0x8b1   :  { %718 = vrot.lane.b32.xlu0 %v11366_v27, %s13304_s30 }
 0x8b5   :  { %929 = vrot.lane.b32.xlu0 %v11491_v14, %s13300_s28  ;;  %s13343_s28 = smov 112  }
 0x8c7   :  { %v649_v20 = vpop.f32.mrb[12].mxu1 }
 0x8c8   :  { %v11503_v21 = vadd.f32 %v649_v20, %v11446_v32  ;;  %v9885_v22 = vpop.f32.mrb[13].mxu1  ;;  %v932_v32 = vpop.permute.xlu1 %931 }
 0x8c9   :  { %v652_v23 = vpop.f32.mrb[14].mxu1  ;;  %v937_v35 = vsel %vm186_vm2, %v932_v32, 0 }
 0x8ca   :  { %v9886_v24 = vpop.f32.mrb[15].mxu1 }
 0x928   :  { %v714_v25 = vpop.xlane.xlu0 %713 }
 0x929   :  { %10924 = vrcp.f32 %v714_v25 }
 0x92c   :  { %v719_v26 = vpop.permute.xlu0 %718 }
 0x92d   :  { %v724_v28 = vsel %vm250_vm3, %v719_v26, 0 }
 0x92e   :  { %9894 = vmatpush3.bf16.msra.mxu1 %v724_v28 }
 0x92f   :  { %9905 = vmatprep.subr.bf16.mxu1 %v11186_v9 }
 0x930   :  { %v930_v36 = vpop.permute.xlu0 %929 }
 0x933   :  { %v10925_v29 = vpop.eup %10924 }
 0x934   :  { %v716_v27 = vmul.f32 %v10925_v29, %v10923_v18 }
 0x936   :  { %v717_v31 = vpack.c.bf16 %v716_v27, %v716_v27 }
 0x938   :  { %9896 = vmatmul.mubr.msk.bf16.vlgmr.msra.gmra.mrb[16].mxu1 %vm186_vm2, %v717_v31 }
 0x939   :  { %9906 = vmatpush3.bf16.xpose.msra.mxu1 %v826_v33  ;;  %9907 = vmatprep.mubr.msk.bf16.mxu1 %vm11187_vm1, %v11186_v9 }
 0x93a   :  { %9917 = vmatprep.subr.bf16.mxu1 %v11186_v9 }
 0x940   :  { %9908 = vmatmul.mubr.msk.bf16.vlgmr.msra.gmra.mrb[20].mxu1 %vm186_vm2, %v11491_v14 }
 0x941   :  { %9918 = vmatpush3.bf16.xpose.msra.mxu1 %v937_v35  ;;  %9919 = vmatprep.mubr.msk.bf16.mxu1 %vm11187_vm1, %v11186_v9 }
 0x942   :  { %9929 = vmatprep.subr.bf16.mxu1 %v11186_v9 }
 0x948   :  { %9920 = vmatmul.mubr.msk.bf16.vlgmr.msra.gmra.mrb[24].mxu1 %vm186_vm2, %v930_v36 }
 0x949   :  { %9930 = vmatpush3.bf16.msra.mxu1 %v11430_v12  ;;  %9931 = vmatprep.mubr.msk.bf16.mxu1 %vm11187_vm1, %v11186_v9 }
 0x94a   :  { %9941 = vmatprep.subr.bf16.mxu1 %v11186_v9 }
 0xa0b   :  { %v760_v41 = vpop.f32.mrb[16].mxu1 }
 0xa0c   :  { %v766_v42 = vpack.c.bf16 %v760_v41, %v760_v41  ;;  %v9897_v43 = vpop.f32.mrb[17].mxu1 }
 0xa0d   :  { %v763_v12 = vpop.f32.mrb[18].mxu1 }
 0xa0e   :  { %v9898_v44 = vpop.f32.mrb[19].mxu1  ;;  %9902 = vmatmul.mubr.msk.bf16.vlgmr.msra.gmra.mrb[28].mxu0 %vm186_vm2, %v766_v42 }
 0xa0f   :  { %9913 = vmatprep.mubr.msk.bf16.mxu0 %vm11187_vm1, %v11186_v9 }
 0xa13   :  { %v862_v46 = vpop.f32.mrb[20].mxu1 }
 0xa14   :  { %v9909_v47 = vpop.f32.mrb[21].mxu1  ;;  %v863_v48 = vadd.f32 %v11537_v45, %v862_v46 }
 0xa15   :  { %v865_v49 = vpop.f32.mrb[22].mxu1 }
 0xa16   :  { %v9910_v50 = vpop.f32.mrb[23].mxu1  ;;  %v868_v51 = vsel %vm186_vm2, %v863_v48, -inf }
 0xa17   :  { %869 = vmax.xlane.f32.xlu1 %v868_v51 }
 0xa1b   :  { %v973_v53 = vpop.f32.mrb[24].mxu1 }
 0xa1c   :  { %v9921_v54 = vpop.f32.mrb[25].mxu1  ;;  %v974_v55 = vadd.f32 %v11544_v52, %v973_v53 }
 0xa1d   :  { %v976_v56 = vpop.f32.mrb[26].mxu1 }
 0xa1e   :  { %v9922_v57 = vpop.f32.mrb[27].mxu1  ;;  %v979_v58 = vsel %vm186_vm2, %v974_v55, -inf  ;;  %v11591_v56 = vld [vmem:[%s13336_s2 + $0x30] sm:$0xff] }
 0xa1f   :  { %980 = vmax.xlane.f32.xlu0 %v979_v58 }
 0xaa4   :  { %v870_v59 = vpop.xlane.xlu1 %869 }
 0xaa5   :  { %v871_v61 = vsub.f32 %v863_v48, %v870_v59 }
 0xaa7   :  { %v872_v62 = vmul.f32 1.442695, %v871_v61 }
 0xaa9   :  { %10926 = vpow2.f32 %v872_v62 }
 0xaac   :  { %v981_v63 = vpop.xlane.xlu0 %980 }
 0xaad   :  { %v982_v0 = vsub.f32 %v974_v55, %v981_v63 }
 0xaaf   :  { %v983_v3 = vmul.f32 1.442695, %v982_v0 }
 0xab1   :  { %10928 = vpow2.f32 %v983_v3 }
 0xab3   :  { %v10927_v5 = vpop.eup %10926 }
 0xab4   :  { %v874_v6 = vsel %vm186_vm2, %v10927_v5, 0.0 }
 0xab5   :  { %875 = vadd.xlane.f32.xlu0 %v874_v6 }
 0xabb   :  { %v10929_v7 = vpop.eup %10928 }
 0xabc   :  { %v985_v8 = vsel %vm186_vm2, %v10929_v7, 0.0 }
 0xabd   :  { %986 = vadd.xlane.f32.xlu1 %v985_v8 }
 0xacb   :  { %880 = vrot.lane.b32.xlu0 %v11491_v14, %s13310_s26  ;;  %s13346_s26 = smov 72  }
 0xace   :  { %991 = vrot.lane.b32.xlu1 %v11491_v14, %s13314_s7 }
 0xacf   :  { %1126 = vrot.lane.b32.xlu0 %v11491_v14, %s13312_s8  ;;  %s13340_s8 = sld [smem:[#allocation14_spill]] }
 0xad2   :  { %1128 = vrot.lane.b32.xlu1 %v11491_v14, %s13308_s1  ;;  %s13345_s1 = smov 80  }
 0xae1   :  { %v807_v11 = vpop.f32.mrb[28].mxu0 }
 0xae2   :  { %v11559_v13 = vadd.f32 %v807_v11, %v11503_v21  ;;  %v9903_v15 = vpop.f32.mrb[29].mxu0 }
 0xae3   :  { %v810_v16 = vpop.f32.mrb[30].mxu0 }
 0xae4   :  { %v9904_v17 = vpop.f32.mrb[31].mxu0 }
 0xb42   :  { %v876_v18 = vpop.xlane.xlu0 %875 }
 0xb43   :  { %10930 = vrcp.f32 %v876_v18 }
 0xb46   :  { %v881_v19 = vpop.permute.xlu0 %880 }
 0xb47   :  { %v886_v20 = vsel %vm250_vm3, %v881_v19, 0 }
 0xb48   :  { %9912 = vmatpush3.bf16.msra.mxu0 %v886_v20 }
 0xb49   :  { %9923 = vmatprep.subr.bf16.mxu0 %v11186_v9 }
 0xb4a   :  { %v987_v22 = vpop.xlane.xlu1 %986  ;;  %v1127_v44 = vpop.permute.xlu0 %1126 }
 0xb4b   :  { %10932 = vrcp.f32 %v987_v22 }
 0xb4d   :  { %v10931_v23 = vpop.eup %10930 }
 0xb4e   :  { %v878_v24 = vmul.f32 %v10931_v23, %v10927_v5  ;;  %v992_v25 = vpop.permute.xlu1 %991 }
 0xb4f   :  { %v997_v21 = vsel %vm250_vm3, %v992_v25, 0 }
 0xb50   :  { %v879_v26 = vpack.c.bf16 %v878_v24, %v878_v24 }
 0xb52   :  { %9914 = vmatmul.mubr.msk.bf16.vlgmr.msra.gmra.mrb[32].mxu0 %vm186_vm2, %v879_v26  ;;  %v1129_v36 = vpop.permute.xlu1 %1128 }
 0xb53   :  { %9924 = vmatpush3.bf16.msra.mxu0 %v997_v21  ;;  %9925 = vmatprep.mubr.msk.bf16.mxu0 %vm11187_vm1, %v11186_v9  ;;  %v1134_v43 = vsel %vm186_vm2, %v1129_v36, 0  ;;  %v11620_v21 = vld [vmem:[%s13336_s2 + $0x38] sm:$0xff]  ;;  %s13347_s2 = smov 40  }
 0xb54   :  { %9935 = vmatprep.subr.bf16.mxu0 %v11186_v9 }
 0xb55   :  { %v10933_v28 = vpop.eup %10932 }
 0xb56   :  { %v989_v29 = vmul.f32 %v10933_v28, %v10929_v7 }
 0xb58   :  { %v990_v27 = vpack.c.bf16 %v989_v29, %v989_v29 }
 0xb5a   :  { %9926 = vmatmul.mubr.msk.bf16.vlgmr.msra.gmra.mrb[36].mxu0 %vm186_vm2, %v990_v27 }
 0xb5b   :  { %9936 = vmatpush3.bf16.msra.mxu0 %v11423_v10  ;;  %9937 = vmatprep.mubr.msk.bf16.mxu0 %vm11187_vm1, %v11186_v9 }
 0xb5c   :  { %9947 = vmatprep.subr.bf16.mxu0 %v11186_v9 }
 0xc25   :  { %v922_v30 = vpop.f32.mrb[32].mxu0 }
 0xc26   :  { %v928_v31 = vpack.c.bf16 %v922_v30, %v922_v30  ;;  %v9915_v33 = vpop.f32.mrb[33].mxu0 }
 0xc27   :  { %v925_v32 = vpop.f32.mrb[34].mxu0 }
 0xc28   :  { %v9916_v35 = vpop.f32.mrb[35].mxu0  ;;  %9938 = vmatmul.mubr.msk.bf16.vlgmr.msra.gmra.mrb[40].mxu0 %vm186_vm2, %v928_v31 }
 0xc29   :  { %9949 = vmatprep.mubr.msk.bf16.mxu0 %vm11187_vm1, %v11186_v9 }
 0xc2d   :  { %v1033_v38 = vpop.f32.mrb[36].mxu0 }
 0xc2e   :  { %v1039_v41 = vpack.c.bf16 %v1033_v38, %v1033_v38  ;;  %v9927_v42 = vpop.f32.mrb[37].mxu0 }
 0xc2f   :  { %v1036_v10 = vpop.f32.mrb[38].mxu0 }
 0xc30   :  { %v9928_v12 = vpop.f32.mrb[39].mxu0  ;;  %9932 = vmatmul.mubr.msk.bf16.vlgmr.msra.gmra.mrb[28].mxu1 %vm186_vm2, %v1039_v41  ;;  %v11630_v41 = vadd.f32 %v11334_v1, %v11559_v13 }
 0xc31   :  { %9942 = vmatpush3.bf16.xpose.msra.mxu1 %v1134_v43  ;;  %9943 = vmatprep.mubr.msk.bf16.mxu1 %vm11187_vm1, %v11186_v9 }
 0xc32   :  { %9953 = vmatprep.subr.bf16.mxu1 %v11186_v9 }
 0xc38   :  { %9944 = vmatmul.mubr.msk.bf16.vlgmr.msra.gmra.mrb[32].mxu1 %vm186_vm2, %v1127_v44 }
 0xc39   :  { %9954 = vmatpush3.bf16.msra.mxu1 %v11476_v60  ;;  %9955 = vmatprep.mubr.msk.bf16.mxu1 %vm11187_vm1, %v11186_v9 }
 0xc3a   :  { %9965 = vmatprep.subr.bf16.mxu1 %v11186_v9 }
 0xcfb   :  { %v1120_v46 = vpop.f32.mrb[40].mxu0 }
 0xcfc   :  { %v9939_v47 = vpop.f32.mrb[41].mxu0 }
 0xcfd   :  { %v1123_v48 = vpop.f32.mrb[42].mxu0 }
 0xcfe   :  { %v9940_v49 = vpop.f32.mrb[43].mxu0 }
 0xd03   :  { %v1077_v50 = vpop.f32.mrb[28].mxu1 }
 0xd04   :  { %v11586_v51 = vadd.f32 %v1120_v46, %v1077_v50  ;;  %v9933_v53 = vpop.f32.mrb[29].mxu1 }
 0xd05   :  { %v1080_v54 = vpop.f32.mrb[30].mxu1 }
 0xd06   :  { %v9934_v55 = vpop.f32.mrb[31].mxu1 }
 0xd0b   :  { %v1170_v60 = vpop.f32.mrb[32].mxu1 }
 0xd0c   :  { %v9945_v57 = vpop.f32.mrb[33].mxu1  ;;  %v1171_v58 = vadd.f32 %v11591_v56, %v1170_v60 }
 0xd0d   :  { %v1173_v59 = vpop.f32.mrb[34].mxu1 }
 0xd0e   :  { %v9946_v61 = vpop.f32.mrb[35].mxu1  ;;  %v1176_v62 = vsel %vm186_vm2, %v1171_v58, -inf }
 0xd0f   :  { %1177 = vmax.xlane.f32.xlu1 %v1176_v62 }
 0xd20   :  { %1283 = vrot.lane.b32.xlu1 %v11491_v14, %s13306_s27  ;;  %s13354_s27 = sld [smem:[#allocation10_spill]] }
 0xd24   :  { %1281 = vrot.lane.b32.xlu1 %v11491_v14, %s13338_s0 }
 0xd9c   :  { %v1178_v63 = vpop.xlane.xlu1 %1177 }
 0xd9d   :  { %v1179_v0 = vsub.f32 %v1171_v58, %v1178_v63 }
 0xd9f   :  { %v1180_v3 = vmul.f32 1.442695, %v1179_v0 }
 0xda0   :  { %v1284_v17 = vpop.permute.xlu1 %1283 }
 0xda1   :  { %10934 = vpow2.f32 %v1180_v3  ;;  %v1289_v19 = vsel %vm186_vm2, %v1284_v17, 0 }
 0xda4   :  { %v1282_v20 = vpop.permute.xlu1 %1281 }
 0xdab   :  { %v10935_v5 = vpop.eup %10934 }
 0xdac   :  { %v1182_v6 = vsel %vm186_vm2, %v10935_v5, 0.0 }
 0xdad   :  { %1183 = vadd.xlane.f32.xlu0 %v1182_v6  ;;  %v10865_v6 = vld [vmem:[%s13272_s10 + $0x8] sm:$0xff]  }
 0xdc3   :  { %1188 = vrot.lane.b32.xlu0 %v11491_v14, %s13339_s6 }
 0xe3a   :  { %v1184_v7 = vpop.xlane.xlu0 %1183 }
 0xe3b   :  { %10936 = vrcp.f32 %v1184_v7  ;;  %v10867_v7 = vld [vmem:[%s13273_s11 + $0x8] sm:$0xff]  }
 0xe3e   :  { %v1189_v8 = vpop.permute.xlu0 %1188 }
 0xe3f   :  { %v1194_v11 = vsel %vm250_vm3, %v1189_v8, 0 }
 0xe40   :  { %9948 = vmatpush3.bf16.msra.mxu0 %v1194_v11 }
 0xe41   :  { %9959 = vmatprep.subr.bf16.mxu0 %v11186_v9 }
 0xe45   :  { %v10937_v15 = vpop.eup %10936 }
 0xe46   :  { %v1186_v16 = vmul.f32 %v10937_v15, %v10935_v5  ;;  %v10864_v5 = vld [vmem:[%s13272_s10] sm:$0xff]  }
 0xe48   :  { %v1187_v18 = vpack.c.bf16 %v1186_v16, %v1186_v16 }
 0xe4a   :  { %9950 = vmatmul.mubr.msk.bf16.vlgmr.msra.gmra.mrb[44].mxu0 %vm186_vm2, %v1187_v18 }
 0xe4b   :  { %9960 = vmatpush3.bf16.xpose.msra.mxu0 %v1289_v19  ;;  %9961 = vmatprep.mubr.msk.bf16.mxu0 %vm11187_vm1, %v11186_v9 }
 0xe4c   :  { %9971 = vmatprep.subr.bf16.mxu0 %v11186_v9 }
 0xe52   :  { %9962 = vmatmul.mubr.msk.bf16.vlgmr.msra.gmra.mrb[48].mxu0 %vm186_vm2, %v1282_v20 }
 0xe53   :  { %9972 = vmatpush3.bf16.msra.mxu0 %v11527_v40  ;;  %9973 = vmatprep.mubr.msk.bf16.mxu0 %vm11187_vm1, %v11186_v9 }
 0xe54   :  { %9985 = vmatprep.subr.bf16.mxu0 %v11186_v9 }
 0xf1d   :  { %v1230_v22 = vpop.f32.mrb[44].mxu0 }
 0xf1e   :  { %v1236_v23 = vpack.c.bf16 %v1230_v22, %v1230_v22  ;;  %v9951_v24 = vpop.f32.mrb[45].mxu0 }
 0xf1f   :  { %v1233_v25 = vpop.f32.mrb[46].mxu0 }
 0xf20   :  { %v9952_v26 = vpop.f32.mrb[47].mxu0  ;;  %9956 = vmatmul.mubr.msk.bf16.vlgmr.msra.gmra.mrb[36].mxu1 %vm186_vm2, %v1236_v23  ;;  %v9217_v23 = vld [vmem:[%s13340_s8] ss:$0 sm:$0xff] }
 0xf21   :  { %9967 = vmatprep.mubr.msk.bf16.mxu1 %vm11187_vm1, %v11186_v9 }
 0xf25   :  { %v1325_v40 = vpop.f32.mrb[48].mxu0 }
 0xf26   :  { %v9963_v28 = vpop.f32.mrb[49].mxu0  ;;  %v1326_v29 = vadd.f32 %v11620_v21, %v1325_v40 }
 0xf27   :  { %v1328_v27 = vpop.f32.mrb[50].mxu0  ;;  %v10868_v28 = vld [vmem:[%s13273_s11 + $0x10] sm:$0xff]  }
 0xf28   :  { %v9964_v30 = vpop.f32.mrb[51].mxu0  ;;  %v1331_v31 = vsel %vm186_vm2, %v1326_v29, -inf }
 0xf29   :  { %1332 = vmax.xlane.f32.xlu0 %v1331_v31 }
 0xf3f   :  { %1343 = vrot.lane.b32.xlu0 %v11491_v14, %s13304_s30  ;;  %v1439_v14 = vmul.f32 %v11630_v41, %v11630_v41  ;;  %s13348_s30 = sld [smem:[#allocation6_spill]] }
 0xf41   :  { %v1441_v43 = vsel %vm89_vm0, %v1439_v14, 0.0 }
 0xfb6   :  { %v1333_v33 = vpop.xlane.xlu0 %1332 }
 0xfb7   :  { %v1334_v32 = vsub.f32 %v1326_v29, %v1333_v33  ;;  %v10869_v29 = vld [vmem:[%s13273_s11 + $0x18] sm:$0xff]  }
 0xfb9   :  { %v1335_v35 = vmul.f32 1.442695, %v1334_v32 }
 0xfba   :  { %v1344_v36 = vpop.permute.xlu0 %1343 }
 0xfbb   :  { %10938 = vpow2.f32 %v1335_v35  ;;  %v1349_v38 = vsel %vm250_vm3, %v1344_v36, 0 }
 0xfbc   :  { %9966 = vmatpush3.bf16.msra.mxu1 %v1349_v38 }
 0xfbd   :  { %9977 = vmatprep.subr.bf16.mxu1 %v11186_v9 }
 0xfc5   :  { %v10939_v42 = vpop.eup %10938 }
 0xfc6   :  { %v1337_v10 = vsel %vm186_vm2, %v10939_v42, 0.0 }
 0xfc7   :  { %1338 = vadd.xlane.f32.xlu1 %v1337_v10 }
 0xfcb   :  { %1442 = vadd.xlane.f32.xlu1 %v1441_v43 }
 0xff3   :  { %v1274_v12 = vpop.f32.mrb[36].mxu1 }
 0xff4   :  { %v1280_v44 = vadd.f32 %v1274_v12, %v11586_v51  ;;  %v9957_v46 = vpop.f32.mrb[37].mxu1 }
 0xff5   :  { %v1277_v47 = vpop.f32.mrb[38].mxu1 }
 0xff6   :  { %v9958_v48 = vpop.f32.mrb[39].mxu1 }
0x1054   :  { %v1339_v49 = vpop.xlane.xlu1 %1338 }
0x1055   :  { %10940 = vrcp.f32 %v1339_v49  ;;  %v10871_v49 = vld [vmem:[%s13334_s3 + $0x18] sm:$0xff]  }
0x1058   :  { %v1443_v8 = vpop.xlane.xlu1 %1442 }
0x1059   :  { %v1447_v11 = vmul.f32 0.03125, %v1443_v8 }
0x105b   :  { %v1449_v15 = vadd.f32 1e-06, %v1447_v11 }
0x105d   :  { %10942 = vrsqrt.f32 %v1449_v15 }
0x105f   :  { %v10941_v1 = vpop.eup %10940 }
0x1060   :  { %v1341_v13 = vmul.f32 %v10941_v1, %v10939_v42 }
0x1062   :  { %v1342_v50 = vpack.c.bf16 %v1341_v13, %v1341_v13 }
0x1064   :  { %9968 = vmatmul.mubr.msk.bf16.vlgmr.msra.gmra.mrb[40].mxu1 %vm186_vm2, %v1342_v50 }
0x1065   :  { %9981 = vmatprep.mubr.msk.bf16.mxu1 %vm11187_vm1, %v11186_v9  ;;  %9978 = vmatpush3.bf16.msra.mxu1 %v10864_v5 }
0x1066   :  { %9979 = vmatprep.subr.bf16.mxu1 %v11186_v9 }
0x1067   :  { %v10943_v19 = vpop.eup %10942 }
0x1068   :  { %v1453_v20 = vmul.f32 %v10943_v19, %v11630_v41 }
0x1069   :  { %9980 = vmatpush3.bf16.msra.mxu1 %v10865_v6 }
0x106a   :  { %9997 = vmatprep.subr.bf16.mxu1 %v11186_v9  ;;  %v1461_v25 = vmul.f32 %v9217_v23, %v1453_v20 }
0x1137   :  { %v1385_v53 = vpop.f32.mrb[40].mxu1 }
0x1138   :  { %v1391_v54 = vpack.c.bf16 %v1385_v53, %v1385_v53  ;;  %v9969_v55 = vpop.f32.mrb[41].mxu1 }
0x1139   :  { %v1388_v60 = vpop.f32.mrb[42].mxu1 }
0x113a   :  { %v9970_v57 = vpop.f32.mrb[43].mxu1  ;;  %9974 = vmatmul.mubr.msk.bf16.vlgmr.msra.gmra.mrb[52].mxu0 %vm186_vm2, %v1391_v54 }
0x113b   :  { %9993 = vmatprep.mubr.msk.bf16.mxu0 %vm11187_vm1, %v11186_v9 }
0x120d   :  { %v1429_v51 = vpop.f32.mrb[52].mxu0 }
0x120e   :  { %v1435_v58 = vadd.f32 %v1429_v51, %v1280_v44  ;;  %v9975_v59 = vpop.f32.mrb[53].mxu0 }
0x120f   :  { %v1432_v61 = vpop.f32.mrb[54].mxu0 }
0x1210   :  { %v1437_v62 = vadd.f32 %v11336_v2, %v1435_v58  ;;  %v9976_v63 = vpop.f32.mrb[55].mxu0  ;;  %v10866_v2 = vld [vmem:[%s13273_s11] sm:$0xff]  }
0x1211   :  { %9986 = vmatpush3.bf16.msra.mxu0 %v10866_v2  ;;  %v9227_v58 = vld [vmem:[%s13335_s4 + $0x1] ss:$0 sm:$0xff]  ;;  %s13342_s4 = smov 120  }
0x1212   :  { %v1440_v0 = vmul.f32 %v1437_v62, %v1437_v62  ;;  %9987 = vmatprep.subr.bf16.mxu0 %v11186_v9 }
0x1214   :  { %v1444_v3 = vsel %vm89_vm0, %v1440_v0, 0.0 }
0x1215   :  { %1445 = vadd.xlane.f32.xlu1 %v1444_v3  ;;  %9988 = vmatpush3.bf16.msra.mxu0 %v10867_v7 }
0x1216   :  { %9989 = vmatprep.subr.bf16.mxu0 %v11186_v9 }
0x1219   :  { %9990 = vmatpush3.bf16.msra.mxu0 %v10868_v28 }
0x121a   :  { %9991 = vmatprep.subr.bf16.mxu0 %v11186_v9 }
0x121d   :  { %9992 = vmatpush3.bf16.msra.mxu0 %v10869_v29 }
0x121e   :  { %10011 = vmatprep.subr.bf16.mxu0 %v11186_v9 }
0x12a2   :  { %v1446_v16 = vpop.xlane.xlu1 %1445 }
0x12a3   :  { %v1448_v17 = vmul.f32 0.03125, %v1446_v16 }
0x12a5   :  { %v1450_v18 = vadd.f32 1e-06, %v1448_v17 }
0x12a7   :  { %10944 = vrsqrt.f32 %v1450_v18 }
0x12b1   :  { %v10945_v22 = vpop.eup %10944 }
0x12b2   :  { %v1454_v24 = vmul.f32 %v10945_v22, %v1437_v62 }
0x12b4   :  { %v1462_v26 = vmul.f32 %v9217_v23, %v1454_v24 }
0x12b6   :  { %v1467_v40 = vpack.c.bf16 %v1462_v26, %v1461_v25 }
0x12b8   :  { %9982 = vmatmul.mubr.msk.bf16.vlgmr.msra.gmra.mrb[44].mxu1 %vm89_vm0, %v1467_v40 }
0x12b9   :  { %10001 = vmatprep.mubr.msk.bf16.mxu1 %vm11187_vm1, %v11186_v9 }
0x138b   :  { %v1517_v27 = vpop.f32.mrb[44].mxu1 }
0x138c   :  { %v9983_v30 = vpop.f32.mrb[45].mxu1  ;;  %v1524_v33 = vmax.f32 %v1517_v27, 0.0 }
0x138d   :  { %v1520_v31 = vpop.f32.mrb[46].mxu1 }
0x138e   :  { %v1525_v32 = vmax.f32 %v1520_v31, 0.0  ;;  %v9984_v35 = vpop.f32.mrb[47].mxu1 }
0x1390   :  { %v1534_v36 = vpack.c.bf16 %v1525_v32, %v1524_v33 }
0x1392   :  { %9994 = vmatmul.mubr.msk.bf16.vlgmr.msra.gmra.mrb[56].mxu0 %vm1559_vm4, %v1534_v36 }
0x1393   :  { %10013 = vmatprep.mubr.msk.bf16.mxu0 %vm11187_vm1, %v11186_v9 }
0x1465   :  { %v1597_v38 = vpop.f32.mrb[56].mxu0 }
0x1466   :  { %v11680_v42 = vadd.f32 %v1597_v38, %v11630_v41  ;;  %v9995_v10 = vpop.f32.mrb[57].mxu0  ;;  %v10870_v41 = vld [vmem:[%s13334_s3 + $0x10] sm:$0xff]   ;;  %s13341_s3 = smov 96  }
0x1467   :  { %v1600_v14 = vpop.f32.mrb[58].mxu0  ;;  %9998 = vmatpush3.bf16.msra.mxu1 %v10870_v41 }
0x1468   :  { %v11682_v43 = vadd.f32 %v1600_v14, %v1437_v62  ;;  %v9996_v12 = vpop.f32.mrb[59].mxu0  ;;  %v1608_v44 = vmul.f32 %v11680_v42, %v11680_v42  ;;  %9999 = vmatprep.subr.bf16.mxu1 %v11186_v9 }
0x146a   :  { %v1610_v46 = vsel %vm89_vm0, %v1608_v44, 0.0  ;;  %v1609_v47 = vmul.f32 %v11682_v43, %v11682_v43 }
0x146b   :  { %1611 = vadd.xlane.f32.xlu1 %v1610_v46  ;;  %10000 = vmatpush3.bf16.msra.mxu1 %v10871_v49 }
0x146c   :  { %v1613_v48 = vsel %vm89_vm0, %v1609_v47, 0.0  ;;  %10005 = vmatprep.subr.bf16.mxu1 %v11186_v9 }
0x146f   :  { %1614 = vadd.xlane.f32.xlu1 %v1613_v48 }
0x14f8   :  { %v1612_v1 = vpop.xlane.xlu1 %1611 }
0x14f9   :  { %v1616_v13 = vmul.f32 0.03125, %v1612_v1 }
0x14fb   :  { %v1618_v50 = vadd.f32 1e-06, %v1616_v13 }
0x14fc   :  { %v1615_v53 = vpop.xlane.xlu1 %1614 }
0x14fd   :  { %10946 = vrsqrt.f32 %v1618_v50  ;;  %v1617_v54 = vmul.f32 0.03125, %v1615_v53  ;;  %v9235_v53 = vld [vmem:[%s13337_s29 + $0x10] sm:$0xf] }
0x14ff   :  { %v1619_v55 = vadd.f32 1e-06, %v1617_v54  ;;  %v11753_v54 = vsel %vm250_vm3, %v9235_v53, 0 }
0x1501   :  { %10948 = vrsqrt.f32 %v1619_v55  ;;  %v9236_v55 = vld [vmem:[%s13337_s29 + $0x14] sm:$0xf] }
0x1507   :  { %v10947_v60 = vpop.eup %10946 }
0x1508   :  { %v1622_v57 = vmul.f32 %v10947_v60, %v11680_v42  ;;  %v11760_v60 = vsel %vm250_vm3, %v9236_v55, 0 }
0x150a   :  { %v1630_v61 = vmul.f32 %v9227_v58, %v1622_v57 }
0x150b   :  { %v10949_v51 = vpop.eup %10948 }
0x150c   :  { %v1623_v59 = vmul.f32 %v10949_v51, %v11682_v43 }
0x150e   :  { %v1631_v62 = vmul.f32 %v9227_v58, %v1623_v59 }
0x1510   :  { %v1637_v63 = vpack.c.bf16 %v1631_v62, %v1630_v61 }
0x1512   :  { %10002 = vmatmul.mubr.msk.bf16.vlgmr.msra.gmra.mrb[48].mxu1 %vm89_vm0, %v1637_v63 }
0x1513   :  { %10007 = vmatprep.mubr.msk.bf16.mxu1 %vm11187_vm1, %v11186_v9 }
0x15e5   :  { %v1687_v0 = vpop.f32.mrb[48].mxu1 }
0x15e6   :  { %v10003_v3 = vpop.f32.mrb[49].mxu1 }
0x15e7   :  { %v1690_v5 = vpop.f32.mrb[50].mxu1 }
0x15e8   :  { %v11706_v6 = vpack.c.bf16 %v1690_v5, %v1687_v0  ;;  %v10004_v2 = vpop.f32.mrb[51].mxu1 }
0x15ea   :  { %1812 = vrot.lane.b32.xlu1 %v11706_v6, %s13316_s5  ;;  %1701 = vrot.lane.b32.xlu0 %v11706_v6, %s13341_s3 }
0x15ee   :  { %1810 = vrot.lane.b32.xlu0 %v11706_v6, %s13342_s4 }
0x165c   :  { %v1702_v7 = vpop.permute.xlu0 %1701  ;;  %v1813_v11 = vpop.permute.xlu1 %1812 }
0x165d   :  { %v1707_v8 = vsel %vm186_vm2, %v1702_v7, 0  ;;  %v1818_v15 = vsel %vm186_vm2, %v1813_v11, 0 }
0x165e   :  { %10006 = vmatpush3.bf16.xpose.msra.mxu1 %v1707_v8 }
0x165f   :  { %10017 = vmatprep.subr.bf16.mxu1 %v11186_v9 }
0x1660   :  { %v1811_v16 = vpop.permute.xlu0 %1810 }
0x1665   :  { %10008 = vmatmul.mubr.msk.bf16.vlgmr.msra.gmra.mrb[52].mxu1 %vm186_vm2, %v11706_v6 }
0x1666   :  { %10018 = vmatpush3.bf16.xpose.msra.mxu1 %v1818_v15  ;;  %10019 = vmatprep.mubr.msk.bf16.mxu1 %vm11187_vm1, %v11186_v9 }
0x1667   :  { %10029 = vmatprep.subr.bf16.mxu1 %v11186_v9 }
0x166d   :  { %10020 = vmatmul.mubr.msk.bf16.vlgmr.msra.gmra.mrb[56].mxu1 %vm186_vm2, %v1811_v16 }
0x166e   :  { %10031 = vmatprep.mubr.msk.bf16.mxu1 %vm11187_vm1, %v11186_v9  ;;  %10030 = vmatpush3.bf16.msra.mxu1 %v11760_v60 }
0x166f   :  { %10041 = vmatprep.subr.bf16.mxu1 %v11186_v9 }
0x1738   :  { %v1743_v17 = vpop.f32.mrb[52].mxu1 }
0x1739   :  { %v10009_v18 = vpop.f32.mrb[53].mxu1  ;;  %v1744_v19 = vadd.f32 %v1743_v17, %v11388_v34 }
0x173a   :  { %v1746_v20 = vpop.f32.mrb[54].mxu1 }
0x173b   :  { %v10010_v22 = vpop.f32.mrb[55].mxu1  ;;  %v1749_v23 = vsel %vm186_vm2, %v1744_v19, -inf }
0x173c   :  { %1750 = vmax.xlane.f32.xlu0 %v1749_v23 }
0x1740   :  { %v1854_v24 = vpop.f32.mrb[56].mxu1 }
0x1741   :  { %v10021_v25 = vpop.f32.mrb[57].mxu1  ;;  %v1855_v26 = vadd.f32 %v1854_v24, %v11394_v39 }
0x1742   :  { %v1857_v40 = vpop.f32.mrb[58].mxu1 }
0x1743   :  { %v10022_v28 = vpop.f32.mrb[59].mxu1  ;;  %v1860_v29 = vsel %vm186_vm2, %v1855_v26, -inf }
0x1744   :  { %1861 = vmax.xlane.f32.xlu1 %v1860_v29 }
0x1755   :  { %1872 = vrot.lane.b32.xlu1 %v11706_v6, %s13314_s7 }
0x1759   :  { %2013 = vrot.lane.b32.xlu1 %v11706_v6, %s13343_s28 }
0x17c9   :  { %v1751_v34 = vpop.xlane.xlu0 %1750 }
0x17ca   :  { %v1752_v27 = vsub.f32 %v1744_v19, %v1751_v34 }
0x17cc   :  { %v1753_v30 = vmul.f32 1.442695, %v1752_v27 }
0x17ce   :  { %10950 = vpow2.f32 %v1753_v30 }
0x17d1   :  { %v1862_v31 = vpop.xlane.xlu1 %1861 }
0x17d2   :  { %v1863_v33 = vsub.f32 %v1855_v26, %v1862_v31 }
0x17d4   :  { %v1864_v32 = vmul.f32 1.442695, %v1863_v33 }
0x17d5   :  { %v1873_v48 = vpop.permute.xlu1 %1872 }
0x17d6   :  { %10952 = vpow2.f32 %v1864_v32  ;;  %v1878_v49 = vsel %vm250_vm3, %v1873_v48, 0 }
0x17d8   :  { %v10951_v39 = vpop.eup %10950 }
0x17d9   :  { %v1755_v35 = vsel %vm186_vm2, %v10951_v39, 0.0  ;;  %v2014_v8 = vpop.permute.xlu1 %2013 }
0x17da   :  { %1756 = vadd.xlane.f32.xlu0 %v1755_v35 }
0x17e0   :  { %v10953_v36 = vpop.eup %10952 }
0x17e1   :  { %v1866_v38 = vsel %vm186_vm2, %v10953_v36, 0.0 }
0x17e2   :  { %1867 = vadd.xlane.f32.xlu0 %v1866_v38 }
0x17f8   :  { %1761 = vrot.lane.b32.xlu0 %v11706_v6, %s13344_s9 }
0x17fc   :  { %2015 = vrot.lane.b32.xlu0 %v11706_v6, %s13345_s1 }
0x1867   :  { %v1757_v10 = vpop.xlane.xlu0 %1756 }
0x1868   :  { %10954 = vrcp.f32 %v1757_v10 }
0x186f   :  { %v1868_v14 = vpop.xlane.xlu0 %1867 }
0x1870   :  { %10956 = vrcp.f32 %v1868_v14 }
0x1872   :  { %v10955_v12 = vpop.eup %10954 }
0x1873   :  { %v1762_v44 = vpop.permute.xlu0 %1761  ;;  %v1759_v46 = vmul.f32 %v10955_v12, %v10951_v39 }
0x1874   :  { %v1767_v47 = vsel %vm250_vm3, %v1762_v44, 0  ;;  %v9237_v44 = vld [vmem:[%s13337_s29 + $0x18] sm:$0xf] }
0x1875   :  { %10012 = vmatpush3.bf16.msra.mxu0 %v1767_v47  ;;  %v1760_v41 = vpack.c.bf16 %v1759_v46, %v1759_v46  ;;  %v11801_v46 = vsel %vm250_vm3, %v9237_v44, 0 }
0x1876   :  { %10023 = vmatprep.subr.bf16.mxu0 %v11186_v9 }
0x1877   :  { %v2016_v62 = vpop.permute.xlu0 %2015 }
0x1878   :  { %10014 = vmatmul.mubr.msk.bf16.vlgmr.msra.gmra.mrb[60].mxu0 %vm186_vm2, %v1760_v41  ;;  %v2021_v2 = vsel %vm186_vm2, %v2016_v62, 0 }
0x1879   :  { %10024 = vmatpush3.bf16.msra.mxu0 %v1878_v49  ;;  %10025 = vmatprep.mubr.msk.bf16.mxu0 %vm11187_vm1, %v11186_v9 }
0x187a   :  { %v10957_v1 = vpop.eup %10956  ;;  %10035 = vmatprep.subr.bf16.mxu0 %v11186_v9 }
0x187b   :  { %v1870_v13 = vmul.f32 %v10957_v1, %v10953_v36 }
0x187d   :  { %v1871_v50 = vpack.c.bf16 %v1870_v13, %v1870_v13 }
0x1880   :  { %10026 = vmatmul.mubr.msk.bf16.vlgmr.msra.gmra.mrb[64].mxu0 %vm186_vm2, %v1871_v50 }
0x1881   :  { %10037 = vmatprep.mubr.msk.bf16.mxu0 %vm11187_vm1, %v11186_v9  ;;  %10036 = vmatpush3.bf16.msra.mxu0 %v11753_v54 }
0x1882   :  { %10047 = vmatprep.subr.bf16.mxu0 %v11186_v9 }
0x194b   :  { %v1803_v57 = vpop.f32.mrb[60].mxu0 }
0x194c   :  { %v1809_v51 = vpack.c.bf16 %v1803_v57, %v1803_v57  ;;  %v10015_v58 = vpop.f32.mrb[61].mxu0 }
0x194d   :  { %v1806_v59 = vpop.f32.mrb[62].mxu0  ;;  %v11811_v58 = vrot.slane %v11706_v6, 4 }
0x194e   :  { %v10016_v61 = vpop.f32.mrb[63].mxu0  ;;  %10038 = vmatmul.mubr.msk.bf16.vlgmr.msra.gmra.mrb[68].mxu0 %vm186_vm2, %v1809_v51 }
0x194f   :  { %10049 = vmatprep.mubr.msk.bf16.mxu0 %vm11187_vm1, %v11186_v9 }
0x1953   :  { %v1914_v63 = vpop.f32.mrb[64].mxu0 }
0x1954   :  { %v1920_v0 = vpack.c.bf16 %v1914_v63, %v1914_v63  ;;  %v10027_v3 = vpop.f32.mrb[65].mxu0 }
0x1955   :  { %v1917_v5 = vpop.f32.mrb[66].mxu0 }
0x1956   :  { %v10028_v7 = vpop.f32.mrb[67].mxu0  ;;  %10032 = vmatmul.mubr.msk.bf16.vlgmr.msra.gmra.mrb[60].mxu1 %vm186_vm2, %v1920_v0 }
0x1957   :  { %10042 = vmatpush3.bf16.xpose.msra.mxu1 %v2021_v2  ;;  %10043 = vmatprep.mubr.msk.bf16.mxu1 %vm11187_vm1, %v11186_v9 }
0x1958   :  { %10053 = vmatprep.subr.bf16.mxu1 %v11186_v9 }
0x195e   :  { %10044 = vmatmul.mubr.msk.bf16.vlgmr.msra.gmra.mrb[64].mxu1 %vm186_vm2, %v2014_v8 }
0x195f   :  { %10055 = vmatprep.mubr.msk.bf16.mxu1 %vm11187_vm1, %v11186_v9  ;;  %10054 = vmatpush3.bf16.msra.mxu1 %v11801_v46 }
0x1960   :  { %10065 = vmatprep.subr.bf16.mxu1 %v11186_v9 }
0x1a21   :  { %v2007_v11 = vpop.f32.mrb[68].mxu0 }
0x1a22   :  { %v10039_v15 = vpop.f32.mrb[69].mxu0 }
0x1a23   :  { %v2010_v16 = vpop.f32.mrb[70].mxu0 }
0x1a24   :  { %v10040_v17 = vpop.f32.mrb[71].mxu0 }
0x1a29   :  { %v1961_v18 = vpop.f32.mrb[60].mxu1 }
0x1a2a   :  { %v10033_v19 = vpop.f32.mrb[61].mxu1  ;;  %v11776_v20 = vadd.f32 %v2007_v11, %v1961_v18 }
0x1a2b   :  { %v1964_v22 = vpop.f32.mrb[62].mxu1 }
0x1a2c   :  { %v10034_v23 = vpop.f32.mrb[63].mxu1 }
0x1a31   :  { %v2057_v24 = vpop.f32.mrb[64].mxu1 }
0x1a32   :  { %v10045_v25 = vpop.f32.mrb[65].mxu1  ;;  %v2058_v26 = vadd.f32 %v2057_v24, %v11451_v37  ;;  %v9238_v24 = vld [vmem:[%s13337_s29 + $0x1c] sm:$0xf]  ;;  %s13351_s29 = smov 56  }
0x1a33   :  { %v2060_v40 = vpop.f32.mrb[66].mxu1  ;;  %v11847_v25 = vsel %vm250_vm3, %v9238_v24, 0 }
0x1a34   :  { %v10046_v28 = vpop.f32.mrb[67].mxu1  ;;  %v2063_v29 = vsel %vm186_vm2, %v2058_v26, -inf }
0x1a35   :  { %2064 = vmax.xlane.f32.xlu0 %v2063_v29 }
0x1a4b   :  { %2075 = vrot.lane.b32.xlu0 %v11706_v6, %s13339_s6 }
0x1a4f   :  { %2171 = vrot.lane.b32.xlu0 %v11706_v6, %s13338_s0 }
0x1ac2   :  { %v2065_v34 = vpop.xlane.xlu0 %2064 }
0x1ac3   :  { %v2066_v27 = vsub.f32 %v2058_v26, %v2065_v34 }
0x1ac5   :  { %v2067_v30 = vmul.f32 1.442695, %v2066_v27 }
0x1ac6   :  { %v2076_v31 = vpop.permute.xlu0 %2075 }
0x1ac7   :  { %10958 = vpow2.f32 %v2067_v30  ;;  %v2081_v33 = vsel %vm250_vm3, %v2076_v31, 0 }
0x1ac8   :  { %10048 = vmatpush3.bf16.msra.mxu0 %v2081_v33 }
0x1ac9   :  { %10059 = vmatprep.subr.bf16.mxu0 %v11186_v9 }
0x1aca   :  { %v2172_v12 = vpop.permute.xlu0 %2171 }
0x1ad1   :  { %v10959_v37 = vpop.eup %10958 }
0x1ad2   :  { %v2069_v32 = vsel %vm186_vm2, %v10959_v37, 0.0 }
0x1ad3   :  { %2070 = vadd.xlane.f32.xlu1 %v2069_v32 }
0x1ae4   :  { %2173 = vrot.lane.b32.xlu1 %v11706_v6, %s13346_s26 }
0x1b60   :  { %v2071_v39 = vpop.xlane.xlu1 %2070 }
0x1b61   :  { %10960 = vrcp.f32 %v2071_v39 }
0x1b64   :  { %v2174_v38 = vpop.permute.xlu1 %2173 }
0x1b65   :  { %v2179_v14 = vsel %vm186_vm2, %v2174_v38, 0 }
0x1b6b   :  { %v10961_v35 = vpop.eup %10960 }
0x1b6c   :  { %v2073_v36 = vmul.f32 %v10961_v35, %v10959_v37 }
0x1b6e   :  { %v2074_v10 = vpack.c.bf16 %v2073_v36, %v2073_v36 }
0x1b70   :  { %10050 = vmatmul.mubr.msk.bf16.vlgmr.msra.gmra.mrb[72].mxu0 %vm186_vm2, %v2074_v10 }
0x1b71   :  { %10060 = vmatpush3.bf16.xpose.msra.mxu0 %v2179_v14  ;;  %10061 = vmatprep.mubr.msk.bf16.mxu0 %vm11187_vm1, %v11186_v9 }
0x1b72   :  { %10071 = vmatprep.subr.bf16.mxu0 %v11186_v9 }
0x1b78   :  { %10062 = vmatmul.mubr.msk.bf16.vlgmr.msra.gmra.mrb[76].mxu0 %vm186_vm2, %v2172_v12 }
0x1b79   :  { %10073 = vmatprep.mubr.msk.bf16.mxu0 %vm11187_vm1, %v11186_v9  ;;  %10072 = vmatpush3.bf16.msra.mxu0 %v11847_v25 }
0x1b7a   :  { %10083 = vmatprep.subr.bf16.mxu0 %v11186_v9 }
0x1c43   :  { %v2117_v47 = vpop.f32.mrb[72].mxu0 }
0x1c44   :  { %v2123_v48 = vpack.c.bf16 %v2117_v47, %v2117_v47  ;;  %v10051_v41 = vpop.f32.mrb[73].mxu0 }
0x1c45   :  { %v2120_v49 = vpop.f32.mrb[74].mxu0 }
0x1c46   :  { %v10052_v1 = vpop.f32.mrb[75].mxu0  ;;  %10056 = vmatmul.mubr.msk.bf16.vlgmr.msra.gmra.mrb[68].mxu1 %vm186_vm2, %v2123_v48 }
0x1c47   :  { %10067 = vmatprep.mubr.msk.bf16.mxu1 %vm11187_vm1, %v11186_v9 }
0x1c4b   :  { %v2215_v13 = vpop.f32.mrb[76].mxu0 }
0x1c4c   :  { %v2216_v50 = vadd.f32 %v2215_v13, %v11486_v4  ;;  %v10063_v53 = vpop.f32.mrb[77].mxu0 }
0x1c4d   :  { %v2218_v55 = vpop.f32.mrb[78].mxu0 }
0x1c4e   :  { %v10064_v57 = vpop.f32.mrb[79].mxu0  ;;  %v2221_v51 = vsel %vm186_vm2, %v2216_v50, -inf }
0x1c4f   :  { %2222 = vmax.xlane.f32.xlu1 %v2221_v51 }
0x1c60   :  { %2330 = vrot.lane.b32.xlu1 %v11811_v58, %s13341_s3 }
0x1c64   :  { %2441 = vrot.lane.b32.xlu1 %v11811_v58, %s13316_s5  ;;  %s13350_s5 = sld [smem:[#allocation8_spill]] }
0x1cdc   :  { %v2223_v59 = vpop.xlane.xlu1 %2222 }
0x1cdd   :  { %v2224_v61 = vsub.f32 %v2216_v50, %v2223_v59 }
0x1cdf   :  { %v2225_v62 = vmul.f32 1.442695, %v2224_v61 }
0x1ce0   :  { %v2331_v17 = vpop.permute.xlu1 %2330 }
0x1ce1   :  { %10962 = vpow2.f32 %v2225_v62  ;;  %v2336_v19 = vsel %vm186_vm2, %v2331_v17, 0 }
0x1ceb   :  { %v10963_v4 = vpop.eup %10962 }
0x1cec   :  { %v2227_v63 = vsel %vm186_vm2, %v10963_v4, 0.0 }
0x1ced   :  { %2228 = vadd.xlane.f32.xlu0 %v2227_v63 }
0x1d03   :  { %2233 = vrot.lane.b32.xlu0 %v11706_v6, %s13347_s2 }
0x1d07   :  { %2439 = vrot.lane.b32.xlu0 %v11811_v58, %s13342_s4 }
0x1d19   :  { %v2164_v0 = vpop.f32.mrb[68].mxu1 }
0x1d1a   :  { %v11823_v3 = vadd.f32 %v2164_v0, %v11776_v20  ;;  %v10057_v5 = vpop.f32.mrb[69].mxu1  ;;  %v2442_v20 = vpop.permute.xlu1 %2441 }
0x1d1b   :  { %v2167_v2 = vpop.f32.mrb[70].mxu1  ;;  %v2447_v22 = vsel %vm186_vm2, %v2442_v20, 0 }
0x1d1c   :  { %v10058_v7 = vpop.f32.mrb[71].mxu1 }
0x1d7a   :  { %v2229_v8 = vpop.xlane.xlu0 %2228 }
0x1d7b   :  { %10964 = vrcp.f32 %v2229_v8 }
0x1d7e   :  { %v2234_v11 = vpop.permute.xlu0 %2233 }
0x1d7f   :  { %v2239_v15 = vsel %vm250_vm3, %v2234_v11, 0 }
0x1d80   :  { %10066 = vmatpush3.bf16.msra.mxu1 %v2239_v15 }
0x1d81   :  { %10077 = vmatprep.subr.bf16.mxu1 %v11186_v9 }
0x1d82   :  { %v2440_v23 = vpop.permute.xlu0 %2439 }
0x1d85   :  { %v10965_v16 = vpop.eup %10964 }
0x1d86   :  { %v2231_v6 = vmul.f32 %v10965_v16, %v10963_v4 }
0x1d88   :  { %v2232_v18 = vpack.c.bf16 %v2231_v6, %v2231_v6 }
0x1d8a   :  { %10068 = vmatmul.mubr.msk.bf16.vlgmr.msra.gmra.mrb[72].mxu1 %vm186_vm2, %v2232_v18 }
0x1d8b   :  { %10078 = vmatpush3.bf16.xpose.msra.mxu1 %v2336_v19  ;;  %10079 = vmatprep.mubr.msk.bf16.mxu1 %vm11187_vm1, %v11186_v9 }
0x1d8c   :  { %10089 = vmatprep.subr.bf16.mxu1 %v11186_v9 }
0x1d92   :  { %10080 = vmatmul.mubr.msk.bf16.vlgmr.msra.gmra.mrb[76].mxu1 %vm186_vm2, %v11811_v58 }
0x1d93   :  { %10090 = vmatpush3.bf16.xpose.msra.mxu1 %v2447_v22  ;;  %10091 = vmatprep.mubr.msk.bf16.mxu1 %vm11187_vm1, %v11186_v9 }
0x1d94   :  { %10101 = vmatprep.subr.bf16.mxu1 %v11186_v9 }
0x1d9a   :  { %10092 = vmatmul.mubr.msk.bf16.vlgmr.msra.gmra.mrb[80].mxu1 %vm186_vm2, %v2440_v23 }
0x1d9b   :  { %10102 = vmatpush3.bf16.msra.mxu1 %v11760_v60  ;;  %10103 = vmatprep.mubr.msk.bf16.mxu1 %vm11187_vm1, %v11186_v9 }
0x1d9c   :  { %10113 = vmatprep.subr.bf16.mxu1 %v11186_v9 }
0x1e5d   :  { %v2275_v26 = vpop.f32.mrb[72].mxu1 }
0x1e5e   :  { %v2281_v40 = vpack.c.bf16 %v2275_v26, %v2275_v26  ;;  %v10069_v28 = vpop.f32.mrb[73].mxu1 }
0x1e5f   :  { %v2278_v60 = vpop.f32.mrb[74].mxu1 }
0x1e60   :  { %v10070_v29 = vpop.f32.mrb[75].mxu1  ;;  %10074 = vmatmul.mubr.msk.bf16.vlgmr.msra.gmra.mrb[80].mxu0 %vm186_vm2, %v2281_v40 }
0x1e61   :  { %10085 = vmatprep.mubr.msk.bf16.mxu0 %vm11187_vm1, %v11186_v9 }
0x1e65   :  { %v2372_v34 = vpop.f32.mrb[76].mxu1 }
0x1e66   :  { %v2373_v27 = vadd.f32 %v11537_v45, %v2372_v34  ;;  %v10081_v30 = vpop.f32.mrb[77].mxu1 }
0x1e67   :  { %v2375_v31 = vpop.f32.mrb[78].mxu1 }
0x1e68   :  { %v10082_v33 = vpop.f32.mrb[79].mxu1  ;;  %v2378_v37 = vsel %vm186_vm2, %v2373_v27, -inf }
0x1e69   :  { %2379 = vmax.xlane.f32.xlu1 %v2378_v37 }
0x1e6d   :  { %v2483_v32 = vpop.f32.mrb[80].mxu1 }
0x1e6e   :  { %v2484_v39 = vadd.f32 %v11544_v52, %v2483_v32  ;;  %v10093_v35 = vpop.f32.mrb[81].mxu1 }
0x1e6f   :  { %v2486_v36 = vpop.f32.mrb[82].mxu1 }
0x1e70   :  { %v10094_v38 = vpop.f32.mrb[83].mxu1  ;;  %v2489_v10 = vsel %vm186_vm2, %v2484_v39, -inf }
0x1e71   :  { %2490 = vmax.xlane.f32.xlu0 %v2489_v10 }
0x1ef6   :  { %v2380_v14 = vpop.xlane.xlu1 %2379 }
0x1ef7   :  { %v2381_v12 = vsub.f32 %v2373_v27, %v2380_v14 }
0x1ef9   :  { %v2382_v44 = vmul.f32 1.442695, %v2381_v12 }
0x1efb   :  { %10966 = vpow2.f32 %v2382_v44 }
0x1efe   :  { %v2491_v45 = vpop.xlane.xlu0 %2490 }
0x1eff   :  { %v2492_v47 = vsub.f32 %v2484_v39, %v2491_v45 }
0x1f01   :  { %v2493_v48 = vmul.f32 1.442695, %v2492_v47 }
0x1f03   :  { %10968 = vpow2.f32 %v2493_v48 }
0x1f05   :  { %v10967_v41 = vpop.eup %10966 }
0x1f06   :  { %v2384_v49 = vsel %vm186_vm2, %v10967_v41, 0.0 }
0x1f07   :  { %2385 = vadd.xlane.f32.xlu0 %v2384_v49 }
0x1f0d   :  { %v10969_v1 = vpop.eup %10968 }
0x1f0e   :  { %v2495_v52 = vsel %vm186_vm2, %v10969_v1, 0.0 }
0x1f0f   :  { %2496 = vadd.xlane.f32.xlu1 %v2495_v52 }
0x1f1d   :  { %2390 = vrot.lane.b32.xlu0 %v11811_v58, %s13344_s9 }
0x1f20   :  { %2501 = vrot.lane.b32.xlu1 %v11811_v58, %s13314_s7 }
0x1f21   :  { %2636 = vrot.lane.b32.xlu0 %v11811_v58, %s13343_s28 }
0x1f24   :  { %2638 = vrot.lane.b32.xlu1 %v11811_v58, %s13345_s1 }
0x1f33   :  { %v2322_v13 = vpop.f32.mrb[80].mxu0 }
0x1f34   :  { %v11869_v50 = vadd.f32 %v2322_v13, %v11823_v3  ;;  %v10075_v53 = vpop.f32.mrb[81].mxu0 }
0x1f35   :  { %v2325_v55 = vpop.f32.mrb[82].mxu0 }
0x1f36   :  { %v10076_v57 = vpop.f32.mrb[83].mxu0 }
0x1f94   :  { %v2386_v51 = vpop.xlane.xlu0 %2385 }
0x1f95   :  { %10970 = vrcp.f32 %v2386_v51 }
0x1f98   :  { %v2391_v59 = vpop.permute.xlu0 %2390 }
0x1f99   :  { %v2396_v61 = vsel %vm250_vm3, %v2391_v59, 0 }
0x1f9a   :  { %10084 = vmatpush3.bf16.msra.mxu0 %v2396_v61 }
0x1f9b   :  { %10095 = vmatprep.subr.bf16.mxu0 %v11186_v9 }
0x1f9c   :  { %v2497_v62 = vpop.xlane.xlu1 %2496  ;;  %v2637_v26 = vpop.permute.xlu0 %2636 }
0x1f9d   :  { %10972 = vrcp.f32 %v2497_v62 }
0x1f9f   :  { %v10971_v4 = vpop.eup %10970 }
0x1fa0   :  { %v2388_v63 = vmul.f32 %v10971_v4, %v10967_v41  ;;  %v2502_v0 = vpop.permute.xlu1 %2501 }
0x1fa1   :  { %v2507_v3 = vsel %vm250_vm3, %v2502_v0, 0 }
0x1fa2   :  { %v2389_v5 = vpack.c.bf16 %v2388_v63, %v2388_v63 }
0x1fa4   :  { %10086 = vmatmul.mubr.msk.bf16.vlgmr.msra.gmra.mrb[84].mxu0 %vm186_vm2, %v2389_v5  ;;  %v2639_v18 = vpop.permute.xlu1 %2638 }
0x1fa5   :  { %10096 = vmatpush3.bf16.msra.mxu0 %v2507_v3  ;;  %10097 = vmatprep.mubr.msk.bf16.mxu0 %vm11187_vm1, %v11186_v9  ;;  %v2644_v23 = vsel %vm186_vm2, %v2639_v18, 0 }
0x1fa6   :  { %10107 = vmatprep.subr.bf16.mxu0 %v11186_v9 }
0x1fa7   :  { %v10973_v2 = vpop.eup %10972 }
0x1fa8   :  { %v2499_v7 = vmul.f32 %v10973_v2, %v10969_v1 }
0x1faa   :  { %v2500_v8 = vpack.c.bf16 %v2499_v7, %v2499_v7 }
0x1fac   :  { %10098 = vmatmul.mubr.msk.bf16.vlgmr.msra.gmra.mrb[88].mxu0 %vm186_vm2, %v2500_v8 }
0x1fad   :  { %10108 = vmatpush3.bf16.msra.mxu0 %v11753_v54  ;;  %10109 = vmatprep.mubr.msk.bf16.mxu0 %vm11187_vm1, %v11186_v9 }
0x1fae   :  { %10119 = vmatprep.subr.bf16.mxu0 %v11186_v9 }
0x2077   :  { %v2432_v11 = vpop.f32.mrb[84].mxu0 }
0x2078   :  { %v2438_v15 = vpack.c.bf16 %v2432_v11, %v2432_v11  ;;  %v10087_v16 = vpop.f32.mrb[85].mxu0 }
0x2079   :  { %v2435_v6 = vpop.f32.mrb[86].mxu0 }
0x207a   :  { %v10088_v17 = vpop.f32.mrb[87].mxu0  ;;  %10110 = vmatmul.mubr.msk.bf16.vlgmr.msra.gmra.mrb[92].mxu0 %vm186_vm2, %v2438_v15 }
0x207b   :  { %10121 = vmatprep.mubr.msk.bf16.mxu0 %vm11187_vm1, %v11186_v9 }
0x207f   :  { %v2543_v19 = vpop.f32.mrb[88].mxu0 }
0x2080   :  { %v2549_v20 = vpack.c.bf16 %v2543_v19, %v2543_v19  ;;  %v10099_v22 = vpop.f32.mrb[89].mxu0 }
0x2081   :  { %v2546_v54 = vpop.f32.mrb[90].mxu0 }
0x2082   :  { %v10100_v24 = vpop.f32.mrb[91].mxu0  ;;  %10104 = vmatmul.mubr.msk.bf16.vlgmr.msra.gmra.mrb[84].mxu1 %vm186_vm2, %v2549_v20 }
0x2083   :  { %10114 = vmatpush3.bf16.xpose.msra.mxu1 %v2644_v23  ;;  %10115 = vmatprep.mubr.msk.bf16.mxu1 %vm11187_vm1, %v11186_v9 }
0x2084   :  { %10125 = vmatprep.subr.bf16.mxu1 %v11186_v9 }
0x208a   :  { %10116 = vmatmul.mubr.msk.bf16.vlgmr.msra.gmra.mrb[88].mxu1 %vm186_vm2, %v2637_v26 }
0x208b   :  { %10126 = vmatpush3.bf16.msra.mxu1 %v11801_v46  ;;  %10127 = vmatprep.mubr.msk.bf16.mxu1 %vm11187_vm1, %v11186_v9 }
0x208c   :  { %10137 = vmatprep.subr.bf16.mxu1 %v11186_v9 }
0x214d   :  { %v2630_v40 = vpop.f32.mrb[92].mxu0 }
0x214e   :  { %v10111_v28 = vpop.f32.mrb[93].mxu0 }
0x214f   :  { %v2633_v60 = vpop.f32.mrb[94].mxu0 }
0x2150   :  { %v10112_v29 = vpop.f32.mrb[95].mxu0  ;;  %v9473_v60 = vld [vmem:[%s13348_s30] sm:$0xff]   ;;  %s13352_s30 = sld [smem:[#allocation9_spill]] }
0x2155   :  { %v2587_v34 = vpop.f32.mrb[84].mxu1 }
0x2156   :  { %v11896_v27 = vadd.f32 %v2630_v40, %v2587_v34  ;;  %v10105_v30 = vpop.f32.mrb[85].mxu1 }
0x2157   :  { %v2590_v31 = vpop.f32.mrb[86].mxu1  ;;  %v11946_v30 = vunpack.c.l.bf16 %v9473_v60 }
0x2158   :  { %v10106_v33 = vpop.f32.mrb[87].mxu1 }
0x215d   :  { %v2680_v37 = vpop.f32.mrb[88].mxu1 }
0x215e   :  { %v2681_v32 = vadd.f32 %v11591_v56, %v2680_v37  ;;  %v10117_v39 = vpop.f32.mrb[89].mxu1 }
0x215f   :  { %v2683_v46 = vpop.f32.mrb[90].mxu1  ;;  %v3153_v39 = vmul.f32 %v11946_v30, %v11946_v30 }
0x2160   :  { %v10118_v35 = vpop.f32.mrb[91].mxu1  ;;  %v2686_v36 = vsel %vm186_vm2, %v2681_v32, -inf  ;;  %v11955_v46 = vunpack.c.h.bf16 %v9473_v60 }
0x2161   :  { %2687 = vmax.xlane.f32.xlu1 %v2686_v36  ;;  %v3155_v36 = vsel %vm89_vm0, %v3153_v39, 0.0 }
0x2172   :  { %2793 = vrot.lane.b32.xlu1 %v11811_v58, %s13346_s26 }
0x2176   :  { %2791 = vrot.lane.b32.xlu1 %v11811_v58, %s13338_s0 }
0x21ee   :  { %v2688_v38 = vpop.xlane.xlu1 %2687 }
0x21ef   :  { %v2689_v10 = vsub.f32 %v2681_v32, %v2688_v38  ;;  %v3154_v38 = vmul.f32 %v11955_v46, %v11955_v46 }
0x21f1   :  { %v2690_v14 = vmul.f32 1.442695, %v2689_v10  ;;  %v10872_v10 = vld [vmem:[%s13272_s10 + $0x10] sm:$0xff]  }
0x21f2   :  { %v2794_v49 = vpop.permute.xlu1 %2793 }
0x21f3   :  { %10974 = vpow2.f32 %v2690_v14  ;;  %v2799_v52 = vsel %vm186_vm2, %v2794_v49, 0  ;;  %v10873_v14 = vld [vmem:[%s13272_s10 + $0x18] sm:$0xff]  }
0x21f6   :  { %v2792_v13 = vpop.permute.xlu1 %2791 }
0x21fd   :  { %v10975_v12 = vpop.eup %10974 }
0x21fe   :  { %v2692_v44 = vsel %vm186_vm2, %v10975_v12, 0.0 }
0x21ff   :  { %2693 = vadd.xlane.f32.xlu0 %v2692_v44  ;;  %v10877_v44 = vld [vmem:[%s13273_s11 + $0x28] sm:$0xff]  }
0x2215   :  { %2698 = vrot.lane.b32.xlu0 %v11811_v58, %s13339_s6 }
0x228c   :  { %v2694_v56 = vpop.xlane.xlu0 %2693 }
0x228d   :  { %10976 = vrcp.f32 %v2694_v56 }
0x2290   :  { %v2699_v45 = vpop.permute.xlu0 %2698 }
0x2291   :  { %v2704_v47 = vsel %vm250_vm3, %v2699_v45, 0 }
0x2292   :  { %10120 = vmatpush3.bf16.msra.mxu0 %v2704_v47 }
0x2293   :  { %10131 = vmatprep.subr.bf16.mxu0 %v11186_v9 }
0x2297   :  { %v10977_v48 = vpop.eup %10976 }
0x2298   :  { %v2696_v41 = vmul.f32 %v10977_v48, %v10975_v12  ;;  %v10876_v12 = vld [vmem:[%s13273_s11 + $0x20] sm:$0xff]  }
0x229a   :  { %v2697_v1 = vpack.c.bf16 %v2696_v41, %v2696_v41 }
0x229c   :  { %10122 = vmatmul.mubr.msk.bf16.vlgmr.msra.gmra.mrb[96].mxu0 %vm186_vm2, %v2697_v1 }
0x229d   :  { %10132 = vmatpush3.bf16.xpose.msra.mxu0 %v2799_v52  ;;  %10133 = vmatprep.mubr.msk.bf16.mxu0 %vm11187_vm1, %v11186_v9 }
0x229e   :  { %10143 = vmatprep.subr.bf16.mxu0 %v11186_v9 }
0x22a4   :  { %10134 = vmatmul.mubr.msk.bf16.vlgmr.msra.gmra.mrb[100].mxu0 %vm186_vm2, %v2792_v13 }
0x22a5   :  { %10144 = vmatpush3.bf16.msra.mxu0 %v11847_v25  ;;  %10145 = vmatprep.mubr.msk.bf16.mxu0 %vm11187_vm1, %v11186_v9 }
0x22a6   :  { %10157 = vmatprep.subr.bf16.mxu0 %v11186_v9 }
0x236f   :  { %v2740_v53 = vpop.f32.mrb[96].mxu0 }
0x2370   :  { %v2746_v55 = vpack.c.bf16 %v2740_v53, %v2740_v53  ;;  %v10123_v57 = vpop.f32.mrb[97].mxu0 }
0x2371   :  { %v2743_v51 = vpop.f32.mrb[98].mxu0 }
0x2372   :  { %v10124_v59 = vpop.f32.mrb[99].mxu0  ;;  %10128 = vmatmul.mubr.msk.bf16.vlgmr.msra.gmra.mrb[92].mxu1 %vm186_vm2, %v2746_v55 }
0x2373   :  { %10139 = vmatprep.mubr.msk.bf16.mxu1 %vm11187_vm1, %v11186_v9 }
0x2377   :  { %v2835_v61 = vpop.f32.mrb[100].mxu0 }
0x2378   :  { %v2836_v62 = vadd.f32 %v11620_v21, %v2835_v61  ;;  %v10135_v4 = vpop.f32.mrb[101].mxu0  ;;  %v11930_v21 = vadd.f32 %v11869_v50, %v11680_v42 }
0x2379   :  { %v2838_v25 = vpop.f32.mrb[102].mxu0 }
0x237a   :  { %v10136_v63 = vpop.f32.mrb[103].mxu0  ;;  %v2841_v0 = vsel %vm186_vm2, %v2836_v62, -inf }
0x237b   :  { %2842 = vmax.xlane.f32.xlu0 %v2841_v0 }
0x2391   :  { %2853 = vrot.lane.b32.xlu0 %v11811_v58, %s13347_s2  ;;  %v2950_v58 = vmul.f32 %v11930_v21, %v11930_v21 }
0x2393   :  { %v2952_v16 = vsel %vm89_vm0, %v2950_v58, 0.0 }
0x2408   :  { %v2843_v5 = vpop.xlane.xlu0 %2842 }
0x2409   :  { %v2844_v3 = vsub.f32 %v2836_v62, %v2843_v5  ;;  %v9264_v62 = vld [vmem:[%s13340_s8 + $0x1] ss:$0 sm:$0xff] }
0x240a   :  { %v10874_v5 = vld [vmem:[%s13276_s14] sm:$0xff]  }
0x240b   :  { %v2845_v2 = vmul.f32 1.442695, %v2844_v3 }
0x240c   :  { %v2854_v7 = vpop.permute.xlu0 %2853 }
0x240d   :  { %10978 = vpow2.f32 %v2845_v2  ;;  %v2859_v8 = vsel %vm250_vm3, %v2854_v7, 0 }
0x240e   :  { %10138 = vmatpush3.bf16.msra.mxu1 %v2859_v8  ;;  %v10875_v8 = vld [vmem:[%s13276_s14 + $0x8] sm:$0xff]  }
0x240f   :  { %10149 = vmatprep.subr.bf16.mxu1 %v11186_v9 }
0x2417   :  { %v10979_v11 = vpop.eup %10978 }
0x2418   :  { %v2847_v15 = vsel %vm186_vm2, %v10979_v11, 0.0 }
0x2419   :  { %2848 = vadd.xlane.f32.xlu1 %v2847_v15 }
0x241d   :  { %2953 = vadd.xlane.f32.xlu1 %v2952_v16 }
0x2445   :  { %v2784_v6 = vpop.f32.mrb[92].mxu1 }
0x2446   :  { %v2790_v17 = vadd.f32 %v2784_v6, %v11896_v27  ;;  %v10129_v18 = vpop.f32.mrb[93].mxu1 }
0x2447   :  { %v2787_v19 = vpop.f32.mrb[94].mxu1  ;;  %v10879_v18 = vld [vmem:[%s13273_s11 + $0x38] sm:$0xff]  }
0x2448   :  { %v10130_v20 = vpop.f32.mrb[95].mxu1 }
0x24a6   :  { %v2849_v22 = vpop.xlane.xlu1 %2848 }
0x24a7   :  { %10980 = vrcp.f32 %v2849_v22 }
0x24aa   :  { %v2954_v56 = vpop.xlane.xlu1 %2953 }
0x24ab   :  { %v2958_v45 = vmul.f32 0.03125, %v2954_v56 }
0x24ad   :  { %v2960_v47 = vadd.f32 1e-06, %v2958_v45  ;;  %v12046_v45 = vld [vmem:[%s13350_s5 + $0x8] sm:$0xff] }
0x24af   :  { %10982 = vrsqrt.f32 %v2960_v47 }
0x24b1   :  { %v10981_v42 = vpop.eup %10980 }
0x24b2   :  { %v2851_v50 = vmul.f32 %v10981_v42, %v10979_v11  ;;  %v9286_v11 = vld [vmem:[%s13275_s13] ss:$0 sm:$0xff] }
0x24b4   :  { %v2852_v54 = vpack.c.bf16 %v2851_v50, %v2851_v50 }
0x24b6   :  { %10140 = vmatmul.mubr.msk.bf16.vlgmr.msra.gmra.mrb[96].mxu1 %vm186_vm2, %v2852_v54 }
0x24b7   :  { %10153 = vmatprep.mubr.msk.bf16.mxu1 %vm11187_vm1, %v11186_v9  ;;  %10150 = vmatpush3.bf16.msra.mxu1 %v10872_v10 }
0x24b8   :  { %10151 = vmatprep.subr.bf16.mxu1 %v11186_v9 }
0x24b9   :  { %v10983_v57 = vpop.eup %10982 }
0x24ba   :  { %v2964_v59 = vmul.f32 %v10983_v57, %v11930_v21 }
0x24bb   :  { %10152 = vmatpush3.bf16.msra.mxu1 %v10873_v14 }
0x24bc   :  { %10169 = vmatprep.subr.bf16.mxu1 %v11186_v9  ;;  %v2972_v25 = vmul.f32 %v9264_v62, %v2964_v59 }
0x2589   :  { %v2895_v23 = vpop.f32.mrb[96].mxu1 }
0x258a   :  { %v2901_v24 = vpack.c.bf16 %v2895_v23, %v2895_v23  ;;  %v10141_v26 = vpop.f32.mrb[97].mxu1 }
0x258b   :  { %v2898_v40 = vpop.f32.mrb[98].mxu1 }
0x258c   :  { %v10142_v28 = vpop.f32.mrb[99].mxu1  ;;  %10146 = vmatmul.mubr.msk.bf16.vlgmr.msra.gmra.mrb[104].mxu0 %vm186_vm2, %v2901_v24 }
0x258d   :  { %10165 = vmatprep.mubr.msk.bf16.mxu0 %vm11187_vm1, %v11186_v9  ;;  %10158 = vmatpush3.bf16.msra.mxu0 %v10876_v12 }
0x258e   :  { %10159 = vmatprep.subr.bf16.mxu0 %v11186_v9 }
0x2591   :  { %10160 = vmatpush3.bf16.msra.mxu0 %v10877_v44 }
0x2592   :  { %10161 = vmatprep.subr.bf16.mxu0 %v11186_v9 }
0x265f   :  { %v2939_v29 = vpop.f32.mrb[104].mxu0 }
0x2660   :  { %v2945_v34 = vadd.f32 %v2939_v29, %v2790_v17  ;;  %v10147_v27 = vpop.f32.mrb[105].mxu0  ;;  %v10878_v17 = vld [vmem:[%s13273_s11 + $0x30] sm:$0xff]   ;;  %s13349_s11 = smov 88  }
0x2661   :  { %v2942_v31 = vpop.f32.mrb[106].mxu0  ;;  %10162 = vmatpush3.bf16.msra.mxu0 %v10878_v17  ;;  %v3239_v17 = vld [vmem:[%s13277_s15] sm:$0xf] }
0x2662   :  { %v11949_v33 = vadd.f32 %v2945_v34, %v11682_v43  ;;  %v10148_v37 = vpop.f32.mrb[107].mxu0  ;;  %v3158_v43 = vsel %vm89_vm0, %v3154_v38, 0.0  ;;  %10163 = vmatprep.subr.bf16.mxu0 %v11186_v9  ;;  %v12039_v38 = vld [vmem:[%s13350_s5] sm:$0xff] }
0x2664   :  { %v2951_v32 = vmul.f32 %v11949_v33, %v11949_v33 }
0x2665   :  { %10164 = vmatpush3.bf16.msra.mxu0 %v10879_v18  ;;  %v12074_v18 = vsel %vm250_vm3, %v3239_v17, 0  ;;  %v12137_v17 = vld [vmem:[%s13350_s5 + $0x18] sm:$0xff] }
0x2666   :  { %v2955_v35 = vsel %vm89_vm0, %v2951_v32, 0.0  ;;  %10183 = vmatprep.subr.bf16.mxu0 %v11186_v9 }
0x2667   :  { %2956 = vadd.xlane.f32.xlu1 %v2955_v35 }
0x266b   :  { %3156 = vadd.xlane.f32.xlu1 %v3155_v36 }
0x266f   :  { %3159 = vadd.xlane.f32.xlu1 %v3158_v43 }
0x26f4   :  { %v2957_v48 = vpop.xlane.xlu1 %2956 }
0x26f5   :  { %v2959_v41 = vmul.f32 0.03125, %v2957_v48 }
0x26f7   :  { %v2961_v49 = vadd.f32 1e-06, %v2959_v41 }
0x26f8   :  { %v3157_v1 = vpop.xlane.xlu1 %3156 }
0x26f9   :  { %10984 = vrsqrt.f32 %v2961_v49  ;;  %v3161_v52 = vmul.f32 0.03125, %v3157_v1 }
0x26fb   :  { %v3163_v13 = vadd.f32 1e-06, %v3161_v52 }
0x26fc   :  { %v3160_v53 = vpop.xlane.xlu1 %3159 }
0x26fd   :  { %10986 = vrsqrt.f32 %v3163_v13  ;;  %v3162_v55 = vmul.f32 0.03125, %v3160_v53 }
0x26ff   :  { %v3164_v51 = vadd.f32 1e-06, %v3162_v55 }
0x2701   :  { %10988 = vrsqrt.f32 %v3164_v51 }
0x2703   :  { %v10985_v61 = vpop.eup %10984 }
0x2704   :  { %v2965_v4 = vmul.f32 %v10985_v61, %v11949_v33 }
0x2706   :  { %v2973_v63 = vmul.f32 %v9264_v62, %v2965_v4 }
0x2707   :  { %v10987_v0 = vpop.eup %10986 }
0x2708   :  { %v2979_v3 = vpack.c.bf16 %v2973_v63, %v2972_v25  ;;  %v3167_v2 = vmul.f32 %v10987_v0, %v11946_v30 }
0x270a   :  { %10154 = vmatmul.mubr.msk.bf16.vlgmr.msra.gmra.mrb[100].mxu1 %vm89_vm0, %v2979_v3  ;;  %v3175_v58 = vmul.f32 %v9286_v11, %v3167_v2 }
0x270b   :  { %v10989_v7 = vpop.eup %10988  ;;  %10170 = vmatpush3.bf16.msra.mxu1 %v10874_v5  ;;  %10173 = vmatprep.mubr.msk.bf16.mxu1 %vm11187_vm1, %v11186_v9 }
0x270c   :  { %v3168_v15 = vmul.f32 %v10989_v7, %v11955_v46  ;;  %10171 = vmatprep.subr.bf16.mxu1 %v11186_v9 }
0x270e   :  { %v3176_v16 = vmul.f32 %v9286_v11, %v3168_v15 }
0x270f   :  { %10172 = vmatpush3.bf16.msra.mxu1 %v10875_v8 }
0x2710   :  { %v3181_v6 = vpack.c.bf16 %v3176_v16, %v3175_v58  ;;  %10177 = vmatprep.subr.bf16.mxu1 %v11186_v9 }
0x2712   :  { %10174 = vmatmul.mubr.msk.bf16.vlgmr.msra.gmra.mrb[104].mxu1 %vm89_vm0, %v3181_v6 }
0x2713   :  { %10179 = vmatprep.mubr.msk.bf16.mxu1 %vm11187_vm1, %v11186_v9 }
0x27dd   :  { %v3029_v19 = vpop.f32.mrb[100].mxu1 }
0x27de   :  { %v10155_v20 = vpop.f32.mrb[101].mxu1  ;;  %v3036_v42 = vmax.f32 %v3029_v19, 0.0  ;;  %v3240_v19 = vld [vmem:[%s13277_s15 + $0x4] sm:$0xf] }
0x27df   :  { %v3032_v22 = vpop.f32.mrb[102].mxu1  ;;  %v12081_v20 = vsel %vm250_vm3, %v3240_v19, 0 }
0x27e0   :  { %v3037_v50 = vmax.f32 %v3032_v22, 0.0  ;;  %v10156_v54 = vpop.f32.mrb[103].mxu1 }
0x27e2   :  { %v3047_v23 = vpack.c.bf16 %v3037_v50, %v3036_v42 }
0x27e4   :  { %10166 = vmatmul.mubr.msk.bf16.vlgmr.msra.gmra.mrb[108].mxu0 %vm1559_vm4, %v3047_v23 }
0x27e5   :  { %v3231_v24 = vpop.f32.mrb[104].mxu1  ;;  %10185 = vmatprep.mubr.msk.bf16.mxu0 %vm11187_vm1, %v11186_v9 }
0x27e6   :  { %v10175_v26 = vpop.f32.mrb[105].mxu1 }
0x27e7   :  { %v3234_v40 = vpop.f32.mrb[106].mxu1 }
0x27e8   :  { %v12013_v28 = vpack.c.bf16 %v3234_v40, %v3231_v24  ;;  %v10176_v60 = vpop.f32.mrb[107].mxu1 }
0x27ea   :  { %3355 = vrot.lane.b32.xlu1 %v12013_v28, %s13349_s11  ;;  %3244 = vrot.lane.b32.xlu0 %v12013_v28, %s13341_s3 }
0x27ee   :  { %3353 = vrot.lane.b32.xlu0 %v12013_v28, %s13342_s4 }
0x285c   :  { %v3245_v29 = vpop.permute.xlu0 %3244  ;;  %v3356_v27 = vpop.permute.xlu1 %3355 }
0x285d   :  { %v3250_v34 = vsel %vm186_vm2, %v3245_v29, 0  ;;  %v3361_v31 = vsel %vm186_vm2, %v3356_v27, 0 }
0x285e   :  { %10178 = vmatpush3.bf16.xpose.msra.mxu1 %v3250_v34 }
0x285f   :  { %10189 = vmatprep.subr.bf16.mxu1 %v11186_v9 }
0x2860   :  { %v3354_v37 = vpop.permute.xlu0 %3353 }
0x2865   :  { %10180 = vmatmul.mubr.msk.bf16.vlgmr.msra.gmra.mrb[108].mxu1 %vm186_vm2, %v12013_v28 }
0x2866   :  { %10190 = vmatpush3.bf16.xpose.msra.mxu1 %v3361_v31  ;;  %10191 = vmatprep.mubr.msk.bf16.mxu1 %vm11187_vm1, %v11186_v9 }
0x2867   :  { %10201 = vmatprep.subr.bf16.mxu1 %v11186_v9 }
0x286d   :  { %10192 = vmatmul.mubr.msk.bf16.vlgmr.msra.gmra.mrb[112].mxu1 %vm186_vm2, %v3354_v37 }
0x286e   :  { %10203 = vmatprep.mubr.msk.bf16.mxu1 %vm11187_vm1, %v11186_v9  ;;  %10202 = vmatpush3.bf16.msra.mxu1 %v12081_v20 }
0x286f   :  { %10213 = vmatprep.subr.bf16.mxu1 %v11186_v9 }
0x28b7   :  { %v12032_v32 = vpop.f32.mrb[108].mxu0 }
0x28b8   :  { %v10167_v39 = vpop.f32.mrb[109].mxu0 }
0x28b9   :  { %v12034_v35 = vpop.f32.mrb[110].mxu0 }
0x28ba   :  { %v10168_v36 = vpop.f32.mrb[111].mxu0 }
0x2938   :  { %v3286_v43 = vpop.f32.mrb[108].mxu1 }
0x2939   :  { %v3287_v10 = vadd.f32 %v3286_v43, %v12039_v38  ;;  %v10181_v14 = vpop.f32.mrb[109].mxu1 }
0x293a   :  { %v3289_v12 = vpop.f32.mrb[110].mxu1 }
0x293b   :  { %v10182_v44 = vpop.f32.mrb[111].mxu1  ;;  %v3292_v56 = vsel %vm186_vm2, %v3287_v10, -inf }
0x293c   :  { %3293 = vmax.xlane.f32.xlu0 %v3292_v56 }
0x2940   :  { %v3397_v47 = vpop.f32.mrb[112].mxu1 }
0x2941   :  { %v3398_v48 = vadd.f32 %v3397_v47, %v12046_v45  ;;  %v10193_v41 = vpop.f32.mrb[113].mxu1  ;;  %v12102_v47 = vld [vmem:[%s13350_s5 + $0x10] sm:$0xff] }
0x2942   :  { %v3400_v49 = vpop.f32.mrb[114].mxu1 }
0x2943   :  { %v10194_v1 = vpop.f32.mrb[115].mxu1  ;;  %v3403_v52 = vsel %vm186_vm2, %v3398_v48, -inf }
0x2944   :  { %3404 = vmax.xlane.f32.xlu1 %v3403_v52 }
0x2955   :  { %3415 = vrot.lane.b32.xlu1 %v12013_v28, %s13351_s29 }
0x2959   :  { %3556 = vrot.lane.b32.xlu1 %v12013_v28, %s13343_s28 }
0x29c9   :  { %v3294_v13 = vpop.xlane.xlu0 %3293 }
0x29ca   :  { %v3295_v53 = vsub.f32 %v3287_v10, %v3294_v13 }
0x29cc   :  { %v3296_v55 = vmul.f32 1.442695, %v3295_v53 }
0x29ce   :  { %10990 = vpow2.f32 %v3296_v55 }
0x29d1   :  { %v3405_v57 = vpop.xlane.xlu1 %3404 }
0x29d2   :  { %v3406_v51 = vsub.f32 %v3398_v48, %v3405_v57 }
0x29d4   :  { %v3407_v59 = vmul.f32 1.442695, %v3406_v51 }
0x29d5   :  { %v3416_v8 = vpop.permute.xlu1 %3415 }
0x29d6   :  { %10992 = vpow2.f32 %v3407_v59  ;;  %v3421_v15 = vsel %vm250_vm3, %v3416_v8, 0 }
0x29d8   :  { %v10991_v61 = vpop.eup %10990 }
0x29d9   :  { %v3298_v62 = vsel %vm186_vm2, %v10991_v61, 0.0  ;;  %v3557_v31 = vpop.permute.xlu1 %3556 }
0x29da   :  { %3299 = vadd.xlane.f32.xlu0 %v3298_v62 }
0x29e0   :  { %v10993_v4 = vpop.eup %10992 }
0x29e1   :  { %v3409_v25 = vsel %vm186_vm2, %v10993_v4, 0.0 }
0x29e2   :  { %3410 = vadd.xlane.f32.xlu0 %v3409_v25 }
0x29f8   :  { %3304 = vrot.lane.b32.xlu0 %v12013_v28, %s13344_s9 }
0x29fc   :  { %3558 = vrot.lane.b32.xlu0 %v12013_v28, %s13345_s1 }
0x2a67   :  { %v3300_v63 = vpop.xlane.xlu0 %3299 }
0x2a68   :  { %10994 = vrcp.f32 %v3300_v63 }
0x2a6f   :  { %v3411_v0 = vpop.xlane.xlu0 %3410 }
0x2a70   :  { %10996 = vrcp.f32 %v3411_v0 }
0x2a72   :  { %v10995_v5 = vpop.eup %10994 }
0x2a73   :  { %v3305_v3 = vpop.permute.xlu0 %3304  ;;  %v3302_v2 = vmul.f32 %v10995_v5, %v10991_v61 }
0x2a74   :  { %v3310_v7 = vsel %vm250_vm3, %v3305_v3, 0 }
0x2a75   :  { %10184 = vmatpush3.bf16.msra.mxu0 %v3310_v7  ;;  %v3303_v11 = vpack.c.bf16 %v3302_v2, %v3302_v2  ;;  %v3241_v7 = vld [vmem:[%s13277_s15 + $0x8] sm:$0xf] }
0x2a76   :  { %10195 = vmatprep.subr.bf16.mxu0 %v11186_v9  ;;  %v12127_v8 = vsel %vm250_vm3, %v3241_v7, 0 }
0x2a77   :  { %v3559_v24 = vpop.permute.xlu0 %3558 }
0x2a78   :  { %10186 = vmatmul.mubr.msk.bf16.vlgmr.msra.gmra.mrb[112].mxu0 %vm186_vm2, %v3303_v11  ;;  %v3564_v34 = vsel %vm186_vm2, %v3559_v24, 0  ;;  %v12142_v24 = vrot.slane %v12013_v28, 4 }
0x2a79   :  { %10196 = vmatpush3.bf16.msra.mxu0 %v3421_v15  ;;  %10197 = vmatprep.mubr.msk.bf16.mxu0 %vm11187_vm1, %v11186_v9 }
0x2a7a   :  { %v10997_v58 = vpop.eup %10996  ;;  %10207 = vmatprep.subr.bf16.mxu0 %v11186_v9 }
0x2a7b   :  { %v3413_v16 = vmul.f32 %v10997_v58, %v10993_v4 }
0x2a7d   :  { %v3414_v6 = vpack.c.bf16 %v3413_v16, %v3413_v16 }
0x2a80   :  { %10198 = vmatmul.mubr.msk.bf16.vlgmr.msra.gmra.mrb[116].mxu0 %vm186_vm2, %v3414_v6 }
0x2a81   :  { %10209 = vmatprep.mubr.msk.bf16.mxu0 %vm11187_vm1, %v11186_v9  ;;  %10208 = vmatpush3.bf16.msra.mxu0 %v12074_v18 }
0x2a82   :  { %10219 = vmatprep.subr.bf16.mxu0 %v11186_v9 }
0x2b4b   :  { %v3346_v22 = vpop.f32.mrb[112].mxu0 }
0x2b4c   :  { %v3352_v42 = vpack.c.bf16 %v3346_v22, %v3346_v22  ;;  %v10187_v50 = vpop.f32.mrb[113].mxu0 }
0x2b4d   :  { %v3349_v54 = vpop.f32.mrb[114].mxu0 }
0x2b4e   :  { %v10188_v23 = vpop.f32.mrb[115].mxu0  ;;  %10210 = vmatmul.mubr.msk.bf16.vlgmr.msra.gmra.mrb[120].mxu0 %vm186_vm2, %v3352_v42 }
0x2b4f   :  { %10221 = vmatprep.mubr.msk.bf16.mxu0 %vm11187_vm1, %v11186_v9 }
0x2b53   :  { %v3457_v26 = vpop.f32.mrb[116].mxu0 }
0x2b54   :  { %v3463_v40 = vpack.c.bf16 %v3457_v26, %v3457_v26  ;;  %v10199_v60 = vpop.f32.mrb[117].mxu0 }
0x2b55   :  { %v3460_v29 = vpop.f32.mrb[118].mxu0 }
0x2b56   :  { %v10200_v27 = vpop.f32.mrb[119].mxu0  ;;  %10204 = vmatmul.mubr.msk.bf16.vlgmr.msra.gmra.mrb[116].mxu1 %vm186_vm2, %v3463_v40 }
0x2b57   :  { %10214 = vmatpush3.bf16.xpose.msra.mxu1 %v3564_v34  ;;  %10215 = vmatprep.mubr.msk.bf16.mxu1 %vm11187_vm1, %v11186_v9 }
0x2b58   :  { %10225 = vmatprep.subr.bf16.mxu1 %v11186_v9 }
0x2b5e   :  { %10216 = vmatmul.mubr.msk.bf16.vlgmr.msra.gmra.mrb[120].mxu1 %vm186_vm2, %v3557_v31 }
0x2b5f   :  { %10227 = vmatprep.mubr.msk.bf16.mxu1 %vm11187_vm1, %v11186_v9  ;;  %10226 = vmatpush3.bf16.msra.mxu1 %v12127_v8 }
0x2b60   :  { %10237 = vmatprep.subr.bf16.mxu1 %v11186_v9 }
0x2c21   :  { %v3550_v37 = vpop.f32.mrb[120].mxu0 }
0x2c22   :  { %v10211_v39 = vpop.f32.mrb[121].mxu0 }
0x2c23   :  { %v3553_v36 = vpop.f32.mrb[122].mxu0 }
0x2c24   :  { %v10212_v43 = vpop.f32.mrb[123].mxu0 }
0x2c29   :  { %v3504_v10 = vpop.f32.mrb[116].mxu1 }
0x2c2a   :  { %v12097_v14 = vadd.f32 %v3550_v37, %v3504_v10  ;;  %v10205_v12 = vpop.f32.mrb[117].mxu1 }
0x2c2b   :  { %v3507_v44 = vpop.f32.mrb[118].mxu1 }
0x2c2c   :  { %v10206_v56 = vpop.f32.mrb[119].mxu1 }
0x2c31   :  { %v3600_v48 = vpop.f32.mrb[120].mxu1 }
0x2c32   :  { %v3601_v41 = vadd.f32 %v3600_v48, %v12102_v47  ;;  %v10217_v49 = vpop.f32.mrb[121].mxu1 }
0x2c33   :  { %v3603_v1 = vpop.f32.mrb[122].mxu1 }
0x2c34   :  { %v10218_v52 = vpop.f32.mrb[123].mxu1  ;;  %v3606_v13 = vsel %vm186_vm2, %v3601_v41, -inf }
0x2c35   :  { %3607 = vmax.xlane.f32.xlu0 %v3606_v13  ;;  %v3242_v52 = vld [vmem:[%s13277_s15 + $0xc] sm:$0xf] }
0x2c36   :  { %v12178_v13 = vsel %vm250_vm3, %v3242_v52, 0 }
0x2c4b   :  { %3618 = vrot.lane.b32.xlu0 %v12013_v28, %s13339_s6 }
0x2c4f   :  { %3714 = vrot.lane.b32.xlu0 %v12013_v28, %s13338_s0 }
0x2cc2   :  { %v3608_v53 = vpop.xlane.xlu0 %3607 }
0x2cc3   :  { %v3609_v55 = vsub.f32 %v3601_v41, %v3608_v53 }
0x2cc5   :  { %v3610_v57 = vmul.f32 1.442695, %v3609_v55 }
0x2cc6   :  { %v3619_v51 = vpop.permute.xlu0 %3618 }
0x2cc7   :  { %10998 = vpow2.f32 %v3610_v57  ;;  %v3624_v59 = vsel %vm250_vm3, %v3619_v51, 0 }
0x2cc8   :  { %10220 = vmatpush3.bf16.msra.mxu0 %v3624_v59 }
0x2cc9   :  { %10231 = vmatprep.subr.bf16.mxu0 %v11186_v9 }
0x2cca   :  { %v3715_v2 = vpop.permute.xlu0 %3714 }
0x2cd1   :  { %v10999_v61 = vpop.eup %10998 }
0x2cd2   :  { %v3612_v62 = vsel %vm186_vm2, %v10999_v61, 0.0 }
0x2cd3   :  { %3613 = vadd.xlane.f32.xlu1 %v3612_v62 }
0x2ce4   :  { %3716 = vrot.lane.b32.xlu1 %v12013_v28, %s13346_s26 }
0x2d60   :  { %v3614_v4 = vpop.xlane.xlu1 %3613 }
0x2d61   :  { %11000 = vrcp.f32 %v3614_v4 }
0x2d64   :  { %v3717_v0 = vpop.permute.xlu1 %3716 }
0x2d65   :  { %v3722_v3 = vsel %vm186_vm2, %v3717_v0, 0 }
0x2d6b   :  { %v11001_v25 = vpop.eup %11000 }
0x2d6c   :  { %v3616_v63 = vmul.f32 %v11001_v25, %v10999_v61 }
0x2d6e   :  { %v3617_v5 = vpack.c.bf16 %v3616_v63, %v3616_v63 }
0x2d70   :  { %10222 = vmatmul.mubr.msk.bf16.vlgmr.msra.gmra.mrb[124].mxu0 %vm186_vm2, %v3617_v5 }
0x2d71   :  { %10232 = vmatpush3.bf16.xpose.msra.mxu0 %v3722_v3  ;;  %10233 = vmatprep.mubr.msk.bf16.mxu0 %vm11187_vm1, %v11186_v9 }
0x2d72   :  { %10243 = vmatprep.subr.bf16.mxu0 %v11186_v9 }
0x2d78   :  { %10234 = vmatmul.mubr.msk.bf16.vlgmr.msra.gmra.mrb[128].mxu0 %vm186_vm2, %v3715_v2 }
0x2d79   :  { %10245 = vmatprep.mubr.msk.bf16.mxu0 %vm11187_vm1, %v11186_v9  ;;  %10244 = vmatpush3.bf16.msra.mxu0 %v12178_v13 }
0x2d7a   :  { %10255 = vmatprep.subr.bf16.mxu0 %v11186_v9 }
0x2e43   :  { %v3660_v11 = vpop.f32.mrb[124].mxu0 }
0x2e44   :  { %v3666_v15 = vpack.c.bf16 %v3660_v11, %v3660_v11  ;;  %v10223_v58 = vpop.f32.mrb[125].mxu0 }
0x2e45   :  { %v3663_v16 = vpop.f32.mrb[126].mxu0 }
0x2e46   :  { %v10224_v6 = vpop.f32.mrb[127].mxu0  ;;  %10228 = vmatmul.mubr.msk.bf16.vlgmr.msra.gmra.mrb[124].mxu1 %vm186_vm2, %v3666_v15 }
0x2e47   :  { %10239 = vmatprep.mubr.msk.bf16.mxu1 %vm11187_vm1, %v11186_v9 }
0x2e4b   :  { %v3758_v19 = vpop.f32.mrb[128].mxu0 }
0x2e4c   :  { %v3759_v22 = vadd.f32 %v3758_v19, %v12137_v17  ;;  %v10235_v42 = vpop.f32.mrb[129].mxu0 }
0x2e4d   :  { %v3761_v50 = vpop.f32.mrb[130].mxu0 }
0x2e4e   :  { %v10236_v54 = vpop.f32.mrb[131].mxu0  ;;  %v3764_v23 = vsel %vm186_vm2, %v3759_v22, -inf }
0x2e4f   :  { %3765 = vmax.xlane.f32.xlu1 %v3764_v23 }
0x2e60   :  { %3873 = vrot.lane.b32.xlu1 %v12142_v24, %s13341_s3 }
0x2e64   :  { %3984 = vrot.lane.b32.xlu1 %v12142_v24, %s13349_s11 }
0x2edc   :  { %v3766_v26 = vpop.xlane.xlu1 %3765 }
0x2edd   :  { %v3767_v40 = vsub.f32 %v3759_v22, %v3766_v26 }
0x2edf   :  { %v3768_v60 = vmul.f32 1.442695, %v3767_v40 }
0x2ee0   :  { %v3874_v56 = vpop.permute.xlu1 %3873 }
0x2ee1   :  { %11002 = vpow2.f32 %v3768_v60  ;;  %v3879_v41 = vsel %vm186_vm2, %v3874_v56, 0 }
0x2eeb   :  { %v11003_v29 = vpop.eup %11002 }
0x2eec   :  { %v3770_v34 = vsel %vm186_vm2, %v11003_v29, 0.0 }
0x2eed   :  { %3771 = vadd.xlane.f32.xlu0 %v3770_v34 }
0x2f03   :  { %3776 = vrot.lane.b32.xlu0 %v12013_v28, %s13347_s2 }
0x2f07   :  { %3982 = vrot.lane.b32.xlu0 %v12142_v24, %s13342_s4 }
0x2f19   :  { %v3707_v27 = vpop.f32.mrb[124].mxu1 }
0x2f1a   :  { %v12154_v31 = vadd.f32 %v3707_v27, %v12097_v14  ;;  %v10229_v37 = vpop.f32.mrb[125].mxu1  ;;  %v3985_v14 = vpop.permute.xlu1 %3984 }
0x2f1b   :  { %v3710_v39 = vpop.f32.mrb[126].mxu1  ;;  %v3990_v49 = vsel %vm186_vm2, %v3985_v14, 0 }
0x2f1c   :  { %v10230_v36 = vpop.f32.mrb[127].mxu1 }
0x2f7a   :  { %v3772_v43 = vpop.xlane.xlu0 %3771 }
0x2f7b   :  { %11004 = vrcp.f32 %v3772_v43 }
0x2f7e   :  { %v3777_v10 = vpop.permute.xlu0 %3776 }
0x2f7f   :  { %v3782_v12 = vsel %vm250_vm3, %v3777_v10, 0 }
0x2f80   :  { %10238 = vmatpush3.bf16.msra.mxu1 %v3782_v12 }
0x2f81   :  { %10249 = vmatprep.subr.bf16.mxu1 %v11186_v9 }
0x2f82   :  { %v3983_v1 = vpop.permute.xlu0 %3982 }
0x2f85   :  { %v11005_v44 = vpop.eup %11004 }
0x2f86   :  { %v3774_v28 = vmul.f32 %v11005_v44, %v11003_v29 }
0x2f88   :  { %v3775_v48 = vpack.c.bf16 %v3774_v28, %v3774_v28 }
0x2f8a   :  { %10240 = vmatmul.mubr.msk.bf16.vlgmr.msra.gmra.mrb[128].mxu1 %vm186_vm2, %v3775_v48 }
0x2f8b   :  { %10250 = vmatpush3.bf16.xpose.msra.mxu1 %v3879_v41  ;;  %10251 = vmatprep.mubr.msk.bf16.mxu1 %vm11187_vm1, %v11186_v9 }
0x2f8c   :  { %10261 = vmatprep.subr.bf16.mxu1 %v11186_v9 }
0x2f92   :  { %10252 = vmatmul.mubr.msk.bf16.vlgmr.msra.gmra.mrb[132].mxu1 %vm186_vm2, %v12142_v24 }
0x2f93   :  { %10262 = vmatpush3.bf16.xpose.msra.mxu1 %v3990_v49  ;;  %10263 = vmatprep.mubr.msk.bf16.mxu1 %vm11187_vm1, %v11186_v9 }
0x2f94   :  { %10273 = vmatprep.subr.bf16.mxu1 %v11186_v9 }
0x2f9a   :  { %10264 = vmatmul.mubr.msk.bf16.vlgmr.msra.gmra.mrb[136].mxu1 %vm186_vm2, %v3983_v1 }
0x2f9b   :  { %10274 = vmatpush3.bf16.msra.mxu1 %v12081_v20  ;;  %10275 = vmatprep.mubr.msk.bf16.mxu1 %vm11187_vm1, %v11186_v9 }
0x2f9c   :  { %10285 = vmatprep.subr.bf16.mxu1 %v11186_v9 }
0x305d   :  { %v3818_v53 = vpop.f32.mrb[128].mxu1 }
0x305e   :  { %v3824_v55 = vpack.c.bf16 %v3818_v53, %v3818_v53  ;;  %v10241_v57 = vpop.f32.mrb[129].mxu1 }
0x305f   :  { %v3821_v20 = vpop.f32.mrb[130].mxu1 }
0x3060   :  { %v10242_v51 = vpop.f32.mrb[131].mxu1  ;;  %10246 = vmatmul.mubr.msk.bf16.vlgmr.msra.gmra.mrb[132].mxu0 %vm186_vm2, %v3824_v55 }
0x3061   :  { %10257 = vmatprep.mubr.msk.bf16.mxu0 %vm11187_vm1, %v11186_v9 }
0x3065   :  { %v3915_v59 = vpop.f32.mrb[132].mxu1 }
0x3066   :  { %v3916_v61 = vadd.f32 %v3915_v59, %v12039_v38  ;;  %v10253_v62 = vpop.f32.mrb[133].mxu1 }
0x3067   :  { %v3918_v4 = vpop.f32.mrb[134].mxu1 }
0x3068   :  { %v10254_v25 = vpop.f32.mrb[135].mxu1  ;;  %v3921_v63 = vsel %vm186_vm2, %v3916_v61, -inf }
0x3069   :  { %3922 = vmax.xlane.f32.xlu1 %v3921_v63 }
0x306d   :  { %v4026_v0 = vpop.f32.mrb[136].mxu1 }
0x306e   :  { %v4027_v5 = vadd.f32 %v4026_v0, %v12046_v45  ;;  %v10265_v3 = vpop.f32.mrb[137].mxu1 }
0x306f   :  { %v4029_v2 = vpop.f32.mrb[138].mxu1 }
0x3070   :  { %v10266_v7 = vpop.f32.mrb[139].mxu1  ;;  %v4032_v11 = vsel %vm186_vm2, %v4027_v5, -inf }
0x3071   :  { %4033 = vmax.xlane.f32.xlu0 %v4032_v11 }
0x30f6   :  { %v3923_v15 = vpop.xlane.xlu1 %3922 }
0x30f7   :  { %v3924_v58 = vsub.f32 %v3916_v61, %v3923_v15 }
0x30f9   :  { %v3925_v16 = vmul.f32 1.442695, %v3924_v58 }
0x30fb   :  { %11006 = vpow2.f32 %v3925_v16 }
0x30fe   :  { %v4034_v38 = vpop.xlane.xlu0 %4033 }
0x30ff   :  { %v4035_v6 = vsub.f32 %v4027_v5, %v4034_v38 }
0x3101   :  { %v4036_v19 = vmul.f32 1.442695, %v4035_v6 }
0x3103   :  { %11008 = vpow2.f32 %v4036_v19 }
0x3105   :  { %v11007_v22 = vpop.eup %11006 }
0x3106   :  { %v3927_v42 = vsel %vm186_vm2, %v11007_v22, 0.0 }
0x3107   :  { %3928 = vadd.xlane.f32.xlu0 %v3927_v42 }
0x310d   :  { %v11009_v50 = vpop.eup %11008 }
0x310e   :  { %v4038_v45 = vsel %vm186_vm2, %v11009_v50, 0.0 }
0x310f   :  { %4039 = vadd.xlane.f32.xlu1 %v4038_v45 }
0x311d   :  { %3933 = vrot.lane.b32.xlu0 %v12142_v24, %s13344_s9 }
0x3120   :  { %4044 = vrot.lane.b32.xlu1 %v12142_v24, %s13351_s29 }
0x3121   :  { %4179 = vrot.lane.b32.xlu0 %v12142_v24, %s13343_s28 }
0x3124   :  { %4181 = vrot.lane.b32.xlu1 %v12142_v24, %s13345_s1 }
0x3133   :  { %v3865_v54 = vpop.f32.mrb[132].mxu0 }
0x3134   :  { %v12200_v23 = vadd.f32 %v3865_v54, %v12154_v31  ;;  %v10247_v26 = vpop.f32.mrb[133].mxu0 }
0x3135   :  { %v3868_v40 = vpop.f32.mrb[134].mxu0 }
0x3136   :  { %v10248_v60 = vpop.f32.mrb[135].mxu0 }
0x3194   :  { %v3929_v29 = vpop.xlane.xlu0 %3928 }
0x3195   :  { %11010 = vrcp.f32 %v3929_v29 }
0x3198   :  { %v3934_v34 = vpop.permute.xlu0 %3933 }
0x3199   :  { %v3939_v27 = vsel %vm250_vm3, %v3934_v34, 0 }
0x319a   :  { %10256 = vmatpush3.bf16.msra.mxu0 %v3939_v27 }
0x319b   :  { %10267 = vmatprep.subr.bf16.mxu0 %v11186_v9 }
0x319c   :  { %v4040_v37 = vpop.xlane.xlu1 %4039  ;;  %v4180_v51 = vpop.permute.xlu0 %4179 }
0x319d   :  { %11012 = vrcp.f32 %v4040_v37 }
0x319f   :  { %v11011_v39 = vpop.eup %11010 }
0x31a0   :  { %v3931_v36 = vmul.f32 %v11011_v39, %v11007_v22  ;;  %v4045_v43 = vpop.permute.xlu1 %4044 }
0x31a1   :  { %v4050_v31 = vsel %vm250_vm3, %v4045_v43, 0 }
0x31a2   :  { %v3932_v10 = vpack.c.bf16 %v3931_v36, %v3931_v36 }
0x31a4   :  { %10258 = vmatmul.mubr.msk.bf16.vlgmr.msra.gmra.mrb[136].mxu0 %vm186_vm2, %v3932_v10  ;;  %v4182_v1 = vpop.permute.xlu1 %4181 }
0x31a5   :  { %10268 = vmatpush3.bf16.msra.mxu0 %v4050_v31  ;;  %10269 = vmatprep.mubr.msk.bf16.mxu0 %vm11187_vm1, %v11186_v9  ;;  %v4187_v57 = vsel %vm186_vm2, %v4182_v1, 0 }
0x31a6   :  { %10279 = vmatprep.subr.bf16.mxu0 %v11186_v9 }
0x31a7   :  { %v11013_v12 = vpop.eup %11012 }
0x31a8   :  { %v4042_v44 = vmul.f32 %v11013_v12, %v11009_v50 }
0x31aa   :  { %v4043_v28 = vpack.c.bf16 %v4042_v44, %v4042_v44 }
0x31ac   :  { %10270 = vmatmul.mubr.msk.bf16.vlgmr.msra.gmra.mrb[140].mxu0 %vm186_vm2, %v4043_v28 }
0x31ad   :  { %10280 = vmatpush3.bf16.msra.mxu0 %v12074_v18  ;;  %10281 = vmatprep.mubr.msk.bf16.mxu0 %vm11187_vm1, %v11186_v9 }
0x31ae   :  { %10291 = vmatprep.subr.bf16.mxu0 %v11186_v9 }
0x3277   :  { %v3975_v56 = vpop.f32.mrb[136].mxu0 }
0x3278   :  { %v3981_v48 = vpack.c.bf16 %v3975_v56, %v3975_v56  ;;  %v10259_v41 = vpop.f32.mrb[137].mxu0 }
0x3279   :  { %v3978_v14 = vpop.f32.mrb[138].mxu0 }
0x327a   :  { %v10260_v49 = vpop.f32.mrb[139].mxu0  ;;  %10282 = vmatmul.mubr.msk.bf16.vlgmr.msra.gmra.mrb[144].mxu0 %vm186_vm2, %v3981_v48 }
0x327b   :  { %10293 = vmatprep.mubr.msk.bf16.mxu0 %vm11187_vm1, %v11186_v9 }
0x327f   :  { %v4086_v52 = vpop.f32.mrb[140].mxu0 }
0x3280   :  { %v4092_v53 = vpack.c.bf16 %v4086_v52, %v4086_v52  ;;  %v10271_v55 = vpop.f32.mrb[141].mxu0  ;;  %v3117_v52 = vadd.f32 %v12034_v35, %v11949_v33 }
0x3281   :  { %v4089_v18 = vpop.f32.mrb[142].mxu0  ;;  %v12266_v55 = vadd.f32 %v11946_v30, %v12200_v23 }
0x3282   :  { %v10272_v20 = vpop.f32.mrb[143].mxu0  ;;  %10276 = vmatmul.mubr.msk.bf16.vlgmr.msra.gmra.mrb[140].mxu1 %vm186_vm2, %v4092_v53  ;;  %v3120_v53 = vmul.f32 %v3117_v52, %v3117_v52 }
0x3283   :  { %10286 = vmatpush3.bf16.xpose.msra.mxu1 %v4187_v57  ;;  %10287 = vmatprep.mubr.msk.bf16.mxu1 %vm11187_vm1, %v11186_v9 }
0x3284   :  { %10297 = vmatprep.subr.bf16.mxu1 %v11186_v9  ;;  %v3124_v57 = vsel %vm89_vm0, %v3120_v53, 0.0 }
0x328a   :  { %10288 = vmatmul.mubr.msk.bf16.vlgmr.msra.gmra.mrb[144].mxu1 %vm186_vm2, %v4180_v51 }
0x328b   :  { %10298 = vmatpush3.bf16.msra.mxu1 %v12127_v8  ;;  %10299 = vmatprep.mubr.msk.bf16.mxu1 %vm11187_vm1, %v11186_v9 }
0x328c   :  { %10309 = vmatprep.subr.bf16.mxu1 %v11186_v9 }
0x334d   :  { %v4173_v59 = vpop.f32.mrb[144].mxu0 }
0x334e   :  { %v10283_v61 = vpop.f32.mrb[145].mxu0 }
0x334f   :  { %v4176_v62 = vpop.f32.mrb[146].mxu0 }
0x3350   :  { %v10284_v4 = vpop.f32.mrb[147].mxu0 }
0x3355   :  { %v4130_v25 = vpop.f32.mrb[140].mxu1 }
0x3356   :  { %v12227_v63 = vadd.f32 %v4173_v59, %v4130_v25  ;;  %v10277_v0 = vpop.f32.mrb[141].mxu1 }
0x3357   :  { %v4133_v5 = vpop.f32.mrb[142].mxu1 }
0x3358   :  { %v10278_v3 = vpop.f32.mrb[143].mxu1 }
0x335d   :  { %v4223_v2 = vpop.f32.mrb[144].mxu1 }
0x335e   :  { %v4224_v7 = vadd.f32 %v4223_v2, %v12102_v47  ;;  %v10289_v11 = vpop.f32.mrb[145].mxu1 }
0x335f   :  { %v4226_v8 = vpop.f32.mrb[146].mxu1 }
0x3360   :  { %v10290_v15 = vpop.f32.mrb[147].mxu1  ;;  %v4229_v58 = vsel %vm186_vm2, %v4224_v7, -inf  ;;  %v10880_v8 = vld [vmem:[%s13280_s18] sm:$0xff]  }
0x3361   :  { %4230 = vmax.xlane.f32.xlu1 %v4229_v58 }
0x3372   :  { %4336 = vrot.lane.b32.xlu1 %v12142_v24, %s13346_s26 }
0x3376   :  { %4334 = vrot.lane.b32.xlu1 %v12142_v24, %s13338_s0 }
0x33ee   :  { %v4231_v16 = vpop.xlane.xlu1 %4230 }
0x33ef   :  { %v4232_v38 = vsub.f32 %v4224_v7, %v4231_v16 }
0x33f1   :  { %v4233_v6 = vmul.f32 1.442695, %v4232_v38 }
0x33f2   :  { %v4337_v26 = vpop.permute.xlu1 %4336 }
0x33f3   :  { %11014 = vpow2.f32 %v4233_v6  ;;  %v4342_v60 = vsel %vm186_vm2, %v4337_v26, 0 }
0x33f6   :  { %v4335_v29 = vpop.permute.xlu1 %4334 }
0x33fd   :  { %v11015_v19 = vpop.eup %11014 }
0x33fe   :  { %v4235_v22 = vsel %vm186_vm2, %v11015_v19, 0.0 }
0x33ff   :  { %4236 = vadd.xlane.f32.xlu0 %v4235_v22  ;;  %v10881_v22 = vld [vmem:[%s13280_s18 + $0x8] sm:$0xff]  }
0x3415   :  { %4241 = vrot.lane.b32.xlu0 %v12142_v24, %s13339_s6 }
0x348c   :  { %v4237_v47 = vpop.xlane.xlu0 %4236 }
0x348d   :  { %11016 = vrcp.f32 %v4237_v47  ;;  %v9285_v47 = vld [vmem:[%s13274_s12] ss:$0 sm:$0xff]  ;;  %s13355_s12 = sld [smem:[#allocation15_spill]] }
0x3490   :  { %v4242_v42 = vpop.permute.xlu0 %4241 }
0x3491   :  { %v4247_v50 = vsel %vm250_vm3, %v4242_v42, 0 }
0x3492   :  { %10292 = vmatpush3.bf16.msra.mxu0 %v4247_v50 }
0x3493   :  { %10303 = vmatprep.subr.bf16.mxu0 %v11186_v9 }
0x3497   :  { %v11017_v45 = vpop.eup %11016 }
0x3498   :  { %v4239_v54 = vmul.f32 %v11017_v45, %v11015_v19 }
0x349a   :  { %v4240_v40 = vpack.c.bf16 %v4239_v54, %v4239_v54 }
0x349c   :  { %10294 = vmatmul.mubr.msk.bf16.vlgmr.msra.gmra.mrb[148].mxu0 %vm186_vm2, %v4240_v40 }
0x349d   :  { %10304 = vmatpush3.bf16.xpose.msra.mxu0 %v4342_v60  ;;  %10305 = vmatprep.mubr.msk.bf16.mxu0 %vm11187_vm1, %v11186_v9 }
0x349e   :  { %10315 = vmatprep.subr.bf16.mxu0 %v11186_v9 }
0x34a4   :  { %10306 = vmatmul.mubr.msk.bf16.vlgmr.msra.gmra.mrb[152].mxu0 %vm186_vm2, %v4335_v29 }
0x34a5   :  { %10316 = vmatpush3.bf16.msra.mxu0 %v12178_v13  ;;  %10317 = vmatprep.mubr.msk.bf16.mxu0 %vm11187_vm1, %v11186_v9 }
0x34a6   :  { %10329 = vmatprep.subr.bf16.mxu0 %v11186_v9 }
0x356f   :  { %v4283_v34 = vpop.f32.mrb[148].mxu0 }
0x3570   :  { %v4289_v27 = vpack.c.bf16 %v4283_v34, %v4283_v34  ;;  %v10295_v37 = vpop.f32.mrb[149].mxu0 }
0x3571   :  { %v4286_v39 = vpop.f32.mrb[150].mxu0 }
0x3572   :  { %v10296_v36 = vpop.f32.mrb[151].mxu0  ;;  %10300 = vmatmul.mubr.msk.bf16.vlgmr.msra.gmra.mrb[148].mxu1 %vm186_vm2, %v4289_v27 }
0x3573   :  { %10311 = vmatprep.mubr.msk.bf16.mxu1 %vm11187_vm1, %v11186_v9 }
0x3577   :  { %v4378_v43 = vpop.f32.mrb[152].mxu0 }
0x3578   :  { %v4379_v10 = vadd.f32 %v4378_v43, %v12137_v17  ;;  %v10307_v31 = vpop.f32.mrb[153].mxu0  ;;  %v3116_v17 = vadd.f32 %v12032_v32, %v11930_v21  ;;  %v4492_v21 = vmul.f32 %v12266_v55, %v12266_v55 }
0x3579   :  { %v4381_v13 = vpop.f32.mrb[154].mxu0 }
0x357a   :  { %v10308_v12 = vpop.f32.mrb[155].mxu0  ;;  %v4384_v44 = vsel %vm186_vm2, %v4379_v10, -inf  ;;  %v3119_v1 = vmul.f32 %v3116_v17, %v3116_v17  ;;  %v4494_v32 = vsel %vm89_vm0, %v4492_v21, 0.0  ;;  %v10883_v13 = vld [vmem:[%s13279_s17 + $0x8] sm:$0xff]  }
0x357b   :  { %4385 = vmax.xlane.f32.xlu0 %v4384_v44 }
0x357c   :  { %v3121_v18 = vsel %vm89_vm0, %v3119_v1, 0.0  ;;  %v9314_v1 = vld [vmem:[%s13278_s16] ss:$0 sm:$0xff] }
0x3591   :  { %4396 = vrot.lane.b32.xlu0 %v12142_v24, %s13347_s2 }
0x3608   :  { %v4386_v28 = vpop.xlane.xlu0 %4385 }
0x3609   :  { %v4387_v56 = vsub.f32 %v4379_v10, %v4386_v28 }
0x360b   :  { %v4388_v48 = vmul.f32 1.442695, %v4387_v56 }
0x360c   :  { %v4397_v41 = vpop.permute.xlu0 %4396 }
0x360d   :  { %11018 = vpow2.f32 %v4388_v48  ;;  %v4402_v14 = vsel %vm250_vm3, %v4397_v41, 0 }
0x360e   :  { %10310 = vmatpush3.bf16.msra.mxu1 %v4402_v14 }
0x360f   :  { %10321 = vmatprep.subr.bf16.mxu1 %v11186_v9 }
0x3617   :  { %v11019_v49 = vpop.eup %11018 }
0x3618   :  { %v4390_v24 = vsel %vm186_vm2, %v11019_v49, 0.0 }
0x3619   :  { %4391 = vadd.xlane.f32.xlu1 %v4390_v24 }
0x361d   :  { %3122 = vadd.xlane.f32.xlu1 %v3121_v18 }
0x3621   :  { %3125 = vadd.xlane.f32.xlu1 %v3124_v57 }
0x3625   :  { %4495 = vadd.xlane.f32.xlu1 %v4494_v32 }
0x3645   :  { %v4327_v33 = vpop.f32.mrb[148].mxu1 }
0x3646   :  { %v4333_v35 = vadd.f32 %v4327_v33, %v12227_v63  ;;  %v10301_v20 = vpop.f32.mrb[149].mxu1 }
0x3647   :  { %v4330_v51 = vpop.f32.mrb[150].mxu1 }
0x3648   :  { %v10302_v59 = vpop.f32.mrb[151].mxu1 }
0x36a6   :  { %v4392_v30 = vpop.xlane.xlu1 %4391 }
0x36a7   :  { %11020 = vrcp.f32 %v4392_v30 }
0x36aa   :  { %v3123_v4 = vpop.xlane.xlu1 %3122 }
0x36ab   :  { %v3127_v5 = vmul.f32 0.03125, %v3123_v4 }
0x36ad   :  { %v3129_v2 = vadd.f32 1e-06, %v3127_v5 }
0x36ae   :  { %v3126_v25 = vpop.xlane.xlu1 %3125 }
0x36af   :  { %v3128_v0 = vmul.f32 0.03125, %v3126_v25 }
0x36b1   :  { %v11021_v23 = vpop.eup %11020  ;;  %v3130_v3 = vadd.f32 1e-06, %v3128_v0 }
0x36b2   :  { %v4394_v61 = vmul.f32 %v11021_v23, %v11019_v49  ;;  %v4496_v12 = vpop.xlane.xlu1 %4495  ;;  %v12342_v23 = vld [vmem:[%s13352_s30] ss:$0 sm:$0xff] }
0x36b3   :  { %11022 = vrsqrt.f32 %v3130_v3  ;;  %v4500_v44 = vmul.f32 0.03125, %v4496_v12 }
0x36b4   :  { %v4395_v62 = vpack.c.bf16 %v4394_v61, %v4394_v61  ;;  %11024 = vrsqrt.f32 %v3129_v2 }
0x36b5   :  { %v4502_v28 = vadd.f32 1e-06, %v4500_v44  ;;  %v4640_v44 = vld [vmem:[%s13281_s19 + $0x4] sm:$0xf] }
0x36b6   :  { %10312 = vmatmul.mubr.msk.bf16.vlgmr.msra.gmra.mrb[152].mxu1 %vm186_vm2, %v4395_v62 }
0x36b7   :  { %10325 = vmatprep.mubr.msk.bf16.mxu1 %vm11187_vm1, %v11186_v9  ;;  %11026 = vrsqrt.f32 %v4502_v28  ;;  %v12379_v28 = vsel %vm250_vm3, %v4640_v44, 0 }
0x36bd   :  { %v11023_v63 = vpop.eup %11022 }
0x36be   :  { %v11025_v7 = vpop.eup %11024  ;;  %v3134_v15 = vmul.f32 %v11023_v63, %v3117_v52 }
0x36bf   :  { %v3133_v6 = vmul.f32 %v11025_v7, %v3116_v17 }
0x36c0   :  { %v3142_v42 = vmul.f32 %v9285_v47, %v3134_v15 }
0x36c1   :  { %v3141_v50 = vmul.f32 %v9285_v47, %v3133_v6  ;;  %v11027_v14 = vpop.eup %11026 }
0x36c2   :  { %v4506_v17 = vmul.f32 %v11027_v14, %v12266_v55 }
0x36c3   :  { %v12290_v45 = vpack.c.bf16 %v3142_v42, %v3141_v50 }
0x36c4   :  { %v4514_v24 = vmul.f32 %v9314_v1, %v4506_v17 }
0x3789   :  { %v4438_v11 = vpop.f32.mrb[152].mxu1 }
0x378a   :  { %v4444_v58 = vpack.c.bf16 %v4438_v11, %v4438_v11  ;;  %v10313_v16 = vpop.f32.mrb[153].mxu1 }
0x378b   :  { %v4441_v38 = vpop.f32.mrb[154].mxu1 }
0x378c   :  { %v10314_v19 = vpop.f32.mrb[155].mxu1  ;;  %10318 = vmatmul.mubr.msk.bf16.vlgmr.msra.gmra.mrb[156].mxu0 %vm186_vm2, %v4444_v58 }
0x378d   :  { %10330 = vmatpush3.bf16.msra.mxu0 %v10880_v8  ;;  %10333 = vmatprep.mubr.msk.bf16.mxu0 %vm11187_vm1, %v11186_v9 }
0x378e   :  { %10331 = vmatprep.subr.bf16.mxu0 %v11186_v9 }
0x3791   :  { %10332 = vmatpush3.bf16.msra.mxu0 %v10881_v22 }
0x3792   :  { %10343 = vmatprep.subr.bf16.mxu0 %v11186_v9 }
0x3794   :  { %10334 = vmatmul.mubr.msk.bf16.vlgmr.msra.gmra.mrb[160].mxu0 %vm89_vm0, %v12290_v45 }
0x3795   :  { %10345 = vmatprep.mubr.msk.bf16.mxu0 %vm11187_vm1, %v11186_v9 }
0x385f   :  { %v4482_v54 = vpop.f32.mrb[156].mxu0 }
0x3860   :  { %v4488_v26 = vadd.f32 %v4482_v54, %v4333_v35  ;;  %v10319_v40 = vpop.f32.mrb[157].mxu0 }
0x3861   :  { %v4485_v60 = vpop.f32.mrb[158].mxu0 }
0x3862   :  { %v12298_v29 = vadd.f32 %v11955_v46, %v4488_v26  ;;  %v10320_v34 = vpop.f32.mrb[159].mxu0  ;;  %v10882_v46 = vld [vmem:[%s13279_s17] sm:$0xff]  }
0x3863   :  { %10322 = vmatpush3.bf16.msra.mxu1 %v10882_v46 }
0x3864   :  { %v4493_v27 = vmul.f32 %v12298_v29, %v12298_v29  ;;  %10323 = vmatprep.subr.bf16.mxu1 %v11186_v9 }
0x3866   :  { %v4497_v37 = vsel %vm89_vm0, %v4493_v27, 0.0 }
0x3867   :  { %4498 = vadd.xlane.f32.xlu1 %v4497_v37  ;;  %v4631_v39 = vpop.f32.mrb[160].mxu0  ;;  %10324 = vmatpush3.bf16.msra.mxu1 %v10883_v13  ;;  %v4639_v13 = vld [vmem:[%s13281_s19] sm:$0xf] }
0x3868   :  { %v10335_v36 = vpop.f32.mrb[161].mxu0  ;;  %10337 = vmatprep.subr.bf16.mxu1 %v11186_v9  ;;  %v12372_v12 = vsel %vm250_vm3, %v4639_v13, 0 }
0x3869   :  { %v4634_v43 = vpop.f32.mrb[162].mxu0 }
0x386a   :  { %v12303_v10 = vpack.c.bf16 %v4634_v43, %v4631_v39  ;;  %v10336_v31 = vpop.f32.mrb[163].mxu0 }
0x386c   :  { %4761 = vrot.lane.b32.xlu0 %v12303_v10, %s13342_s4  ;;  %v4654_v57 = vsel %vm186_vm2, %v12303_v10, 0 }
0x38de   :  { %v4762_v33 = vpop.permute.xlu0 %4761 }
0x38df   :  { %v4767_v59 = vsel %vm186_vm2, %v4762_v33, 0 }
0x38f4   :  { %v4499_v56 = vpop.xlane.xlu1 %4498 }
0x38f5   :  { %v4501_v48 = vmul.f32 0.03125, %v4499_v56 }
0x38f7   :  { %v4503_v41 = vadd.f32 1e-06, %v4501_v48 }
0x38f9   :  { %11028 = vrsqrt.f32 %v4503_v41 }
0x3903   :  { %v11029_v49 = vpop.eup %11028 }
0x3904   :  { %v4507_v52 = vmul.f32 %v11029_v49, %v12298_v29 }
0x3906   :  { %v4515_v53 = vmul.f32 %v9314_v1, %v4507_v52 }
0x3908   :  { %v4520_v18 = vpack.c.bf16 %v4515_v53, %v4514_v24 }
0x390a   :  { %10326 = vmatmul.mubr.msk.bf16.vlgmr.msra.gmra.mrb[156].mxu1 %vm89_vm0, %v4520_v18 }
0x390b   :  { %10338 = vmatpush3.bf16.xpose.msra.mxu1 %v4654_v57  ;;  %10339 = vmatprep.mubr.msk.bf16.mxu1 %vm11187_vm1, %v11186_v9 }
0x390c   :  { %10349 = vmatprep.subr.bf16.mxu1 %v11186_v9 }
0x39dd   :  { %v4570_v21 = vpop.f32.mrb[156].mxu1 }
0x39de   :  { %v10327_v32 = vpop.f32.mrb[157].mxu1 }
0x39df   :  { %v4573_v35 = vpop.f32.mrb[158].mxu1 }
0x39e0   :  { %v12326_v20 = vpack.c.bf16 %v4573_v35, %v4570_v21  ;;  %v10328_v51 = vpop.f32.mrb[159].mxu1 }
0x39e2   :  { %4759 = vrot.lane.b32.xlu1 %v12326_v20, %s13342_s4  ;;  %10340 = vmatmul.mubr.msk.bf16.vlgmr.msra.gmra.mrb[160].mxu1 %vm186_vm2, %v12326_v20 }
0x39e3   :  { %10350 = vmatpush3.bf16.xpose.msra.mxu1 %v4767_v59  ;;  %10351 = vmatprep.mubr.msk.bf16.mxu1 %vm11187_vm1, %v11186_v9 }
0x39e4   :  { %10361 = vmatprep.subr.bf16.mxu1 %v11186_v9 }
0x3a54   :  { %v4760_v30 = vpop.permute.xlu1 %4759 }
0x3a55   :  { %10352 = vmatmul.mubr.msk.bf16.vlgmr.msra.gmra.mrb[164].mxu1 %vm186_vm2, %v4760_v30 }
0x3a56   :  { %10363 = vmatprep.mubr.msk.bf16.mxu1 %vm11187_vm1, %v11186_v9  ;;  %10362 = vmatpush3.bf16.msra.mxu1 %v12379_v28 }
0x3a57   :  { %10373 = vmatprep.subr.bf16.mxu1 %v11186_v9 }
0x3ab5   :  { %v4690_v61 = vpop.f32.mrb[160].mxu1 }
0x3ab6   :  { %v4691_v62 = vadd.f32 %v12342_v23, %v4690_v61  ;;  %v10341_v4 = vpop.f32.mrb[161].mxu1 }
0x3ab7   :  { %v4693_v25 = vpop.f32.mrb[162].mxu1 }
0x3ab8   :  { %v10342_v0 = vpop.f32.mrb[163].mxu1  ;;  %v4696_v5 = vsel %vm186_vm2, %v4691_v62, -inf }
0x3ab9   :  { %4697 = vmax.xlane.f32.xlu0 %v4696_v5 }
0x3b28   :  { %v4803_v3 = vpop.f32.mrb[164].mxu1 }
0x3b29   :  { %v4804_v2 = vadd.f32 %v12342_v23, %v4803_v3  ;;  %v10353_v63 = vpop.f32.mrb[165].mxu1 }
0x3b2a   :  { %v4806_v7 = vpop.f32.mrb[166].mxu1 }
0x3b2b   :  { %v10354_v11 = vpop.f32.mrb[167].mxu1  ;;  %v4809_v8 = vsel %vm186_vm2, %v4804_v2, -inf }
0x3b2c   :  { %4810 = vmax.xlane.f32.xlu1 %v4809_v8 }
0x3b3d   :  { %4821 = vrot.lane.b32.xlu1 %v12303_v10, %s13349_s11 }
0x3b46   :  { %v4698_v15 = vpop.xlane.xlu0 %4697 }
0x3b47   :  { %v4699_v58 = vsub.f32 %v4691_v62, %v4698_v15 }
0x3b49   :  { %v4700_v16 = vmul.f32 1.442695, %v4699_v58 }
0x3b4b   :  { %11030 = vpow2.f32 %v4700_v16 }
0x3b55   :  { %v11031_v38 = vpop.eup %11030 }
0x3b56   :  { %v4702_v6 = vsel %vm186_vm2, %v11031_v38, 0.0 }
0x3b57   :  { %4703 = vadd.xlane.f32.xlu0 %v4702_v6 }
0x3bb9   :  { %v4811_v19 = vpop.xlane.xlu1 %4810 }
0x3bba   :  { %v4812_v22 = vsub.f32 %v4804_v2, %v4811_v19 }
0x3bbc   :  { %v4813_v47 = vmul.f32 1.442695, %v4812_v22 }
0x3bbd   :  { %v4822_v37 = vpop.permute.xlu1 %4821 }
0x3bbe   :  { %11032 = vpow2.f32 %v4813_v47  ;;  %v4827_v36 = vsel %vm250_vm3, %v4822_v37, 0 }
0x3bc8   :  { %v11033_v42 = vpop.eup %11032 }
0x3bc9   :  { %v4815_v50 = vsel %vm186_vm2, %v11033_v42, 0.0 }
0x3bca   :  { %4816 = vadd.xlane.f32.xlu0 %v4815_v50 }
0x3be0   :  { %4709 = vrot.lane.b32.xlu0 %v12303_v10, %s13341_s3 }
0x3be4   :  { %4964 = vrot.lane.b32.xlu0 %v12303_v10, %s13343_s28  ;;  %v4704_v54 = vpop.xlane.xlu0 %4703 }
0x3be5   :  { %11034 = vrcp.f32 %v4704_v54 }
0x3be8   :  { %4962 = vrot.lane.b32.xlu0 %v12326_v20, %s13343_s28 }
0x3bef   :  { %v11035_v26 = vpop.eup %11034 }
0x3bf0   :  { %v4706_v60 = vmul.f32 %v11035_v26, %v11031_v38  ;;  %v4641_v26 = vld [vmem:[%s13281_s19 + $0x8] sm:$0xf] }
0x3bf2   :  { %v4707_v39 = vpack.c.bf16 %v4706_v60, %v4706_v60 }
0x3c57   :  { %v4817_v40 = vpop.xlane.xlu0 %4816 }
0x3c58   :  { %11036 = vrcp.f32 %v4817_v40  ;;  %v12420_v40 = vsel %vm250_vm3, %v4641_v26, 0 }
0x3c5b   :  { %v4710_v34 = vpop.permute.xlu0 %4709 }
0x3c5c   :  { %v4715_v27 = vsel %vm250_vm3, %v4710_v34, 0 }
0x3c5d   :  { %10344 = vmatpush3.bf16.msra.mxu0 %v4715_v27 }
0x3c5e   :  { %10355 = vmatprep.subr.bf16.mxu0 %v11186_v9 }
0x3c5f   :  { %v4965_v49 = vpop.permute.xlu0 %4964 }
0x3c60   :  { %10346 = vmatmul.mubr.msk.bf16.vlgmr.msra.gmra.mrb[164].mxu0 %vm186_vm2, %v4707_v39  ;;  %v4970_v18 = vsel %vm186_vm2, %v4965_v49, 0 }
0x3c61   :  { %10356 = vmatpush3.bf16.msra.mxu0 %v4827_v36  ;;  %10357 = vmatprep.mubr.msk.bf16.mxu0 %vm11187_vm1, %v11186_v9 }
0x3c62   :  { %v11037_v43 = vpop.eup %11036  ;;  %10367 = vmatprep.subr.bf16.mxu0 %v11186_v9 }
0x3c63   :  { %v4819_v31 = vmul.f32 %v11037_v43, %v11033_v42  ;;  %v4963_v21 = vpop.permute.xlu0 %4962 }
0x3c65   :  { %v4820_v46 = vpack.c.bf16 %v4819_v31, %v4819_v31 }
0x3c68   :  { %10358 = vmatmul.mubr.msk.bf16.vlgmr.msra.gmra.mrb[168].mxu0 %vm186_vm2, %v4820_v46 }
0x3c69   :  { %10369 = vmatprep.mubr.msk.bf16.mxu0 %vm11187_vm1, %v11186_v9  ;;  %10368 = vmatpush3.bf16.msra.mxu0 %v12372_v12 }
0x3c6a   :  { %10379 = vmatprep.subr.bf16.mxu0 %v11186_v9 }
0x3d33   :  { %v4751_v56 = vpop.f32.mrb[164].mxu0 }
0x3d34   :  { %v4757_v48 = vpack.c.bf16 %v4751_v56, %v4751_v56  ;;  %v10347_v41 = vpop.f32.mrb[165].mxu0  ;;  %v12432_v56 = vrot.slane %v12326_v20, 4 }
0x3d35   :  { %v4754_v14 = vpop.f32.mrb[166].mxu0 }
0x3d36   :  { %v10348_v17 = vpop.f32.mrb[167].mxu0  ;;  %10370 = vmatmul.mubr.msk.bf16.vlgmr.msra.gmra.mrb[172].mxu0 %vm186_vm2, %v4757_v48 }
0x3d37   :  { %10381 = vmatprep.mubr.msk.bf16.mxu0 %vm11187_vm1, %v11186_v9 }
0x3d3b   :  { %v4863_v1 = vpop.f32.mrb[168].mxu0 }
0x3d3c   :  { %v4869_v52 = vpack.c.bf16 %v4863_v1, %v4863_v1  ;;  %v10359_v24 = vpop.f32.mrb[169].mxu0 }
0x3d3d   :  { %v4866_v53 = vpop.f32.mrb[170].mxu0 }
0x3d3e   :  { %v10360_v57 = vpop.f32.mrb[171].mxu0  ;;  %10364 = vmatmul.mubr.msk.bf16.vlgmr.msra.gmra.mrb[168].mxu1 %vm186_vm2, %v4869_v52 }
0x3d3f   :  { %10374 = vmatpush3.bf16.xpose.msra.mxu1 %v4970_v18  ;;  %10375 = vmatprep.mubr.msk.bf16.mxu1 %vm11187_vm1, %v11186_v9 }
0x3d40   :  { %10385 = vmatprep.subr.bf16.mxu1 %v11186_v9 }
0x3d46   :  { %10376 = vmatmul.mubr.msk.bf16.vlgmr.msra.gmra.mrb[172].mxu1 %vm186_vm2, %v4963_v21 }
0x3d47   :  { %10387 = vmatprep.mubr.msk.bf16.mxu1 %vm11187_vm1, %v11186_v9  ;;  %10386 = vmatpush3.bf16.msra.mxu1 %v12420_v40 }
0x3d48   :  { %10397 = vmatprep.subr.bf16.mxu1 %v11186_v9 }
0x3e09   :  { %v4956_v32 = vpop.f32.mrb[172].mxu0 }
0x3e0a   :  { %v10371_v33 = vpop.f32.mrb[173].mxu0 }
0x3e0b   :  { %v4959_v35 = vpop.f32.mrb[174].mxu0 }
0x3e0c   :  { %v10372_v51 = vpop.f32.mrb[175].mxu0 }
0x3e11   :  { %v4910_v59 = vpop.f32.mrb[168].mxu1 }
0x3e12   :  { %v12395_v30 = vadd.f32 %v4956_v32, %v4910_v59  ;;  %v10365_v61 = vpop.f32.mrb[169].mxu1 }
0x3e13   :  { %v4913_v62 = vpop.f32.mrb[170].mxu1  ;;  %v4642_v61 = vld [vmem:[%s13281_s19 + $0xc] sm:$0xf] }
0x3e14   :  { %v10366_v4 = vpop.f32.mrb[171].mxu1  ;;  %v12468_v62 = vsel %vm250_vm3, %v4642_v61, 0 }
0x3e19   :  { %v5006_v25 = vpop.f32.mrb[172].mxu1 }
0x3e1a   :  { %v5007_v0 = vadd.f32 %v12342_v23, %v5006_v25  ;;  %v10377_v5 = vpop.f32.mrb[173].mxu1 }
0x3e1b   :  { %v5009_v3 = vpop.f32.mrb[174].mxu1 }
0x3e1c   :  { %v10378_v2 = vpop.f32.mrb[175].mxu1  ;;  %v5012_v63 = vsel %vm186_vm2, %v5007_v0, -inf  ;;  %v12478_v3 = vld [vmem:[%s13352_s30 + $0x1] ss:$0 sm:$0xff] }
0x3e1d   :  { %5013 = vmax.xlane.f32.xlu1 %v5012_v63 }
0x3e2e   :  { %5122 = vrot.lane.b32.xlu1 %v12303_v10, %s13338_s0 }
0x3e32   :  { %5120 = vrot.lane.b32.xlu1 %v12326_v20, %s13338_s0  ;;  %v12440_v20 = vrot.slane %v12303_v10, 4 }
0x3eaa   :  { %v5014_v7 = vpop.xlane.xlu1 %5013 }
0x3eab   :  { %v5015_v11 = vsub.f32 %v5007_v0, %v5014_v7 }
0x3ead   :  { %v5016_v8 = vmul.f32 1.442695, %v5015_v11 }
0x3eae   :  { %v5123_v47 = vpop.permute.xlu1 %5122 }
0x3eaf   :  { %11038 = vpow2.f32 %v5016_v8  ;;  %v5128_v50 = vsel %vm186_vm2, %v5123_v47, 0 }
0x3eb2   :  { %v5121_v54 = vpop.permute.xlu1 %5120 }
0x3eb9   :  { %v11039_v15 = vpop.eup %11038 }
0x3eba   :  { %v5018_v58 = vsel %vm186_vm2, %v11039_v15, 0.0 }
0x3ebb   :  { %5019 = vadd.xlane.f32.xlu0 %v5018_v58 }
0x3ed1   :  { %5024 = vrot.lane.b32.xlu0 %v12303_v10, %s13345_s1 }
0x3f48   :  { %v5020_v16 = vpop.xlane.xlu0 %5019 }
0x3f49   :  { %11040 = vrcp.f32 %v5020_v16 }
0x3f4c   :  { %v5025_v38 = vpop.permute.xlu0 %5024 }
0x3f4d   :  { %v5030_v6 = vsel %vm250_vm3, %v5025_v38, 0 }
0x3f4e   :  { %10380 = vmatpush3.bf16.msra.mxu0 %v5030_v6 }
0x3f4f   :  { %10391 = vmatprep.subr.bf16.mxu0 %v11186_v9 }
0x3f53   :  { %v11041_v19 = vpop.eup %11040 }
0x3f54   :  { %v5022_v22 = vmul.f32 %v11041_v19, %v11039_v15 }
0x3f56   :  { %v5023_v42 = vpack.c.bf16 %v5022_v22, %v5022_v22 }
0x3f58   :  { %10382 = vmatmul.mubr.msk.bf16.vlgmr.msra.gmra.mrb[176].mxu0 %vm186_vm2, %v5023_v42 }
0x3f59   :  { %10392 = vmatpush3.bf16.xpose.msra.mxu0 %v5128_v50  ;;  %10393 = vmatprep.mubr.msk.bf16.mxu0 %vm11187_vm1, %v11186_v9 }
0x3f5a   :  { %10403 = vmatprep.subr.bf16.mxu0 %v11186_v9 }
0x3f60   :  { %10394 = vmatmul.mubr.msk.bf16.vlgmr.msra.gmra.mrb[180].mxu0 %vm186_vm2, %v5121_v54 }
0x3f61   :  { %10405 = vmatprep.mubr.msk.bf16.mxu0 %vm11187_vm1, %v11186_v9  ;;  %10404 = vmatpush3.bf16.msra.mxu0 %v12468_v62 }
0x3f62   :  { %10415 = vmatprep.subr.bf16.mxu0 %v11186_v9 }
0x402b   :  { %v5066_v60 = vpop.f32.mrb[176].mxu0 }
0x402c   :  { %v5072_v34 = vpack.c.bf16 %v5066_v60, %v5066_v60  ;;  %v10383_v27 = vpop.f32.mrb[177].mxu0 }
0x402d   :  { %v5069_v37 = vpop.f32.mrb[178].mxu0 }
0x402e   :  { %v10384_v39 = vpop.f32.mrb[179].mxu0  ;;  %10388 = vmatmul.mubr.msk.bf16.vlgmr.msra.gmra.mrb[176].mxu1 %vm186_vm2, %v5072_v34 }
0x402f   :  { %10399 = vmatprep.mubr.msk.bf16.mxu1 %vm11187_vm1, %v11186_v9 }
0x4033   :  { %v5164_v36 = vpop.f32.mrb[180].mxu0 }
0x4034   :  { %v5165_v43 = vadd.f32 %v12342_v23, %v5164_v36  ;;  %v10395_v31 = vpop.f32.mrb[181].mxu0 }
0x4035   :  { %v5167_v46 = vpop.f32.mrb[182].mxu0 }
0x4036   :  { %v10396_v13 = vpop.f32.mrb[183].mxu0  ;;  %v5170_v44 = vsel %vm186_vm2, %v5165_v43, -inf }
0x4037   :  { %5171 = vmax.xlane.f32.xlu0 %v5170_v44 }
0x404d   :  { %5182 = vrot.lane.b32.xlu0 %v12303_v10, %s13346_s26  ;;  %v5292_v10 = vsel %vm186_vm2, %v12440_v20, 0 }
0x4051   :  { %5395 = vrot.lane.b32.xlu0 %v12432_v56, %s13342_s4 }
0x40c4   :  { %v5172_v48 = vpop.xlane.xlu0 %5171 }
0x40c5   :  { %v5173_v41 = vsub.f32 %v5165_v43, %v5172_v48 }
0x40c7   :  { %v5174_v14 = vmul.f32 1.442695, %v5173_v41 }
0x40c8   :  { %v5183_v17 = vpop.permute.xlu0 %5182 }
0x40c9   :  { %11042 = vpow2.f32 %v5174_v14  ;;  %v5188_v23 = vsel %vm250_vm3, %v5183_v17, 0 }
0x40ca   :  { %10398 = vmatpush3.bf16.msra.mxu1 %v5188_v23 }
0x40cb   :  { %10409 = vmatprep.subr.bf16.mxu1 %v11186_v9 }
0x40d3   :  { %v11043_v49 = vpop.eup %11042 }
0x40d4   :  { %v5176_v1 = vsel %vm186_vm2, %v11043_v49, 0.0 }
0x40d5   :  { %5177 = vadd.xlane.f32.xlu1 %v5176_v1 }
0x40e6   :  { %5397 = vrot.lane.b32.xlu1 %v12440_v20, %s13342_s4 }
0x4101   :  { %v5113_v52 = vpop.f32.mrb[176].mxu1 }
0x4102   :  { %v12445_v24 = vadd.f32 %v5113_v52, %v12395_v30  ;;  %v10389_v53 = vpop.f32.mrb[177].mxu1  ;;  %v5396_v30 = vpop.permute.xlu0 %5395 }
0x4103   :  { %v5116_v18 = vpop.f32.mrb[178].mxu1 }
0x4104   :  { %v10390_v57 = vpop.f32.mrb[179].mxu1 }
0x4162   :  { %v5178_v21 = vpop.xlane.xlu1 %5177 }
0x4163   :  { %11044 = vrcp.f32 %v5178_v21 }
0x4166   :  { %v5398_v51 = vpop.permute.xlu1 %5397 }
0x4167   :  { %v5403_v59 = vsel %vm186_vm2, %v5398_v51, 0 }
0x416d   :  { %v11045_v32 = vpop.eup %11044 }
0x416e   :  { %v5180_v33 = vmul.f32 %v11045_v32, %v11043_v49 }
0x4170   :  { %v5181_v35 = vpack.c.bf16 %v5180_v33, %v5180_v33 }
0x4172   :  { %10400 = vmatmul.mubr.msk.bf16.vlgmr.msra.gmra.mrb[180].mxu1 %vm186_vm2, %v5181_v35 }
0x4173   :  { %10410 = vmatpush3.bf16.xpose.msra.mxu1 %v5292_v10  ;;  %10411 = vmatprep.mubr.msk.bf16.mxu1 %vm11187_vm1, %v11186_v9 }
0x4174   :  { %10421 = vmatprep.subr.bf16.mxu1 %v11186_v9 }
0x417a   :  { %10412 = vmatmul.mubr.msk.bf16.vlgmr.msra.gmra.mrb[184].mxu1 %vm186_vm2, %v12432_v56 }
0x417b   :  { %10422 = vmatpush3.bf16.xpose.msra.mxu1 %v5403_v59  ;;  %10423 = vmatprep.mubr.msk.bf16.mxu1 %vm11187_vm1, %v11186_v9 }
0x417c   :  { %10433 = vmatprep.subr.bf16.mxu1 %v11186_v9 }
0x4182   :  { %10424 = vmatmul.mubr.msk.bf16.vlgmr.msra.gmra.mrb[188].mxu1 %vm186_vm2, %v5396_v30 }
0x4183   :  { %10434 = vmatpush3.bf16.msra.mxu1 %v12379_v28  ;;  %10435 = vmatprep.mubr.msk.bf16.mxu1 %vm11187_vm1, %v11186_v9 }
0x4184   :  { %10445 = vmatprep.subr.bf16.mxu1 %v11186_v9 }
0x4245   :  { %v5224_v4 = vpop.f32.mrb[180].mxu1 }
0x4246   :  { %v5230_v25 = vpack.c.bf16 %v5224_v4, %v5224_v4  ;;  %v10401_v0 = vpop.f32.mrb[181].mxu1 }
0x4247   :  { %v5227_v28 = vpop.f32.mrb[182].mxu1 }
0x4248   :  { %v10402_v5 = vpop.f32.mrb[183].mxu1  ;;  %10406 = vmatmul.mubr.msk.bf16.vlgmr.msra.gmra.mrb[184].mxu0 %vm186_vm2, %v5230_v25 }
0x4249   :  { %10417 = vmatprep.mubr.msk.bf16.mxu0 %vm11187_vm1, %v11186_v9 }
0x424d   :  { %v5328_v2 = vpop.f32.mrb[184].mxu1 }
0x424e   :  { %v5329_v63 = vadd.f32 %v12478_v3, %v5328_v2  ;;  %v10413_v7 = vpop.f32.mrb[185].mxu1 }
0x424f   :  { %v5331_v11 = vpop.f32.mrb[186].mxu1 }
0x4250   :  { %v10414_v8 = vpop.f32.mrb[187].mxu1  ;;  %v5334_v15 = vsel %vm186_vm2, %v5329_v63, -inf }
0x4251   :  { %5335 = vmax.xlane.f32.xlu1 %v5334_v15 }
0x4255   :  { %v5439_v58 = vpop.f32.mrb[188].mxu1 }
0x4256   :  { %v5440_v16 = vadd.f32 %v12478_v3, %v5439_v58  ;;  %v10425_v38 = vpop.f32.mrb[189].mxu1 }
0x4257   :  { %v5442_v6 = vpop.f32.mrb[190].mxu1 }
0x4258   :  { %v10426_v19 = vpop.f32.mrb[191].mxu1  ;;  %v5445_v22 = vsel %vm186_vm2, %v5440_v16, -inf }
0x4259   :  { %5446 = vmax.xlane.f32.xlu0 %v5445_v22 }
0x42de   :  { %v5336_v47 = vpop.xlane.xlu1 %5335 }
0x42df   :  { %v5337_v42 = vsub.f32 %v5329_v63, %v5336_v47 }
0x42e1   :  { %v5338_v50 = vmul.f32 1.442695, %v5337_v42 }
0x42e3   :  { %11046 = vpow2.f32 %v5338_v50 }
0x42e6   :  { %v5447_v54 = vpop.xlane.xlu0 %5446 }
0x42e7   :  { %v5448_v26 = vsub.f32 %v5440_v16, %v5447_v54 }
0x42e9   :  { %v5449_v60 = vmul.f32 1.442695, %v5448_v26 }
0x42eb   :  { %11048 = vpow2.f32 %v5449_v60 }
0x42ed   :  { %v11047_v34 = vpop.eup %11046 }
0x42ee   :  { %v5340_v27 = vsel %vm186_vm2, %v11047_v34, 0.0 }
0x42ef   :  { %5341 = vadd.xlane.f32.xlu0 %v5340_v27 }
0x42f5   :  { %v11049_v37 = vpop.eup %11048 }
0x42f6   :  { %v5451_v39 = vsel %vm186_vm2, %v11049_v37, 0.0 }
0x42f7   :  { %5452 = vadd.xlane.f32.xlu1 %v5451_v39 }
0x4305   :  { %5346 = vrot.lane.b32.xlu0 %v12440_v20, %s13341_s3 }
0x4308   :  { %5457 = vrot.lane.b32.xlu1 %v12440_v20, %s13349_s11 }
0x4309   :  { %5592 = vrot.lane.b32.xlu0 %v12432_v56, %s13343_s28 }
0x430c   :  { %5594 = vrot.lane.b32.xlu1 %v12440_v20, %s13343_s28 }
0x431b   :  { %v5271_v36 = vpop.f32.mrb[184].mxu0 }
0x431c   :  { %v12495_v43 = vadd.f32 %v5271_v36, %v12445_v24  ;;  %v10407_v31 = vpop.f32.mrb[185].mxu0 }
0x431d   :  { %v5274_v46 = vpop.f32.mrb[186].mxu0 }
0x431e   :  { %v10408_v13 = vpop.f32.mrb[187].mxu0 }
0x437c   :  { %v5342_v44 = vpop.xlane.xlu0 %5341 }
0x437d   :  { %11050 = vrcp.f32 %v5342_v44 }
0x4380   :  { %v5347_v48 = vpop.permute.xlu0 %5346 }
0x4381   :  { %v5352_v41 = vsel %vm250_vm3, %v5347_v48, 0 }
0x4382   :  { %10416 = vmatpush3.bf16.msra.mxu0 %v5352_v41 }
0x4383   :  { %10427 = vmatprep.subr.bf16.mxu0 %v11186_v9 }
0x4384   :  { %v5453_v14 = vpop.xlane.xlu1 %5452  ;;  %v5593_v25 = vpop.permute.xlu0 %5592 }
0x4385   :  { %11052 = vrcp.f32 %v5453_v14 }
0x4387   :  { %v11051_v17 = vpop.eup %11050 }
0x4388   :  { %v5344_v23 = vmul.f32 %v11051_v17, %v11047_v34  ;;  %v5458_v49 = vpop.permute.xlu1 %5457 }
0x4389   :  { %v5463_v52 = vsel %vm250_vm3, %v5458_v49, 0 }
0x438a   :  { %v5345_v1 = vpack.c.bf16 %v5344_v23, %v5344_v23 }
0x438c   :  { %10418 = vmatmul.mubr.msk.bf16.vlgmr.msra.gmra.mrb[188].mxu0 %vm186_vm2, %v5345_v1  ;;  %v5595_v10 = vpop.permute.xlu1 %5594 }
0x438d   :  { %10428 = vmatpush3.bf16.msra.mxu0 %v5463_v52  ;;  %10429 = vmatprep.mubr.msk.bf16.mxu0 %vm11187_vm1, %v11186_v9  ;;  %v5600_v61 = vsel %vm186_vm2, %v5595_v10, 0 }
0x438e   :  { %10439 = vmatprep.subr.bf16.mxu0 %v11186_v9 }
0x438f   :  { %v11053_v24 = vpop.eup %11052 }
0x4390   :  { %v5455_v53 = vmul.f32 %v11053_v24, %v11049_v37 }
0x4392   :  { %v5456_v18 = vpack.c.bf16 %v5455_v53, %v5455_v53 }
0x4394   :  { %10430 = vmatmul.mubr.msk.bf16.vlgmr.msra.gmra.mrb[192].mxu0 %vm186_vm2, %v5456_v18 }
0x4395   :  { %10440 = vmatpush3.bf16.msra.mxu0 %v12372_v12  ;;  %10441 = vmatprep.mubr.msk.bf16.mxu0 %vm11187_vm1, %v11186_v9 }
0x4396   :  { %10451 = vmatprep.subr.bf16.mxu0 %v11186_v9 }
0x445f   :  { %v5388_v57 = vpop.f32.mrb[188].mxu0 }
0x4460   :  { %v5394_v21 = vpack.c.bf16 %v5388_v57, %v5388_v57  ;;  %v10419_v32 = vpop.f32.mrb[189].mxu0 }
0x4461   :  { %v5391_v33 = vpop.f32.mrb[190].mxu0 }
0x4462   :  { %v10420_v35 = vpop.f32.mrb[191].mxu0  ;;  %10442 = vmatmul.mubr.msk.bf16.vlgmr.msra.gmra.mrb[196].mxu0 %vm186_vm2, %v5394_v21 }
0x4463   :  { %10453 = vmatprep.mubr.msk.bf16.mxu0 %vm11187_vm1, %v11186_v9 }
0x4467   :  { %v5499_v51 = vpop.f32.mrb[192].mxu0 }
0x4468   :  { %v5505_v59 = vpack.c.bf16 %v5499_v51, %v5499_v51  ;;  %v10431_v30 = vpop.f32.mrb[193].mxu0 }
0x4469   :  { %v5502_v12 = vpop.f32.mrb[194].mxu0 }
0x446a   :  { %v10432_v4 = vpop.f32.mrb[195].mxu0  ;;  %10436 = vmatmul.mubr.msk.bf16.vlgmr.msra.gmra.mrb[192].mxu1 %vm186_vm2, %v5505_v59 }
0x446b   :  { %10446 = vmatpush3.bf16.xpose.msra.mxu1 %v5600_v61  ;;  %10447 = vmatprep.mubr.msk.bf16.mxu1 %vm11187_vm1, %v11186_v9 }
0x446c   :  { %10457 = vmatprep.subr.bf16.mxu1 %v11186_v9 }
0x4472   :  { %10448 = vmatmul.mubr.msk.bf16.vlgmr.msra.gmra.mrb[196].mxu1 %vm186_vm2, %v5593_v25 }
0x4473   :  { %10458 = vmatpush3.bf16.msra.mxu1 %v12420_v40  ;;  %10459 = vmatprep.mubr.msk.bf16.mxu1 %vm11187_vm1, %v11186_v9 }
0x4474   :  { %10469 = vmatprep.subr.bf16.mxu1 %v11186_v9 }
0x4535   :  { %v5586_v0 = vpop.f32.mrb[196].mxu0 }
0x4536   :  { %v10443_v28 = vpop.f32.mrb[197].mxu0 }
0x4537   :  { %v5589_v5 = vpop.f32.mrb[198].mxu0 }
0x4538   :  { %v10444_v2 = vpop.f32.mrb[199].mxu0 }
0x453d   :  { %v5543_v63 = vpop.f32.mrb[192].mxu1 }
0x453e   :  { %v12522_v7 = vadd.f32 %v5586_v0, %v5543_v63  ;;  %v10437_v11 = vpop.f32.mrb[193].mxu1 }
0x453f   :  { %v5546_v8 = vpop.f32.mrb[194].mxu1 }
0x4540   :  { %v10438_v15 = vpop.f32.mrb[195].mxu1 }
0x4545   :  { %v5636_v58 = vpop.f32.mrb[196].mxu1 }
0x4546   :  { %v5637_v16 = vadd.f32 %v12478_v3, %v5636_v58  ;;  %v10449_v38 = vpop.f32.mrb[197].mxu1 }
0x4547   :  { %v5639_v40 = vpop.f32.mrb[198].mxu1  ;;  %v10884_v38 = vld [vmem:[%s13283_s21] sm:$0xff]  }
0x4548   :  { %v10450_v6 = vpop.f32.mrb[199].mxu1  ;;  %v5642_v19 = vsel %vm186_vm2, %v5637_v16, -inf  ;;  %v10885_v40 = vld [vmem:[%s13283_s21 + $0x8] sm:$0xff]  }
0x4549   :  { %5643 = vmax.xlane.f32.xlu1 %v5642_v19  ;;  %v10887_v6 = vld [vmem:[%s13284_s22 + $0x8] sm:$0xff]  }
0x455a   :  { %5749 = vrot.lane.b32.xlu1 %v12440_v20, %s13338_s0 }
0x455e   :  { %5747 = vrot.lane.b32.xlu1 %v12432_v56, %s13338_s0 }
0x45d6   :  { %v5644_v22 = vpop.xlane.xlu1 %5643 }
0x45d7   :  { %v5645_v47 = vsub.f32 %v5637_v16, %v5644_v22 }
0x45d9   :  { %v5646_v42 = vmul.f32 1.442695, %v5645_v47 }
0x45da   :  { %v5750_v37 = vpop.permute.xlu1 %5749 }
0x45db   :  { %11054 = vpow2.f32 %v5646_v42  ;;  %v5755_v36 = vsel %vm186_vm2, %v5750_v37, 0 }
0x45de   :  { %v5748_v31 = vpop.permute.xlu1 %5747 }
0x45e5   :  { %v11055_v50 = vpop.eup %11054 }
0x45e6   :  { %v5648_v54 = vsel %vm186_vm2, %v11055_v50, 0.0 }
0x45e7   :  { %5649 = vadd.xlane.f32.xlu0 %v5648_v54 }
0x45fd   :  { %5654 = vrot.lane.b32.xlu0 %v12440_v20, %s13345_s1 }
0x4674   :  { %v5650_v26 = vpop.xlane.xlu0 %5649 }
0x4675   :  { %11056 = vrcp.f32 %v5650_v26 }
0x4678   :  { %v5655_v60 = vpop.permute.xlu0 %5654 }
0x4679   :  { %v5660_v34 = vsel %vm250_vm3, %v5655_v60, 0 }
0x467a   :  { %10452 = vmatpush3.bf16.msra.mxu0 %v5660_v34 }
0x467b   :  { %10463 = vmatprep.subr.bf16.mxu0 %v11186_v9 }
0x467f   :  { %v11057_v56 = vpop.eup %11056 }
0x4680   :  { %v5652_v27 = vmul.f32 %v11057_v56, %v11055_v50  ;;  %v9348_v56 = vld [vmem:[%s13282_s20] ss:$0 sm:$0xff] }
0x4682   :  { %v5653_v39 = vpack.c.bf16 %v5652_v27, %v5652_v27 }
0x4684   :  { %10454 = vmatmul.mubr.msk.bf16.vlgmr.msra.gmra.mrb[200].mxu0 %vm186_vm2, %v5653_v39 }
0x4685   :  { %10464 = vmatpush3.bf16.xpose.msra.mxu0 %v5755_v36  ;;  %10465 = vmatprep.mubr.msk.bf16.mxu0 %vm11187_vm1, %v11186_v9 }
0x4686   :  { %10475 = vmatprep.subr.bf16.mxu0 %v11186_v9 }
0x468c   :  { %10466 = vmatmul.mubr.msk.bf16.vlgmr.msra.gmra.mrb[204].mxu0 %vm186_vm2, %v5748_v31  ;;  %v10888_v31 = vld [vmem:[%s13284_s22 + $0x10] sm:$0xff]  }
0x468d   :  { %10476 = vmatpush3.bf16.msra.mxu0 %v12468_v62  ;;  %10477 = vmatprep.mubr.msk.bf16.mxu0 %vm11187_vm1, %v11186_v9 }
0x468e   :  { %10489 = vmatprep.subr.bf16.mxu0 %v11186_v9 }
0x4757   :  { %v5696_v46 = vpop.f32.mrb[200].mxu0 }
0x4758   :  { %v5702_v13 = vpack.c.bf16 %v5696_v46, %v5696_v46  ;;  %v10455_v44 = vpop.f32.mrb[201].mxu0  ;;  %v10889_v46 = vld [vmem:[%s13284_s22 + $0x18] sm:$0xff]  }
0x4759   :  { %v5699_v48 = vpop.f32.mrb[202].mxu0 }
0x475a   :  { %v10456_v41 = vpop.f32.mrb[203].mxu0  ;;  %10460 = vmatmul.mubr.msk.bf16.vlgmr.msra.gmra.mrb[200].mxu1 %vm186_vm2, %v5702_v13 }
0x475b   :  { %10471 = vmatprep.mubr.msk.bf16.mxu1 %vm11187_vm1, %v11186_v9 }
0x475f   :  { %v5791_v14 = vpop.f32.mrb[204].mxu0 }
0x4760   :  { %v5792_v17 = vadd.f32 %v12478_v3, %v5791_v14  ;;  %v10467_v23 = vpop.f32.mrb[205].mxu0  ;;  %v12556_v3 = vadd.f32 %v12495_v43, %v12266_v55 }
0x4761   :  { %v5794_v62 = vpop.f32.mrb[206].mxu0 }
0x4762   :  { %v10468_v49 = vpop.f32.mrb[207].mxu0  ;;  %v5797_v1 = vsel %vm186_vm2, %v5792_v17, -inf }
0x4763   :  { %5798 = vmax.xlane.f32.xlu0 %v5797_v1 }
0x4779   :  { %5809 = vrot.lane.b32.xlu0 %v12440_v20, %s13346_s26  ;;  %v5905_v20 = vmul.f32 %v12556_v3, %v12556_v3 }
0x477b   :  { %v5907_v33 = vsel %vm89_vm0, %v5905_v20, 0.0  ;;  %v10891_v20 = vld [vmem:[%s13276_s14 + $0x18] sm:$0xff]  }
0x47f0   :  { %v5799_v52 = vpop.xlane.xlu0 %5798 }
0x47f1   :  { %v5800_v24 = vsub.f32 %v5792_v17, %v5799_v52 }
0x47f3   :  { %v5801_v53 = vmul.f32 1.442695, %v5800_v24 }
0x47f4   :  { %v5810_v18 = vpop.permute.xlu0 %5809 }
0x47f5   :  { %11058 = vpow2.f32 %v5801_v53  ;;  %v5815_v57 = vsel %vm250_vm3, %v5810_v18, 0 }
0x47f6   :  { %10470 = vmatpush3.bf16.msra.mxu1 %v5815_v57 }
0x47f7   :  { %10481 = vmatprep.subr.bf16.mxu1 %v11186_v9 }
0x47ff   :  { %v11059_v21 = vpop.eup %11058 }
0x4800   :  { %v5803_v32 = vsel %vm186_vm2, %v11059_v21, 0.0 }
0x4801   :  { %5804 = vadd.xlane.f32.xlu1 %v5803_v32 }
0x4805   :  { %5908 = vadd.xlane.f32.xlu1 %v5907_v33 }
0x482d   :  { %v5740_v35 = vpop.f32.mrb[200].mxu1 }
0x482e   :  { %v5746_v10 = vadd.f32 %v5740_v35, %v12522_v7  ;;  %v10461_v51 = vpop.f32.mrb[201].mxu1 }
0x482f   :  { %v5743_v59 = vpop.f32.mrb[202].mxu1 }
0x4830   :  { %v10462_v30 = vpop.f32.mrb[203].mxu1 }
0x488e   :  { %v5805_v12 = vpop.xlane.xlu1 %5804 }
0x488f   :  { %11060 = vrcp.f32 %v5805_v12 }
0x4892   :  { %v5909_v19 = vpop.xlane.xlu1 %5908 }
0x4893   :  { %v5913_v22 = vmul.f32 0.03125, %v5909_v19 }
0x4895   :  { %v5915_v47 = vadd.f32 1e-06, %v5913_v22 }
0x4897   :  { %11062 = vrsqrt.f32 %v5915_v47 }
0x4899   :  { %v11061_v55 = vpop.eup %11060 }
0x489a   :  { %v5807_v43 = vmul.f32 %v11061_v55, %v11059_v21 }
0x489c   :  { %v5808_v61 = vpack.c.bf16 %v5807_v43, %v5807_v43 }
0x489e   :  { %10472 = vmatmul.mubr.msk.bf16.vlgmr.msra.gmra.mrb[204].mxu1 %vm186_vm2, %v5808_v61  ;;  %v9358_v61 = vld [vmem:[%s13275_s13 + $0x1] ss:$0 sm:$0xff] }
0x489f   :  { %10485 = vmatprep.mubr.msk.bf16.mxu1 %vm11187_vm1, %v11186_v9  ;;  %10482 = vmatpush3.bf16.msra.mxu1 %v10884_v38 }
0x48a0   :  { %10483 = vmatprep.subr.bf16.mxu1 %v11186_v9 }
0x48a1   :  { %v11063_v26 = vpop.eup %11062 }
0x48a2   :  { %v5919_v60 = vmul.f32 %v11063_v26, %v12556_v3 }
0x48a3   :  { %10484 = vmatpush3.bf16.msra.mxu1 %v10885_v40 }
0x48a4   :  { %10501 = vmatprep.subr.bf16.mxu1 %v11186_v9  ;;  %v5927_v37 = vmul.f32 %v9348_v56, %v5919_v60 }
0x4971   :  { %v5851_v4 = vpop.f32.mrb[204].mxu1 }
0x4972   :  { %v5857_v25 = vpack.c.bf16 %v5851_v4, %v5851_v4  ;;  %v10473_v0 = vpop.f32.mrb[205].mxu1 }
0x4973   :  { %v5854_v28 = vpop.f32.mrb[206].mxu1 }
0x4974   :  { %v10474_v5 = vpop.f32.mrb[207].mxu1  ;;  %10478 = vmatmul.mubr.msk.bf16.vlgmr.msra.gmra.mrb[208].mxu0 %vm186_vm2, %v5857_v25 }
0x4975   :  { %10497 = vmatprep.mubr.msk.bf16.mxu0 %vm11187_vm1, %v11186_v9 }
0x4a47   :  { %v5895_v2 = vpop.f32.mrb[208].mxu0 }
0x4a48   :  { %v5901_v63 = vadd.f32 %v5895_v2, %v5746_v10  ;;  %v10479_v7 = vpop.f32.mrb[209].mxu0 }
0x4a49   :  { %v5898_v11 = vpop.f32.mrb[210].mxu0 }
0x4a4a   :  { %v5903_v8 = vadd.f32 %v5901_v63, %v12298_v29  ;;  %v10480_v15 = vpop.f32.mrb[211].mxu0  ;;  %v10886_v29 = vld [vmem:[%s13284_s22] sm:$0xff]  }
0x4a4b   :  { %10490 = vmatpush3.bf16.msra.mxu0 %v10886_v29  ;;  %v12654_v29 = vld [vmem:[%s13350_s5] sm:$0xff] }
0x4a4c   :  { %v5906_v58 = vmul.f32 %v5903_v8, %v5903_v8  ;;  %10491 = vmatprep.subr.bf16.mxu0 %v11186_v9 }
0x4a4e   :  { %v5910_v16 = vsel %vm89_vm0, %v5906_v58, 0.0 }
0x4a4f   :  { %5911 = vadd.xlane.f32.xlu1 %v5910_v16  ;;  %10492 = vmatpush3.bf16.msra.mxu0 %v10887_v6 }
0x4a50   :  { %10493 = vmatprep.subr.bf16.mxu0 %v11186_v9 }
0x4a53   :  { %10494 = vmatpush3.bf16.msra.mxu0 %v10888_v31 }
0x4a54   :  { %10495 = vmatprep.subr.bf16.mxu0 %v11186_v9 }
0x4a57   :  { %10496 = vmatpush3.bf16.msra.mxu0 %v10889_v46 }
0x4a58   :  { %10515 = vmatprep.subr.bf16.mxu0 %v11186_v9 }
0x4adc   :  { %v5912_v42 = vpop.xlane.xlu1 %5911 }
0x4add   :  { %v5914_v50 = vmul.f32 0.03125, %v5912_v42 }
0x4adf   :  { %v5916_v54 = vadd.f32 1e-06, %v5914_v50 }
0x4ae1   :  { %11064 = vrsqrt.f32 %v5916_v54  ;;  %v12661_v54 = vld [vmem:[%s13350_s5 + $0x8] sm:$0xff] }
0x4aeb   :  { %v11065_v34 = vpop.eup %11064 }
0x4aec   :  { %v5920_v27 = vmul.f32 %v11065_v34, %v5903_v8 }
0x4aee   :  { %v5928_v39 = vmul.f32 %v9348_v56, %v5920_v27 }
0x4af0   :  { %v5933_v36 = vpack.c.bf16 %v5928_v39, %v5927_v37 }
0x4af2   :  { %10486 = vmatmul.mubr.msk.bf16.vlgmr.msra.gmra.mrb[208].mxu1 %vm89_vm0, %v5933_v36 }
0x4af3   :  { %10505 = vmatprep.mubr.msk.bf16.mxu1 %vm11187_vm1, %v11186_v9 }
0x4bc5   :  { %v5983_v13 = vpop.f32.mrb[208].mxu1 }
0x4bc6   :  { %v10487_v44 = vpop.f32.mrb[209].mxu1  ;;  %v5990_v41 = vmax.f32 %v5983_v13, 0.0 }
0x4bc7   :  { %v5986_v48 = vpop.f32.mrb[210].mxu1 }
0x4bc8   :  { %v5991_v14 = vmax.f32 %v5986_v48, 0.0  ;;  %v10488_v17 = vpop.f32.mrb[211].mxu1 }
0x4bca   :  { %v6000_v23 = vpack.c.bf16 %v5991_v14, %v5990_v41 }
0x4bcc   :  { %10498 = vmatmul.mubr.msk.bf16.vlgmr.msra.gmra.mrb[212].mxu0 %vm1559_vm4, %v6000_v23 }
0x4bcd   :  { %10517 = vmatprep.mubr.msk.bf16.mxu0 %vm11187_vm1, %v11186_v9 }
0x4c9f   :  { %v6062_v62 = vpop.f32.mrb[212].mxu0 }
0x4ca0   :  { %v12606_v49 = vadd.f32 %v6062_v62, %v12556_v3  ;;  %v10499_v1 = vpop.f32.mrb[213].mxu0  ;;  %v10890_v3 = vld [vmem:[%s13276_s14 + $0x10] sm:$0xff]  }
0x4ca1   :  { %v6065_v52 = vpop.f32.mrb[214].mxu0  ;;  %10502 = vmatpush3.bf16.msra.mxu1 %v10890_v3 }
0x4ca2   :  { %v12608_v24 = vadd.f32 %v6065_v52, %v5903_v8  ;;  %v10500_v53 = vpop.f32.mrb[215].mxu0  ;;  %v6073_v18 = vmul.f32 %v12606_v49, %v12606_v49  ;;  %10503 = vmatprep.subr.bf16.mxu1 %v11186_v9 }
0x4ca4   :  { %v6075_v57 = vsel %vm89_vm0, %v6073_v18, 0.0  ;;  %v6074_v21 = vmul.f32 %v12608_v24, %v12608_v24 }
0x4ca5   :  { %6076 = vadd.xlane.f32.xlu1 %v6075_v57  ;;  %10504 = vmatpush3.bf16.msra.mxu1 %v10891_v20 }
0x4ca6   :  { %v6078_v32 = vsel %vm89_vm0, %v6074_v21, 0.0  ;;  %10509 = vmatprep.subr.bf16.mxu1 %v11186_v9 }
0x4ca9   :  { %6079 = vadd.xlane.f32.xlu1 %v6078_v32 }
0x4d32   :  { %v6077_v33 = vpop.xlane.xlu1 %6076 }
0x4d33   :  { %v6081_v35 = vmul.f32 0.03125, %v6077_v33  ;;  %v9366_v33 = vld [vmem:[%s13277_s15 + $0x10] sm:$0xf] }
0x4d35   :  { %v6083_v10 = vadd.f32 1e-06, %v6081_v35  ;;  %v12689_v35 = vsel %vm250_vm3, %v9366_v33, 0 }
0x4d36   :  { %v6080_v51 = vpop.xlane.xlu1 %6079 }
0x4d37   :  { %11066 = vrsqrt.f32 %v6083_v10  ;;  %v6082_v59 = vmul.f32 0.03125, %v6080_v51  ;;  %v9367_v10 = vld [vmem:[%s13277_s15 + $0x14] sm:$0xf] }
0x4d38   :  { %v12696_v51 = vsel %vm250_vm3, %v9367_v10, 0 }
0x4d39   :  { %v6084_v30 = vadd.f32 1e-06, %v6082_v59 }
0x4d3b   :  { %11068 = vrsqrt.f32 %v6084_v30 }
0x4d41   :  { %v11067_v12 = vpop.eup %11066 }
0x4d42   :  { %v6087_v55 = vmul.f32 %v11067_v12, %v12606_v49 }
0x4d44   :  { %v6095_v25 = vmul.f32 %v9358_v61, %v6087_v55 }
0x4d45   :  { %v11069_v43 = vpop.eup %11068 }
0x4d46   :  { %v6088_v4 = vmul.f32 %v11069_v43, %v12608_v24 }
0x4d48   :  { %v6096_v0 = vmul.f32 %v9358_v61, %v6088_v4 }
0x4d4a   :  { %v6102_v28 = vpack.c.bf16 %v6096_v0, %v6095_v25 }
0x4d4c   :  { %10506 = vmatmul.mubr.msk.bf16.vlgmr.msra.gmra.mrb[212].mxu1 %vm89_vm0, %v6102_v28 }
0x4d4d   :  { %10511 = vmatprep.mubr.msk.bf16.mxu1 %vm11187_vm1, %v11186_v9 }
0x4e1f   :  { %v6152_v5 = vpop.f32.mrb[212].mxu1 }
0x4e20   :  { %v10507_v2 = vpop.f32.mrb[213].mxu1 }
0x4e21   :  { %v6155_v63 = vpop.f32.mrb[214].mxu1 }
0x4e22   :  { %v12632_v7 = vpack.c.bf16 %v6155_v63, %v6152_v5  ;;  %v10508_v11 = vpop.f32.mrb[215].mxu1 }
0x4e24   :  { %6277 = vrot.lane.b32.xlu1 %v12632_v7, %s13349_s11  ;;  %6166 = vrot.lane.b32.xlu0 %v12632_v7, %s13341_s3 }
0x4e28   :  { %6275 = vrot.lane.b32.xlu0 %v12632_v7, %s13342_s4 }
0x4e96   :  { %v6167_v8 = vpop.permute.xlu0 %6166  ;;  %v6278_v58 = vpop.permute.xlu1 %6277 }
0x4e97   :  { %v6172_v15 = vsel %vm186_vm2, %v6167_v8, 0  ;;  %v6283_v16 = vsel %vm186_vm2, %v6278_v58, 0 }
0x4e98   :  { %10510 = vmatpush3.bf16.xpose.msra.mxu1 %v6172_v15 }
0x4e99   :  { %10521 = vmatprep.subr.bf16.mxu1 %v11186_v9 }
0x4e9a   :  { %v6276_v38 = vpop.permute.xlu0 %6275 }
0x4e9f   :  { %10512 = vmatmul.mubr.msk.bf16.vlgmr.msra.gmra.mrb[216].mxu1 %vm186_vm2, %v12632_v7 }
0x4ea0   :  { %10522 = vmatpush3.bf16.xpose.msra.mxu1 %v6283_v16  ;;  %10523 = vmatprep.mubr.msk.bf16.mxu1 %vm11187_vm1, %v11186_v9 }
0x4ea1   :  { %10533 = vmatprep.subr.bf16.mxu1 %v11186_v9 }
0x4ea7   :  { %10524 = vmatmul.mubr.msk.bf16.vlgmr.msra.gmra.mrb[220].mxu1 %vm186_vm2, %v6276_v38 }
0x4ea8   :  { %10535 = vmatprep.mubr.msk.bf16.mxu1 %vm11187_vm1, %v11186_v9  ;;  %10534 = vmatpush3.bf16.msra.mxu1 %v12696_v51 }
0x4ea9   :  { %10545 = vmatprep.subr.bf16.mxu1 %v11186_v9 }
0x4f72   :  { %v6208_v40 = vpop.f32.mrb[216].mxu1 }
0x4f73   :  { %v6209_v6 = vadd.f32 %v12654_v29, %v6208_v40  ;;  %v10513_v19 = vpop.f32.mrb[217].mxu1 }
0x4f74   :  { %v6211_v22 = vpop.f32.mrb[218].mxu1 }
0x4f75   :  { %v10514_v47 = vpop.f32.mrb[219].mxu1  ;;  %v6214_v42 = vsel %vm186_vm2, %v6209_v6, -inf }
0x4f76   :  { %6215 = vmax.xlane.f32.xlu0 %v6214_v42  ;;  %v12717_v47 = vld [vmem:[%s13350_s5 + $0x10] sm:$0xff] }
0x4f7a   :  { %v6319_v50 = vpop.f32.mrb[220].mxu1 }
0x4f7b   :  { %v6320_v26 = vadd.f32 %v12661_v54, %v6319_v50  ;;  %v10525_v60 = vpop.f32.mrb[221].mxu1 }
0x4f7c   :  { %v6322_v34 = vpop.f32.mrb[222].mxu1 }
0x4f7d   :  { %v10526_v56 = vpop.f32.mrb[223].mxu1  ;;  %v6325_v27 = vsel %vm186_vm2, %v6320_v26, -inf }
0x4f7e   :  { %6326 = vmax.xlane.f32.xlu1 %v6325_v27 }
0x4f8f   :  { %6337 = vrot.lane.b32.xlu1 %v12632_v7, %s13351_s29 }
0x4f93   :  { %6478 = vrot.lane.b32.xlu1 %v12632_v7, %s13343_s28 }
0x5003   :  { %v6216_v37 = vpop.xlane.xlu0 %6215 }
0x5004   :  { %v6217_v39 = vsub.f32 %v6209_v6, %v6216_v37 }
0x5006   :  { %v6218_v36 = vmul.f32 1.442695, %v6217_v39 }
0x5008   :  { %11070 = vpow2.f32 %v6218_v36 }
0x500b   :  { %v6327_v31 = vpop.xlane.xlu1 %6326 }
0x500c   :  { %v6328_v46 = vsub.f32 %v6320_v26, %v6327_v31 }
0x500e   :  { %v6329_v13 = vmul.f32 1.442695, %v6328_v46 }
0x500f   :  { %v6338_v18 = vpop.permute.xlu1 %6337 }
0x5010   :  { %11072 = vpow2.f32 %v6329_v13  ;;  %v6343_v21 = vsel %vm250_vm3, %v6338_v18, 0 }
0x5012   :  { %v11071_v44 = vpop.eup %11070 }
0x5013   :  { %v6220_v48 = vsel %vm186_vm2, %v11071_v44, 0.0  ;;  %v6479_v63 = vpop.permute.xlu1 %6478 }
0x5014   :  { %6221 = vadd.xlane.f32.xlu0 %v6220_v48 }
0x501a   :  { %v11073_v41 = vpop.eup %11072 }
0x501b   :  { %v6331_v14 = vsel %vm186_vm2, %v11073_v41, 0.0 }
0x501c   :  { %6332 = vadd.xlane.f32.xlu0 %v6331_v14 }
0x5032   :  { %6226 = vrot.lane.b32.xlu0 %v12632_v7, %s13344_s9 }
0x5036   :  { %6480 = vrot.lane.b32.xlu0 %v12632_v7, %s13345_s1 }
0x50a1   :  { %v6222_v17 = vpop.xlane.xlu0 %6221 }
0x50a2   :  { %11074 = vrcp.f32 %v6222_v17 }
0x50a9   :  { %v6333_v23 = vpop.xlane.xlu0 %6332 }
0x50aa   :  { %11076 = vrcp.f32 %v6333_v23 }
0x50ac   :  { %v11075_v62 = vpop.eup %11074 }
0x50ad   :  { %v6224_v1 = vmul.f32 %v11075_v62, %v11071_v44  ;;  %v6227_v52 = vpop.permute.xlu0 %6226  ;;  %v9368_v62 = vld [vmem:[%s13277_s15 + $0x18] sm:$0xf] }
0x50ae   :  { %v6232_v53 = vsel %vm250_vm3, %v6227_v52, 0 }
0x50af   :  { %10516 = vmatpush3.bf16.msra.mxu0 %v6232_v53  ;;  %v6225_v57 = vpack.c.bf16 %v6224_v1, %v6224_v1  ;;  %v12742_v1 = vsel %vm250_vm3, %v9368_v62, 0 }
0x50b0   :  { %10527 = vmatprep.subr.bf16.mxu0 %v11186_v9 }
0x50b1   :  { %v6481_v61 = vpop.permute.xlu0 %6480 }
0x50b2   :  { %10518 = vmatmul.mubr.msk.bf16.vlgmr.msra.gmra.mrb[216].mxu0 %vm186_vm2, %v6225_v57  ;;  %v6486_v5 = vsel %vm186_vm2, %v6481_v61, 0 }
0x50b3   :  { %10528 = vmatpush3.bf16.msra.mxu0 %v6343_v21  ;;  %10529 = vmatprep.mubr.msk.bf16.mxu0 %vm11187_vm1, %v11186_v9 }
0x50b4   :  { %v11077_v32 = vpop.eup %11076  ;;  %10539 = vmatprep.subr.bf16.mxu0 %v11186_v9 }
0x50b5   :  { %v6335_v3 = vmul.f32 %v11077_v32, %v11073_v41 }
0x50b7   :  { %v6336_v20 = vpack.c.bf16 %v6335_v3, %v6335_v3  ;;  %v12752_v3 = vld [vmem:[%s13350_s5 + $0x18] sm:$0xff] }
0x50ba   :  { %10530 = vmatmul.mubr.msk.bf16.vlgmr.msra.gmra.mrb[220].mxu0 %vm186_vm2, %v6336_v20 }
0x50bb   :  { %10541 = vmatprep.mubr.msk.bf16.mxu0 %vm11187_vm1, %v11186_v9  ;;  %10540 = vmatpush3.bf16.msra.mxu0 %v12689_v35 }
0x50bc   :  { %10551 = vmatprep.subr.bf16.mxu0 %v11186_v9 }
0x5185   :  { %v6268_v59 = vpop.f32.mrb[216].mxu0 }
0x5186   :  { %v6274_v30 = vpack.c.bf16 %v6268_v59, %v6268_v59  ;;  %v10519_v12 = vpop.f32.mrb[217].mxu0 }
0x5187   :  { %v6271_v55 = vpop.f32.mrb[218].mxu0  ;;  %v12757_v12 = vrot.slane %v12632_v7, 4 }
0x5188   :  { %v10520_v43 = vpop.f32.mrb[219].mxu0  ;;  %10542 = vmatmul.mubr.msk.bf16.vlgmr.msra.gmra.mrb[224].mxu0 %vm186_vm2, %v6274_v30 }
0x5189   :  { %10553 = vmatprep.mubr.msk.bf16.mxu0 %vm11187_vm1, %v11186_v9 }
0x518d   :  { %v6379_v4 = vpop.f32.mrb[220].mxu0 }
0x518e   :  { %v6385_v25 = vpack.c.bf16 %v6379_v4, %v6379_v4  ;;  %v10531_v0 = vpop.f32.mrb[221].mxu0 }
0x518f   :  { %v6382_v28 = vpop.f32.mrb[222].mxu0 }
0x5190   :  { %v10532_v2 = vpop.f32.mrb[223].mxu0  ;;  %10536 = vmatmul.mubr.msk.bf16.vlgmr.msra.gmra.mrb[224].mxu1 %vm186_vm2, %v6385_v25 }
0x5191   :  { %10546 = vmatpush3.bf16.xpose.msra.mxu1 %v6486_v5  ;;  %10547 = vmatprep.mubr.msk.bf16.mxu1 %vm11187_vm1, %v11186_v9 }
0x5192   :  { %10557 = vmatprep.subr.bf16.mxu1 %v11186_v9 }
0x5198   :  { %10548 = vmatmul.mubr.msk.bf16.vlgmr.msra.gmra.mrb[228].mxu1 %vm186_vm2, %v6479_v63 }
0x5199   :  { %10559 = vmatprep.mubr.msk.bf16.mxu1 %vm11187_vm1, %v11186_v9  ;;  %10558 = vmatpush3.bf16.msra.mxu1 %v12742_v1 }
0x519a   :  { %10569 = vmatprep.subr.bf16.mxu1 %v11186_v9 }
0x525b   :  { %v6472_v11 = vpop.f32.mrb[224].mxu0 }
0x525c   :  { %v10543_v8 = vpop.f32.mrb[225].mxu0 }
0x525d   :  { %v6475_v15 = vpop.f32.mrb[226].mxu0 }
0x525e   :  { %v10544_v58 = vpop.f32.mrb[227].mxu0 }
0x5263   :  { %v6426_v16 = vpop.f32.mrb[224].mxu1 }
0x5264   :  { %v12712_v38 = vadd.f32 %v6472_v11, %v6426_v16  ;;  %v10537_v40 = vpop.f32.mrb[225].mxu1 }
0x5265   :  { %v6429_v6 = vpop.f32.mrb[226].mxu1 }
0x5266   :  { %v10538_v19 = vpop.f32.mrb[227].mxu1 }
0x526b   :  { %v6522_v22 = vpop.f32.mrb[228].mxu1 }
0x526c   :  { %v6523_v42 = vadd.f32 %v12717_v47, %v6522_v22  ;;  %v10549_v50 = vpop.f32.mrb[229].mxu1 }
0x526d   :  { %v6525_v26 = vpop.f32.mrb[230].mxu1 }
0x526e   :  { %v10550_v60 = vpop.f32.mrb[231].mxu1  ;;  %v6528_v34 = vsel %vm186_vm2, %v6523_v42, -inf }
0x526f   :  { %6529 = vmax.xlane.f32.xlu0 %v6528_v34 }
0x5285   :  { %6540 = vrot.lane.b32.xlu0 %v12632_v7, %s13339_s6 }
0x5289   :  { %6636 = vrot.lane.b32.xlu0 %v12632_v7, %s13338_s0 }
0x52fc   :  { %v6530_v56 = vpop.xlane.xlu0 %6529 }
0x52fd   :  { %v6531_v27 = vsub.f32 %v6523_v42, %v6530_v56  ;;  %v9369_v42 = vld [vmem:[%s13277_s15 + $0x1c] sm:$0xf] }
0x52fe   :  { %v12793_v50 = vsel %vm250_vm3, %v9369_v42, 0 }
0x52ff   :  { %v6532_v37 = vmul.f32 1.442695, %v6531_v27 }
0x5300   :  { %v6541_v39 = vpop.permute.xlu0 %6540 }
0x5301   :  { %11078 = vpow2.f32 %v6532_v37  ;;  %v6546_v36 = vsel %vm250_vm3, %v6541_v39, 0 }
0x5302   :  { %10552 = vmatpush3.bf16.msra.mxu0 %v6546_v36 }
0x5303   :  { %10563 = vmatprep.subr.bf16.mxu0 %v11186_v9 }
0x5304   :  { %v6637_v23 = vpop.permute.xlu0 %6636 }
0x530b   :  { %v11079_v31 = vpop.eup %11078 }
0x530c   :  { %v6534_v46 = vsel %vm186_vm2, %v11079_v31, 0.0 }
0x530d   :  { %6535 = vadd.xlane.f32.xlu1 %v6534_v46 }
0x531e   :  { %6638 = vrot.lane.b32.xlu1 %v12632_v7, %s13346_s26 }
0x539a   :  { %v6536_v13 = vpop.xlane.xlu1 %6535 }
0x539b   :  { %11080 = vrcp.f32 %v6536_v13 }
0x539e   :  { %v6639_v41 = vpop.permute.xlu1 %6638 }
0x539f   :  { %v6644_v17 = vsel %vm186_vm2, %v6639_v41, 0 }
0x53a5   :  { %v11081_v44 = vpop.eup %11080 }
0x53a6   :  { %v6538_v48 = vmul.f32 %v11081_v44, %v11079_v31 }
0x53a8   :  { %v6539_v14 = vpack.c.bf16 %v6538_v48, %v6538_v48 }
0x53aa   :  { %10554 = vmatmul.mubr.msk.bf16.vlgmr.msra.gmra.mrb[228].mxu0 %vm186_vm2, %v6539_v14 }
0x53ab   :  { %10564 = vmatpush3.bf16.xpose.msra.mxu0 %v6644_v17  ;;  %10565 = vmatprep.mubr.msk.bf16.mxu0 %vm11187_vm1, %v11186_v9 }
0x53ac   :  { %10575 = vmatprep.subr.bf16.mxu0 %v11186_v9 }
0x53b2   :  { %10566 = vmatmul.mubr.msk.bf16.vlgmr.msra.gmra.mrb[232].mxu0 %vm186_vm2, %v6637_v23 }
0x53b3   :  { %10577 = vmatprep.mubr.msk.bf16.mxu0 %vm11187_vm1, %v11186_v9  ;;  %10576 = vmatpush3.bf16.msra.mxu0 %v12793_v50 }
0x53b4   :  { %10587 = vmatprep.subr.bf16.mxu0 %v11186_v9 }
0x547d   :  { %v6582_v52 = vpop.f32.mrb[228].mxu0 }
0x547e   :  { %v6588_v53 = vpack.c.bf16 %v6582_v52, %v6582_v52  ;;  %v10555_v18 = vpop.f32.mrb[229].mxu0 }
0x547f   :  { %v6585_v57 = vpop.f32.mrb[230].mxu0 }
0x5480   :  { %v10556_v21 = vpop.f32.mrb[231].mxu0  ;;  %10560 = vmatmul.mubr.msk.bf16.vlgmr.msra.gmra.mrb[232].mxu1 %vm186_vm2, %v6588_v53 }
0x5481   :  { %10571 = vmatprep.mubr.msk.bf16.mxu1 %vm11187_vm1, %v11186_v9 }
0x5485   :  { %v6680_v32 = vpop.f32.mrb[232].mxu0 }
0x5486   :  { %v6681_v20 = vadd.f32 %v12752_v3, %v6680_v32  ;;  %v10567_v33 = vpop.f32.mrb[233].mxu0 }
0x5487   :  { %v6683_v10 = vpop.f32.mrb[234].mxu0 }
0x5488   :  { %v10568_v59 = vpop.f32.mrb[235].mxu0  ;;  %v6686_v30 = vsel %vm186_vm2, %v6681_v20, -inf }
0x5489   :  { %6687 = vmax.xlane.f32.xlu1 %v6686_v30 }
0x549a   :  { %6795 = vrot.lane.b32.xlu1 %v12757_v12, %s13341_s3 }
0x549e   :  { %6906 = vrot.lane.b32.xlu1 %v12757_v12, %s13349_s11 }
0x5516   :  { %v6688_v55 = vpop.xlane.xlu1 %6687 }
0x5517   :  { %v6689_v43 = vsub.f32 %v6681_v20, %v6688_v55 }
0x5519   :  { %v6690_v61 = vmul.f32 1.442695, %v6689_v43 }
0x551a   :  { %v6796_v16 = vpop.permute.xlu1 %6795 }
0x551b   :  { %11082 = vpow2.f32 %v6690_v61  ;;  %v6801_v6 = vsel %vm186_vm2, %v6796_v16, 0 }
0x5525   :  { %v11083_v4 = vpop.eup %11082 }
0x5526   :  { %v6692_v25 = vsel %vm186_vm2, %v11083_v4, 0.0 }
0x5527   :  { %6693 = vadd.xlane.f32.xlu0 %v6692_v25 }
0x553d   :  { %6698 = vrot.lane.b32.xlu0 %v12632_v7, %s13347_s2 }
0x5541   :  { %6904 = vrot.lane.b32.xlu0 %v12757_v12, %s13342_s4 }
0x5553   :  { %v6629_v0 = vpop.f32.mrb[232].mxu1 }
0x5554   :  { %v12769_v28 = vadd.f32 %v6629_v0, %v12712_v38  ;;  %v10561_v5 = vpop.f32.mrb[233].mxu1  ;;  %v6907_v38 = vpop.permute.xlu1 %6906 }
0x5555   :  { %v6632_v2 = vpop.f32.mrb[234].mxu1  ;;  %v6912_v19 = vsel %vm186_vm2, %v6907_v38, 0 }
0x5556   :  { %v10562_v63 = vpop.f32.mrb[235].mxu1 }
0x55b4   :  { %v6694_v11 = vpop.xlane.xlu0 %6693 }
0x55b5   :  { %11084 = vrcp.f32 %v6694_v11 }
0x55b8   :  { %v6699_v8 = vpop.permute.xlu0 %6698 }
0x55b9   :  { %v6704_v15 = vsel %vm250_vm3, %v6699_v8, 0 }
0x55ba   :  { %10570 = vmatpush3.bf16.msra.mxu1 %v6704_v15 }
0x55bb   :  { %10581 = vmatprep.subr.bf16.mxu1 %v11186_v9 }
0x55bc   :  { %v6905_v22 = vpop.permute.xlu0 %6904 }
0x55bf   :  { %v11085_v58 = vpop.eup %11084 }
0x55c0   :  { %v6696_v7 = vmul.f32 %v11085_v58, %v11083_v4 }
0x55c2   :  { %v6697_v40 = vpack.c.bf16 %v6696_v7, %v6696_v7 }
0x55c4   :  { %10572 = vmatmul.mubr.msk.bf16.vlgmr.msra.gmra.mrb[236].mxu1 %vm186_vm2, %v6697_v40 }
0x55c5   :  { %10582 = vmatpush3.bf16.xpose.msra.mxu1 %v6801_v6  ;;  %10583 = vmatprep.mubr.msk.bf16.mxu1 %vm11187_vm1, %v11186_v9 }
0x55c6   :  { %10593 = vmatprep.subr.bf16.mxu1 %v11186_v9 }
0x55cc   :  { %10584 = vmatmul.mubr.msk.bf16.vlgmr.msra.gmra.mrb[240].mxu1 %vm186_vm2, %v12757_v12 }
0x55cd   :  { %10594 = vmatpush3.bf16.xpose.msra.mxu1 %v6912_v19  ;;  %10595 = vmatprep.mubr.msk.bf16.mxu1 %vm11187_vm1, %v11186_v9 }
0x55ce   :  { %10605 = vmatprep.subr.bf16.mxu1 %v11186_v9 }
0x55d4   :  { %10596 = vmatmul.mubr.msk.bf16.vlgmr.msra.gmra.mrb[244].mxu1 %vm186_vm2, %v6905_v22 }
0x55d5   :  { %10606 = vmatpush3.bf16.msra.mxu1 %v12696_v51  ;;  %10607 = vmatprep.mubr.msk.bf16.mxu1 %vm11187_vm1, %v11186_v9 }
0x55d6   :  { %10617 = vmatprep.subr.bf16.mxu1 %v11186_v9 }
0x5697   :  { %v6740_v26 = vpop.f32.mrb[236].mxu1 }
0x5698   :  { %v6746_v60 = vpack.c.bf16 %v6740_v26, %v6740_v26  ;;  %v10573_v34 = vpop.f32.mrb[237].mxu1 }
0x5699   :  { %v6743_v51 = vpop.f32.mrb[238].mxu1 }
0x569a   :  { %v10574_v56 = vpop.f32.mrb[239].mxu1  ;;  %10578 = vmatmul.mubr.msk.bf16.vlgmr.msra.gmra.mrb[236].mxu0 %vm186_vm2, %v6746_v60 }
0x569b   :  { %10589 = vmatprep.mubr.msk.bf16.mxu0 %vm11187_vm1, %v11186_v9 }
0x569f   :  { %v6837_v27 = vpop.f32.mrb[240].mxu1 }
0x56a0   :  { %v6838_v37 = vadd.f32 %v12654_v29, %v6837_v27  ;;  %v10585_v39 = vpop.f32.mrb[241].mxu1 }
0x56a1   :  { %v6840_v36 = vpop.f32.mrb[242].mxu1 }
0x56a2   :  { %v10586_v31 = vpop.f32.mrb[243].mxu1  ;;  %v6843_v46 = vsel %vm186_vm2, %v6838_v37, -inf }
0x56a3   :  { %6844 = vmax.xlane.f32.xlu1 %v6843_v46 }
0x56a7   :  { %v6948_v13 = vpop.f32.mrb[244].mxu1 }
0x56a8   :  { %v6949_v44 = vadd.f32 %v12661_v54, %v6948_v13  ;;  %v10597_v48 = vpop.f32.mrb[245].mxu1 }
0x56a9   :  { %v6951_v41 = vpop.f32.mrb[246].mxu1 }
0x56aa   :  { %v10598_v14 = vpop.f32.mrb[247].mxu1  ;;  %v6954_v17 = vsel %vm186_vm2, %v6949_v44, -inf }
0x56ab   :  { %6955 = vmax.xlane.f32.xlu0 %v6954_v17 }
0x5730   :  { %v6845_v23 = vpop.xlane.xlu1 %6844 }
0x5731   :  { %v6846_v62 = vsub.f32 %v6838_v37, %v6845_v23 }
0x5733   :  { %v6847_v52 = vmul.f32 1.442695, %v6846_v62 }
0x5735   :  { %11086 = vpow2.f32 %v6847_v52 }
0x5738   :  { %v6956_v29 = vpop.xlane.xlu0 %6955 }
0x5739   :  { %v6957_v53 = vsub.f32 %v6949_v44, %v6956_v29 }
0x573b   :  { %v6958_v18 = vmul.f32 1.442695, %v6957_v53 }
0x573d   :  { %11088 = vpow2.f32 %v6958_v18 }
0x573f   :  { %v11087_v57 = vpop.eup %11086 }
0x5740   :  { %v6849_v21 = vsel %vm186_vm2, %v11087_v57, 0.0 }
0x5741   :  { %6850 = vadd.xlane.f32.xlu0 %v6849_v21 }
0x5747   :  { %v11089_v32 = vpop.eup %11088 }
0x5748   :  { %v6960_v54 = vsel %vm186_vm2, %v11089_v32, 0.0 }
0x5749   :  { %6961 = vadd.xlane.f32.xlu1 %v6960_v54 }
0x5757   :  { %6855 = vrot.lane.b32.xlu0 %v12757_v12, %s13344_s9 }
0x575a   :  { %6966 = vrot.lane.b32.xlu1 %v12757_v12, %s13351_s29 }
0x575b   :  { %7101 = vrot.lane.b32.xlu0 %v12757_v12, %s13343_s28 }
0x575e   :  { %7103 = vrot.lane.b32.xlu1 %v12757_v12, %s13345_s1 }
0x576d   :  { %v6787_v20 = vpop.f32.mrb[236].mxu0 }
0x576e   :  { %v12815_v33 = vadd.f32 %v6787_v20, %v12769_v28  ;;  %v10579_v10 = vpop.f32.mrb[237].mxu0 }
0x576f   :  { %v6790_v59 = vpop.f32.mrb[238].mxu0 }
0x5770   :  { %v10580_v30 = vpop.f32.mrb[239].mxu0 }
0x57ce   :  { %v6851_v55 = vpop.xlane.xlu0 %6850 }
0x57cf   :  { %11090 = vrcp.f32 %v6851_v55 }
0x57d2   :  { %v6856_v43 = vpop.permute.xlu0 %6855 }
0x57d3   :  { %v6861_v61 = vsel %vm250_vm3, %v6856_v43, 0 }
0x57d4   :  { %10588 = vmatpush3.bf16.msra.mxu0 %v6861_v61 }
0x57d5   :  { %10599 = vmatprep.subr.bf16.mxu0 %v11186_v9 }
0x57d6   :  { %v6962_v4 = vpop.xlane.xlu1 %6961  ;;  %v7102_v60 = vpop.permute.xlu0 %7101 }
0x57d7   :  { %11092 = vrcp.f32 %v6962_v4 }
0x57d9   :  { %v11091_v25 = vpop.eup %11090 }
0x57da   :  { %v6853_v0 = vmul.f32 %v11091_v25, %v11087_v57  ;;  %v6967_v5 = vpop.permute.xlu1 %6966 }
0x57db   :  { %v6972_v28 = vsel %vm250_vm3, %v6967_v5, 0 }
0x57dc   :  { %v6854_v2 = vpack.c.bf16 %v6853_v0, %v6853_v0 }
0x57de   :  { %10590 = vmatmul.mubr.msk.bf16.vlgmr.msra.gmra.mrb[240].mxu0 %vm186_vm2, %v6854_v2  ;;  %v7104_v6 = vpop.permute.xlu1 %7103 }
0x57df   :  { %10600 = vmatpush3.bf16.msra.mxu0 %v6972_v28  ;;  %10601 = vmatprep.mubr.msk.bf16.mxu0 %vm11187_vm1, %v11186_v9  ;;  %v7109_v42 = vsel %vm186_vm2, %v7104_v6, 0 }
0x57e0   :  { %10611 = vmatprep.subr.bf16.mxu0 %v11186_v9 }
0x57e1   :  { %v11093_v63 = vpop.eup %11092 }
0x57e2   :  { %v6964_v11 = vmul.f32 %v11093_v63, %v11089_v32 }
0x57e4   :  { %v6965_v8 = vpack.c.bf16 %v6964_v11, %v6964_v11 }
0x57e6   :  { %10602 = vmatmul.mubr.msk.bf16.vlgmr.msra.gmra.mrb[244].mxu0 %vm186_vm2, %v6965_v8 }
0x57e7   :  { %10612 = vmatpush3.bf16.msra.mxu0 %v12689_v35  ;;  %10613 = vmatprep.mubr.msk.bf16.mxu0 %vm11187_vm1, %v11186_v9 }
0x57e8   :  { %10623 = vmatprep.subr.bf16.mxu0 %v11186_v9 }
0x58b1   :  { %v6897_v15 = vpop.f32.mrb[240].mxu0 }
0x58b2   :  { %v6903_v58 = vpack.c.bf16 %v6897_v15, %v6897_v15  ;;  %v10591_v7 = vpop.f32.mrb[241].mxu0 }
0x58b3   :  { %v6900_v16 = vpop.f32.mrb[242].mxu0 }
0x58b4   :  { %v10592_v40 = vpop.f32.mrb[243].mxu0  ;;  %10614 = vmatmul.mubr.msk.bf16.vlgmr.msra.gmra.mrb[248].mxu0 %vm186_vm2, %v6903_v58 }
0x58b5   :  { %10625 = vmatprep.mubr.msk.bf16.mxu0 %vm11187_vm1, %v11186_v9 }
0x58b9   :  { %v7008_v38 = vpop.f32.mrb[244].mxu0 }
0x58ba   :  { %v7014_v19 = vpack.c.bf16 %v7008_v38, %v7008_v38  ;;  %v10603_v22 = vpop.f32.mrb[245].mxu0 }
0x58bb   :  { %v7011_v35 = vpop.f32.mrb[246].mxu0 }
0x58bc   :  { %v10604_v26 = vpop.f32.mrb[247].mxu0  ;;  %10608 = vmatmul.mubr.msk.bf16.vlgmr.msra.gmra.mrb[248].mxu1 %vm186_vm2, %v7014_v19 }
0x58bd   :  { %10618 = vmatpush3.bf16.xpose.msra.mxu1 %v7109_v42  ;;  %10619 = vmatprep.mubr.msk.bf16.mxu1 %vm11187_vm1, %v11186_v9 }
0x58be   :  { %10629 = vmatprep.subr.bf16.mxu1 %v11186_v9 }
0x58c4   :  { %10620 = vmatmul.mubr.msk.bf16.vlgmr.msra.gmra.mrb[252].mxu1 %vm186_vm2, %v7102_v60  ;;  %v10892_v60 = vld [vmem:[%s13280_s18 + $0x10] sm:$0xff]  }
0x58c5   :  { %10630 = vmatpush3.bf16.msra.mxu1 %v12742_v1  ;;  %10631 = vmatprep.mubr.msk.bf16.mxu1 %vm11187_vm1, %v11186_v9 }
0x58c6   :  { %10641 = vmatprep.subr.bf16.mxu1 %v11186_v9 }
0x5987   :  { %v7095_v34 = vpop.f32.mrb[248].mxu0 }
0x5988   :  { %v10615_v51 = vpop.f32.mrb[249].mxu0 }
0x5989   :  { %v7098_v56 = vpop.f32.mrb[250].mxu0 }
0x598a   :  { %v10616_v27 = vpop.f32.mrb[251].mxu0 }
0x598f   :  { %v7052_v37 = vpop.f32.mrb[248].mxu1 }
0x5990   :  { %v12842_v39 = vadd.f32 %v7095_v34, %v7052_v37  ;;  %v10609_v36 = vpop.f32.mrb[249].mxu1  ;;  %v10893_v37 = vld [vmem:[%s13280_s18 + $0x18] sm:$0xff]  }
0x5991   :  { %v7055_v31 = vpop.f32.mrb[250].mxu1 }
0x5992   :  { %v10610_v46 = vpop.f32.mrb[251].mxu1 }
0x5997   :  { %v7145_v13 = vpop.f32.mrb[252].mxu1 }
0x5998   :  { %v7146_v44 = vadd.f32 %v12717_v47, %v7145_v13  ;;  %v10621_v48 = vpop.f32.mrb[253].mxu1 }
0x5999   :  { %v7148_v1 = vpop.f32.mrb[254].mxu1 }
0x599a   :  { %v10622_v41 = vpop.f32.mrb[255].mxu1  ;;  %v7151_v14 = vsel %vm186_vm2, %v7146_v44, -inf }
0x599b   :  { %7152 = vmax.xlane.f32.xlu1 %v7151_v14 }
0x59ac   :  { %7258 = vrot.lane.b32.xlu1 %v12757_v12, %s13346_s26 }
0x59b0   :  { %7256 = vrot.lane.b32.xlu1 %v12757_v12, %s13338_s0 }
0x5a28   :  { %v7153_v17 = vpop.xlane.xlu1 %7152 }
0x5a29   :  { %v7154_v23 = vsub.f32 %v7146_v44, %v7153_v17 }
0x5a2b   :  { %v7155_v62 = vmul.f32 1.442695, %v7154_v23 }
0x5a2c   :  { %v7259_v32 = vpop.permute.xlu1 %7258 }
0x5a2d   :  { %11094 = vpow2.f32 %v7155_v62  ;;  %v7264_v20 = vsel %vm186_vm2, %v7259_v32, 0  ;;  %v10895_v62 = vld [vmem:[%s13279_s17 + $0x18] sm:$0xff]  }
0x5a30   :  { %v7257_v10 = vpop.permute.xlu1 %7256 }
0x5a37   :  { %v11095_v52 = vpop.eup %11094 }
0x5a38   :  { %v7157_v29 = vsel %vm186_vm2, %v11095_v52, 0.0 }
0x5a39   :  { %7158 = vadd.xlane.f32.xlu0 %v7157_v29 }
0x5a4f   :  { %7163 = vrot.lane.b32.xlu0 %v12757_v12, %s13339_s6 }
0x5ac6   :  { %v7159_v47 = vpop.xlane.xlu0 %7158 }
0x5ac7   :  { %11096 = vrcp.f32 %v7159_v47 }
0x5aca   :  { %v7164_v53 = vpop.permute.xlu0 %7163 }
0x5acb   :  { %v7169_v18 = vsel %vm250_vm3, %v7164_v53, 0 }
0x5acc   :  { %10624 = vmatpush3.bf16.msra.mxu0 %v7169_v18 }
0x5acd   :  { %10635 = vmatprep.subr.bf16.mxu0 %v11186_v9 }
0x5ad1   :  { %v11097_v57 = vpop.eup %11096 }
0x5ad2   :  { %v7161_v21 = vmul.f32 %v11097_v57, %v11095_v52 }
0x5ad4   :  { %v7162_v54 = vpack.c.bf16 %v7161_v21, %v7161_v21 }
0x5ad6   :  { %10626 = vmatmul.mubr.msk.bf16.vlgmr.msra.gmra.mrb[252].mxu0 %vm186_vm2, %v7162_v54 }
0x5ad7   :  { %10636 = vmatpush3.bf16.xpose.msra.mxu0 %v7264_v20  ;;  %10637 = vmatprep.mubr.msk.bf16.mxu0 %vm11187_vm1, %v11186_v9  ;;  %v9395_v20 = vld [vmem:[%s13278_s16 + $0x1] ss:$0 sm:$0xff] }
0x5ad8   :  { %10647 = vmatprep.subr.bf16.mxu0 %v11186_v9 }
0x5ade   :  { %10638 = vmatmul.mubr.msk.bf16.vlgmr.msra.gmra.mrb[0].mxu0 %vm186_vm2, %v7257_v10 }
0x5adf   :  { %10648 = vmatpush3.bf16.msra.mxu0 %v12793_v50  ;;  %10649 = vmatprep.mubr.msk.bf16.mxu0 %vm11187_vm1, %v11186_v9 }
0x5ae0   :  { %10661 = vmatprep.subr.bf16.mxu0 %v11186_v9 }
0x5ba9   :  { %v7205_v59 = vpop.f32.mrb[252].mxu0 }
0x5baa   :  { %v7211_v30 = vpack.c.bf16 %v7205_v59, %v7205_v59  ;;  %v10627_v55 = vpop.f32.mrb[253].mxu0 }
0x5bab   :  { %v7208_v43 = vpop.f32.mrb[254].mxu0 }
0x5bac   :  { %v10628_v61 = vpop.f32.mrb[255].mxu0  ;;  %10632 = vmatmul.mubr.msk.bf16.vlgmr.msra.gmra.mrb[0].mxu1 %vm186_vm2, %v7211_v30 }
0x5bad   :  { %10643 = vmatprep.mubr.msk.bf16.mxu1 %vm11187_vm1, %v11186_v9 }
0x5bb1   :  { %v7300_v4 = vpop.f32.mrb[0].mxu0 }
0x5bb2   :  { %v7301_v25 = vadd.f32 %v12752_v3, %v7300_v4  ;;  %v10639_v0 = vpop.f32.mrb[1].mxu0  ;;  %v12876_v3 = vadd.f32 %v12815_v33, %v12606_v49 }
0x5bb3   :  { %v7303_v50 = vpop.f32.mrb[2].mxu0 }
0x5bb4   :  { %v10640_v5 = vpop.f32.mrb[3].mxu0  ;;  %v7306_v2 = vsel %vm186_vm2, %v7301_v25, -inf }
0x5bb5   :  { %7307 = vmax.xlane.f32.xlu0 %v7306_v2 }
0x5bcb   :  { %7318 = vrot.lane.b32.xlu0 %v12757_v12, %s13347_s2  ;;  %v7415_v12 = vmul.f32 %v12876_v3, %v12876_v3 }
0x5bcd   :  { %v7417_v16 = vsel %vm89_vm0, %v7415_v12, 0.0 }
0x5c42   :  { %v7308_v28 = vpop.xlane.xlu0 %7307 }
0x5c43   :  { %v7309_v63 = vsub.f32 %v7301_v25, %v7308_v28 }
0x5c45   :  { %v7310_v11 = vmul.f32 1.442695, %v7309_v63 }
0x5c46   :  { %v7319_v8 = vpop.permute.xlu0 %7318 }
0x5c47   :  { %11098 = vpow2.f32 %v7310_v11  ;;  %v7324_v15 = vsel %vm250_vm3, %v7319_v8, 0  ;;  %v12946_v11 = vld [vmem:[%s13352_s30] ss:$0 sm:$0xff] }
0x5c48   :  { %10642 = vmatpush3.bf16.msra.mxu1 %v7324_v15 }
0x5c49   :  { %10653 = vmatprep.subr.bf16.mxu1 %v11186_v9 }
0x5c51   :  { %v11099_v58 = vpop.eup %11098 }
0x5c52   :  { %v7312_v7 = vsel %vm186_vm2, %v11099_v58, 0.0 }
0x5c53   :  { %7313 = vadd.xlane.f32.xlu1 %v7312_v7 }
0x5c57   :  { %7418 = vadd.xlane.f32.xlu1 %v7417_v16 }
0x5c7f   :  { %v7249_v40 = vpop.f32.mrb[0].mxu1 }
0x5c80   :  { %v7255_v6 = vadd.f32 %v7249_v40, %v12842_v39  ;;  %v10633_v38 = vpop.f32.mrb[1].mxu1 }
0x5c81   :  { %v7252_v19 = vpop.f32.mrb[2].mxu1 }
0x5c82   :  { %v10634_v22 = vpop.f32.mrb[3].mxu1 }
0x5ce0   :  { %v7314_v35 = vpop.xlane.xlu1 %7313 }
0x5ce1   :  { %11100 = vrcp.f32 %v7314_v35 }
0x5ce4   :  { %v7419_v52 = vpop.xlane.xlu1 %7418 }
0x5ce5   :  { %v7423_v29 = vmul.f32 0.03125, %v7419_v52  ;;  %v9411_v52 = vld [vmem:[%s13281_s19 + $0x14] sm:$0xf] }
0x5ce7   :  { %v7425_v47 = vadd.f32 1e-06, %v7423_v29  ;;  %v12983_v29 = vsel %vm250_vm3, %v9411_v52, 0 }
0x5ce9   :  { %11102 = vrsqrt.f32 %v7425_v47 }
0x5ceb   :  { %v11101_v49 = vpop.eup %11100 }
0x5cec   :  { %v7316_v33 = vmul.f32 %v11101_v49, %v11099_v58 }
0x5cee   :  { %v7317_v42 = vpack.c.bf16 %v7316_v33, %v7316_v33 }
0x5cf0   :  { %10644 = vmatmul.mubr.msk.bf16.vlgmr.msra.gmra.mrb[4].mxu1 %vm186_vm2, %v7317_v42 }
0x5cf1   :  { %10657 = vmatprep.mubr.msk.bf16.mxu1 %vm11187_vm1, %v11186_v9 }
0x5cf3   :  { %v11103_v21 = vpop.eup %11102 }
0x5cf4   :  { %v7429_v32 = vmul.f32 %v11103_v21, %v12876_v3 }
0x5cf6   :  { %v7437_v59 = vmul.f32 %v9395_v20, %v7429_v32 }
0x5dc3   :  { %v7360_v26 = vpop.f32.mrb[4].mxu1 }
0x5dc4   :  { %v7366_v34 = vpack.c.bf16 %v7360_v26, %v7360_v26  ;;  %v10645_v51 = vpop.f32.mrb[5].mxu1 }
0x5dc5   :  { %v7363_v56 = vpop.f32.mrb[6].mxu1 }
0x5dc6   :  { %v10646_v27 = vpop.f32.mrb[7].mxu1  ;;  %10650 = vmatmul.mubr.msk.bf16.vlgmr.msra.gmra.mrb[4].mxu0 %vm186_vm2, %v7366_v34 }
0x5dc7   :  { %10662 = vmatpush3.bf16.msra.mxu0 %v10892_v60  ;;  %10665 = vmatprep.mubr.msk.bf16.mxu0 %vm11187_vm1, %v11186_v9 }
0x5dc8   :  { %10663 = vmatprep.subr.bf16.mxu0 %v11186_v9 }
0x5dcb   :  { %10664 = vmatpush3.bf16.msra.mxu0 %v10893_v37 }
0x5dcc   :  { %10675 = vmatprep.subr.bf16.mxu0 %v11186_v9 }
0x5dce   :  { %10666 = vmatmul.mubr.msk.bf16.vlgmr.msra.gmra.mrb[8].mxu0 %vm89_vm0, %v12290_v45 }
0x5dcf   :  { %10677 = vmatprep.mubr.msk.bf16.mxu0 %vm11187_vm1, %v11186_v9 }
0x5e99   :  { %v7404_v39 = vpop.f32.mrb[4].mxu0 }
0x5e9a   :  { %v7410_v36 = vadd.f32 %v7404_v39, %v7255_v6  ;;  %v10651_v31 = vpop.f32.mrb[5].mxu0 }
0x5e9b   :  { %v7407_v46 = vpop.f32.mrb[6].mxu0 }
0x5e9c   :  { %v12902_v13 = vadd.f32 %v7410_v36, %v12608_v24  ;;  %v10652_v44 = vpop.f32.mrb[7].mxu0  ;;  %v10894_v24 = vld [vmem:[%s13279_s17 + $0x10] sm:$0xff]  }
0x5e9d   :  { %10654 = vmatpush3.bf16.msra.mxu1 %v10894_v24  ;;  %v9410_v24 = vld [vmem:[%s13281_s19 + $0x10] sm:$0xf] }
0x5e9e   :  { %v7416_v48 = vmul.f32 %v12902_v13, %v12902_v13  ;;  %10655 = vmatprep.subr.bf16.mxu1 %v11186_v9 }
0x5ea0   :  { %v7420_v1 = vsel %vm89_vm0, %v7416_v48, 0.0 }
0x5ea1   :  { %7421 = vadd.xlane.f32.xlu1 %v7420_v1  ;;  %v7553_v41 = vpop.f32.mrb[8].mxu0  ;;  %10656 = vmatpush3.bf16.msra.mxu1 %v10895_v62  ;;  %v12976_v62 = vsel %vm250_vm3, %v9410_v24, 0 }
0x5ea2   :  { %v10667_v14 = vpop.f32.mrb[9].mxu0  ;;  %10669 = vmatprep.subr.bf16.mxu1 %v11186_v9 }
0x5ea3   :  { %v7556_v45 = vpop.f32.mrb[10].mxu0 }
0x5ea4   :  { %v12907_v17 = vpack.c.bf16 %v7556_v45, %v7553_v41  ;;  %v10668_v23 = vpop.f32.mrb[11].mxu0 }
0x5ea6   :  { %v7570_v43 = vsel %vm186_vm2, %v12907_v17, 0 }
0x5eb2   :  { %7677 = vrot.lane.b32.xlu1 %v12907_v17, %s13342_s4 }
0x5f2e   :  { %v7422_v53 = vpop.xlane.xlu1 %7421 }
0x5f2f   :  { %v7424_v18 = vmul.f32 0.03125, %v7422_v53 }
0x5f31   :  { %v7426_v57 = vadd.f32 1e-06, %v7424_v18 }
0x5f32   :  { %v7678_v25 = vpop.permute.xlu1 %7677 }
0x5f33   :  { %11104 = vrsqrt.f32 %v7426_v57  ;;  %v7683_v2 = vsel %vm186_vm2, %v7678_v25, 0 }
0x5f3d   :  { %v11105_v54 = vpop.eup %11104 }
0x5f3e   :  { %v7430_v10 = vmul.f32 %v11105_v54, %v12902_v13 }
0x5f40   :  { %v7438_v30 = vmul.f32 %v9395_v20, %v7430_v10 }
0x5f42   :  { %v7444_v55 = vpack.c.bf16 %v7438_v30, %v7437_v59 }
0x5f44   :  { %10658 = vmatmul.mubr.msk.bf16.vlgmr.msra.gmra.mrb[8].mxu1 %vm89_vm0, %v7444_v55 }
0x5f45   :  { %10670 = vmatpush3.bf16.xpose.msra.mxu1 %v7570_v43  ;;  %10671 = vmatprep.mubr.msk.bf16.mxu1 %vm11187_vm1, %v11186_v9 }
0x5f46   :  { %10681 = vmatprep.subr.bf16.mxu1 %v11186_v9 }
0x6017   :  { %v7494_v61 = vpop.f32.mrb[8].mxu1 }
0x6018   :  { %v10659_v4 = vpop.f32.mrb[9].mxu1 }
0x6019   :  { %v7497_v0 = vpop.f32.mrb[10].mxu1 }
0x601a   :  { %v12930_v50 = vpack.c.bf16 %v7497_v0, %v7494_v61  ;;  %v10660_v5 = vpop.f32.mrb[11].mxu1 }
0x601c   :  { %7675 = vrot.lane.b32.xlu0 %v12930_v50, %s13342_s4  ;;  %10672 = vmatmul.mubr.msk.bf16.vlgmr.msra.gmra.mrb[12].mxu1 %vm186_vm2, %v12930_v50  ;;  %v13036_v52 = vrot.slane %v12930_v50, 4 }
0x601d   :  { %10682 = vmatpush3.bf16.xpose.msra.mxu1 %v7683_v2  ;;  %10683 = vmatprep.mubr.msk.bf16.mxu1 %vm11187_vm1, %v11186_v9 }
0x601e   :  { %10693 = vmatprep.subr.bf16.mxu1 %v11186_v9 }
0x608e   :  { %v7676_v28 = vpop.permute.xlu0 %7675 }
0x608f   :  { %10684 = vmatmul.mubr.msk.bf16.vlgmr.msra.gmra.mrb[16].mxu1 %vm186_vm2, %v7676_v28 }
0x6090   :  { %10695 = vmatprep.mubr.msk.bf16.mxu1 %vm11187_vm1, %v11186_v9  ;;  %10694 = vmatpush3.bf16.msra.mxu1 %v12983_v29 }
0x6091   :  { %10705 = vmatprep.subr.bf16.mxu1 %v11186_v9 }
0x60ef   :  { %v7606_v63 = vpop.f32.mrb[12].mxu1 }
0x60f0   :  { %v7607_v8 = vadd.f32 %v12946_v11, %v7606_v63  ;;  %v10673_v15 = vpop.f32.mrb[13].mxu1 }
0x60f1   :  { %v7609_v58 = vpop.f32.mrb[14].mxu1 }
0x60f2   :  { %v10674_v7 = vpop.f32.mrb[15].mxu1  ;;  %v7612_v12 = vsel %vm186_vm2, %v7607_v8, -inf }
0x60f3   :  { %7613 = vmax.xlane.f32.xlu0 %v7612_v12 }
0x6162   :  { %v7719_v16 = vpop.f32.mrb[16].mxu1 }
0x6163   :  { %v7720_v40 = vadd.f32 %v12946_v11, %v7719_v16  ;;  %v10685_v6 = vpop.f32.mrb[17].mxu1 }
0x6164   :  { %v7722_v38 = vpop.f32.mrb[18].mxu1 }
0x6165   :  { %v10686_v19 = vpop.f32.mrb[19].mxu1  ;;  %v7725_v22 = vsel %vm186_vm2, %v7720_v40, -inf }
0x6166   :  { %7726 = vmax.xlane.f32.xlu1 %v7725_v22 }
0x6177   :  { %7737 = vrot.lane.b32.xlu1 %v12907_v17, %s13349_s11 }
0x617b   :  { %7880 = vrot.lane.b32.xlu1 %v12907_v17, %s13343_s28 }
0x6180   :  { %v7614_v35 = vpop.xlane.xlu0 %7613 }
0x6181   :  { %v7615_v49 = vsub.f32 %v7607_v8, %v7614_v35 }
0x6183   :  { %v7616_v33 = vmul.f32 1.442695, %v7615_v49 }
0x6185   :  { %11106 = vpow2.f32 %v7616_v33 }
0x618f   :  { %v11107_v42 = vpop.eup %11106 }
0x6190   :  { %v7618_v26 = vsel %vm186_vm2, %v11107_v42, 0.0 }
0x6191   :  { %7619 = vadd.xlane.f32.xlu0 %v7618_v26 }
0x61f3   :  { %v7727_v60 = vpop.xlane.xlu1 %7726 }
0x61f4   :  { %v7728_v34 = vsub.f32 %v7720_v40, %v7727_v60 }
0x61f6   :  { %v7729_v51 = vmul.f32 1.442695, %v7728_v34 }
0x61f7   :  { %v7738_v48 = vpop.permute.xlu1 %7737 }
0x61f8   :  { %11108 = vpow2.f32 %v7729_v51  ;;  %v7743_v41 = vsel %vm250_vm3, %v7738_v48, 0 }
0x61fb   :  { %v7881_v32 = vpop.permute.xlu1 %7880 }
0x61fc   :  { %v7886_v30 = vsel %vm186_vm2, %v7881_v32, 0 }
0x6202   :  { %v11109_v56 = vpop.eup %11108 }
0x6203   :  { %v7731_v27 = vsel %vm186_vm2, %v11109_v56, 0.0 }
0x6204   :  { %7732 = vadd.xlane.f32.xlu0 %v7731_v27 }
0x621a   :  { %7625 = vrot.lane.b32.xlu0 %v12907_v17, %s13341_s3 }
0x621e   :  { %7878 = vrot.lane.b32.xlu0 %v12930_v50, %s13343_s28  ;;  %v7620_v37 = vpop.xlane.xlu0 %7619 }
0x621f   :  { %11110 = vrcp.f32 %v7620_v37  ;;  %v9412_v37 = vld [vmem:[%s13281_s19 + $0x18] sm:$0xf] }
0x6229   :  { %v11111_v39 = vpop.eup %11110 }
0x622a   :  { %v7622_v31 = vmul.f32 %v11111_v39, %v11107_v42  ;;  %v13024_v39 = vsel %vm250_vm3, %v9412_v37, 0 }
0x622c   :  { %v7623_v1 = vpack.c.bf16 %v7622_v31, %v7622_v31 }
0x6291   :  { %v7733_v36 = vpop.xlane.xlu0 %7732 }
0x6292   :  { %11112 = vrcp.f32 %v7733_v36 }
0x6295   :  { %v7626_v46 = vpop.permute.xlu0 %7625 }
0x6296   :  { %v7631_v44 = vsel %vm250_vm3, %v7626_v46, 0 }
0x6297   :  { %10676 = vmatpush3.bf16.msra.mxu0 %v7631_v44 }
0x6298   :  { %10687 = vmatprep.subr.bf16.mxu0 %v11186_v9 }
0x6299   :  { %v7879_v43 = vpop.permute.xlu0 %7878 }
0x629a   :  { %10678 = vmatmul.mubr.msk.bf16.vlgmr.msra.gmra.mrb[12].mxu0 %vm186_vm2, %v7623_v1 }
0x629b   :  { %10688 = vmatpush3.bf16.msra.mxu0 %v7743_v41  ;;  %10689 = vmatprep.mubr.msk.bf16.mxu0 %vm11187_vm1, %v11186_v9 }
0x629c   :  { %v11113_v14 = vpop.eup %11112  ;;  %10699 = vmatprep.subr.bf16.mxu0 %v11186_v9 }
0x629d   :  { %v7735_v45 = vmul.f32 %v11113_v14, %v11109_v56 }
0x629f   :  { %v7736_v23 = vpack.c.bf16 %v7735_v45, %v7735_v45 }
0x62a2   :  { %10690 = vmatmul.mubr.msk.bf16.vlgmr.msra.gmra.mrb[16].mxu0 %vm186_vm2, %v7736_v23 }
0x62a3   :  { %10701 = vmatprep.mubr.msk.bf16.mxu0 %vm11187_vm1, %v11186_v9  ;;  %10700 = vmatpush3.bf16.msra.mxu0 %v12976_v62 }
0x62a4   :  { %10711 = vmatprep.subr.bf16.mxu0 %v11186_v9 }
0x636d   :  { %v7667_v47 = vpop.f32.mrb[12].mxu0 }
0x636e   :  { %v7673_v53 = vpack.c.bf16 %v7667_v47, %v7667_v47  ;;  %v10679_v18 = vpop.f32.mrb[13].mxu0 }
0x636f   :  { %v7670_v57 = vpop.f32.mrb[14].mxu0 }
0x6370   :  { %v10680_v21 = vpop.f32.mrb[15].mxu0  ;;  %10702 = vmatmul.mubr.msk.bf16.vlgmr.msra.gmra.mrb[20].mxu0 %vm186_vm2, %v7673_v53 }
0x6371   :  { %10713 = vmatprep.mubr.msk.bf16.mxu0 %vm11187_vm1, %v11186_v9 }
0x6375   :  { %v7779_v54 = vpop.f32.mrb[16].mxu0 }
0x6376   :  { %v7785_v20 = vpack.c.bf16 %v7779_v54, %v7779_v54  ;;  %v10691_v10 = vpop.f32.mrb[17].mxu0 }
0x6377   :  { %v7782_v59 = vpop.f32.mrb[18].mxu0 }
0x6378   :  { %v10692_v55 = vpop.f32.mrb[19].mxu0  ;;  %10696 = vmatmul.mubr.msk.bf16.vlgmr.msra.gmra.mrb[20].mxu1 %vm186_vm2, %v7785_v20 }
0x6379   :  { %10706 = vmatpush3.bf16.xpose.msra.mxu1 %v7886_v30  ;;  %10707 = vmatprep.mubr.msk.bf16.mxu1 %vm11187_vm1, %v11186_v9 }
0x637a   :  { %10717 = vmatprep.subr.bf16.mxu1 %v11186_v9 }
0x6380   :  { %10708 = vmatmul.mubr.msk.bf16.vlgmr.msra.gmra.mrb[24].mxu1 %vm186_vm2, %v7879_v43 }
0x6381   :  { %10719 = vmatprep.mubr.msk.bf16.mxu1 %vm11187_vm1, %v11186_v9  ;;  %10718 = vmatpush3.bf16.msra.mxu1 %v13024_v39 }
0x6382   :  { %10729 = vmatprep.subr.bf16.mxu1 %v11186_v9 }
0x6443   :  { %v7872_v61 = vpop.f32.mrb[20].mxu0 }
0x6444   :  { %v10703_v4 = vpop.f32.mrb[21].mxu0 }
0x6445   :  { %v7875_v25 = vpop.f32.mrb[22].mxu0 }
0x6446   :  { %v10704_v0 = vpop.f32.mrb[23].mxu0 }
0x644b   :  { %v7826_v5 = vpop.f32.mrb[20].mxu1 }
0x644c   :  { %v12999_v2 = vadd.f32 %v7872_v61, %v7826_v5  ;;  %v10697_v28 = vpop.f32.mrb[21].mxu1 }
0x644d   :  { %v7829_v63 = vpop.f32.mrb[22].mxu1 }
0x644e   :  { %v10698_v8 = vpop.f32.mrb[23].mxu1 }
0x6453   :  { %v7922_v15 = vpop.f32.mrb[24].mxu1 }
0x6454   :  { %v7923_v58 = vadd.f32 %v12946_v11, %v7922_v15  ;;  %v10709_v7 = vpop.f32.mrb[25].mxu1 }
0x6455   :  { %v7925_v12 = vpop.f32.mrb[26].mxu1 }
0x6456   :  { %v10710_v16 = vpop.f32.mrb[27].mxu1  ;;  %v7928_v40 = vsel %vm186_vm2, %v7923_v58, -inf  ;;  %v13082_v12 = vld [vmem:[%s13352_s30 + $0x1] ss:$0 sm:$0xff] }
0x6457   :  { %7929 = vmax.xlane.f32.xlu1 %v7928_v40 }
0x6468   :  { %8038 = vrot.lane.b32.xlu1 %v12907_v17, %s13338_s0 }
0x646c   :  { %8036 = vrot.lane.b32.xlu1 %v12930_v50, %s13338_s0  ;;  %v13044_v50 = vrot.slane %v12907_v17, 4 }
0x64e4   :  { %v7930_v6 = vpop.xlane.xlu1 %7929 }
0x64e5   :  { %v7931_v38 = vsub.f32 %v7923_v58, %v7930_v6 }
0x64e7   :  { %v7932_v19 = vmul.f32 1.442695, %v7931_v38 }
0x64e8   :  { %v8039_v34 = vpop.permute.xlu1 %8038 }
0x64e9   :  { %11114 = vpow2.f32 %v7932_v19  ;;  %v8044_v56 = vsel %vm186_vm2, %v8039_v34, 0 }
0x64ec   :  { %v8037_v27 = vpop.permute.xlu1 %8036 }
0x64f3   :  { %v11115_v22 = vpop.eup %11114 }
0x64f4   :  { %v7934_v35 = vsel %vm186_vm2, %v11115_v22, 0.0 }
0x64f5   :  { %7935 = vadd.xlane.f32.xlu0 %v7934_v35 }
0x650b   :  { %7940 = vrot.lane.b32.xlu0 %v12907_v17, %s13345_s1 }
0x6582   :  { %v7936_v49 = vpop.xlane.xlu0 %7935 }
0x6583   :  { %11116 = vrcp.f32 %v7936_v49 }
0x6586   :  { %v7941_v33 = vpop.permute.xlu0 %7940 }
0x6587   :  { %v7946_v42 = vsel %vm250_vm3, %v7941_v33, 0 }
0x6588   :  { %10712 = vmatpush3.bf16.msra.mxu0 %v7946_v42 }
0x6589   :  { %10723 = vmatprep.subr.bf16.mxu0 %v11186_v9 }
0x658d   :  { %v11117_v26 = vpop.eup %11116 }
0x658e   :  { %v7938_v60 = vmul.f32 %v11117_v26, %v11115_v22 }
0x6590   :  { %v7939_v51 = vpack.c.bf16 %v7938_v60, %v7938_v60 }
0x6592   :  { %10714 = vmatmul.mubr.msk.bf16.vlgmr.msra.gmra.mrb[24].mxu0 %vm186_vm2, %v7939_v51 }
0x6593   :  { %10724 = vmatpush3.bf16.xpose.msra.mxu0 %v8044_v56  ;;  %10725 = vmatprep.mubr.msk.bf16.mxu0 %vm11187_vm1, %v11186_v9 }
0x6594   :  { %10735 = vmatprep.subr.bf16.mxu0 %v11186_v9 }
0x659a   :  { %10726 = vmatmul.mubr.msk.bf16.vlgmr.msra.gmra.mrb[28].mxu0 %vm186_vm2, %v8037_v27 }
0x659b   :  { %10737 = vmatprep.mubr.msk.bf16.mxu0 %vm11187_vm1, %v11186_v9 }
0x6665   :  { %v7982_v36 = vpop.f32.mrb[24].mxu0 }
0x6666   :  { %v7988_v31 = vpack.c.bf16 %v7982_v36, %v7982_v36  ;;  %v10715_v46 = vpop.f32.mrb[25].mxu0 }
0x6667   :  { %v7985_v44 = vpop.f32.mrb[26].mxu0 }
0x6668   :  { %v10716_v48 = vpop.f32.mrb[27].mxu0  ;;  %10720 = vmatmul.mubr.msk.bf16.vlgmr.msra.gmra.mrb[28].mxu1 %vm186_vm2, %v7988_v31 }
0x6669   :  { %10731 = vmatprep.mubr.msk.bf16.mxu1 %vm11187_vm1, %v11186_v9 }
0x666d   :  { %v8080_v1 = vpop.f32.mrb[28].mxu0 }
0x666e   :  { %v8081_v41 = vadd.f32 %v12946_v11, %v8080_v1  ;;  %v10727_v14 = vpop.f32.mrb[29].mxu0 }
0x666f   :  { %v8083_v45 = vpop.f32.mrb[30].mxu0 }
0x6670   :  { %v10728_v23 = vpop.f32.mrb[31].mxu0  ;;  %v8086_v24 = vsel %vm186_vm2, %v8081_v41, -inf }
0x6671   :  { %8087 = vmax.xlane.f32.xlu0 %v8086_v24 }
0x6687   :  { %8098 = vrot.lane.b32.xlu0 %v12907_v17, %s13346_s26  ;;  %v8200_v17 = vsel %vm186_vm2, %v13044_v50, 0 }
0x668b   :  { %8303 = vrot.lane.b32.xlu0 %v13036_v52, %s13342_s4 }
0x66fe   :  { %v8088_v47 = vpop.xlane.xlu0 %8087 }
0x66ff   :  { %v8089_v53 = vsub.f32 %v8081_v41, %v8088_v47 }
0x6701   :  { %v8090_v18 = vmul.f32 1.442695, %v8089_v53 }
0x6702   :  { %v8099_v57 = vpop.permute.xlu0 %8098 }
0x6703   :  { %11118 = vpow2.f32 %v8090_v18  ;;  %v8104_v11 = vsel %vm250_vm3, %v8099_v57, 0 }
0x6704   :  { %10730 = vmatpush3.bf16.msra.mxu1 %v8104_v11 }
0x6705   :  { %10741 = vmatprep.subr.bf16.mxu1 %v11186_v9 }
0x6706   :  { %v8304_v5 = vpop.permute.xlu0 %8303 }
0x670d   :  { %v11119_v21 = vpop.eup %11118 }
0x670e   :  { %v8092_v32 = vsel %vm186_vm2, %v11119_v21, 0.0 }
0x670f   :  { %8093 = vadd.xlane.f32.xlu1 %v8092_v32 }
0x6720   :  { %8305 = vrot.lane.b32.xlu1 %v13044_v50, %s13342_s4 }
0x673b   :  { %v8029_v54 = vpop.f32.mrb[28].mxu1 }
0x673c   :  { %v13049_v20 = vadd.f32 %v8029_v54, %v12999_v2  ;;  %v10721_v10 = vpop.f32.mrb[29].mxu1  ;;  %v9413_v2 = vld [vmem:[%s13281_s19 + $0x1c] sm:$0xf] }
0x673d   :  { %v8032_v59 = vpop.f32.mrb[30].mxu1  ;;  %v13072_v28 = vsel %vm250_vm3, %v9413_v2, 0 }
0x673e   :  { %v10722_v30 = vpop.f32.mrb[31].mxu1  ;;  %10736 = vmatpush3.bf16.msra.mxu0 %v13072_v28 }
0x673f   :  { %10747 = vmatprep.subr.bf16.mxu0 %v11186_v9 }
0x679c   :  { %v8094_v55 = vpop.xlane.xlu1 %8093 }
0x679d   :  { %11120 = vrcp.f32 %v8094_v55 }
0x67a0   :  { %v8306_v25 = vpop.permute.xlu1 %8305 }
0x67a1   :  { %v8311_v0 = vsel %vm186_vm2, %v8306_v25, 0 }
0x67a7   :  { %v11121_v43 = vpop.eup %11120 }
0x67a8   :  { %v8096_v61 = vmul.f32 %v11121_v43, %v11119_v21 }
0x67aa   :  { %v8097_v4 = vpack.c.bf16 %v8096_v61, %v8096_v61 }
0x67ac   :  { %10732 = vmatmul.mubr.msk.bf16.vlgmr.msra.gmra.mrb[32].mxu1 %vm186_vm2, %v8097_v4 }
0x67ad   :  { %10742 = vmatpush3.bf16.xpose.msra.mxu1 %v8200_v17  ;;  %10743 = vmatprep.mubr.msk.bf16.mxu1 %vm11187_vm1, %v11186_v9 }
0x67ae   :  { %10753 = vmatprep.subr.bf16.mxu1 %v11186_v9 }
0x67b4   :  { %10744 = vmatmul.mubr.msk.bf16.vlgmr.msra.gmra.mrb[36].mxu1 %vm186_vm2, %v13036_v52 }
0x67b5   :  { %10754 = vmatpush3.bf16.xpose.msra.mxu1 %v8311_v0  ;;  %10755 = vmatprep.mubr.msk.bf16.mxu1 %vm11187_vm1, %v11186_v9 }
0x67b6   :  { %10765 = vmatprep.subr.bf16.mxu1 %v11186_v9 }
0x67bc   :  { %10756 = vmatmul.mubr.msk.bf16.vlgmr.msra.gmra.mrb[40].mxu1 %vm186_vm2, %v8304_v5 }
0x67bd   :  { %10766 = vmatpush3.bf16.msra.mxu1 %v12983_v29  ;;  %10767 = vmatprep.mubr.msk.bf16.mxu1 %vm11187_vm1, %v11186_v9 }
0x67be   :  { %10777 = vmatprep.subr.bf16.mxu1 %v11186_v9 }
0x687f   :  { %v8140_v63 = vpop.f32.mrb[32].mxu1 }
0x6880   :  { %v8146_v8 = vpack.c.bf16 %v8140_v63, %v8140_v63  ;;  %v10733_v15 = vpop.f32.mrb[33].mxu1 }
0x6881   :  { %v8143_v29 = vpop.f32.mrb[34].mxu1 }
0x6882   :  { %v10734_v58 = vpop.f32.mrb[35].mxu1  ;;  %10738 = vmatmul.mubr.msk.bf16.vlgmr.msra.gmra.mrb[32].mxu0 %vm186_vm2, %v8146_v8 }
0x6883   :  { %10749 = vmatprep.mubr.msk.bf16.mxu0 %vm11187_vm1, %v11186_v9 }
0x6887   :  { %v8236_v7 = vpop.f32.mrb[36].mxu1 }
0x6888   :  { %v8237_v16 = vadd.f32 %v13082_v12, %v8236_v7  ;;  %v10745_v40 = vpop.f32.mrb[37].mxu1 }
0x6889   :  { %v8239_v6 = vpop.f32.mrb[38].mxu1 }
0x688a   :  { %v10746_v38 = vpop.f32.mrb[39].mxu1  ;;  %v8242_v19 = vsel %vm186_vm2, %v8237_v16, -inf }
0x688b   :  { %8243 = vmax.xlane.f32.xlu1 %v8242_v19 }
0x688f   :  { %v8347_v22 = vpop.f32.mrb[40].mxu1 }
0x6890   :  { %v8348_v35 = vadd.f32 %v13082_v12, %v8347_v22  ;;  %v10757_v49 = vpop.f32.mrb[41].mxu1 }
0x6891   :  { %v8350_v33 = vpop.f32.mrb[42].mxu1 }
0x6892   :  { %v10758_v42 = vpop.f32.mrb[43].mxu1  ;;  %v8353_v26 = vsel %vm186_vm2, %v8348_v35, -inf }
0x6893   :  { %8354 = vmax.xlane.f32.xlu0 %v8353_v26 }
0x6918   :  { %v8244_v60 = vpop.xlane.xlu1 %8243 }
0x6919   :  { %v8245_v34 = vsub.f32 %v8237_v16, %v8244_v60 }
0x691b   :  { %v8246_v51 = vmul.f32 1.442695, %v8245_v34 }
0x691d   :  { %11122 = vpow2.f32 %v8246_v51 }
0x6920   :  { %v8355_v56 = vpop.xlane.xlu0 %8354 }
0x6921   :  { %v8356_v27 = vsub.f32 %v8348_v35, %v8355_v56 }
0x6923   :  { %v8357_v37 = vmul.f32 1.442695, %v8356_v27 }
0x6925   :  { %11124 = vpow2.f32 %v8357_v37 }
0x6927   :  { %v11123_v36 = vpop.eup %11122 }
0x6928   :  { %v8248_v31 = vsel %vm186_vm2, %v11123_v36, 0.0 }
0x6929   :  { %8249 = vadd.xlane.f32.xlu0 %v8248_v31 }
0x692f   :  { %v11125_v46 = vpop.eup %11124 }
0x6930   :  { %v8359_v44 = vsel %vm186_vm2, %v11125_v46, 0.0 }
0x6931   :  { %8360 = vadd.xlane.f32.xlu1 %v8359_v44 }
0x693f   :  { %8254 = vrot.lane.b32.xlu0 %v13044_v50, %s13341_s3 }
0x6942   :  { %8365 = vrot.lane.b32.xlu1 %v13044_v50, %s13349_s11 }
0x6943   :  { %8500 = vrot.lane.b32.xlu0 %v13036_v52, %s13343_s28 }
0x6946   :  { %8502 = vrot.lane.b32.xlu1 %v13044_v50, %s13343_s28 }
0x6955   :  { %v8187_v48 = vpop.f32.mrb[32].mxu0 }
0x6956   :  { %v13099_v1 = vadd.f32 %v8187_v48, %v13049_v20  ;;  %v10739_v41 = vpop.f32.mrb[33].mxu0 }
0x6957   :  { %v8190_v14 = vpop.f32.mrb[34].mxu0 }
0x6958   :  { %v10740_v45 = vpop.f32.mrb[35].mxu0 }
0x69b6   :  { %v8250_v23 = vpop.xlane.xlu0 %8249 }
0x69b7   :  { %11126 = vrcp.f32 %v8250_v23 }
0x69ba   :  { %v8255_v24 = vpop.permute.xlu0 %8254 }
0x69bb   :  { %v8260_v47 = vsel %vm250_vm3, %v8255_v24, 0 }
0x69bc   :  { %10748 = vmatpush3.bf16.msra.mxu0 %v8260_v47 }
0x69bd   :  { %10759 = vmatprep.subr.bf16.mxu0 %v11186_v9 }
0x69be   :  { %v8361_v53 = vpop.xlane.xlu1 %8360  ;;  %v8501_v63 = vpop.permute.xlu0 %8500 }
0x69bf   :  { %11128 = vrcp.f32 %v8361_v53 }
0x69c1   :  { %v11127_v18 = vpop.eup %11126 }
0x69c2   :  { %v8252_v57 = vmul.f32 %v11127_v18, %v11123_v36  ;;  %v8366_v11 = vpop.permute.xlu1 %8365 }
0x69c3   :  { %v8371_v32 = vsel %vm250_vm3, %v8366_v11, 0 }
0x69c4   :  { %v8253_v21 = vpack.c.bf16 %v8252_v57, %v8252_v57 }
0x69c6   :  { %10750 = vmatmul.mubr.msk.bf16.vlgmr.msra.gmra.mrb[36].mxu0 %vm186_vm2, %v8253_v21  ;;  %v8503_v4 = vpop.permute.xlu1 %8502 }
0x69c7   :  { %10760 = vmatpush3.bf16.msra.mxu0 %v8371_v32  ;;  %10761 = vmatprep.mubr.msk.bf16.mxu0 %vm11187_vm1, %v11186_v9  ;;  %v8508_v5 = vsel %vm186_vm2, %v8503_v4, 0 }
0x69c8   :  { %10771 = vmatprep.subr.bf16.mxu0 %v11186_v9 }
0x69c9   :  { %v11129_v54 = vpop.eup %11128 }
0x69ca   :  { %v8363_v20 = vmul.f32 %v11129_v54, %v11125_v46 }
0x69cc   :  { %v8364_v10 = vpack.c.bf16 %v8363_v20, %v8363_v20 }
0x69ce   :  { %10762 = vmatmul.mubr.msk.bf16.vlgmr.msra.gmra.mrb[40].mxu0 %vm186_vm2, %v8364_v10 }
0x69cf   :  { %10772 = vmatpush3.bf16.msra.mxu0 %v12976_v62  ;;  %10773 = vmatprep.mubr.msk.bf16.mxu0 %vm11187_vm1, %v11186_v9 }
0x69d0   :  { %10783 = vmatprep.subr.bf16.mxu0 %v11186_v9 }
0x6a99   :  { %v8296_v59 = vpop.f32.mrb[36].mxu0 }
0x6a9a   :  { %v8302_v30 = vpack.c.bf16 %v8296_v59, %v8296_v59  ;;  %v10751_v55 = vpop.f32.mrb[37].mxu0 }
0x6a9b   :  { %v8299_v43 = vpop.f32.mrb[38].mxu0 }
0x6a9c   :  { %v10752_v61 = vpop.f32.mrb[39].mxu0  ;;  %10774 = vmatmul.mubr.msk.bf16.vlgmr.msra.gmra.mrb[44].mxu0 %vm186_vm2, %v8302_v30 }
0x6a9d   :  { %10785 = vmatprep.mubr.msk.bf16.mxu0 %vm11187_vm1, %v11186_v9 }
0x6aa1   :  { %v8407_v17 = vpop.f32.mrb[40].mxu0 }
0x6aa2   :  { %v8413_v25 = vpack.c.bf16 %v8407_v17, %v8407_v17  ;;  %v10763_v0 = vpop.f32.mrb[41].mxu0 }
0x6aa3   :  { %v8410_v62 = vpop.f32.mrb[42].mxu0 }
0x6aa4   :  { %v10764_v2 = vpop.f32.mrb[43].mxu0  ;;  %10768 = vmatmul.mubr.msk.bf16.vlgmr.msra.gmra.mrb[44].mxu1 %vm186_vm2, %v8413_v25 }
0x6aa5   :  { %10778 = vmatpush3.bf16.xpose.msra.mxu1 %v8508_v5  ;;  %10779 = vmatprep.mubr.msk.bf16.mxu1 %vm11187_vm1, %v11186_v9 }
0x6aa6   :  { %10789 = vmatprep.subr.bf16.mxu1 %v11186_v9 }
0x6aac   :  { %10780 = vmatmul.mubr.msk.bf16.vlgmr.msra.gmra.mrb[48].mxu1 %vm186_vm2, %v8501_v63 }
0x6aad   :  { %10790 = vmatpush3.bf16.msra.mxu1 %v13024_v39  ;;  %10791 = vmatprep.mubr.msk.bf16.mxu1 %vm11187_vm1, %v11186_v9 }
0x6aae   :  { %10801 = vmatprep.subr.bf16.mxu1 %v11186_v9 }
0x6b6f   :  { %v8494_v8 = vpop.f32.mrb[44].mxu0 }
0x6b70   :  { %v10775_v15 = vpop.f32.mrb[45].mxu0 }
0x6b71   :  { %v8497_v29 = vpop.f32.mrb[46].mxu0 }
0x6b72   :  { %v10776_v58 = vpop.f32.mrb[47].mxu0 }
0x6b77   :  { %v8451_v7 = vpop.f32.mrb[44].mxu1 }
0x6b78   :  { %v13126_v16 = vadd.f32 %v8494_v8, %v8451_v7  ;;  %v10769_v40 = vpop.f32.mrb[45].mxu1 }
0x6b79   :  { %v8454_v6 = vpop.f32.mrb[46].mxu1 }
0x6b7a   :  { %v10770_v38 = vpop.f32.mrb[47].mxu1 }
0x6b7f   :  { %v8544_v19 = vpop.f32.mrb[48].mxu1 }
0x6b80   :  { %v8545_v22 = vadd.f32 %v13082_v12, %v8544_v19  ;;  %v10781_v35 = vpop.f32.mrb[49].mxu1 }
0x6b81   :  { %v8547_v39 = vpop.f32.mrb[50].mxu1  ;;  %v10897_v35 = vld [vmem:[%s13283_s21 + $0x18] sm:$0xff]  }
0x6b82   :  { %v10782_v49 = vpop.f32.mrb[51].mxu1  ;;  %v8550_v33 = vsel %vm186_vm2, %v8545_v22, -inf  ;;  %v10899_v39 = vld [vmem:[%s13284_s22 + $0x28] sm:$0xff]  }
0x6b83   :  { %8551 = vmax.xlane.f32.xlu1 %v8550_v33 }
0x6b94   :  { %8657 = vrot.lane.b32.xlu1 %v13044_v50, %s13338_s0 }
0x6b98   :  { %8655 = vrot.lane.b32.xlu1 %v13036_v52, %s13338_s0  ;;  %s11200_s0 = smov [#allocation2]  }
0x6b99   :  { %s9177_s3 = sshll.u32 %s11200_s0, 4  ;;  %s9178_s3 = int_to_ptr.vmem [resolvable:$true] %s9177_s3 }
0x6b9a   :  { %s11162_s28 = scalar_lea.vmem %s9178_s3, 16  ;;  %p11167_p1 = scmp.lt.s32.totalorder %s9178_s3, %s9178_s3 }
0x6b9b   :  { %p11163_p0 = scmp.ne.s32.totalorder %s9178_s3, %s11162_s28 }
0x6c10   :  { %v8552_v42 = vpop.xlane.xlu1 %8551 }
0x6c11   :  { %v8553_v26 = vsub.f32 %v8545_v22, %v8552_v42  ;;  %v10896_v22 = vld [vmem:[%s13283_s21 + $0x10] sm:$0xff]  }
0x6c13   :  { %v8554_v60 = vmul.f32 1.442695, %v8553_v26 }
0x6c14   :  { %v8658_v31 = vpop.permute.xlu1 %8657 }
0x6c15   :  { %11130 = vpow2.f32 %v8554_v60  ;;  %v8663_v44 = vsel %vm186_vm2, %v8658_v31, 0 }
0x6c18   :  { %v8656_v48 = vpop.permute.xlu1 %8655 }
0x6c1f   :  { %v11131_v34 = vpop.eup %11130 }
0x6c20   :  { %v8556_v51 = vsel %vm186_vm2, %v11131_v34, 0.0 }
0x6c21   :  { %8557 = vadd.xlane.f32.xlu0 %v8556_v51 }
0x6c37   :  { %8562 = vrot.lane.b32.xlu0 %v13044_v50, %s13345_s1  ;;  %s11166_s1 = scalar_lea.vmem %s9178_s3, 32 }
0x6c38   :  { %p11168_p2 = scmp.lt.s32.totalorder %s11166_s1, %s11162_s28 }
0x6c3a   :  { %p11169_p3 = por %p11168_p2, %p11167_p1 }
0x6c3c   :  { %p11170_p4 = pnand %p11169_p3, %p11163_p0 }
0x6cae   :  { %v8558_v56 = vpop.xlane.xlu0 %8557 }
0x6caf   :  { %11132 = vrcp.f32 %v8558_v56 }
0x6cb2   :  { %v8563_v27 = vpop.permute.xlu0 %8562 }
0x6cb3   :  { %v8568_v37 = vsel %vm250_vm3, %v8563_v27, 0 }
0x6cb4   :  { %10784 = vmatpush3.bf16.msra.mxu0 %v8568_v37  ;;  %v9439_v37 = vld [vmem:[%s13282_s20 + $0x1] ss:$0 sm:$0xff] }
0x6cb5   :  { %10795 = vmatprep.subr.bf16.mxu0 %v11186_v9 }
0x6cb9   :  { %v11133_v52 = vpop.eup %11132 }
0x6cba   :  { %v8560_v36 = vmul.f32 %v11133_v52, %v11131_v34 }
0x6cbc   :  { %v8561_v46 = vpack.c.bf16 %v8560_v36, %v8560_v36 }
0x6cbe   :  { %10786 = vmatmul.mubr.msk.bf16.vlgmr.msra.gmra.mrb[48].mxu0 %vm186_vm2, %v8561_v46 }
0x6cbf   :  { %10796 = vmatpush3.bf16.xpose.msra.mxu0 %v8663_v44  ;;  %10797 = vmatprep.mubr.msk.bf16.mxu0 %vm11187_vm1, %v11186_v9  ;;  %v10900_v44 = vld [vmem:[%s13284_s22 + $0x30] sm:$0xff]  }
0x6cc0   :  { %10807 = vmatprep.subr.bf16.mxu0 %v11186_v9 }
0x6cc6   :  { %10798 = vmatmul.mubr.msk.bf16.vlgmr.msra.gmra.mrb[52].mxu0 %vm186_vm2, %v8656_v48  ;;  %v10901_v48 = vld [vmem:[%s13284_s22 + $0x38] sm:$0xff]  }
0x6cc7   :  { %10808 = vmatpush3.bf16.msra.mxu0 %v13072_v28  ;;  %10809 = vmatprep.mubr.msk.bf16.mxu0 %vm11187_vm1, %v11186_v9 }
0x6cc8   :  { %10821 = vmatprep.subr.bf16.mxu0 %v11186_v9 }
0x6d91   :  { %v8604_v41 = vpop.f32.mrb[48].mxu0 }
0x6d92   :  { %v8610_v14 = vpack.c.bf16 %v8604_v41, %v8604_v41  ;;  %v10787_v45 = vpop.f32.mrb[49].mxu0 }
0x6d93   :  { %v8607_v23 = vpop.f32.mrb[50].mxu0 }
0x6d94   :  { %v10788_v24 = vpop.f32.mrb[51].mxu0  ;;  %10792 = vmatmul.mubr.msk.bf16.vlgmr.msra.gmra.mrb[52].mxu1 %vm186_vm2, %v8610_v14 }
0x6d95   :  { %10803 = vmatprep.mubr.msk.bf16.mxu1 %vm11187_vm1, %v11186_v9 }
0x6d99   :  { %v8699_v47 = vpop.f32.mrb[52].mxu0 }
0x6d9a   :  { %v8700_v53 = vadd.f32 %v13082_v12, %v8699_v47  ;;  %v10799_v18 = vpop.f32.mrb[53].mxu0  ;;  %v13160_v12 = vadd.f32 %v13099_v1, %v12876_v3 }
0x6d9b   :  { %v8702_v28 = vpop.f32.mrb[54].mxu0  ;;  %v10902_v18 = vld [vmem:[%s13353_s24] sm:$0xff]  }
0x6d9c   :  { %v10800_v57 = vpop.f32.mrb[55].mxu0  ;;  %v8705_v11 = vsel %vm186_vm2, %v8700_v53, -inf  ;;  %v9042_v28 = vsel %vm89_vm0, %v10902_v18, 0 }
0x6d9d   :  { %8706 = vmax.xlane.f32.xlu0 %v8705_v11 }
0x6db3   :  { %8717 = vrot.lane.b32.xlu0 %v13044_v50, %s13346_s26  ;;  %v8814_v50 = vmul.f32 %v13160_v12, %v13160_v12 }
0x6db5   :  { %v8816_v55 = vsel %vm89_vm0, %v8814_v50, 0.0 }
0x6e2a   :  { %v8707_v21 = vpop.xlane.xlu0 %8706 }
0x6e2b   :  { %v8708_v32 = vsub.f32 %v8700_v53, %v8707_v21 }
0x6e2d   :  { %v8709_v54 = vmul.f32 1.442695, %v8708_v32 }
0x6e2e   :  { %v8718_v20 = vpop.permute.xlu0 %8717 }
0x6e2f   :  { %11134 = vpow2.f32 %v8709_v54  ;;  %v8723_v10 = vsel %vm250_vm3, %v8718_v20, 0 }
0x6e30   :  { %10802 = vmatpush3.bf16.msra.mxu1 %v8723_v10 }
0x6e31   :  { %10813 = vmatprep.subr.bf16.mxu1 %v11186_v9 }
0x6e39   :  { %v11135_v59 = vpop.eup %11134 }
0x6e3a   :  { %v8711_v30 = vsel %vm186_vm2, %v11135_v59, 0.0 }
0x6e3b   :  { %8712 = vadd.xlane.f32.xlu1 %v8711_v30 }
0x6e3f   :  { %8817 = vadd.xlane.f32.xlu1 %v8816_v55  ;;  %v10903_v55 = vld [vmem:[%s13353_s24 + $0x8] sm:$0xff]  }
0x6e67   :  { %v8648_v43 = vpop.f32.mrb[52].mxu1 }
0x6e68   :  { %v8654_v61 = vadd.f32 %v8648_v43, %v13126_v16  ;;  %v10793_v4 = vpop.f32.mrb[53].mxu1  ;;  %v9045_v43 = vsel %vm89_vm0, %v10903_v55, 0 }
0x6e69   :  { %v8651_v17 = vpop.f32.mrb[54].mxu1  ;;  %v10905_v4 = vld [vmem:[%s13353_s24 + $0x18] sm:$0xff]  }
0x6e6a   :  { %v10794_v25 = vpop.f32.mrb[55].mxu1  ;;  %v9051_v17 = vsel %vm89_vm0, %v10905_v4, 0 }
0x6e6b   :  { %v9094_v25 = vld [vmem:[%s13354_s27] sm:$0xff] }
0x6e6c   :  { %vm9138_vm6 = vcmp.ne.s32.totalorder %v9094_v25, 4294967196 }
0x6ec8   :  { %v8713_v0 = vpop.xlane.xlu1 %8712 }
0x6ec9   :  { %11136 = vrcp.f32 %v8713_v0  ;;  %v11199_v0 = vmov 0  }
0x6eca   :  { %10860 = vset.pattern.permute.xlu1 %v11199_v0  ;;  %10861 = vset.pattern.permute.xlu0 %v11199_v0 }
0x6ecc   :  { %v8818_v49 = vpop.xlane.xlu1 %8817 }
0x6ecd   :  { %v8822_v33 = vmul.f32 0.03125, %v8818_v49 }
0x6ecf   :  { %v8824_v42 = vadd.f32 1e-06, %v8822_v33 }
0x6ed1   :  { %11138 = vrsqrt.f32 %v8824_v42 }
0x6ed3   :  { %v11137_v3 = vpop.eup %11136 }
0x6ed4   :  { %v8715_v1 = vmul.f32 %v11137_v3, %v11135_v59 }
0x6ed6   :  { %v8716_v62 = vpack.c.bf16 %v8715_v1, %v8715_v1 }
0x6ed8   :  { %10804 = vmatmul.mubr.msk.bf16.vlgmr.msra.gmra.mrb[56].mxu1 %vm186_vm2, %v8716_v62 }
0x6ed9   :  { %10817 = vmatprep.mubr.msk.bf16.mxu1 %vm11187_vm1, %v11186_v9  ;;  %10814 = vmatpush3.bf16.msra.mxu1 %v10896_v22  ;;  %v9120_v22 = vlaneseq }
0x6eda   :  { %10815 = vmatprep.subr.bf16.mxu1 %v11186_v9 }
0x6edb   :  { %v11139_v51 = vpop.eup %11138 }
0x6edc   :  { %v8828_v56 = vmul.f32 %v11139_v51, %v13160_v12 }
0x6edd   :  { %10816 = vmatpush3.bf16.msra.mxu1 %v10897_v35  ;;  %v9121_v35 = vand.u32 127, %v9120_v22 }
0x6ede   :  { %10833 = vmatprep.subr.bf16.mxu1 %v11186_v9  ;;  %v8836_v36 = vmul.f32 %v9439_v37, %v8828_v56 }
0x6fab   :  { %v8759_v5 = vpop.f32.mrb[56].mxu1 }
0x6fac   :  { %v8765_v2 = vpack.c.bf16 %v8759_v5, %v8759_v5  ;;  %v10805_v63 = vpop.f32.mrb[57].mxu1 }
0x6fad   :  { %v8762_v8 = vpop.f32.mrb[58].mxu1 }
0x6fae   :  { %v10806_v15 = vpop.f32.mrb[59].mxu1  ;;  %10810 = vmatmul.mubr.msk.bf16.vlgmr.msra.gmra.mrb[56].mxu0 %vm186_vm2, %v8765_v2 }
0x6faf   :  { %10829 = vmatprep.mubr.msk.bf16.mxu0 %vm11187_vm1, %v11186_v9 }
0x7081   :  { %v8803_v29 = vpop.f32.mrb[56].mxu0 }
0x7082   :  { %v8809_v58 = vadd.f32 %v8803_v29, %v8654_v61  ;;  %v10811_v7 = vpop.f32.mrb[57].mxu0  ;;  %v9460_v29 = vld [vmem:[%s13355_s12] ss:$0 sm:$0xff] }
0x7083   :  { %v8806_v16 = vpop.f32.mrb[58].mxu0 }
0x7084   :  { %v8811_v40 = vadd.f32 %v8809_v58, %v12902_v13  ;;  %v10812_v6 = vpop.f32.mrb[59].mxu0  ;;  %v10898_v13 = vld [vmem:[%s13284_s22 + $0x20] sm:$0xff]  }
0x7085   :  { %10822 = vmatpush3.bf16.msra.mxu0 %v10898_v13 }
0x7086   :  { %v8815_v38 = vmul.f32 %v8811_v40, %v8811_v40  ;;  %10823 = vmatprep.subr.bf16.mxu0 %v11186_v9 }
0x7088   :  { %v8819_v19 = vsel %vm89_vm0, %v8815_v38, 0.0 }
0x7089   :  { %8820 = vadd.xlane.f32.xlu1 %v8819_v19  ;;  %10824 = vmatpush3.bf16.msra.mxu0 %v10899_v39 }
0x708a   :  { %10825 = vmatprep.subr.bf16.mxu0 %v11186_v9 }
0x708d   :  { %10826 = vmatpush3.bf16.msra.mxu0 %v10900_v44 }
0x708e   :  { %10827 = vmatprep.subr.bf16.mxu0 %v11186_v9 }
0x7091   :  { %10828 = vmatpush3.bf16.msra.mxu0 %v10901_v48 }
0x7116   :  { %v8821_v26 = vpop.xlane.xlu1 %8820 }
0x7117   :  { %v8823_v60 = vmul.f32 0.03125, %v8821_v26 }
0x7119   :  { %v8825_v34 = vadd.f32 1e-06, %v8823_v60 }
0x711b   :  { %11140 = vrsqrt.f32 %v8825_v34 }
0x7125   :  { %v11141_v27 = vpop.eup %11140 }
0x7126   :  { %v8829_v52 = vmul.f32 %v11141_v27, %v8811_v40 }
0x7128   :  { %v8837_v31 = vmul.f32 %v9439_v37, %v8829_v52 }
0x712a   :  { %v8843_v46 = vpack.c.bf16 %v8837_v31, %v8836_v36 }
0x712c   :  { %10818 = vmatmul.mubr.msk.bf16.vlgmr.msra.gmra.mrb[60].mxu1 %vm89_vm0, %v8843_v46 }
0x712d   :  { %10841 = vmatprep.mubr.msk.bf16.mxu1 %vm11187_vm1, %v11186_v9  ;;  %10834 = vmatpush3.bf16.xpose.msra.mxu1 %v9042_v28 }
0x712e   :  { %10835 = vmatprep.subr.bf16.mxu1 %v11186_v9 }
0x7135   :  { %10836 = vmatpush3.bf16.xpose.msra.mxu1 %v9045_v43 }
0x7136   :  { %10837 = vmatprep.subr.bf16.mxu1 %v11186_v9 }
0x71ff   :  { %v8893_v41 = vpop.f32.mrb[60].mxu1 }
0x7200   :  { %v10819_v14 = vpop.f32.mrb[61].mxu1  ;;  %v8900_v23 = vmax.f32 %v8893_v41, 0.0 }
0x7201   :  { %v8896_v45 = vpop.f32.mrb[62].mxu1  ;;  %v9095_v14 = vld [vmem:[%s13354_s27 + $0x8] sm:$0xff] }
0x7202   :  { %v8901_v24 = vmax.f32 %v8896_v45, 0.0  ;;  %v10820_v47 = vpop.f32.mrb[63].mxu1  ;;  %vm9139_vm7 = vcmp.ne.s32.totalorder %v9095_v14, 4294967196  ;;  %v9466_v45 = vsel %vm9138_vm6, 1.0, %v11186_v9 }
0x7204   :  { %v8911_v53 = vpack.c.bf16 %v8901_v24, %v8900_v23  ;;  %v9467_v23 = vsel %vm9139_vm7, 1.0, %v11186_v9  ;;  %v9158_v24 = vsel %vm9148_vm8, %v9466_v45, 0.0 }
0x7205   :  { %v9159_v47 = vsel %vm9148_vm8, %v9467_v23, 0.0 }
0x7206   :  { %10830 = vmatmul.mubr.msk.bf16.vlgmr.msra.gmra.mrb[60].mxu0 %vm1559_vm4, %v8911_v53  ;;  %v9160_v53 = vadd.f32 %v9159_v47, %v9158_v24 }
0x72d9   :  { %v8973_v57 = vpop.f32.mrb[60].mxu0 }
0x72da   :  { %v8980_v11 = vadd.f32 %v8973_v57, %v13160_v12  ;;  %v10831_v21 = vpop.f32.mrb[61].mxu0  ;;  %v10904_v12 = vld [vmem:[%s13353_s24 + $0x10] sm:$0xff]  }
0x72db   :  { %v8976_v32 = vpop.f32.mrb[62].mxu0  ;;  %v9048_v61 = vsel %vm89_vm0, %v10904_v12, 0 }
0x72dc   :  { %v8983_v54 = vmul.f32 %v8980_v11, %v8980_v11  ;;  %v8981_v20 = vadd.f32 %v8976_v32, %v8811_v40  ;;  %v10832_v10 = vpop.f32.mrb[63].mxu0  ;;  %10838 = vmatpush3.bf16.xpose.msra.mxu1 %v9048_v61 }
0x72dd   :  { %10839 = vmatprep.subr.bf16.mxu1 %v11186_v9 }
0x72de   :  { %v8984_v59 = vmul.f32 %v8981_v20, %v8981_v20  ;;  %v8985_v30 = vsel %vm89_vm0, %v8983_v54, 0.0 }
0x72df   :  { %8986 = vadd.xlane.f32.xlu1 %v8985_v30  ;;  %v9161_v30 = vrot.slane %v9160_v53, 4 }
0x72e0   :  { %v8988_v50 = vsel %vm89_vm0, %v8984_v59, 0.0 }
0x72e3   :  { %8989 = vadd.xlane.f32.xlu1 %v8988_v50  ;;  %v9162_v50 = vadd.f32 %v9161_v30, %v9160_v53 }
0x72e4   :  { %10840 = vmatpush3.bf16.xpose.msra.mxu1 %v9051_v17 }
0x72e5   :  { %v9163_v55 = vrot.slane %v9162_v50, 2 }
0x72e7   :  { %v9164_v61 = vadd.f32 %v9163_v55, %v9162_v50 }
0x72e9   :  { %v9165_v17 = vrot.slane %v9164_v61, 1 }
0x72f4   :  { %9123 = vperm.xlu1 %10860, %v9094_v25  }
0x736c   :  { %v8987_v3 = vpop.xlane.xlu1 %8986 }
0x736d   :  { %v8991_v1 = vmul.f32 0.03125, %v8987_v3  ;;  %v9166_v3 = vadd.f32 %v9165_v17, %v9164_v61 }
0x736f   :  { %v8993_v62 = vadd.f32 1e-06, %v8991_v1 }
0x7370   :  { %v8990_v5 = vpop.xlane.xlu1 %8989 }
0x7371   :  { %11142 = vrsqrt.f32 %v8993_v62  ;;  %v8992_v2 = vmul.f32 0.03125, %v8990_v5 }
0x7373   :  { %v8994_v63 = vadd.f32 1e-06, %v8992_v2 }
0x7374   :  { %v9124_v13 = vpop.permute.xlu1 %9123 }
0x7375   :  { %11144 = vrsqrt.f32 %v8994_v63  ;;  %vm9128_vm5 = vcmp.eq.s32.totalorder %v9121_v35, %v9124_v13 }
0x737b   :  { %v11143_v8 = vpop.eup %11142 }
0x737c   :  { %v8997_v15 = vmul.f32 %v11143_v8, %v8980_v11 }
0x737e   :  { %v9005_v7 = vmul.f32 %v9460_v29, %v8997_v15 }
0x737f   :  { %v11145_v58 = vpop.eup %11144 }
0x7380   :  { %v8998_v16 = vmul.f32 %v11145_v58, %v8981_v20  ;;  %v9007_v6 = vmul.f32 0.17677669, %v9005_v7 }
0x7382   :  { %v9006_v40 = vmul.f32 %v9460_v29, %v8998_v16 }
0x7384   :  { %v9008_v38 = vmul.f32 0.17677669, %v9006_v40 }
0x7386   :  { %v9009_v19 = vpack.c.bf16 %v9008_v38, %v9007_v6 }
0x7388   :  { %10842 = vmatmul.mubr.msk.bf16.vlgmr.msra.gmra.mrb[64].mxu1 %vm89_vm0, %v9009_v19 }
0x745b   :  { %v9087_v39 = vpop.f32.mrb[64].mxu1 }
0x745c   :  { %v10843_v49 = vpop.f32.mrb[65].mxu1  ;;  %v9096_v33 = vsel %vm1559_vm4, %v9087_v39, -inf  ;;  %v9130_v26 = vsel %vm9128_vm5, %v9087_v39, 0.0 }
0x745d   :  { %9097 = vmax.xlane.f32.xlu0 %v9096_v33  ;;  %v9090_v42 = vpop.f32.mrb[66].mxu1  ;;  %v9132_v51 = vsel %vm1559_vm4, %v9130_v26, 0.0 }
0x745e   :  { %v10844_v60 = vpop.f32.mrb[67].mxu1  ;;  %v9099_v34 = vsel %vm1559_vm4, %v9090_v42, -inf }
0x745f   :  { %9100 = vmax.xlane.f32.xlu1 %v9099_v34 }
0x7461   :  { %9133 = vadd.xlane.f32.xlu0 %v9132_v51 }
0x74ea   :  { %v9098_v56 = vpop.xlane.xlu0 %9097 }
0x74eb   :  { %v9102_v27 = vsub.f32 %v9087_v39, %v9098_v56 }
0x74ec   :  { %v9101_v37 = vpop.xlane.xlu1 %9100 }
0x74ed   :  { %v9104_v52 = vmul.f32 1.442695, %v9102_v27  ;;  %v9103_v36 = vsub.f32 %v9090_v42, %v9101_v37 }
0x74ee   :  { %v9134_v10 = vpop.xlane.xlu0 %9133 }
0x74ef   :  { %11146 = vpow2.f32 %v9104_v52  ;;  %v9106_v31 = vmul.f32 1.442695, %v9103_v36 }
0x74f1   :  { %11148 = vpow2.f32 %v9106_v31 }
0x74f9   :  { %v11147_v46 = vpop.eup %11146 }
0x74fa   :  { %v9108_v44 = vsel %vm1559_vm4, %v11147_v46, 0.0 }
0x74fb   :  { %v11149_v48 = vpop.eup %11148  ;;  %9109 = vadd.xlane.f32.xlu1 %v9108_v44 }
0x74fc   :  { %v9111_v41 = vsel %vm1559_vm4, %v11149_v48, 0.0 }
0x74ff   :  { %9112 = vadd.xlane.f32.xlu1 %v9111_v41 }
0x7510   :  { %9126 = vperm.xlu1 %10860, %v9095_v14  }
0x7588   :  { %v9110_v18 = vpop.xlane.xlu1 %9109 }
0x7589   :  { %11150 = vlog2.f32 %v9110_v18 }
0x758c   :  { %v9113_v28 = vpop.xlane.xlu1 %9112 }
0x758d   :  { %11152 = vlog2.f32 %v9113_v28 }
0x758e   :  { %11154 = vrcp.f32 %v9166_v3 }
0x7590   :  { %v9127_v57 = vpop.permute.xlu1 %9126 }
0x7591   :  { %vm9129_vm9 = vcmp.eq.s32.totalorder %v9121_v35, %v9127_v57 }
0x7592   :  { %v9131_v11 = vsel %vm9129_vm9, %v9090_v42, 0.0 }
0x7593   :  { %v11151_v21 = vpop.eup %11150  ;;  %v9135_v32 = vsel %vm1559_vm4, %v9131_v11, 0.0 }
0x7594   :  { %v9115_v54 = vmul.f32 0.6931472, %v11151_v21  ;;  %9136 = vadd.xlane.f32.xlu1 %v9135_v32 }
0x7596   :  { %v9118_v20 = vadd.f32 %v9115_v54, %v9098_v56 }
0x7597   :  { %v11153_v43 = vpop.eup %11152 }
0x7598   :  { %v9144_v9 = vsub.f32 %v9118_v20, %v9134_v10  ;;  %v9117_v12 = vmul.f32 0.6931472, %v11153_v43  ;;  %v11155_v7 = vpop.eup %11154 }
0x759a   :  { %v9146_v59 = vmul.f32 %v9466_v45, %v9144_v9  ;;  %v9119_v4 = vadd.f32 %v9117_v12, %v9101_v37 }
0x759c   :  { %v9149_v62 = vsel %vm9148_vm8, %v9146_v59, 0.0 }
0x7621   :  { %v9137_v25 = vpop.xlane.xlu1 %9136 }
0x7622   :  { %v9145_v0 = vsub.f32 %v9119_v4, %v9137_v25 }
0x7624   :  { %v9147_v1 = vmul.f32 %v9467_v23, %v9145_v0 }
0x7626   :  { %v9150_v5 = vsel %vm9148_vm8, %v9147_v1, 0.0 }
0x7627   :  { %v9151_v2 = vadd.f32 %v9150_v5, %v9149_v62 }
0x7629   :  { %v9152_v63 = vrot.slane %v9151_v2, 4 }
0x762b   :  { %v9153_v8 = vadd.f32 %v9152_v63, %v9151_v2 }
0x762d   :  { %v9154_v15 = vrot.slane %v9153_v8, 2 }
0x762f   :  { %v9155_v29 = vadd.f32 %v9154_v15, %v9153_v8 }
0x7631   :  { %v9156_v58 = vrot.slane %v9155_v29, 1 }
0x7633   :  { %v9157_v16 = vadd.f32 %v9156_v58, %v9155_v29 }
0x7635   :  { %v9168_v40 = vmul.f32 %v11155_v7, %v9157_v16 }
0x7637   :  { %9170 = vst.msk [vmem:[#allocation2] sm:$0x1] %vm9169_vm10, %v9168_v40 }
0x7638   :  { %11173 = shalt.err (!%p11170_p4)
}
0x7639   :  { %s13356_s30 = sld [smem:[#allocation17_spill]] }
0x763f   :  { %s11174_s6 = scalar_lea.hbm %s13356_s30, 16 }
0x7640   :  { %p11175_p5 = scmp.ne.s32.totalorder %s13356_s30, %s11174_s6  ;;  %p11178_p6 = scmp.lt.u32.totalorder %s11174_s6, %s13356_s30 }
0x7642   :  { %p11180_p7 = pnand %p11178_p6, %p11175_p5 }
0x7644   :  { %11183 = shalt.err (!%p11180_p7)
}
0x7645   :  { %9180 = dma.vmem_to_hbm [thread:$0]  %s9178_s3, 16, %s13356_s30, [#allocation3]  }
0x7646   :  { %11184 = dma.done.wait [#allocation3], 16  }
0x7647   :  { %11185 = vsyncadd [#allocation3], 4294967280 }
0x7648   :  { %9184 = vsyncpa [#allocation3], 1 }

</bundles_post_ra>
